<compile_context>
chip_gen: v5e
topology: v5e:2x2
jax: 0.10.0
libtpu: 0.0.40
codegen_flags: <defaults>
</compile_context>

<pallas_src>
import jax
import jax.numpy as jnp
from jax import lax
from jax.experimental import pallas as pl
from jax.experimental.pallas import tpu as pltpu

KSIZE = 3
NEG_SLOPE = 0.01   # nn.LeakyReLU default negative_slope
LANE = 128


def _make_kernel(TH, W, C, R, H):
    """Build the kernel for one (row-tile, batch) grid step.

    TH : output rows produced per step (H % TH == 0, TH >= 2)
    W  : image width
    C  : lane-padded channel count (multiple of 128); Cin == Cout == C
    R  : number of row tiles (H // TH)
    H  : image height
    """
    bf16 = jnp.bfloat16

    def kernel(x_blk_ref, x_hbm_ref, w1_ref, b1_ref, w2_ref, b2_ref, out_ref,
               xpad_s, mid_s, rowbuf_s, sems):
        # x_blk_ref : (1, TH, W, C) f32    auto-pipelined body rows (+ residual)
        # x_hbm_ref : (N, H, W, C)  f32    whole input in HBM (halo-row DMAs)
        # w*_ref    : (9*C, C)      bf16   conv weights, rows t*C:(t+1)*C = tap t
        # b*_ref    : (1, C)        f32    conv biases
        # out_ref   : (1, TH, W, C)
        # xpad_s    : (TH+4, W+2, C) bf16  padded input rows r*TH-2 .. r*TH+TH+1
        # mid_s     : (TH+2, W+2, C) bf16  padded conv1 activation rows
        # rowbuf_s  : (4, W, C)      f32   halo-row DMA landing buffer
        # sems      : DMA semaphores (2,)
        r = pl.program_id(0)
        n = pl.program_id(1)

        # ---- kick off halo-row DMAs (2 rows above / 2 below this tile).
        # Sources are clamped into [0, H); at the image edges the landed rows
        # are overwritten with zeros below, so clamped values are never used.
        top_src = jnp.maximum(r * TH - 2, 0)
        bot_src = jnp.minimum(r * TH + TH, H - 2)
        cp_top = pltpu.make_async_copy(
            x_hbm_ref.at[n, pl.ds(top_src, 2)], rowbuf_s.at[pl.ds(0, 2)],
            sems.at[0])
        cp_bot = pltpu.make_async_copy(
            x_hbm_ref.at[n, pl.ds(bot_src, 2)], rowbuf_s.at[pl.ds(2, 2)],
            sems.at[1])
        cp_top.start()
        cp_bot.start()

        # ---- stage body rows (single cast pass to bf16) while the DMAs fly.
        x_body = x_blk_ref[0]                                    # (TH, W, C) f32
        xpad_s[2:TH + 2, 1:W + 1, :] = x_body.astype(bf16)
        # Column zero-padding strips (interior columns are fully overwritten).
        xpad_s[:, 0:1, :] = jnp.zeros((TH + 4, 1, C), bf16)
        xpad_s[:, W + 1:W + 2, :] = jnp.zeros((TH + 4, 1, C), bf16)
        mid_s[:, 0:1, :] = jnp.zeros((TH + 2, 1, C), bf16)
        mid_s[:, W + 1:W + 2, :] = jnp.zeros((TH + 2, 1, C), bf16)

        # ---- land the halo rows (or zeros at the image top / bottom edge).
        cp_top.wait()
        cp_bot.wait()

        @pl.when(r > 0)
        def _():
            xpad_s[0:2, 1:W + 1, :] = rowbuf_s[0:2, :, :].astype(bf16)

        @pl.when(r == 0)
        def _():
            xpad_s[0:2, :, :] = jnp.zeros((2, W + 2, C), bf16)

        @pl.when(r < R - 1)
        def _():
            xpad_s[TH + 2:TH + 4, 1:W + 1, :] = rowbuf_s[2:4, :, :].astype(bf16)

        @pl.when(r == R - 1)
        def _():
            xpad_s[TH + 2:TH + 4, :, :] = jnp.zeros((2, W + 2, C), bf16)

        def conv3x3(buf, w_ref, b_ref, rows):
            # Direct-tap conv: 9 accumulated (rows*W, C) x (C, C) bf16 matmuls
            # with f32 accumulation (no im2col patch buffer).
            acc = None
            for kh in range(KSIZE):
                for kw in range(KSIZE):
                    t = kh * KSIZE + kw
                    win = buf[kh:kh + rows, kw:kw + W, :].reshape(rows * W, C)
                    p = jnp.dot(win, w_ref[t * C:(t + 1) * C, :],
                                preferred_element_type=jnp.float32)
                    acc = p if acc is None else acc + p
            return acc + b_ref[...]

        # ---- conv1 over TH+2 rows (gives conv2 its 1-row activation halo).
        a1 = conv3x3(xpad_s, w1_ref, b1_ref, TH + 2)
        a1 = jnp.where(a1 > 0, a1, NEG_SLOPE * a1)               # LeakyReLU, f32
        mid_s[:, 1:W + 1, :] = a1.reshape(TH + 2, W, C).astype(bf16)

        # conv2's top / bottom zero padding at the image edges.
        @pl.when(r == 0)
        def _():
            mid_s[0:1, :, :] = jnp.zeros((1, W + 2, C), bf16)

        @pl.when(r == R - 1)
        def _():
            mid_s[TH + 1:TH + 2, :, :] = jnp.zeros((1, W + 2, C), bf16)

        # ---- conv2 + residual (residual from the un-rounded f32 block).
        a2 = conv3x3(mid_s, w2_ref, b2_ref, TH)
        out = a2 + x_body.reshape(TH * W, C)
        out_ref[0] = out.reshape(TH, W, C).astype(out_ref.dtype)

    return kernel


def _vmem_limit_bytes(TH, W, C):
    f32, b16 = 4, 2
    blk = TH * W * C * f32                      # one input / output block
    wgt = KSIZE * KSIZE * C * C * b16           # one conv weight
    xpad = (TH + 4) * (W + 2) * C * b16
    mid = (TH + 2) * (W + 2) * C * b16
    rowbuf = 4 * W * C * f32
    temps = 3 * (TH + 2) * W * C * f32          # f32 accumulators / activations
    total = 2 * 2 * blk + 2 * 2 * wgt + xpad + mid + rowbuf + temps
    return int(min(int(total * 1.5) + (8 << 20), 96 << 20))


def _pick_row_tile(H):
    for cand in (64, 32, 16, 8, 4, 2):
        if cand <= H and H % cand == 0:
            return cand
    return H


def residual_block_pallas(x_nhwc, w1, b1, w2, b2, row_tile=None):
    """x_nhwc: (N, H, W, C); w*: (3, 3, C, C) HWIO; b*: (C,)."""
    N, H, W, Cin = x_nhwc.shape
    Cout = w1.shape[-1]
    assert Cin == Cout, "downsample=None requires in_channels == out_channels"
    C = Cin

    # ---- lane-dense channel padding (multiple of 128).  Zero-padded weights
    # and bias keep the extra channels exactly zero through both convs and the
    # residual, so they are simply sliced off at the end.
    Cp = ((C + LANE - 1) // LANE) * LANE
    if Cp != C:
        x_p = jnp.pad(x_nhwc, ((0, 0), (0, 0), (0, 0), (0, Cp - C)))
        w1_p = jnp.pad(w1, ((0, 0), (0, 0), (0, Cp - C), (0, Cp - C)))
        w2_p = jnp.pad(w2, ((0, 0), (0, 0), (0, Cp - C), (0, Cp - C)))
        b1_p = jnp.pad(b1, (0, Cp - C))
        b2_p = jnp.pad(b2, (0, Cp - C))
    else:
        x_p, w1_p, w2_p, b1_p, b2_p = x_nhwc, w1, w2, b1, b2

    # ---- row tiling (bounds VMEM per grid step; requires H % TH == 0, TH >= 2)
    TH = row_tile if row_tile is not None else _pick_row_tile(H)
    assert H % TH == 0 and TH >= 2, "row_tile must divide H and be >= 2"
    R = H // TH

    # Flatten HWIO -> ((kh*3+kw)*C + cin, Cout), cast to bf16 (native MXU path).
    w1f = w1_p.reshape(KSIZE * KSIZE * Cp, Cp).astype(jnp.bfloat16)
    w2f = w2_p.reshape(KSIZE * KSIZE * Cp, Cp).astype(jnp.bfloat16)
    b1_2d = b1_p.reshape(1, Cp).astype(jnp.float32)
    b2_2d = b2_p.reshape(1, Cp).astype(jnp.float32)

    kernel = _make_kernel(TH, W, Cp, R, H)

    out = pl.pallas_call(
        kernel,
        out_shape=jax.ShapeDtypeStruct((N, H, W, Cp), x_nhwc.dtype),
        grid=(R, N),                   # row-tile axis leading (v7x megacore)
        in_specs=[
            pl.BlockSpec((1, TH, W, Cp), lambda r, n: (n, r, 0, 0)),
            pl.BlockSpec(memory_space=pl.ANY),       # whole x: halo-row DMAs
            pl.BlockSpec((KSIZE * KSIZE * Cp, Cp), lambda r, n: (0, 0)),
            pl.BlockSpec((1, Cp), lambda r, n: (0, 0)),
            pl.BlockSpec((KSIZE * KSIZE * Cp, Cp), lambda r, n: (0, 0)),
            pl.BlockSpec((1, Cp), lambda r, n: (0, 0)),
        ],
        out_specs=pl.BlockSpec((1, TH, W, Cp), lambda r, n: (n, r, 0, 0)),
        scratch_shapes=[
            pltpu.VMEM((TH + 4, W + 2, Cp), jnp.bfloat16),   # padded input rows
            pltpu.VMEM((TH + 2, W + 2, Cp), jnp.bfloat16),   # padded conv1 act
            pltpu.VMEM((4, W, Cp), jnp.float32),             # halo DMA buffer
            pltpu.SemaphoreType.DMA((2,)),
        ],
        compiler_params=pltpu.CompilerParams(
            dimension_semantics=("parallel", "parallel"),
            vmem_limit_bytes=_vmem_limit_bytes(TH, W, Cp)),
    )(x_p, x_p, w1f, b1_2d, w2f, b2_2d)

    return out if Cp == C else out[..., :C]


def residual_block_ref(x_nhwc, w1, b1, w2, b2):
    """Pure-JAX f32 reference (mirrors the PyTorch forward)."""
    dn = lax.conv_dimension_numbers(x_nhwc.shape, w1.shape,
                                    ('NHWC', 'HWIO', 'NHWC'))
    y = lax.conv_general_dilated(x_nhwc, w1, (1, 1), 'SAME',
                                 dimension_numbers=dn) + b1
    y = jnp.where(y > 0, y, NEG_SLOPE * y)
    y = lax.conv_general_dilated(y, w2, (1, 1), 'SAME',
                                 dimension_numbers=dn) + b2
    return y + x_nhwc


if __name__ == "__main__":
    # Small deterministic example: batch=2, channels=4, spatial=16x16.
    N, C, Hs, Ws = 2, 4, 16, 16
    key = jax.random.PRNGKey(0)
    kx, kw1, kb1, kw2, kb2 = jax.random.split(key, 5)

    # PyTorch-convention input (NCHW), transposed to the kernel layout (NHWC).
    x_nchw = jax.random.normal(kx, (N, C, Hs, Ws), dtype=jnp.float32)
    x_nhwc = jnp.transpose(x_nchw, (0, 2, 3, 1))

    # Conv parameters (deterministic synthetic init), HWIO layout.
    fan_in = C * KSIZE * KSIZE
    scale = 1.0 / jnp.sqrt(jnp.float32(fan_in))
    w1 = jax.random.normal(kw1, (KSIZE, KSIZE, C, C), dtype=jnp.float32) * scale
    b1 = jax.random.normal(kb1, (C,), dtype=jnp.float32) * scale
    w2 = jax.random.normal(kw2, (KSIZE, KSIZE, C, C), dtype=jnp.float32) * scale
    b2 = jax.random.normal(kb2, (C,), dtype=jnp.float32) * scale

    # row_tile=8 -> 2 row tiles: exercises the halo DMA + edge-zero paths.
    out = residual_block_pallas(x_nhwc, w1, b1, w2, b2, row_tile=8)
    out = jax.block_until_ready(out)

    # The kernel runs the matmuls with bf16 operands (f32 accumulation), so
    # compare against an f32 reference using the same bf16-rounded weights and
    # a bf16-appropriate tolerance.
    w1_q = w1.astype(jnp.bfloat16).astype(jnp.float32)
    w2_q = w2.astype(jnp.bfloat16).astype(jnp.float32)
    ref = residual_block_ref(x_nhwc, w1_q, b1, w2_q, b2)

    assert out.shape == (N, Hs, Ws, C)
    assert jnp.allclose(out, ref, atol=5e-2, rtol=5e-2), "mismatch vs reference"

    print("KERNEL_OK")
</pallas_src>

<mosaic_0001>
module attributes {stable_mosaic.version = 11 : i64} {
  func.func @kernel(%arg0: i32, %arg1: i32, %arg2: memref<1x8x16x128xf32, #tpu.memory_space<vmem>>, %arg3: memref<2x16x16x128xf32, #tpu.memory_space<any>>, %arg4: memref<1152x128xbf16, #tpu.memory_space<vmem>>, %arg5: memref<1x128xf32, #tpu.memory_space<vmem>>, %arg6: memref<1152x128xbf16, #tpu.memory_space<vmem>>, %arg7: memref<1x128xf32, #tpu.memory_space<vmem>>, %arg8: memref<1x8x16x128xf32, #tpu.memory_space<vmem>>, %arg9: memref<12x18x128xbf16, #tpu.memory_space<vmem>>, %arg10: memref<10x18x128xbf16, #tpu.memory_space<vmem>>, %arg11: memref<4x16x128xf32, #tpu.memory_space<vmem>>, %arg12: memref<2x!tpu.dma_semaphore, #tpu.memory_space<semaphore_mem>>) attributes {dimension_semantics = [#tpu.dimension_semantics<parallel>, #tpu.dimension_semantics<parallel>], iteration_bounds = array<i64: 2, 2>, scalar_prefetch = 0 : i64, scratch_operands = 4 : i64, tpu.core_type = #tpu.core_type<tc>, window_params = [{transform_indices = @transform_0, window_bounds = array<i64: 1, 8, 16, 128>}, {}, {pipeline_mode = #tpu.pipeline_mode<synchronous>, transform_indices = @transform_2, window_bounds = array<i64: 1152, 128>}, {pipeline_mode = #tpu.pipeline_mode<synchronous>, transform_indices = @transform_3, window_bounds = array<i64: 1, 128>}, {pipeline_mode = #tpu.pipeline_mode<synchronous>, transform_indices = @transform_4, window_bounds = array<i64: 1152, 128>}, {pipeline_mode = #tpu.pipeline_mode<synchronous>, transform_indices = @transform_5, window_bounds = array<i64: 1, 128>}, {transform_indices = @transform_6, window_bounds = array<i64: 1, 8, 16, 128>}]} {
    %c8_i32 = arith.constant 8 : i32
    %0 = arith.muli %arg0, %c8_i32 : i32
    %c2_i32 = arith.constant 2 : i32
    %1 = arith.subi %0, %c2_i32 : i32
    %c0_i32 = arith.constant 0 : i32
    %2 = arith.maxsi %1, %c0_i32 : i32
    %c8_i32_0 = arith.constant 8 : i32
    %3 = arith.muli %arg0, %c8_i32_0 : i32
    %c8_i32_1 = arith.constant 8 : i32
    %4 = arith.addi %3, %c8_i32_1 : i32
    %c14_i32 = arith.constant 14 : i32
    %5 = arith.minsi %4, %c14_i32 : i32
    %c0_i32_2 = arith.constant 0 : i32
    %c0_i32_3 = arith.constant 0 : i32
    %c0_i32_4 = arith.constant 0 : i32
    %6 = tpu.memref_slice %arg3[%arg1, %2, %c0_i32_3, %c0_i32_4] : memref<2x16x16x128xf32, #tpu.memory_space<any>> -> memref<1x2x16x128xf32, #tpu.memory_space<any>>
    %7 = tpu.memref_squeeze %6 : memref<1x2x16x128xf32, #tpu.memory_space<any>> -> memref<2x16x128xf32, #tpu.memory_space<any>>
    %c0_i32_5 = arith.constant 0 : i32
    %c0_i32_6 = arith.constant 0 : i32
    %c0_i32_7 = arith.constant 0 : i32
    %8 = tpu.memref_slice %arg11[%c0_i32_5, %c0_i32_6, %c0_i32_7] : memref<4x16x128xf32, #tpu.memory_space<vmem>> -> memref<2x16x128xf32, #tpu.memory_space<vmem>>
    %9 = tpu.memref_slice %arg12[%c0_i32_2] : memref<2x!tpu.dma_semaphore, #tpu.memory_space<semaphore_mem>> -> memref<1x!tpu.dma_semaphore, #tpu.memory_space<semaphore_mem>>
    %10 = tpu.memref_squeeze %9 : memref<1x!tpu.dma_semaphore, #tpu.memory_space<semaphore_mem>> -> memref<!tpu.dma_semaphore, #tpu.memory_space<semaphore_mem>>
    tpu.enqueue_dma source(%7 : memref<2x16x128xf32, #tpu.memory_space<any>>) target(%8 : memref<2x16x128xf32, #tpu.memory_space<vmem>>) target_semaphore(%10 : memref<!tpu.dma_semaphore, #tpu.memory_space<semaphore_mem>>)
    %c1_i32 = arith.constant 1 : i32
    %c0_i32_8 = arith.constant 0 : i32
    %c0_i32_9 = arith.constant 0 : i32
    %11 = tpu.memref_slice %arg3[%arg1, %5, %c0_i32_8, %c0_i32_9] : memref<2x16x16x128xf32, #tpu.memory_space<any>> -> memref<1x2x16x128xf32, #tpu.memory_space<any>>
    %12 = tpu.memref_squeeze %11 : memref<1x2x16x128xf32, #tpu.memory_space<any>> -> memref<2x16x128xf32, #tpu.memory_space<any>>
    %c2_i32_10 = arith.constant 2 : i32
    %c0_i32_11 = arith.constant 0 : i32
    %c0_i32_12 = arith.constant 0 : i32
    %13 = tpu.memref_slice %arg11[%c2_i32_10, %c0_i32_11, %c0_i32_12] : memref<4x16x128xf32, #tpu.memory_space<vmem>> -> memref<2x16x128xf32, #tpu.memory_space<vmem>>
    %14 = tpu.memref_slice %arg12[%c1_i32] : memref<2x!tpu.dma_semaphore, #tpu.memory_space<semaphore_mem>> -> memref<1x!tpu.dma_semaphore, #tpu.memory_space<semaphore_mem>>
    %15 = tpu.memref_squeeze %14 : memref<1x!tpu.dma_semaphore, #tpu.memory_space<semaphore_mem>> -> memref<!tpu.dma_semaphore, #tpu.memory_space<semaphore_mem>>
    tpu.enqueue_dma source(%12 : memref<2x16x128xf32, #tpu.memory_space<any>>) target(%13 : memref<2x16x128xf32, #tpu.memory_space<vmem>>) target_semaphore(%15 : memref<!tpu.dma_semaphore, #tpu.memory_space<semaphore_mem>>)
    %c0 = arith.constant 0 : index
    %c0_13 = arith.constant 0 : index
    %c0_14 = arith.constant 0 : index
    %c0_15 = arith.constant 0 : index
    %16 = vector.load %arg2[%c0, %c0_13, %c0_14, %c0_15] : memref<1x8x16x128xf32, #tpu.memory_space<vmem>>, vector<1x8x16x128xf32>
    %17 = vector.shape_cast %16 : vector<1x8x16x128xf32> to vector<8x16x128xf32>
    %18 = arith.truncf %17 : vector<8x16x128xf32> to vector<8x16x128xbf16>
    %c2 = arith.constant 2 : index
    %c1 = arith.constant 1 : index
    %c0_16 = arith.constant 0 : index
    %19 = vector.load %arg9[%c2, %c1, %c0_16] : memref<12x18x128xbf16, #tpu.memory_space<vmem>>, vector<8x16x128xbf16>
    tpu.vector_store %arg9[%c2, %c1, %c0_16], %18 {strides = array<i32>} : memref<12x18x128xbf16, #tpu.memory_space<vmem>>, vector<8x16x128xbf16>,
    %cst = arith.constant 0.000000e+00 : bf16
    %20 = vector.broadcast %cst : bf16 to vector<12x1x128xbf16>
    %c0_17 = arith.constant 0 : index
    %c0_18 = arith.constant 0 : index
    %c0_19 = arith.constant 0 : index
    %21 = vector.load %arg9[%c0_17, %c0_18, %c0_19] : memref<12x18x128xbf16, #tpu.memory_space<vmem>>, vector<12x1x128xbf16>
    tpu.vector_store %arg9[%c0_17, %c0_18, %c0_19], %20 {strides = array<i32>} : memref<12x18x128xbf16, #tpu.memory_space<vmem>>, vector<12x1x128xbf16>,
    %cst_20 = arith.constant 0.000000e+00 : bf16
    %22 = vector.broadcast %cst_20 : bf16 to vector<12x1x128xbf16>
    %c0_21 = arith.constant 0 : index
    %c17 = arith.constant 17 : index
    %c0_22 = arith.constant 0 : index
    %23 = vector.load %arg9[%c0_21, %c17, %c0_22] : memref<12x18x128xbf16, #tpu.memory_space<vmem>>, vector<12x1x128xbf16>
    tpu.vector_store %arg9[%c0_21, %c17, %c0_22], %22 {strides = array<i32>} : memref<12x18x128xbf16, #tpu.memory_space<vmem>>, vector<12x1x128xbf16>,
    %cst_23 = arith.constant 0.000000e+00 : bf16
    %24 = vector.broadcast %cst_23 : bf16 to vector<10x1x128xbf16>
    %c0_24 = arith.constant 0 : index
    %c0_25 = arith.constant 0 : index
    %c0_26 = arith.constant 0 : index
    %25 = vector.load %arg10[%c0_24, %c0_25, %c0_26] : memref<10x18x128xbf16, #tpu.memory_space<vmem>>, vector<10x1x128xbf16>
    tpu.vector_store %arg10[%c0_24, %c0_25, %c0_26], %24 {strides = array<i32>} : memref<10x18x128xbf16, #tpu.memory_space<vmem>>, vector<10x1x128xbf16>,
    %cst_27 = arith.constant 0.000000e+00 : bf16
    %26 = vector.broadcast %cst_27 : bf16 to vector<10x1x128xbf16>
    %c0_28 = arith.constant 0 : index
    %c17_29 = arith.constant 17 : index
    %c0_30 = arith.constant 0 : index
    %27 = vector.load %arg10[%c0_28, %c17_29, %c0_30] : memref<10x18x128xbf16, #tpu.memory_space<vmem>>, vector<10x1x128xbf16>
    tpu.vector_store %arg10[%c0_28, %c17_29, %c0_30], %26 {strides = array<i32>} : memref<10x18x128xbf16, #tpu.memory_space<vmem>>, vector<10x1x128xbf16>,
    %c0_i32_31 = arith.constant 0 : i32
    %c0_i32_32 = arith.constant 0 : i32
    %c0_i32_33 = arith.constant 0 : i32
    %28 = tpu.memref_slice %arg3[%arg1, %2, %c0_i32_32, %c0_i32_33] : memref<2x16x16x128xf32, #tpu.memory_space<any>> -> memref<1x2x16x128xf32, #tpu.memory_space<any>>
    %29 = tpu.memref_squeeze %28 : memref<1x2x16x128xf32, #tpu.memory_space<any>> -> memref<2x16x128xf32, #tpu.memory_space<any>>
    %c0_i32_34 = arith.constant 0 : i32
    %c0_i32_35 = arith.constant 0 : i32
    %c0_i32_36 = arith.constant 0 : i32
    %30 = tpu.memref_slice %arg11[%c0_i32_34, %c0_i32_35, %c0_i32_36] : memref<4x16x128xf32, #tpu.memory_space<vmem>> -> memref<2x16x128xf32, #tpu.memory_space<vmem>>
    %31 = tpu.memref_slice %arg12[%c0_i32_31] : memref<2x!tpu.dma_semaphore, #tpu.memory_space<semaphore_mem>> -> memref<1x!tpu.dma_semaphore, #tpu.memory_space<semaphore_mem>>
    %32 = tpu.memref_squeeze %31 : memref<1x!tpu.dma_semaphore, #tpu.memory_space<semaphore_mem>> -> memref<!tpu.dma_semaphore, #tpu.memory_space<semaphore_mem>>
    tpu.wait_dma2 semaphore(%32 : memref<!tpu.dma_semaphore, #tpu.memory_space<semaphore_mem>>) src(%29 : memref<2x16x128xf32, #tpu.memory_space<any>>) dst(%30 : memref<2x16x128xf32, #tpu.memory_space<vmem>>)
    %c1_i32_37 = arith.constant 1 : i32
    %c0_i32_38 = arith.constant 0 : i32
    %c0_i32_39 = arith.constant 0 : i32
    %33 = tpu.memref_slice %arg3[%arg1, %5, %c0_i32_38, %c0_i32_39] : memref<2x16x16x128xf32, #tpu.memory_space<any>> -> memref<1x2x16x128xf32, #tpu.memory_space<any>>
    %34 = tpu.memref_squeeze %33 : memref<1x2x16x128xf32, #tpu.memory_space<any>> -> memref<2x16x128xf32, #tpu.memory_space<any>>
    %c2_i32_40 = arith.constant 2 : i32
    %c0_i32_41 = arith.constant 0 : i32
    %c0_i32_42 = arith.constant 0 : i32
    %35 = tpu.memref_slice %arg11[%c2_i32_40, %c0_i32_41, %c0_i32_42] : memref<4x16x128xf32, #tpu.memory_space<vmem>> -> memref<2x16x128xf32, #tpu.memory_space<vmem>>
    %36 = tpu.memref_slice %arg12[%c1_i32_37] : memref<2x!tpu.dma_semaphore, #tpu.memory_space<semaphore_mem>> -> memref<1x!tpu.dma_semaphore, #tpu.memory_space<semaphore_mem>>
    %37 = tpu.memref_squeeze %36 : memref<1x!tpu.dma_semaphore, #tpu.memory_space<semaphore_mem>> -> memref<!tpu.dma_semaphore, #tpu.memory_space<semaphore_mem>>
    tpu.wait_dma2 semaphore(%37 : memref<!tpu.dma_semaphore, #tpu.memory_space<semaphore_mem>>) src(%34 : memref<2x16x128xf32, #tpu.memory_space<any>>) dst(%35 : memref<2x16x128xf32, #tpu.memory_space<vmem>>)
    %c0_i32_43 = arith.constant 0 : i32
    %38 = arith.cmpi sgt, %arg0, %c0_i32_43 : i32
    %39 = arith.extui %38 : i1 to i32
    %c0_i32_44 = arith.constant 0 : i32
    %40 = arith.cmpi ne, %39, %c0_i32_44 : i32
    scf.if %40 {
      %c0_168 = arith.constant 0 : index
      %c0_169 = arith.constant 0 : index
      %c0_170 = arith.constant 0 : index
      %164 = vector.load %arg11[%c0_168, %c0_169, %c0_170] : memref<4x16x128xf32, #tpu.memory_space<vmem>>, vector<2x16x128xf32>
      %165 = arith.truncf %164 : vector<2x16x128xf32> to vector<2x16x128xbf16>
      %c0_171 = arith.constant 0 : index
      %c1_172 = arith.constant 1 : index
      %c0_173 = arith.constant 0 : index
      %166 = vector.load %arg9[%c0_171, %c1_172, %c0_173] : memref<12x18x128xbf16, #tpu.memory_space<vmem>>, vector<2x16x128xbf16>
      tpu.vector_store %arg9[%c0_171, %c1_172, %c0_173], %165 {strides = array<i32>} : memref<12x18x128xbf16, #tpu.memory_space<vmem>>, vector<2x16x128xbf16>,
    } else {
    }
    %c0_i32_45 = arith.constant 0 : i32
    %41 = arith.cmpi eq, %arg0, %c0_i32_45 : i32
    %42 = arith.extui %41 : i1 to i32
    %c0_i32_46 = arith.constant 0 : i32
    %43 = arith.cmpi ne, %42, %c0_i32_46 : i32
    scf.if %43 {
      %cst_168 = arith.constant 0.000000e+00 : bf16
      %164 = vector.broadcast %cst_168 : bf16 to vector<2x18x128xbf16>
      %c0_169 = arith.constant 0 : index
      %c0_170 = arith.constant 0 : index
      %c0_171 = arith.constant 0 : index
      %165 = vector.load %arg9[%c0_169, %c0_170, %c0_171] : memref<12x18x128xbf16, #tpu.memory_space<vmem>>, vector<2x18x128xbf16>
      tpu.vector_store %arg9[%c0_169, %c0_170, %c0_171], %164 {strides = array<i32>} : memref<12x18x128xbf16, #tpu.memory_space<vmem>>, vector<2x18x128xbf16>,
    } else {
    }
    %c1_i32_47 = arith.constant 1 : i32
    %44 = arith.cmpi slt, %arg0, %c1_i32_47 : i32
    %45 = arith.extui %44 : i1 to i32
    %c0_i32_48 = arith.constant 0 : i32
    %46 = arith.cmpi ne, %45, %c0_i32_48 : i32
    scf.if %46 {
      %c2_168 = arith.constant 2 : index
      %c0_169 = arith.constant 0 : index
      %c0_170 = arith.constant 0 : index
      %164 = vector.load %arg11[%c2_168, %c0_169, %c0_170] : memref<4x16x128xf32, #tpu.memory_space<vmem>>, vector<2x16x128xf32>
      %165 = arith.truncf %164 : vector<2x16x128xf32> to vector<2x16x128xbf16>
      %c10 = arith.constant 10 : index
      %c1_171 = arith.constant 1 : index
      %c0_172 = arith.constant 0 : index
      %166 = vector.load %arg9[%c10, %c1_171, %c0_172] : memref<12x18x128xbf16, #tpu.memory_space<vmem>>, vector<2x16x128xbf16>
      tpu.vector_store %arg9[%c10, %c1_171, %c0_172], %165 {strides = array<i32>} : memref<12x18x128xbf16, #tpu.memory_space<vmem>>, vector<2x16x128xbf16>,
    } else {
    }
    %c1_i32_49 = arith.constant 1 : i32
    %47 = arith.cmpi eq, %arg0, %c1_i32_49 : i32
    %48 = arith.extui %47 : i1 to i32
    %c0_i32_50 = arith.constant 0 : i32
    %49 = arith.cmpi ne, %48, %c0_i32_50 : i32
    scf.if %49 {
      %cst_168 = arith.constant 0.000000e+00 : bf16
      %164 = vector.broadcast %cst_168 : bf16 to vector<2x18x128xbf16>
      %c10 = arith.constant 10 : index
      %c0_169 = arith.constant 0 : index
      %c0_170 = arith.constant 0 : index
      %165 = vector.load %arg9[%c10, %c0_169, %c0_170] : memref<12x18x128xbf16, #tpu.memory_space<vmem>>, vector<2x18x128xbf16>
      tpu.vector_store %arg9[%c10, %c0_169, %c0_170], %164 {strides = array<i32>} : memref<12x18x128xbf16, #tpu.memory_space<vmem>>, vector<2x18x128xbf16>,
    } else {
    }
    %c0_51 = arith.constant 0 : index
    %c0_52 = arith.constant 0 : index
    %c0_53 = arith.constant 0 : index
    %50 = vector.load %arg9[%c0_51, %c0_52, %c0_53] : memref<12x18x128xbf16, #tpu.memory_space<vmem>>, vector<10x16x128xbf16>
    %51 = vector.shape_cast %50 : vector<10x16x128xbf16> to vector<160x128xbf16>
    %c0_54 = arith.constant 0 : index
    %c0_55 = arith.constant 0 : index
    %52 = vector.load %arg4[%c0_54, %c0_55] : memref<1152x128xbf16, #tpu.memory_space<vmem>>, vector<128x128xbf16>
    %cst_56 = arith.constant dense<0.000000e+00> : vector<160x128xf32>
    %53 = tpu.matmul %51, %52, %cst_56 {dimension_numbers = #tpu.dot_dimension_numbers<[1], [0], [0], [1], [0, 0, 1, 1], [], []>} : vector<160x128xbf16>, vector<128x128xbf16>, vector<160x128xf32> -> vector<160x128xf32>
    %c0_57 = arith.constant 0 : index
    %c1_58 = arith.constant 1 : index
    %c0_59 = arith.constant 0 : index
    %54 = vector.load %arg9[%c0_57, %c1_58, %c0_59] : memref<12x18x128xbf16, #tpu.memory_space<vmem>>, vector<10x16x128xbf16>
    %55 = vector.shape_cast %54 : vector<10x16x128xbf16> to vector<160x128xbf16>
    %c128 = arith.constant 128 : index
    %c0_60 = arith.constant 0 : index
    %56 = vector.load %arg4[%c128, %c0_60] : memref<1152x128xbf16, #tpu.memory_space<vmem>>, vector<128x128xbf16>
    %cst_61 = arith.constant dense<0.000000e+00> : vector<160x128xf32>
    %57 = tpu.matmul %55, %56, %cst_61 {dimension_numbers = #tpu.dot_dimension_numbers<[1], [0], [0], [1], [0, 0, 1, 1], [], []>} : vector<160x128xbf16>, vector<128x128xbf16>, vector<160x128xf32> -> vector<160x128xf32>
    %58 = arith.addf %53, %57 : vector<160x128xf32>
    %c0_62 = arith.constant 0 : index
    %c2_63 = arith.constant 2 : index
    %c0_64 = arith.constant 0 : index
    %59 = vector.load %arg9[%c0_62, %c2_63, %c0_64] : memref<12x18x128xbf16, #tpu.memory_space<vmem>>, vector<10x16x128xbf16>
    %60 = vector.shape_cast %59 : vector<10x16x128xbf16> to vector<160x128xbf16>
    %c256 = arith.constant 256 : index
    %c0_65 = arith.constant 0 : index
    %61 = vector.load %arg4[%c256, %c0_65] : memref<1152x128xbf16, #tpu.memory_space<vmem>>, vector<128x128xbf16>
    %cst_66 = arith.constant dense<0.000000e+00> : vector<160x128xf32>
    %62 = tpu.matmul %60, %61, %cst_66 {dimension_numbers = #tpu.dot_dimension_numbers<[1], [0], [0], [1], [0, 0, 1, 1], [], []>} : vector<160x128xbf16>, vector<128x128xbf16>, vector<160x128xf32> -> vector<160x128xf32>
    %63 = arith.addf %58, %62 : vector<160x128xf32>
    %c1_67 = arith.constant 1 : index
    %c0_68 = arith.constant 0 : index
    %c0_69 = arith.constant 0 : index
    %64 = vector.load %arg9[%c1_67, %c0_68, %c0_69] : memref<12x18x128xbf16, #tpu.memory_space<vmem>>, vector<10x16x128xbf16>
    %65 = vector.shape_cast %64 : vector<10x16x128xbf16> to vector<160x128xbf16>
    %c384 = arith.constant 384 : index
    %c0_70 = arith.constant 0 : index
    %66 = vector.load %arg4[%c384, %c0_70] : memref<1152x128xbf16, #tpu.memory_space<vmem>>, vector<128x128xbf16>
    %cst_71 = arith.constant dense<0.000000e+00> : vector<160x128xf32>
    %67 = tpu.matmul %65, %66, %cst_71 {dimension_numbers = #tpu.dot_dimension_numbers<[1], [0], [0], [1], [0, 0, 1, 1], [], []>} : vector<160x128xbf16>, vector<128x128xbf16>, vector<160x128xf32> -> vector<160x128xf32>
    %68 = arith.addf %63, %67 : vector<160x128xf32>
    %c1_72 = arith.constant 1 : index
    %c1_73 = arith.constant 1 : index
    %c0_74 = arith.constant 0 : index
    %69 = vector.load %arg9[%c1_72, %c1_73, %c0_74] : memref<12x18x128xbf16, #tpu.memory_space<vmem>>, vector<10x16x128xbf16>
    %70 = vector.shape_cast %69 : vector<10x16x128xbf16> to vector<160x128xbf16>
    %c512 = arith.constant 512 : index
    %c0_75 = arith.constant 0 : index
    %71 = vector.load %arg4[%c512, %c0_75] : memref<1152x128xbf16, #tpu.memory_space<vmem>>, vector<128x128xbf16>
    %cst_76 = arith.constant dense<0.000000e+00> : vector<160x128xf32>
    %72 = tpu.matmul %70, %71, %cst_76 {dimension_numbers = #tpu.dot_dimension_numbers<[1], [0], [0], [1], [0, 0, 1, 1], [], []>} : vector<160x128xbf16>, vector<128x128xbf16>, vector<160x128xf32> -> vector<160x128xf32>
    %73 = arith.addf %68, %72 : vector<160x128xf32>
    %c1_77 = arith.constant 1 : index
    %c2_78 = arith.constant 2 : index
    %c0_79 = arith.constant 0 : index
    %74 = vector.load %arg9[%c1_77, %c2_78, %c0_79] : memref<12x18x128xbf16, #tpu.memory_space<vmem>>, vector<10x16x128xbf16>
    %75 = vector.shape_cast %74 : vector<10x16x128xbf16> to vector<160x128xbf16>
    %c640 = arith.constant 640 : index
    %c0_80 = arith.constant 0 : index
    %76 = vector.load %arg4[%c640, %c0_80] : memref<1152x128xbf16, #tpu.memory_space<vmem>>, vector<128x128xbf16>
    %cst_81 = arith.constant dense<0.000000e+00> : vector<160x128xf32>
    %77 = tpu.matmul %75, %76, %cst_81 {dimension_numbers = #tpu.dot_dimension_numbers<[1], [0], [0], [1], [0, 0, 1, 1], [], []>} : vector<160x128xbf16>, vector<128x128xbf16>, vector<160x128xf32> -> vector<160x128xf32>
    %78 = arith.addf %73, %77 : vector<160x128xf32>
    %c2_82 = arith.constant 2 : index
    %c0_83 = arith.constant 0 : index
    %c0_84 = arith.constant 0 : index
    %79 = vector.load %arg9[%c2_82, %c0_83, %c0_84] : memref<12x18x128xbf16, #tpu.memory_space<vmem>>, vector<10x16x128xbf16>
    %80 = vector.shape_cast %79 : vector<10x16x128xbf16> to vector<160x128xbf16>
    %c768 = arith.constant 768 : index
    %c0_85 = arith.constant 0 : index
    %81 = vector.load %arg4[%c768, %c0_85] : memref<1152x128xbf16, #tpu.memory_space<vmem>>, vector<128x128xbf16>
    %cst_86 = arith.constant dense<0.000000e+00> : vector<160x128xf32>
    %82 = tpu.matmul %80, %81, %cst_86 {dimension_numbers = #tpu.dot_dimension_numbers<[1], [0], [0], [1], [0, 0, 1, 1], [], []>} : vector<160x128xbf16>, vector<128x128xbf16>, vector<160x128xf32> -> vector<160x128xf32>
    %83 = arith.addf %78, %82 : vector<160x128xf32>
    %c2_87 = arith.constant 2 : index
    %c1_88 = arith.constant 1 : index
    %c0_89 = arith.constant 0 : index
    %84 = vector.load %arg9[%c2_87, %c1_88, %c0_89] : memref<12x18x128xbf16, #tpu.memory_space<vmem>>, vector<10x16x128xbf16>
    %85 = vector.shape_cast %84 : vector<10x16x128xbf16> to vector<160x128xbf16>
    %c896 = arith.constant 896 : index
    %c0_90 = arith.constant 0 : index
    %86 = vector.load %arg4[%c896, %c0_90] : memref<1152x128xbf16, #tpu.memory_space<vmem>>, vector<128x128xbf16>
    %cst_91 = arith.constant dense<0.000000e+00> : vector<160x128xf32>
    %87 = tpu.matmul %85, %86, %cst_91 {dimension_numbers = #tpu.dot_dimension_numbers<[1], [0], [0], [1], [0, 0, 1, 1], [], []>} : vector<160x128xbf16>, vector<128x128xbf16>, vector<160x128xf32> -> vector<160x128xf32>
    %88 = arith.addf %83, %87 : vector<160x128xf32>
    %c2_92 = arith.constant 2 : index
    %c2_93 = arith.constant 2 : index
    %c0_94 = arith.constant 0 : index
    %89 = vector.load %arg9[%c2_92, %c2_93, %c0_94] : memref<12x18x128xbf16, #tpu.memory_space<vmem>>, vector<10x16x128xbf16>
    %90 = vector.shape_cast %89 : vector<10x16x128xbf16> to vector<160x128xbf16>
    %c1024 = arith.constant 1024 : index
    %c0_95 = arith.constant 0 : index
    %91 = vector.load %arg4[%c1024, %c0_95] : memref<1152x128xbf16, #tpu.memory_space<vmem>>, vector<128x128xbf16>
    %cst_96 = arith.constant dense<0.000000e+00> : vector<160x128xf32>
    %92 = tpu.matmul %90, %91, %cst_96 {dimension_numbers = #tpu.dot_dimension_numbers<[1], [0], [0], [1], [0, 0, 1, 1], [], []>} : vector<160x128xbf16>, vector<128x128xbf16>, vector<160x128xf32> -> vector<160x128xf32>
    %93 = arith.addf %88, %92 : vector<160x128xf32>
    %c0_97 = arith.constant 0 : index
    %c0_98 = arith.constant 0 : index
    %94 = vector.load %arg5[%c0_97, %c0_98] : memref<1x128xf32, #tpu.memory_space<vmem>>, vector<1x128xf32>
    %95 = vector.broadcast %94 : vector<1x128xf32> to vector<160x128xf32>
    %96 = arith.addf %93, %95 : vector<160x128xf32>
    %cst_99 = arith.constant 0.000000e+00 : f32
    %97 = vector.broadcast %cst_99 : f32 to vector<160x128xf32>
    %98 = arith.cmpf ogt, %96, %97 : vector<160x128xf32>
    %cst_100 = arith.constant 0.00999999977 : f32
    %99 = vector.broadcast %cst_100 : f32 to vector<160x128xf32>
    %100 = arith.mulf %99, %96 : vector<160x128xf32>
    %101 = arith.select %98, %96, %100 : vector<160x128xi1>, vector<160x128xf32>
    %102 = vector.shape_cast %101 : vector<160x128xf32> to vector<10x16x128xf32>
    %103 = arith.truncf %102 : vector<10x16x128xf32> to vector<10x16x128xbf16>
    %c0_101 = arith.constant 0 : index
    %c1_102 = arith.constant 1 : index
    %c0_103 = arith.constant 0 : index
    %104 = vector.load %arg10[%c0_101, %c1_102, %c0_103] : memref<10x18x128xbf16, #tpu.memory_space<vmem>>, vector<10x16x128xbf16>
    tpu.vector_store %arg10[%c0_101, %c1_102, %c0_103], %103 {strides = array<i32>} : memref<10x18x128xbf16, #tpu.memory_space<vmem>>, vector<10x16x128xbf16>,
    %c0_i32_104 = arith.constant 0 : i32
    %105 = arith.cmpi eq, %arg0, %c0_i32_104 : i32
    %106 = arith.extui %105 : i1 to i32
    %c0_i32_105 = arith.constant 0 : i32
    %107 = arith.cmpi ne, %106, %c0_i32_105 : i32
    scf.if %107 {
      %cst_168 = arith.constant 0.000000e+00 : bf16
      %164 = vector.broadcast %cst_168 : bf16 to vector<1x18x128xbf16>
      %c0_169 = arith.constant 0 : index
      %c0_170 = arith.constant 0 : index
      %c0_171 = arith.constant 0 : index
      %165 = vector.load %arg10[%c0_169, %c0_170, %c0_171] : memref<10x18x128xbf16, #tpu.memory_space<vmem>>, vector<1x18x128xbf16>
      tpu.vector_store %arg10[%c0_169, %c0_170, %c0_171], %164 {strides = array<i32>} : memref<10x18x128xbf16, #tpu.memory_space<vmem>>, vector<1x18x128xbf16>,
    } else {
    }
    %c1_i32_106 = arith.constant 1 : i32
    %108 = arith.cmpi eq, %arg0, %c1_i32_106 : i32
    %109 = arith.extui %108 : i1 to i32
    %c0_i32_107 = arith.constant 0 : i32
    %110 = arith.cmpi ne, %109, %c0_i32_107 : i32
    scf.if %110 {
      %cst_168 = arith.constant 0.000000e+00 : bf16
      %164 = vector.broadcast %cst_168 : bf16 to vector<1x18x128xbf16>
      %c9 = arith.constant 9 : index
      %c0_169 = arith.constant 0 : index
      %c0_170 = arith.constant 0 : index
      %165 = vector.load %arg10[%c9, %c0_169, %c0_170] : memref<10x18x128xbf16, #tpu.memory_space<vmem>>, vector<1x18x128xbf16>
      tpu.vector_store %arg10[%c9, %c0_169, %c0_170], %164 {strides = array<i32>} : memref<10x18x128xbf16, #tpu.memory_space<vmem>>, vector<1x18x128xbf16>,
    } else {
    }
    %c0_108 = arith.constant 0 : index
    %c0_109 = arith.constant 0 : index
    %c0_110 = arith.constant 0 : index
    %111 = vector.load %arg10[%c0_108, %c0_109, %c0_110] : memref<10x18x128xbf16, #tpu.memory_space<vmem>>, vector<8x16x128xbf16>
    %112 = vector.shape_cast %111 : vector<8x16x128xbf16> to vector<128x128xbf16>
    %c0_111 = arith.constant 0 : index
    %c0_112 = arith.constant 0 : index
    %113 = vector.load %arg6[%c0_111, %c0_112] : memref<1152x128xbf16, #tpu.memory_space<vmem>>, vector<128x128xbf16>
    %cst_113 = arith.constant dense<0.000000e+00> : vector<128x128xf32>
    %114 = tpu.matmul %112, %113, %cst_113 {dimension_numbers = #tpu.dot_dimension_numbers<[1], [0], [0], [1], [0, 0, 1, 1], [], []>} : vector<128x128xbf16>, vector<128x128xbf16>, vector<128x128xf32> -> vector<128x128xf32>
    %c0_114 = arith.constant 0 : index
    %c1_115 = arith.constant 1 : index
    %c0_116 = arith.constant 0 : index
    %115 = vector.load %arg10[%c0_114, %c1_115, %c0_116] : memref<10x18x128xbf16, #tpu.memory_space<vmem>>, vector<8x16x128xbf16>
    %116 = vector.shape_cast %115 : vector<8x16x128xbf16> to vector<128x128xbf16>
    %c128_117 = arith.constant 128 : index
    %c0_118 = arith.constant 0 : index
    %117 = vector.load %arg6[%c128_117, %c0_118] : memref<1152x128xbf16, #tpu.memory_space<vmem>>, vector<128x128xbf16>
    %cst_119 = arith.constant dense<0.000000e+00> : vector<128x128xf32>
    %118 = tpu.matmul %116, %117, %cst_119 {dimension_numbers = #tpu.dot_dimension_numbers<[1], [0], [0], [1], [0, 0, 1, 1], [], []>} : vector<128x128xbf16>, vector<128x128xbf16>, vector<128x128xf32> -> vector<128x128xf32>
    %119 = arith.addf %114, %118 : vector<128x128xf32>
    %c0_120 = arith.constant 0 : index
    %c2_121 = arith.constant 2 : index
    %c0_122 = arith.constant 0 : index
    %120 = vector.load %arg10[%c0_120, %c2_121, %c0_122] : memref<10x18x128xbf16, #tpu.memory_space<vmem>>, vector<8x16x128xbf16>
    %121 = vector.shape_cast %120 : vector<8x16x128xbf16> to vector<128x128xbf16>
    %c256_123 = arith.constant 256 : index
    %c0_124 = arith.constant 0 : index
    %122 = vector.load %arg6[%c256_123, %c0_124] : memref<1152x128xbf16, #tpu.memory_space<vmem>>, vector<128x128xbf16>
    %cst_125 = arith.constant dense<0.000000e+00> : vector<128x128xf32>
    %123 = tpu.matmul %121, %122, %cst_125 {dimension_numbers = #tpu.dot_dimension_numbers<[1], [0], [0], [1], [0, 0, 1, 1], [], []>} : vector<128x128xbf16>, vector<128x128xbf16>, vector<128x128xf32> -> vector<128x128xf32>
    %124 = arith.addf %119, %123 : vector<128x128xf32>
    %c1_126 = arith.constant 1 : index
    %c0_127 = arith.constant 0 : index
    %c0_128 = arith.constant 0 : index
    %125 = vector.load %arg10[%c1_126, %c0_127, %c0_128] : memref<10x18x128xbf16, #tpu.memory_space<vmem>>, vector<8x16x128xbf16>
    %126 = vector.shape_cast %125 : vector<8x16x128xbf16> to vector<128x128xbf16>
    %c384_129 = arith.constant 384 : index
    %c0_130 = arith.constant 0 : index
    %127 = vector.load %arg6[%c384_129, %c0_130] : memref<1152x128xbf16, #tpu.memory_space<vmem>>, vector<128x128xbf16>
    %cst_131 = arith.constant dense<0.000000e+00> : vector<128x128xf32>
    %128 = tpu.matmul %126, %127, %cst_131 {dimension_numbers = #tpu.dot_dimension_numbers<[1], [0], [0], [1], [0, 0, 1, 1], [], []>} : vector<128x128xbf16>, vector<128x128xbf16>, vector<128x128xf32> -> vector<128x128xf32>
    %129 = arith.addf %124, %128 : vector<128x128xf32>
    %c1_132 = arith.constant 1 : index
    %c1_133 = arith.constant 1 : index
    %c0_134 = arith.constant 0 : index
    %130 = vector.load %arg10[%c1_132, %c1_133, %c0_134] : memref<10x18x128xbf16, #tpu.memory_space<vmem>>, vector<8x16x128xbf16>
    %131 = vector.shape_cast %130 : vector<8x16x128xbf16> to vector<128x128xbf16>
    %c512_135 = arith.constant 512 : index
    %c0_136 = arith.constant 0 : index
    %132 = vector.load %arg6[%c512_135, %c0_136] : memref<1152x128xbf16, #tpu.memory_space<vmem>>, vector<128x128xbf16>
    %cst_137 = arith.constant dense<0.000000e+00> : vector<128x128xf32>
    %133 = tpu.matmul %131, %132, %cst_137 {dimension_numbers = #tpu.dot_dimension_numbers<[1], [0], [0], [1], [0, 0, 1, 1], [], []>} : vector<128x128xbf16>, vector<128x128xbf16>, vector<128x128xf32> -> vector<128x128xf32>
    %134 = arith.addf %129, %133 : vector<128x128xf32>
    %c1_138 = arith.constant 1 : index
    %c2_139 = arith.constant 2 : index
    %c0_140 = arith.constant 0 : index
    %135 = vector.load %arg10[%c1_138, %c2_139, %c0_140] : memref<10x18x128xbf16, #tpu.memory_space<vmem>>, vector<8x16x128xbf16>
    %136 = vector.shape_cast %135 : vector<8x16x128xbf16> to vector<128x128xbf16>
    %c640_141 = arith.constant 640 : index
    %c0_142 = arith.constant 0 : index
    %137 = vector.load %arg6[%c640_141, %c0_142] : memref<1152x128xbf16, #tpu.memory_space<vmem>>, vector<128x128xbf16>
    %cst_143 = arith.constant dense<0.000000e+00> : vector<128x128xf32>
    %138 = tpu.matmul %136, %137, %cst_143 {dimension_numbers = #tpu.dot_dimension_numbers<[1], [0], [0], [1], [0, 0, 1, 1], [], []>} : vector<128x128xbf16>, vector<128x128xbf16>, vector<128x128xf32> -> vector<128x128xf32>
    %139 = arith.addf %134, %138 : vector<128x128xf32>
    %c2_144 = arith.constant 2 : index
    %c0_145 = arith.constant 0 : index
    %c0_146 = arith.constant 0 : index
    %140 = vector.load %arg10[%c2_144, %c0_145, %c0_146] : memref<10x18x128xbf16, #tpu.memory_space<vmem>>, vector<8x16x128xbf16>
    %141 = vector.shape_cast %140 : vector<8x16x128xbf16> to vector<128x128xbf16>
    %c768_147 = arith.constant 768 : index
    %c0_148 = arith.constant 0 : index
    %142 = vector.load %arg6[%c768_147, %c0_148] : memref<1152x128xbf16, #tpu.memory_space<vmem>>, vector<128x128xbf16>
    %cst_149 = arith.constant dense<0.000000e+00> : vector<128x128xf32>
    %143 = tpu.matmul %141, %142, %cst_149 {dimension_numbers = #tpu.dot_dimension_numbers<[1], [0], [0], [1], [0, 0, 1, 1], [], []>} : vector<128x128xbf16>, vector<128x128xbf16>, vector<128x128xf32> -> vector<128x128xf32>
    %144 = arith.addf %139, %143 : vector<128x128xf32>
    %c2_150 = arith.constant 2 : index
    %c1_151 = arith.constant 1 : index
    %c0_152 = arith.constant 0 : index
    %145 = vector.load %arg10[%c2_150, %c1_151, %c0_152] : memref<10x18x128xbf16, #tpu.memory_space<vmem>>, vector<8x16x128xbf16>
    %146 = vector.shape_cast %145 : vector<8x16x128xbf16> to vector<128x128xbf16>
    %c896_153 = arith.constant 896 : index
    %c0_154 = arith.constant 0 : index
    %147 = vector.load %arg6[%c896_153, %c0_154] : memref<1152x128xbf16, #tpu.memory_space<vmem>>, vector<128x128xbf16>
    %cst_155 = arith.constant dense<0.000000e+00> : vector<128x128xf32>
    %148 = tpu.matmul %146, %147, %cst_155 {dimension_numbers = #tpu.dot_dimension_numbers<[1], [0], [0], [1], [0, 0, 1, 1], [], []>} : vector<128x128xbf16>, vector<128x128xbf16>, vector<128x128xf32> -> vector<128x128xf32>
    %149 = arith.addf %144, %148 : vector<128x128xf32>
    %c2_156 = arith.constant 2 : index
    %c2_157 = arith.constant 2 : index
    %c0_158 = arith.constant 0 : index
    %150 = vector.load %arg10[%c2_156, %c2_157, %c0_158] : memref<10x18x128xbf16, #tpu.memory_space<vmem>>, vector<8x16x128xbf16>
    %151 = vector.shape_cast %150 : vector<8x16x128xbf16> to vector<128x128xbf16>
    %c1024_159 = arith.constant 1024 : index
    %c0_160 = arith.constant 0 : index
    %152 = vector.load %arg6[%c1024_159, %c0_160] : memref<1152x128xbf16, #tpu.memory_space<vmem>>, vector<128x128xbf16>
    %cst_161 = arith.constant dense<0.000000e+00> : vector<128x128xf32>
    %153 = tpu.matmul %151, %152, %cst_161 {dimension_numbers = #tpu.dot_dimension_numbers<[1], [0], [0], [1], [0, 0, 1, 1], [], []>} : vector<128x128xbf16>, vector<128x128xbf16>, vector<128x128xf32> -> vector<128x128xf32>
    %154 = arith.addf %149, %153 : vector<128x128xf32>
    %c0_162 = arith.constant 0 : index
    %c0_163 = arith.constant 0 : index
    %155 = vector.load %arg7[%c0_162, %c0_163] : memref<1x128xf32, #tpu.memory_space<vmem>>, vector<1x128xf32>
    %156 = vector.broadcast %155 : vector<1x128xf32> to vector<128x128xf32>
    %157 = arith.addf %154, %156 : vector<128x128xf32>
    %158 = vector.shape_cast %17 : vector<8x16x128xf32> to vector<128x128xf32>
    %159 = arith.addf %157, %158 : vector<128x128xf32>
    %160 = vector.shape_cast %159 : vector<128x128xf32> to vector<8x16x128xf32>
    %c0_164 = arith.constant 0 : index
    %c0_165 = arith.constant 0 : index
    %c0_166 = arith.constant 0 : index
    %c0_167 = arith.constant 0 : index
    %161 = vector.load %arg8[%c0_164, %c0_165, %c0_166, %c0_167] : memref<1x8x16x128xf32, #tpu.memory_space<vmem>>, vector<1x8x16x128xf32>
    %162 = vector.shape_cast %161 : vector<1x8x16x128xf32> to vector<8x16x128xf32>
    %163 = vector.shape_cast %160 : vector<8x16x128xf32> to vector<1x8x16x128xf32>
    tpu.vector_store %arg8[%c0_164, %c0_165, %c0_166, %c0_167], %163 {strides = array<i32>} : memref<1x8x16x128xf32, #tpu.memory_space<vmem>>, vector<1x8x16x128xf32>,
    return
  }
  func.func @transform_0(%arg0: i32, %arg1: i32) -> (i32, i32, i32, i32) {
    %c0_i32 = arith.constant 0 : i32
    %c0_i32_0 = arith.constant 0 : i32
    %c0_i32_1 = arith.constant 0 : i32
    return %arg1, %arg0, %c0_i32, %c0_i32_0 : i32, i32, i32, i32
  }
  func.func @transform_2(%arg0: i32, %arg1: i32) -> (i32, i32) {
    %c0_i32 = arith.constant 0 : i32
    %c0_i32_0 = arith.constant 0 : i32
    %c0_i32_1 = arith.constant 0 : i32
    return %c0_i32, %c0_i32_0 : i32, i32
  }
  func.func @transform_3(%arg0: i32, %arg1: i32) -> (i32, i32) {
    %c0_i32 = arith.constant 0 : i32
    %c0_i32_0 = arith.constant 0 : i32
    %c0_i32_1 = arith.constant 0 : i32
    return %c0_i32, %c0_i32_0 : i32, i32
  }
  func.func @transform_4(%arg0: i32, %arg1: i32) -> (i32, i32) {
    %c0_i32 = arith.constant 0 : i32
    %c0_i32_0 = arith.constant 0 : i32
    %c0_i32_1 = arith.constant 0 : i32
    return %c0_i32, %c0_i32_0 : i32, i32
  }
  func.func @transform_5(%arg0: i32, %arg1: i32) -> (i32, i32) {
    %c0_i32 = arith.constant 0 : i32
    %c0_i32_0 = arith.constant 0 : i32
    %c0_i32_1 = arith.constant 0 : i32
    return %c0_i32, %c0_i32_0 : i32, i32
  }
  func.func @transform_6(%arg0: i32, %arg1: i32) -> (i32, i32, i32, i32) {
    %c0_i32 = arith.constant 0 : i32
    %c0_i32_0 = arith.constant 0 : i32
    %c0_i32_1 = arith.constant 0 : i32
    return %arg1, %arg0, %c0_i32, %c0_i32_0 : i32, i32, i32, i32
  }
}

</mosaic_0001>

<bundles_post_ra>
// kernel: tpu_custom_call.1
= control target key start
LH: loop header
LB: loop body
LE: loop exit
PB: predicated region body
PF: predicated region fallthrough
CT: control target
= control target key end

     0   :  { %s10178_s0 = inlined_call_operand.hbm [shape: f32[2,16,16,128], index: 0, kind: input, shape index: {}]   ;;  %s10179_s1 = inlined_call_operand.hbm [shape: f32[2,16,16,128], index: 1, kind: input, shape index: {}]   ;;  %s10180_s2 = inlined_call_operand.hbm [shape: bf16[1152,128], index: 2, kind: input, shape index: {}]   ;;  %s10181_s3 = inlined_call_operand.vmem [shape: f32[1,128], index: 3, kind: input, shape index: {}]   ;;  %s10182_s4 = inlined_call_operand.hbm [shape: bf16[1152,128], index: 4, kind: input, shape index: {}]   ;;  %s10183_s5 = inlined_call_operand.vmem [shape: f32[1,128], index: 5, kind: input, shape index: {}]   ;;  %s10184_s6 = inlined_call_operand.hbm [shape: f32[2,16,16,128], index: 6, kind: output, shape index: {}]  }
   0x1   :  { %10214 = sst [smem:[#allocation53_spill]] %s10180_s2 }
   0x2   :  { %10215 = sst [smem:[#allocation54_spill]] %s10181_s3 }
   0x3   :  { %10216 = sst [smem:[#allocation55_spill]] %s10182_s4 }
   0x4   :  { %10217 = sst [smem:[#allocation56_spill]] %s10183_s5 }
   0x5   :  { %10218 = sst [smem:[#allocation57_spill]] %s10184_s6 }
   0x6   :  { %11 = vsyncpa [#allocation7], 0 }
   0x7   :  { %13 = vsyncpa [#allocation7 + $0x1], 0 }
   0x8   :  { %14 = vsyncpa [#allocation10], 0 }
   0x9   :  { %15 = vsyncpa [#allocation8], 0 }
   0xa   :  { %17 = vsyncpa [#allocation8 + $0x1], 0  ;;  %s8242_s21 = smov 0   ;;  %s8244_s22 = smov 0  }
   0xb   :  { %s8246_s23 = smov 0   ;;  %s8248_s24 = smov 0  }
   0xc   :  { %s8250_s25 = smov 0   ;;  %s8252_s26 = smov 0  }
   0xd   :  { %s8254_s27 = smov 0   ;;  %s8256_s28 = smov 0  }
   0xe LB: > { %10219 = sst [smem:[#allocation24_spill]] %s8163_s21  ;;  %s6728_s29 = sadd.s32 4294967295, %s8191_s28   ;;  %s8191_s28 = sphi %s8256_s28, %s23_s28   ;;  %s8187_s27 = sphi %s8254_s27, %s10307_s27   ;;  %s8183_s26 = sphi %s8252_s26, %s10306_s26   ;;  %s8179_s25 = sphi %s8250_s25, %s10305_s25   ;;  %s8175_s24 = sphi %s8248_s24, %s10304_s24   ;;  %s8171_s23 = sphi %s8246_s23, %s10303_s23   ;;  %s8167_s22 = sphi %s8244_s22, %s10302_s22   ;;  %s8163_s21 = sphi %s8242_s21, %s10301_s21  }
   0xf   : > { %s6729_s30 = sadd.s32 4294967294, %s8191_s28   ;;  %p57_p0 = scmp.ne.s32.totalorder %s8167_s22, %s8163_s21 }
  0x10   : > { %p8286_p1 = scmp.eq.s32.totalorder %s6728_s29, 0  ;;  %p8290_p2 = scmp.eq.s32.totalorder %s6728_s29, 3 }
  0x11   : > { %p173_p3 = scmp.eq.s32.totalorder %s6729_s30, 3  ;;  %p6730_p5 = scmp.ge.s32.totalorder %s8191_s28, 1 }
  0x12   : > { %p8296_p4 = por %p8286_p1, %p57_p0  ;;  %p180_p7 = scmp.lt.s32.totalorder %s8191_s28, 5 }
  0x13   : > { %p8301_p6 = por %p173_p3, %p57_p0  ;;  %s10225_s2 = sld [smem:[#allocation53_spill]] }
  0x14   : > { %p8309_p8 = pnand %p6730_p5, %p180_p7  ;;  %s8193_s15 = smov [#allocation9]  }
  0x15   : > { %s10223_s10 = scalar_select %p8301_p6, 1, 0 }
  0x16   : > { %p7838_p9 = pneg %p8309_p8  ;;  %s193_s16 = sshll.u32 %s8193_s15, 4  ;;  %s194_s16 = int_to_ptr.vmem [resolvable:$true] %s193_s16 }
  0x17   : > { %10224 = sst [smem:[#allocation25_spill]] %s10223_s10  ;;  %s8194_s20 = smov 64  }
  0x18   : > { %p7839_p10 = pnand %p7838_p9, %p8286_p1  ;;  %s10227_s4 = sld [smem:[#allocation55_spill]] }
  0x19   : > { %s191_s13 = sshll.u32 %s10225_s2, 4  ;;  %s8195_s29 = smov 4   ;;  %s192_s13 = int_to_ptr.hbm [resolvable:$true] %s191_s13 }
  0x1a   : > { %7841 = dma.hbm_to_vmem [thread:$0]  (!%p7839_p10), %s192_s13, 9216, %s194_s16, [#allocation10], %s8194_s20, %s8194_s20, %s8195_s29  }
  0x1b   : > { %s8196_s30 = smov [#allocation11]   ;;  %s32_s12 = sadd.s32 1, %s8183_s26 }
  0x1c   : > { %s210_s11 = sshll.u32 %s8196_s30, 4  ;;  %s35_s15 = sadd.s32 1, %s8187_s27  ;;  %s211_s11 = int_to_ptr.vmem [resolvable:$true] %s210_s11 }
  0x1d   : > { %p33_p11 = scmp.ge.s32.totalorder %s32_s12, 2  ;;  %s44_s17 = sadd.s32 1, %s8171_s23 }
  0x1e   : > { %s208_s19 = sshll.u32 %s10227_s4, 4  ;;  %p51_p12 = scmp.ne.s32.totalorder %s8171_s23, %s8167_s22  ;;  %s209_s19 = int_to_ptr.hbm [resolvable:$true] %s208_s19 }
  0x1f   : > { %7844 = dma.hbm_to_vmem [thread:$0]  (!%p7839_p10), %s209_s19, 9216, %s211_s11, [#allocation10], %s8194_s20, %s8194_s20, %s8195_s29  }
  0x20   : > { %p52_p13 = scmp.eq.s32.totalorder %s8191_s28, 0  ;;  %s10309_s12 = smov (%p33_p11, %s32_s12), 0 }
  0x21   : > { %10228 = sst [smem:[#allocation26_spill]] %s10309_s12  ;;  %s10311_s15 = smov (!%p33_p11, %s35_s15), %s8187_s27 }
  0x22   : > { %s39_s13 = ssub.s32 %s8183_s26, %s10309_s12  ;;  %p8331_p0 = por %p52_p13, %p51_p12 }
  0x23   : > { %p37_p3 = scmp.ge.s32.totalorder %s10311_s15, 2  ;;  %p8337_p5 = por %p8290_p2, %p51_p12 }
  0x24   : > { %p7855_p7 = scmp.lt.s32.totalorder %s8191_s28, 4  ;;  %s227_s19 = sand.u32 1, %s8171_s23  }
  0x25   : > { %s10230_s18 = scalar_select %p8337_p5, 1, 0 }
  0x26   : > { %s10313_s15 = smov (%p37_p3, %s10311_s15), 0  ;;  %s6734_s20 = sshll.u32 %s227_s19, 7 }
  0x27   : > { %10231 = sst [smem:[#allocation27_spill]] %s10230_s18  ;;  %s40_s29 = ssub.s32 %s8187_s27, %s10313_s15 }
  0x28   : > { %s41_s30 = sor.u32 %s40_s29, %s39_s13  ;;  %s7610_s11 = sshll.u32 %s8187_s27, 4 }
  0x29   : > { %p42_p9 = scmp.eq.s32.totalorder %s41_s30, 0  ;;  %s6737_s2 = sshll.u32 %s8183_s26, 5 }
  0x2a   : > { %s237_s4 = sadd.s32 %s7610_s11, %s6737_s2  ;;  %s231_s12 = scalar_lea.vmem [#allocation6], %s6734_s20 }
  0x2b   : > { %s242_s8 = sshll.u32 %s231_s12, 4  ;;  %s6738_s21 = sshll.u32 %s237_s4, 3  ;;  %s243_s8 = int_to_ptr.vmem [resolvable:$true] %s242_s8 }
  0x2c   : > { %s8350_s10 = scalar_select %p42_p9, %s8171_s23, %s44_s17  }
  0x2d   : > { %s239_s5 = scalar_lea.hbm %s10178_s0, %s6738_s21  ;;  %p7846_p2 = pnand %p7855_p7, %p8331_p0 }
  0x2e   : > { %s240_s3 = sshll.u32 %s239_s5, 4  ;;  %s228_s13 = scalar_lea.sflag [#allocation7], %s227_s19  ;;  %s241_s3 = int_to_ptr.hbm [resolvable:$true] %s240_s3 }
  0x2f   : > { %s8197_s29 = smov 128   ;;  %s8198_s30 = smov 8  }
  0x30   : > { %7848 = dma.hbm_to_vmem [thread:$0]  (!%p7846_p2), %s241_s3, 2048, %s243_s8, %s228_s13, %s8197_s29, %s8197_s29, %s8198_s30  }
  0x31   : > { %254 = sbr.rel (%p8309_p8) target bundleno = 1498 (0x5da), region = 40 }
  0x36   : > { %s8362_s2 = sand.u32 1, %s8167_s22  }
  0x37   : > { %s6740_s4 = sshll.u32 %s8362_s2, 7  ;;  %s257_s6 = scalar_lea.sflag [#allocation7], %s8362_s2 }
  0x38   : > { %s8368_s21 = scalar_lea.vmem [#allocation6], %s6740_s4 }
  0x39   : > { %8146 = dma.done.wait (%p8296_p4), %s257_s6, 2048  }
  0x3a   : > { %8148 = vsyncadd (%p8296_p4), %s257_s6, 4294965248 }
  0x3b   : > { %8150 = dma.done.wait (%p8286_p1), [#allocation10], 18432  }
  0x3c   : > { %8152 = vsyncadd (%p8286_p1), [#allocation10], 4294948864  ;;  %s6744_s3 = sshll.u32 %s8179_s25, 3  ;;  %v8382_v0 = vld [vmem:[%s8368_s21] sm:$0xff]  ;;  %v8385_v1 = vld [vmem:[%s8368_s21 + $0x8] sm:$0xff]  ;;  %vm539_vm1 = vcmask 1043456  }
  0x3d   : > { %s6745_s5 = sadd.s32 4294967294, %s6744_s3  ;;  %10232 = vst [vmem:[#allocation28_spill] sm:$0xff] %v8382_v0  ;;  %v359_v2 = vpack.c.bf16 %v8382_v0, %v8382_v0  ;;  %vm375_vm0 = vsmask.f32 256  ;;  %v8391_v3 = vpack.c.bf16 %v8385_v1, %v8385_v1  ;;  %v8394_v4 = vld [vmem:[%s8368_s21 + $0x10] sm:$0xff]  ;;  %vm546_vm3 = vcmask 1040384  }
  0x3e   : > { %p303_p8 = scmp.gt.s32.totalorder %s6745_s5, 0  ;;  %10233 = vst [vmem:[#allocation29_spill] sm:$0xff] %v8385_v1  ;;  %vm540_vm2 = vsmask.f32 7938  ;;  %v361_v5 = vpack.c.bf16 %v8394_v4, %v8394_v4  ;;  %v8401_v6 = vld [vmem:[%s8368_s21 + $0x18] sm:$0xff]  ;;  %v8404_v7 = vld [vmem:[%s8368_s21 + $0x20] sm:$0xff]  ;;  %vm8428_vm4 = vmand %vm546_vm3, %vm375_vm0 }
  0x3f   : > { %10234 = vst [vmem:[#allocation30_spill] sm:$0xff] %v8394_v4  ;;  %v379_v8 = vshrl.u32 %v359_v2, 16  ;;  %v382_v9 = vshll.u32 %v359_v2, 16  ;;  %v387_v10 = vshrl.u32 %v8391_v3, 16  ;;  %v8409_v11 = vpack.c.bf16 %v8401_v6, %v8401_v6  ;;  %v8412_v12 = vld [vmem:[%s8368_s21 + $0x28] sm:$0xff]  ;;  %s6747_s7 = sshll.u32 %s8175_s24, 8  ;;  %vm8440_vm5 = vmand %vm539_vm1, %vm540_vm2 }
  0x40   : > { %s10315_s5 = smov (!%p303_p8, %s6745_s5), 0  ;;  %10235 = vst [vmem:[#allocation31_spill] sm:$0xff] %v8401_v6  ;;  %v542_v13 = vld [vmem:[#allocation2 + $0x18] sm:$0xf]  ;;  %v548_v14 = vld [vmem:[#allocation2 + $0x20] sm:$0x1]  ;;  %v363_v17 = vpack.c.bf16 %v8404_v7, %v8404_v7  ;;  %v8419_v18 = vpack.c.bf16 %v8412_v12, %v8412_v12 }
  0x41   : > { %10236 = vst [vmem:[#allocation32_spill] sm:$0xff] %v8404_v7  ;;  %v396_v15 = vshrl.u32 %v361_v5, 16  ;;  %v399_v16 = vshll.u32 %v361_v5, 16  ;;  %v8422_v19 = vld [vmem:[%s8368_s21 + $0x30] sm:$0xff]  ;;  %v8424_v20 = vrot.slane %v379_v8, 7  ;;  %v10239_v21 = vmov 0 }
  0x42   : > { %10237 = vst [vmem:[#allocation33_spill] sm:$0xff] %v8412_v12  ;;  %v10240_v21 = vsel %vm8428_vm4, 4294967295, %v10239_v21  ;;  %v8432_v22 = vrot.slane %v387_v10, 7  ;;  %v551_v23 = vld [vmem:[#allocation2 + $0x24] sm:$0xf]  ;;  %v404_v24 = vshrl.u32 %v8409_v11, 16  ;;  %v365_v25 = vpack.c.bf16 %v8422_v19, %v8422_v19 }
  0x43   : > { %10238 = vst [vmem:[#allocation34_spill] sm:$0xff] %v8422_v19  ;;  %s6746_s9 = sshll.u32 %s10315_s5, 4  ;;  %v10242_v26 = vmov 0  ;;  %v8444_v27 = vrot.slane %v396_v15, 7  ;;  %v555_v28 = vld [vmem:[#allocation2 + $0x2c] sm:$0x1]  ;;  %v384_v32 = vor.u32 %v382_v9, %v8424_v20 }
  0x44   : > { %10241 = vst [vmem:[#allocation35_spill] sm:$0xff] %v10240_v21  ;;  %v10243_v26 = vsel %vm8440_vm5, 4294967295, %v10242_v26  ;;  %v413_v29 = vshrl.u32 %v363_v17, 16  ;;  %v416_v30 = vshll.u32 %v363_v17, 16  ;;  %v421_v31 = vshrl.u32 %v8419_v18, 16  ;;  %v8452_v37 = vld [vmem:[%s8368_s21 + $0x38] sm:$0xff]  ;;  %s8467_s14 = sadd.s32 %s6747_s7, %s6746_s9 }
  0x45   : > { %10244 = vst [vmem:[#allocation36_spill] sm:$0xff] %v10243_v26  ;;  %v394_v33 = vrot.slane %v8432_v22, 4  ;;  %v8449_v34 = vrot.slane %v404_v24, 7  ;;  %v558_v35 = vld [vmem:[#allocation2 + $0x30] sm:$0xf]  ;;  %v430_v36 = vshrl.u32 %v365_v25, 16  ;;  %v401_v38 = vor.u32 %v399_v16, %v8444_v27  ;;  %s311_s20 = scalar_lea.hbm %s10179_s1, %s8467_s14 }
  0x46   : > { %10245 = vst [vmem:[#allocation37_spill] sm:$0xff] %v8452_v37  ;;  %v8455_v39 = vrot.slane %v413_v29, 7  ;;  %v8457_v40 = vrot.slane %v421_v31, 7  ;;  %v433_v41 = vshll.u32 %v365_v25, 16  ;;  %v8460_v42 = vld [vmem:[%s8368_s21 + $0x40] sm:$0xff]  ;;  %v8463_v43 = vld [vmem:[%s8368_s21 + $0x48] sm:$0xff]  ;;  %v543_v44 = vsel %vm8440_vm5, %v384_v32, %v542_v13 }
  0x47   : > { %10246 = vst [vmem:[#allocation38_spill] sm:$0xff] %v8460_v42  ;;  %s8471_s12 = sadd.s32 8, %s6744_s3  ;;  %v549_v45 = vsel %vm8428_vm4, %v394_v33, %v548_v14  ;;  %v411_v46 = vrot.slane %v8449_v34, 4  ;;  %v562_v47 = vld [vmem:[#allocation2 + $0x38] sm:$0x1]  ;;  %v8478_v48 = vrot.slane %v430_v36, 7  ;;  %v552_v50 = vsel %vm8440_vm5, %v401_v38, %v551_v23 }
  0x48   : > { %10247 = vst [vmem:[#allocation39_spill] sm:$0xff] %v8463_v43  ;;  %v8481_v49 = vld [vmem:[%s8368_s21 + $0x50] sm:$0xff]  ;;  %v418_v51 = vor.u32 %v416_v30, %v8455_v39  ;;  %v428_v52 = vrot.slane %v8457_v40, 4  ;;  %v8489_v54 = vpack.c.bf16 %v8452_v37, %v8452_v37  ;;  %s8199_s17 = smov [#allocation4]   ;;  %v367_v57 = vpack.c.bf16 %v8460_v42, %v8460_v42  ;;  %v8503_v59 = vld [vmem:[%s8368_s21 + $0x58] sm:$0xff]  ;;  %p306_p1 = scmp.lt.s32.totalorder %s8471_s12, 14 }
  0x49   : > { %10248 = vst [vmem:[#allocation40_spill] sm:$0xff] %v8481_v49  ;;  %v565_v53 = vld [vmem:[#allocation2 + $0x3c] sm:$0xf]  ;;  %s8491_s16 = sshll.u32 %s8199_s17, 4  ;;  %v556_v55 = vsel %vm8428_vm4, %v411_v46, %v555_v28  ;;  %v435_v56 = vor.u32 %v433_v41, %v8478_v48  ;;  %v8500_v58 = vpack.c.bf16 %v8463_v43, %v8463_v43  ;;  %v369_v63 = vpack.c.bf16 %v8481_v49, %v8481_v49  ;;  %v8518_v2 = vld [vmem:[%s8368_s21 + $0x60] sm:$0xff]  ;;  %v8521_v5 = vld [vmem:[%s8368_s21 + $0x68] sm:$0xff]  ;;  %s322_s16 = int_to_ptr.vmem [resolvable:$true] %s8491_s16 }
  0x4a   : > { %544 = vst [vmem:[#allocation2 + $0x18] sm:$0xf] %v543_v44  ;;  %v559_v60 = vsel %vm8440_vm5, %v418_v51, %v558_v35  ;;  %v563_v61 = vsel %vm8428_vm4, %v428_v52, %v562_v47  ;;  %v438_v62 = vshrl.u32 %v8489_v54, 16  ;;  %s8200_s11 = smov [#allocation4 + $0x20]   ;;  %vm376_vm6 = vsmask.f32 4368 }
  0x4b   : > { %550 = vst [vmem:[#allocation2 + $0x20] sm:$0x1] %v549_v45  ;;  %s8523_s8 = sshll.u32 %s8200_s11, 4  ;;  %v566_v8 = vsel %vm8440_vm5, %v435_v56, %v565_v53  ;;  %v569_v9 = vld [vmem:[#allocation2 + $0x44] sm:$0x1]  ;;  %v447_v10 = vshrl.u32 %v367_v57, 16  ;;  %v8535_v28 = vpack.c.bf16 %v8503_v59, %v8503_v59  ;;  %v371_v32 = vpack.c.bf16 %v8518_v2, %v8518_v2  ;;  %s340_s8 = int_to_ptr.vmem [resolvable:$true] %s8523_s8 }
  0x4c   : > { %10249 = vst [vmem:[#allocation41_spill] sm:$0xff] %v8503_v59  ;;  %v450_v13 = vshll.u32 %v367_v57, 16  ;;  %v455_v14 = vshrl.u32 %v8500_v58, 16  ;;  %v8529_v15 = vld [vmem:[%s8368_s21 + $0x70] sm:$0xff]  ;;  %v8531_v16 = vrot.slane %v438_v62, 7  ;;  %v464_v24 = vshrl.u32 %v369_v63, 16 }
  0x4d   : > { %553 = vst [vmem:[#allocation2 + $0x24] sm:$0xf] %v552_v50  ;;  %v572_v17 = vld [vmem:[#allocation2 + $0x48] sm:$0xf]  ;;  %v576_v23 = vld [vmem:[#allocation2 + $0x50] sm:$0x1]  ;;  %v8548_v33 = vpack.c.bf16 %v8521_v5, %v8521_v5  ;;  %v373_v41 = vpack.c.bf16 %v8529_v15, %v8529_v15 }
  0x4e   : > { %10250 = vst [vmem:[#allocation42_spill] sm:$0xff] %v8518_v2  ;;  %v467_v25 = vshll.u32 %v369_v63, 16  ;;  %s8537_s13 = sshll.u32 %s311_s20, 4  ;;  %v8540_v29 = vrot.slane %v447_v10, 7  ;;  %v8542_v30 = vrot.slane %v455_v14, 7  ;;  %v445_v35 = vrot.slane %v8531_v16, 4  ;;  %s320_s13 = int_to_ptr.hbm [resolvable:$true] %s8537_s13 }
  0x4f   : > { %10251 = vst [vmem:[#allocation43_spill] sm:$0xff] %v8521_v5  ;;  %v579_v31 = vld [vmem:[#allocation2 + $0x54] sm:$0xf]  ;;  %v8552_v36 = vrot.slane %v464_v24, 7  ;;  %v472_v38 = vshrl.u32 %v8535_v28, 16  ;;  %s10317_s12 = smov (!%p306_p1, %s8471_s12), 14 }
  0x50   : > { %557 = vst [vmem:[#allocation2 + $0x2c] sm:$0x1] %v556_v55  ;;  %v452_v44 = vor.u32 %v450_v13, %v8540_v29  ;;  %v462_v45 = vrot.slane %v8542_v30, 4  ;;  %v583_v46 = vld [vmem:[#allocation2 + $0x5c] sm:$0x1]  ;;  %v481_v47 = vshrl.u32 %v371_v32, 16 }
  0x51   : > { %10252 = vst [vmem:[#allocation44_spill] sm:$0xff] %v8529_v15  ;;  %v484_v50 = vshll.u32 %v371_v32, 16  ;;  %s8037_s29 = sshra.s32 %s320_s13, 4  ;;  %s8041_s5 = scalar_lea.hbm %s10179_s1, 512  ;;  %s8038_s29 = int_to_ptr.hbm [resolvable:$true] %s8037_s29 }
  0x52   : > { %560 = vst [vmem:[#allocation2 + $0x30] sm:$0xf] %v559_v60  ;;  %s8039_s30 = scalar_lea.hbm %s8038_s29, 32  ;;  %p8042_p10 = scmp.lt.s32.totalorder %s8038_s29, %s10179_s1 }
  0x53   : > { %564 = vst [vmem:[#allocation2 + $0x38] sm:$0x1] %v563_v61  ;;  %p8040_p4 = scmp.ne.s32.totalorder %s8038_s29, %s8039_s30  ;;  %p8043_p11 = scmp.lt.s32.totalorder %s8041_s5, %s8039_s30 }
  0x54   : > { %567 = vst [vmem:[#allocation2 + $0x3c] sm:$0xf] %v566_v8 }
  0x55   : > { %p8044_p12 = por %p8043_p11, %p8042_p10 }
  0x57   : > { %p8045_p13 = pnand %p8044_p12, %p8040_p4 }
  0x59   : > { %8048 = shalt.err (!%p8045_p13)  }
  0x5a   : > { %324 = dma.hbm_to_vmem [thread:$0]  %s320_s13, 512, %s322_s16, [#allocation5]  ;;  %v570_v51 = vsel %vm8428_vm4, %v445_v35, %v569_v9  ;;  %v469_v52 = vor.u32 %v467_v25, %v8552_v36  ;;  %v8579_v53 = vrot.slane %v472_v38, 7  ;;  %v586_v55 = vld [vmem:[#allocation2 + $0x60] sm:$0xf]  ;;  %v489_v56 = vshrl.u32 %v8548_v33, 16 }
  0x5b   : > { %v8583_v57 = vld [vmem:[%s8368_s21 + $0x78] sm:$0xff]  ;;  %s6748_s19 = sshll.u32 %s10317_s12, 4  ;;  %571 = vst [vmem:[#allocation2 + $0x44] sm:$0x1] %v570_v51  ;;  %v573_v60 = vsel %vm8440_vm5, %v452_v44, %v572_v17  ;;  %v577_v61 = vsel %vm8428_vm4, %v462_v45, %v576_v23  ;;  %v8590_v62 = vrot.slane %v481_v47, 7  ;;  %v498_v8 = vshrl.u32 %v373_v41, 16 }
  0x5c   : > { %10253 = vst [vmem:[#allocation45_spill] sm:$0xff] %v8583_v57  ;;  %v590_v63 = vld [vmem:[#allocation2 + $0x68] sm:$0x1]  ;;  %s326_s16 = sadd.s32 %s6748_s19, %s6747_s7  ;;  %v580_v9 = vsel %vm8440_vm5, %v469_v52, %v579_v31  ;;  %v479_v10 = vrot.slane %v8579_v53, 4  ;;  %v8597_v13 = vrot.slane %v489_v56, 7  ;;  %v501_v14 = vshll.u32 %v373_v41, 16 }
  0x5d   : > { %574 = vst [vmem:[#allocation2 + $0x48] sm:$0xf] %v573_v60  ;;  %v593_v24 = vld [vmem:[#allocation2 + $0x6c] sm:$0xf]  ;;  %s327_s20 = scalar_lea.hbm %s10179_s1, %s326_s16  ;;  %v486_v17 = vor.u32 %v484_v50, %v8590_v62  ;;  %v8604_v23 = vrot.slane %v498_v8, 7  ;;  %v8608_v25 = vpack.c.bf16 %v8583_v57, %v8583_v57  ;;  %v385_v31 = vrot.slane %v8424_v20, 4 }
  0x5e   : > { %578 = vst [vmem:[#allocation2 + $0x50] sm:$0x1] %v577_v61  ;;  %s337_s7 = sshll.u32 %s327_s20, 4  ;;  %v584_v32 = vsel %vm8428_vm4, %v479_v10, %v583_v46  ;;  %v496_v35 = vrot.slane %v8597_v13, 4  ;;  %v390_v38 = vshll.u32 %v8391_v3, 16  ;;  %v402_v41 = vrot.slane %v8444_v27, 4  ;;  %s338_s7 = int_to_ptr.hbm [resolvable:$true] %s337_s7 }
  0x5f   : > { %581 = vst [vmem:[#allocation2 + $0x54] sm:$0xf] %v580_v9  ;;  %v587_v44 = vsel %vm8440_vm5, %v486_v17, %v586_v55  ;;  %v503_v45 = vor.u32 %v501_v14, %v8604_v23  ;;  %v506_v47 = vshrl.u32 %v8608_v25, 16  ;;  %s8061_s11 = sshra.s32 %s338_s7, 4  ;;  %s8062_s11 = int_to_ptr.hbm [resolvable:$true] %s8061_s11 }
  0x60   : > { %585 = vst [vmem:[#allocation2 + $0x5c] sm:$0x1] %v584_v32  ;;  %s8063_s13 = scalar_lea.hbm %s8062_s11, 32  ;;  %p8066_p3 = scmp.lt.s32.totalorder %s8062_s11, %s10179_s1 }
  0x61   : > { %p8064_p0 = scmp.ne.s32.totalorder %s8062_s11, %s8063_s13  ;;  %p8067_p7 = scmp.lt.s32.totalorder %s8041_s5, %s8063_s13 }
  0x63   : > { %p8068_p9 = por %p8067_p7, %p8066_p3 }
  0x65   : > { %p8069_p2 = pnand %p8068_p9, %p8064_p0 }
  0x67   : > { %8072 = shalt.err (!%p8069_p2)  }
  0x68   : > { %342 = dma.hbm_to_vmem [thread:$0]  %s338_s7, 512, %s340_s8, [#allocation5 + $0x1]  ;;  %vm8629_vm7 = vmor %vm375_vm0, %vm376_vm6  ;;  %v10254_v3 = vmov 0  ;;  %v407_v20 = vshll.u32 %v8409_v11, 16  ;;  %588 = vst [vmem:[#allocation2 + $0x60] sm:$0xf] %v587_v44  ;;  %v591_v27 = vsel %vm8428_vm4, %v496_v35, %v590_v63  ;;  %v392_v46 = vor.u32 %v390_v38, %v8432_v22 }
  0x69   : > { %v10255_v3 = vsel %vm8629_vm7, 4294967295, %v10254_v3  ;;  %v419_v50 = vrot.slane %v8455_v39, 4  ;;  %v424_v51 = vshll.u32 %v8419_v18, 16  ;;  %592 = vst [vmem:[#allocation2 + $0x68] sm:$0x1] %v591_v27  ;;  %v594_v52 = vsel %vm8440_vm5, %v503_v45, %v593_v24  ;;  %vm8695_vm8 = vmand %vm546_vm3, %vm540_vm2  ;;  %s8771_s8 = scalar_lea.vmem [#allocation12], %s6740_s4 }
  0x6a   : > { %10256 = vst [vmem:[#allocation46_spill] sm:$0xff] %v10255_v3  ;;  %v508_v55 = vrot.slane %v506_v47, 7  ;;  %v409_v56 = vor.u32 %v407_v20, %v8449_v34  ;;  %v597_v60 = vld [vmem:[#allocation2 + $0x74] sm:$0x1]  ;;  %v393_v11 = vsel %vm8629_vm7, %v385_v31, %v392_v46  ;;  %v436_v22 = vrot.slane %v8478_v48, 4 }
  0x6b   : > { %595 = vst [vmem:[#allocation2 + $0x6c] sm:$0xf] %v594_v52  ;;  %v426_v61 = vor.u32 %v424_v51, %v8457_v40  ;;  %v441_v39 = vshll.u32 %v8489_v54, 16  ;;  %v453_v8 = vrot.slane %v8540_v29, 4  ;;  %v458_v34 = vshll.u32 %v8500_v58, 16 }
  0x6c   : > { %v513_v63 = vrot.slane %v508_v55, 4  ;;  %545 = vst [vmem:[#allocation2 + $0x1c] sm:$0xf] %v393_v11  ;;  %v410_v18 = vsel %vm8629_vm7, %v402_v41, %v409_v56  ;;  %v470_v40 = vrot.slane %v8552_v36, 4  ;;  %v475_v48 = vshll.u32 %v8535_v28, 16 }
  0x6d   : > { %554 = vst [vmem:[#allocation2 + $0x28] sm:$0xf] %v410_v18  ;;  %v427_v9 = vsel %vm8629_vm7, %v419_v50, %v426_v61  ;;  %v443_v10 = vor.u32 %v441_v39, %v8531_v16  ;;  %v460_v14 = vor.u32 %v458_v34, %v8542_v30  ;;  %v487_v29 = vrot.slane %v8590_v62, 4  ;;  %v600_v17 = vld [vmem:[#allocation2] sm:$0x1] }
  0x6e   : > { %v598_v54 = vsel %vm8428_vm4, %v513_v63, %v597_v60  ;;  %561 = vst [vmem:[#allocation2 + $0x34] sm:$0xf] %v427_v9  ;;  %v492_v58 = vshll.u32 %v8548_v33, 16  ;;  %v477_v16 = vor.u32 %v475_v48, %v8579_v53  ;;  %v504_v36 = vrot.slane %v8604_v23, 4  ;;  %v603_v62 = vld [vmem:[#allocation2 + $0xc] sm:$0x1] }
  0x6f   : > { %599 = vst [vmem:[#allocation2 + $0x74] sm:$0x1] %v598_v54  ;;  %v444_v24 = vsel %vm8629_vm7, %v436_v22, %v443_v10  ;;  %v509_v28 = vshll.u32 %v8608_v25, 16  ;;  %v461_v31 = vsel %vm8629_vm7, %v453_v8, %v460_v14  ;;  %v606_v35 = vld [vmem:[#allocation2 + $0x18] sm:$0x1]  ;;  %v601_v23 = vsel %vm8428_vm4, 0, %v600_v17 }
  0x70   : > { %568 = vst [vmem:[#allocation2 + $0x40] sm:$0xf] %v444_v24  ;;  %v494_v30 = vor.u32 %v492_v58, %v8597_v13  ;;  %v478_v33 = vsel %vm8629_vm7, %v470_v40, %v477_v16  ;;  %v609_v25 = vld [vmem:[#allocation2 + $0x24] sm:$0x1]  ;;  %v604_v13 = vsel %vm8428_vm4, 0, %v603_v62  ;;  %v607_v44 = vsel %vm8428_vm4, 0, %v606_v35 }
  0x71   : > { %575 = vst [vmem:[#allocation2 + $0x4c] sm:$0xf] %v461_v31  ;;  %v511_v32 = vor.u32 %v509_v28, %v508_v55  ;;  %v612_v41 = vld [vmem:[#allocation2 + $0x30] sm:$0x1]  ;;  %v615_v45 = vld [vmem:[#allocation2 + $0x3c] sm:$0x1] }
  0x72   : > { %582 = vst [vmem:[#allocation2 + $0x58] sm:$0xf] %v478_v33  ;;  %v495_v53 = vsel %vm8629_vm7, %v487_v29, %v494_v30  ;;  %v610_v47 = vsel %vm8428_vm4, 0, %v609_v25  ;;  %v618_v20 = vld [vmem:[#allocation2 + $0x48] sm:$0x1]  ;;  %v613_v27 = vsel %vm8428_vm4, 0, %v612_v41 }
  0x73   : > { %589 = vst [vmem:[#allocation2 + $0x64] sm:$0xf] %v495_v53  ;;  %v512_v38 = vsel %vm8629_vm7, %v504_v36, %v511_v32  ;;  %v621_v46 = vld [vmem:[#allocation2 + $0x54] sm:$0x1]  ;;  %v616_v50 = vsel %vm8428_vm4, 0, %v615_v45  ;;  %v619_v52 = vsel %vm8428_vm4, 0, %v618_v20 }
  0x74   : > { %596 = vst [vmem:[#allocation2 + $0x70] sm:$0xf] %v512_v38  ;;  %v624_v51 = vld [vmem:[#allocation2 + $0x60] sm:$0x1]  ;;  %v627_v55 = vld [vmem:[#allocation2 + $0x6c] sm:$0x1] }
  0x75   : > { %602 = vst [vmem:[#allocation2] sm:$0x1] %v601_v23  ;;  %v622_v56 = vsel %vm8428_vm4, 0, %v621_v46  ;;  %v630_v60 = vld [vmem:[#allocation2 + $0x78] sm:$0x1]  ;;  %v625_v11 = vsel %vm8428_vm4, 0, %v624_v51 }
  0x76   : > { %605 = vst [vmem:[#allocation2 + $0xc] sm:$0x1] %v604_v13  ;;  %v633_v61 = vld [vmem:[#allocation2 + $0x84] sm:$0x1]  ;;  %v628_v39 = vsel %vm8428_vm4, 0, %v627_v55  ;;  %v631_v18 = vsel %vm8428_vm4, 0, %v630_v60 }
  0x77   : > { %608 = vst [vmem:[#allocation2 + $0x18] sm:$0x1] %v607_v44  ;;  %v637_v63 = vld [vmem:[#allocation2 + $0x8] sm:$0x1]  ;;  %v640_v8 = vld [vmem:[#allocation2 + $0x14] sm:$0x1] }
  0x78   : > { %611 = vst [vmem:[#allocation2 + $0x24] sm:$0x1] %v610_v47  ;;  %v634_v34 = vsel %vm8428_vm4, 0, %v633_v61  ;;  %v643_v9 = vld [vmem:[#allocation2 + $0x20] sm:$0x1]  ;;  %v638_v10 = vsel %vm8695_vm8, 0, %v637_v63 }
  0x79   : > { %614 = vst [vmem:[#allocation2 + $0x30] sm:$0x1] %v613_v27  ;;  %v646_v40 = vld [vmem:[#allocation2 + $0x2c] sm:$0x1]  ;;  %v641_v48 = vsel %vm8695_vm8, 0, %v640_v8  ;;  %v644_v14 = vsel %vm8695_vm8, 0, %v643_v9 }
  0x7a   : > { %617 = vst [vmem:[#allocation2 + $0x3c] sm:$0x1] %v616_v50  ;;  %v649_v54 = vld [vmem:[#allocation2 + $0x38] sm:$0x1]  ;;  %v652_v29 = vld [vmem:[#allocation2 + $0x44] sm:$0x1] }
  0x7b   : > { %620 = vst [vmem:[#allocation2 + $0x48] sm:$0x1] %v619_v52  ;;  %v647_v58 = vsel %vm8695_vm8, 0, %v646_v40  ;;  %v655_v24 = vld [vmem:[#allocation2 + $0x50] sm:$0x1]  ;;  %v650_v16 = vsel %vm8695_vm8, 0, %v649_v54 }
  0x7c   : > { %623 = vst [vmem:[#allocation2 + $0x54] sm:$0x1] %v622_v56  ;;  %v658_v36 = vld [vmem:[#allocation2 + $0x5c] sm:$0x1]  ;;  %v653_v28 = vsel %vm8695_vm8, 0, %v652_v29  ;;  %v656_v31 = vsel %vm8695_vm8, 0, %v655_v24 }
  0x7d   : > { %626 = vst [vmem:[#allocation2 + $0x60] sm:$0x1] %v625_v11  ;;  %v661_v17 = vld [vmem:[#allocation2 + $0x68] sm:$0x1]  ;;  %v664_v30 = vld [vmem:[#allocation2 + $0x74] sm:$0x1] }
  0x7e   : > { %629 = vst [vmem:[#allocation2 + $0x6c] sm:$0x1] %v628_v39  ;;  %v659_v62 = vsel %vm8695_vm8, 0, %v658_v36  ;;  %v667_v33 = vld [vmem:[#allocation2 + $0x80] sm:$0x1]  ;;  %v662_v32 = vsel %vm8695_vm8, 0, %v661_v17 }
  0x7f   : > { %632 = vst [vmem:[#allocation2 + $0x78] sm:$0x1] %v631_v18  ;;  %v670_v35 = vld [vmem:[#allocation2 + $0x8c] sm:$0x1]  ;;  %v665_v53 = vsel %vm8695_vm8, 0, %v664_v30  ;;  %v668_v25 = vsel %vm8695_vm8, 0, %v667_v33 }
  0x80   : > { %635 = vst [vmem:[#allocation2 + $0x84] sm:$0x1] %v634_v34  ;;  %v673_v23 = vld [vmem:[#allocation3] sm:$0x1]  ;;  %v676_v38 = vld [vmem:[#allocation3 + $0xc] sm:$0x1] }
  0x81   : > { %639 = vst [vmem:[#allocation2 + $0x8] sm:$0x1] %v638_v10  ;;  %v671_v13 = vsel %vm8695_vm8, 0, %v670_v35  ;;  %v679_v41 = vld [vmem:[#allocation3 + $0x18] sm:$0x1]  ;;  %v674_v44 = vsel %vm8428_vm4, 0, %v673_v23 }
  0x82   : > { %642 = vst [vmem:[#allocation2 + $0x14] sm:$0x1] %v641_v48  ;;  %v682_v45 = vld [vmem:[#allocation3 + $0x24] sm:$0x1]  ;;  %v677_v47 = vsel %vm8428_vm4, 0, %v676_v38  ;;  %v680_v27 = vsel %vm8428_vm4, 0, %v679_v41 }
  0x83   : > { %645 = vst [vmem:[#allocation2 + $0x20] sm:$0x1] %v644_v14  ;;  %v685_v20 = vld [vmem:[#allocation3 + $0x30] sm:$0x1]  ;;  %v688_v46 = vld [vmem:[#allocation3 + $0x3c] sm:$0x1] }
  0x84   : > { %648 = vst [vmem:[#allocation2 + $0x2c] sm:$0x1] %v647_v58  ;;  %v683_v50 = vsel %vm8428_vm4, 0, %v682_v45  ;;  %v691_v51 = vld [vmem:[#allocation3 + $0x48] sm:$0x1]  ;;  %v686_v52 = vsel %vm8428_vm4, 0, %v685_v20 }
  0x85   : > { %651 = vst [vmem:[#allocation2 + $0x38] sm:$0x1] %v650_v16  ;;  %v694_v55 = vld [vmem:[#allocation3 + $0x54] sm:$0x1]  ;;  %v689_v56 = vsel %vm8428_vm4, 0, %v688_v46  ;;  %v692_v11 = vsel %vm8428_vm4, 0, %v691_v51 }
  0x86   : > { %654 = vst [vmem:[#allocation2 + $0x44] sm:$0x1] %v653_v28  ;;  %v697_v60 = vld [vmem:[#allocation3 + $0x60] sm:$0x1]  ;;  %v700_v61 = vld [vmem:[#allocation3 + $0x6c] sm:$0x1] }
  0x87   : > { %657 = vst [vmem:[#allocation2 + $0x50] sm:$0x1] %v656_v31  ;;  %v695_v39 = vsel %vm8428_vm4, 0, %v694_v55  ;;  %v703_v63 = vld [vmem:[#allocation3 + $0x8] sm:$0x1]  ;;  %v698_v18 = vsel %vm8428_vm4, 0, %v697_v60 }
  0x88   : > { %660 = vst [vmem:[#allocation2 + $0x5c] sm:$0x1] %v659_v62  ;;  %v706_v8 = vld [vmem:[#allocation3 + $0x14] sm:$0x1]  ;;  %v701_v34 = vsel %vm8428_vm4, 0, %v700_v61  ;;  %v704_v10 = vsel %vm8695_vm8, 0, %v703_v63 }
  0x89   : > { %663 = vst [vmem:[#allocation2 + $0x68] sm:$0x1] %v662_v32  ;;  %v709_v9 = vld [vmem:[#allocation3 + $0x20] sm:$0x1]  ;;  %v712_v40 = vld [vmem:[#allocation3 + $0x2c] sm:$0x1] }
  0x8a   : > { %666 = vst [vmem:[#allocation2 + $0x74] sm:$0x1] %v665_v53  ;;  %v707_v48 = vsel %vm8695_vm8, 0, %v706_v8  ;;  %v715_v54 = vld [vmem:[#allocation3 + $0x38] sm:$0x1]  ;;  %v710_v14 = vsel %vm8695_vm8, 0, %v709_v9 }
  0x8b   : > { %669 = vst [vmem:[#allocation2 + $0x80] sm:$0x1] %v668_v25  ;;  %v718_v29 = vld [vmem:[#allocation3 + $0x44] sm:$0x1]  ;;  %v713_v58 = vsel %vm8695_vm8, 0, %v712_v40  ;;  %v716_v16 = vsel %vm8695_vm8, 0, %v715_v54 }
  0x8c   : > { %672 = vst [vmem:[#allocation2 + $0x8c] sm:$0x1] %v671_v13  ;;  %v721_v24 = vld [vmem:[#allocation3 + $0x50] sm:$0x1]  ;;  %v724_v36 = vld [vmem:[#allocation3 + $0x5c] sm:$0x1] }
  0x8d   : > { %675 = vst [vmem:[#allocation3] sm:$0x1] %v674_v44  ;;  %v719_v28 = vsel %vm8695_vm8, 0, %v718_v29  ;;  %v727_v17 = vld [vmem:[#allocation3 + $0x68] sm:$0x1]  ;;  %v722_v31 = vsel %vm8695_vm8, 0, %v721_v24 }
  0x8e   : > { %678 = vst [vmem:[#allocation3 + $0xc] sm:$0x1] %v677_v47  ;;  %v730_v30 = vld [vmem:[#allocation3 + $0x74] sm:$0x1]  ;;  %v725_v62 = vsel %vm8695_vm8, 0, %v724_v36  ;;  %v728_v33 = vsel %vm8695_vm8, 0, %v727_v17 }
  0x8f   : > { %681 = vst [vmem:[#allocation3 + $0x18] sm:$0x1] %v680_v27  ;;  %v731_v32 = vsel %vm8695_vm8, 0, %v730_v30 }
  0x90   : > { %684 = vst [vmem:[#allocation3 + $0x24] sm:$0x1] %v683_v50 }
  0x91   : > { %687 = vst [vmem:[#allocation3 + $0x30] sm:$0x1] %v686_v52 }
  0x92   : > { %690 = vst [vmem:[#allocation3 + $0x3c] sm:$0x1] %v689_v56 }
  0x93   : > { %693 = vst [vmem:[#allocation3 + $0x48] sm:$0x1] %v692_v11 }
  0x94   : > { %696 = vst [vmem:[#allocation3 + $0x54] sm:$0x1] %v695_v39 }
  0x95   : > { %699 = vst [vmem:[#allocation3 + $0x60] sm:$0x1] %v698_v18 }
  0x96   : > { %702 = vst [vmem:[#allocation3 + $0x6c] sm:$0x1] %v701_v34 }
  0x97   : > { %705 = vst [vmem:[#allocation3 + $0x8] sm:$0x1] %v704_v10 }
  0x98   : > { %708 = vst [vmem:[#allocation3 + $0x14] sm:$0x1] %v707_v48 }
  0x99   : > { %711 = vst [vmem:[#allocation3 + $0x20] sm:$0x1] %v710_v14 }
  0x9a   : > { %714 = vst [vmem:[#allocation3 + $0x2c] sm:$0x1] %v713_v58 }
  0x9b   : > { %717 = vst [vmem:[#allocation3 + $0x38] sm:$0x1] %v716_v16 }
  0x9c   : > { %720 = vst [vmem:[#allocation3 + $0x44] sm:$0x1] %v719_v28 }
  0x9d   : > { %723 = vst [vmem:[#allocation3 + $0x50] sm:$0x1] %v722_v31 }
  0x9e   : > { %726 = vst [vmem:[#allocation3 + $0x5c] sm:$0x1] %v725_v62 }
  0x9f   : > { %729 = vst [vmem:[#allocation3 + $0x68] sm:$0x1] %v728_v33 }
  0xa0   : > { %732 = vst [vmem:[#allocation3 + $0x74] sm:$0x1] %v731_v32 }
  0xa1   : > { %8153 = dma.done.wait [#allocation5], 512 }
  0xa2   : > { %8154 = vsyncadd [#allocation5], 4294966784 }
  0xa3   : > { %8155 = dma.done.wait [#allocation5 + $0x1], 512 }
  0xa4   : > { %8156 = vsyncadd [#allocation5 + $0x1], 4294966784  ;;  %p6749_p8 = scmp.le.s32.totalorder %s8179_s25, 0 }
  0xa6   : > { %742 = sbr.rel (%p6749_p8) target bundleno = 187 (0xbb), region = 64 }
  0xab   : > { %v743_v35 = vld [vmem:[#allocation4] sm:$0xff]  ;;  %v744_v53 = vld [vmem:[#allocation4 + $0x8] sm:$0xff]  ;;  %v745_v38 = vld [vmem:[#allocation4 + $0x10] sm:$0xff] }
  0xac   : > { %v747_v23 = vpack.c.bf16 %v743_v35, %v743_v35  ;;  %v748_v25 = vpack.c.bf16 %v744_v53, %v744_v53  ;;  %v749_v22 = vpack.c.bf16 %v745_v38, %v745_v38  ;;  %v746_v13 = vld [vmem:[#allocation4 + $0x18] sm:$0xff]  ;;  %v795_v55 = vld [vmem:[#allocation2 + $0x8] sm:$0x1]  ;;  %v798_v8 = vld [vmem:[#allocation2 + $0xc] sm:$0xf] }
  0xad   : > { %v750_v46 = vpack.c.bf16 %v746_v13, %v746_v13  ;;  %v791_v51 = vld [vmem:[#allocation2] sm:$0xf]  ;;  %v802_v14 = vld [vmem:[#allocation2 + $0x14] sm:$0x1] }
  0xae   : > { %v752_v41 = vshrl.u32 %v747_v23, 16  ;;  %v755_v44 = vshll.u32 %v747_v23, 16  ;;  %v760_v45 = vshrl.u32 %v748_v25, 16  ;;  %v763_v47 = vshll.u32 %v748_v25, 16 }
  0xaf   : > { %v769_v20 = vshrl.u32 %v749_v22, 16  ;;  %v772_v27 = vshll.u32 %v749_v22, 16  ;;  %v777_v60 = vshrl.u32 %v750_v46, 16  ;;  %v780_v11 = vshll.u32 %v750_v46, 16 }
  0xb0   : > { %v754_v50 = vrot.slane %v752_v41, 7  ;;  %v762_v52 = vrot.slane %v760_v45, 7 }
  0xb1   : > { %v771_v56 = vrot.slane %v769_v20, 7  ;;  %v779_v10 = vrot.slane %v777_v60, 7 }
  0xb2   : > { %v757_v61 = vor.u32 %v755_v44, %v754_v50  ;;  %v758_v39 = vrot.slane %v754_v50, 4  ;;  %v765_v63 = vor.u32 %v763_v47, %v762_v52  ;;  %v767_v18 = vrot.slane %v762_v52, 4 }
  0xb3   : > { %v774_v34 = vor.u32 %v772_v27, %v771_v56  ;;  %v775_v9 = vrot.slane %v771_v56, 4  ;;  %v782_v58 = vor.u32 %v780_v11, %v779_v10  ;;  %v784_v24 = vrot.slane %v779_v10, 4 }
  0xb4   : > { %v792_v40 = vsel %vm8440_vm5, %v757_v61, %v791_v51  ;;  %v766_v48 = vsel %vm8629_vm7, %v758_v39, %v765_v63  ;;  %v796_v54 = vsel %vm8428_vm4, %v767_v18, %v795_v55 }
  0xb5   : > { %793 = vst [vmem:[#allocation2] sm:$0xf] %v792_v40  ;;  %v799_v29 = vsel %vm8440_vm5, %v774_v34, %v798_v8  ;;  %v783_v16 = vsel %vm8629_vm7, %v775_v9, %v782_v58  ;;  %v803_v36 = vsel %vm8428_vm4, %v784_v24, %v802_v14 }
  0xb6   : > { %794 = vst [vmem:[#allocation2 + $0x4] sm:$0xf] %v766_v48 }
  0xb7   : > { %797 = vst [vmem:[#allocation2 + $0x8] sm:$0x1] %v796_v54 }
  0xb8   : > { %800 = vst [vmem:[#allocation2 + $0xc] sm:$0xf] %v799_v29 }
  0xb9   : > { %801 = vst [vmem:[#allocation2 + $0x10] sm:$0xf] %v783_v16 }
  0xba   : > { %804 = vst [vmem:[#allocation2 + $0x14] sm:$0x1] %v803_v36 }
  0xbb PF: > { %p6750_p1 = scmp.ne.s32.totalorder %s8179_s25, 0 }
  0xbd   : > { %808 = sbr.rel (%p6750_p1) target bundleno = 201 (0xc9), region = 68 }
  0xc2   : > { %v8201_v28 = vmov 0  }
  0xc3   : > { %809 = vst [vmem:[#allocation2] sm:$0xf] %v8201_v28 }
  0xc4   : > { %810 = vst [vmem:[#allocation2 + $0x4] sm:$0xf] %v8201_v28 }
  0xc5   : > { %811 = vst [vmem:[#allocation2 + $0x8] sm:$0x1] %v8201_v28 }
  0xc6   : > { %812 = vst [vmem:[#allocation2 + $0xc] sm:$0xf] %v8201_v28 }
  0xc7   : > { %813 = vst [vmem:[#allocation2 + $0x10] sm:$0xf] %v8201_v28 }
  0xc8   : > { %814 = vst [vmem:[#allocation2 + $0x14] sm:$0x1] %v8201_v28 }
  0xc9 PF: > { %p6751_p4 = scmp.ge.s32.totalorder %s8179_s25, 1 }
  0xcb   : > { %818 = sbr.rel (%p6751_p4) target bundleno = 224 (0xe0), region = 72 }
  0xd0   : > { %v819_v17 = vld [vmem:[#allocation4 + $0x20] sm:$0xff]  ;;  %v820_v31 = vld [vmem:[#allocation4 + $0x28] sm:$0xff]  ;;  %v821_v33 = vld [vmem:[#allocation4 + $0x30] sm:$0xff] }
  0xd1   : > { %v823_v30 = vpack.c.bf16 %v819_v17, %v819_v17  ;;  %v824_v62 = vpack.c.bf16 %v820_v31, %v820_v31  ;;  %v825_v32 = vpack.c.bf16 %v821_v33, %v821_v33  ;;  %v822_v35 = vld [vmem:[#allocation4 + $0x38] sm:$0xff]  ;;  %v868_v45 = vld [vmem:[#allocation2 + $0x78] sm:$0xf]  ;;  %v879_v34 = vld [vmem:[#allocation2 + $0x8c] sm:$0x1] }
  0xd2   : > { %v826_v41 = vpack.c.bf16 %v822_v35, %v822_v35  ;;  %v872_v20 = vld [vmem:[#allocation2 + $0x80] sm:$0x1]  ;;  %v875_v60 = vld [vmem:[#allocation2 + $0x84] sm:$0xf] }
  0xd3   : > { %v828_v53 = vshrl.u32 %v823_v30, 16  ;;  %v831_v23 = vshll.u32 %v823_v30, 16  ;;  %v836_v25 = vshrl.u32 %v824_v62, 16  ;;  %v839_v38 = vshll.u32 %v824_v62, 16 }
  0xd4   : > { %v845_v22 = vshrl.u32 %v825_v32, 16  ;;  %v848_v13 = vshll.u32 %v825_v32, 16  ;;  %v853_v46 = vshrl.u32 %v826_v41, 16  ;;  %v856_v50 = vshll.u32 %v826_v41, 16 }
  0xd5   : > { %v830_v44 = vrot.slane %v828_v53, 7  ;;  %v838_v47 = vrot.slane %v836_v25, 7 }
  0xd6   : > { %v847_v27 = vrot.slane %v845_v22, 7  ;;  %v855_v39 = vrot.slane %v853_v46, 7 }
  0xd7   : > { %v833_v51 = vor.u32 %v831_v23, %v830_v44  ;;  %v834_v52 = vrot.slane %v830_v44, 4  ;;  %v841_v55 = vor.u32 %v839_v38, %v838_v47  ;;  %v843_v56 = vrot.slane %v838_v47, 4 }
  0xd8   : > { %v850_v11 = vor.u32 %v848_v13, %v847_v27  ;;  %v851_v61 = vrot.slane %v847_v27, 4  ;;  %v858_v10 = vor.u32 %v856_v50, %v855_v39  ;;  %v860_v40 = vrot.slane %v855_v39, 4 }
  0xd9   : > { %v869_v63 = vsel %vm8440_vm5, %v833_v51, %v868_v45  ;;  %v842_v18 = vsel %vm8629_vm7, %v834_v52, %v841_v55  ;;  %v873_v8 = vsel %vm8428_vm4, %v843_v56, %v872_v20 }
  0xda   : > { %870 = vst [vmem:[#allocation2 + $0x78] sm:$0xf] %v869_v63  ;;  %v876_v9 = vsel %vm8440_vm5, %v850_v11, %v875_v60  ;;  %v859_v48 = vsel %vm8629_vm7, %v851_v61, %v858_v10  ;;  %v880_v54 = vsel %vm8428_vm4, %v860_v40, %v879_v34 }
  0xdb   : > { %871 = vst [vmem:[#allocation2 + $0x7c] sm:$0xf] %v842_v18 }
  0xdc   : > { %874 = vst [vmem:[#allocation2 + $0x80] sm:$0x1] %v873_v8 }
  0xdd   : > { %877 = vst [vmem:[#allocation2 + $0x84] sm:$0xf] %v876_v9 }
  0xde   : > { %878 = vst [vmem:[#allocation2 + $0x88] sm:$0xf] %v859_v48 }
  0xdf   : > { %881 = vst [vmem:[#allocation2 + $0x8c] sm:$0x1] %v880_v54 }
  0xe0 PF: > { %p6752_p10 = scmp.ne.s32.totalorder %s8179_s25, 1 }
  0xe2   : > { %885 = sbr.rel (%p6752_p10) target bundleno = 238 (0xee), region = 76 }
  0xe7   : > { %v8202_v14 = vmov 0  }
  0xe8   : > { %887 = vst [vmem:[#allocation2 + $0x78] sm:$0xf] %v8202_v14 }
  0xe9   : > { %888 = vst [vmem:[#allocation2 + $0x7c] sm:$0xf] %v8202_v14 }
  0xea   : > { %889 = vst [vmem:[#allocation2 + $0x80] sm:$0x1] %v8202_v14 }
  0xeb   : > { %890 = vst [vmem:[#allocation2 + $0x84] sm:$0xf] %v8202_v14 }
  0xec   : > { %891 = vst [vmem:[#allocation2 + $0x88] sm:$0xf] %v8202_v14 }
  0xed   : > { %892 = vst [vmem:[#allocation2 + $0x8c] sm:$0x1] %v8202_v14 }
  0xee PF: > { %v7636_v29 = vld [vmem:[#allocation9 + $0x78] sm:$0xff]  ;;  %v7635_v24 = vld [vmem:[#allocation9 + $0x70] sm:$0xff]  ;;  %v7634_v17 = vld [vmem:[#allocation9 + $0x68] sm:$0xff]  ;;  %vm939_vm9 = vsmask.f32 3328  ;;  %vm1542_vm12 = vcmask 1042432  }
  0xef   : > { %v7628_v58 = vld [vmem:[#allocation9 + $0x38] sm:$0xff]  ;;  %1286 = vmatpush.bf16.msra.mxu0 %v7636_v29  ;;  %v7627_v16 = vld [vmem:[#allocation9 + $0x30] sm:$0xff]  ;;  %v7626_v31 = vld [vmem:[#allocation9 + $0x28] sm:$0xff]  ;;  %vm940_vm10 = vsmask.f32 7440  ;;  %vm1543_vm13 = vcmask 1046532  }
  0xf0   : > { %1453 = vmatpush.bf16.msra.mxu1 %v7628_v58  ;;  %7810 = vmatpush.bf16.msra.mxu3 %v7628_v58  ;;  %v893_v36 = vld [vmem:[#allocation2] sm:$0xf]  ;;  %v8805_v28 = vld [vmem:[#allocation2 + $0x4] sm:$0xf]  ;;  %v7633_v53 = vld [vmem:[#allocation9 + $0x60] sm:$0xff]  ;;  %s10275_s9 = sld [smem:[#allocation54_spill]] }
  0xf1   : > { %v943_v30 = vshrl.u32 %v893_v36, 16  ;;  %v946_v62 = vshll.u32 %v893_v36, 16  ;;  %v952_v33 = vshll.u32 %v8805_v28, 16  ;;  %v956_v32 = vshrl.u32 %v8805_v28, 16  ;;  %v8809_v35 = vld [vmem:[#allocation9 + $0xb8] sm:$0xff]  ;;  %v7625_v23 = vld [vmem:[#allocation9 + $0x20] sm:$0xff]  ;;  %vm8819_vm11 = vmor %vm939_vm9, %vm940_vm10 }
  0xf2   : > { %7818 = vmatpush.bf16.msra.mxu2 %v8809_v35  ;;  %v8812_v41 = vld [vmem:[#allocation2 + $0x8] sm:$0x1]  ;;  %v7632_v44 = vld [vmem:[#allocation9 + $0x58] sm:$0xff]  ;;  %v895_v46 = vld [vmem:[#allocation2 + $0xc] sm:$0xf] }
  0xf3   : > { %1287 = vmatpush.bf16.msra.mxu0 %v7635_v24  ;;  %v945_v25 = vrot.slane %v943_v30, 4  ;;  %v948_v38 = vrot.slane %v946_v62, 5  ;;  %v954_v22 = vrot.slane %v952_v33, 5  ;;  %v958_v13 = vrot.slane %v956_v32, 4  ;;  %v7624_v45 = vld [vmem:[#allocation9 + $0x18] sm:$0xff]  ;;  %v8817_v51 = vld [vmem:[#allocation9 + $0xb0] sm:$0xff]  ;;  %vm8859_vm14 = vmor %vm1542_vm12, %vm1543_vm13 }
  0xf4   : > { %1454 = vmatpush.bf16.msra.mxu1 %v7627_v16  ;;  %7811 = vmatpush.bf16.msra.mxu3 %v7627_v16  ;;  %v962_v27 = vshll.u32 %v8812_v41, 16  ;;  %v8815_v50 = vld [vmem:[#allocation2 + $0x10] sm:$0xf]  ;;  %v7631_v52 = vld [vmem:[#allocation9 + $0x50] sm:$0xff]  ;;  %v967_v39 = vshrl.u32 %v895_v46, 16  ;;  %v970_v63 = vshll.u32 %v895_v46, 16 }
  0xf5   : > { %v949_v47 = vor.u32 %v948_v38, %v945_v25  ;;  %v959_v20 = vor.u32 %v958_v13, %v954_v22  ;;  %v7623_v55 = vld [vmem:[#allocation9 + $0x10] sm:$0xff]  ;;  %v8824_v18 = vld [vmem:[#allocation9 + $0xa8] sm:$0xff]  ;;  %v976_v8 = vshll.u32 %v8815_v50, 16  ;;  %v980_v34 = vshrl.u32 %v8815_v50, 16  ;;  %v8833_v29 = vld [vmem:[#allocation9 + $0xa0] sm:$0xff] }
  0xf6   : > { %v964_v11 = vrot.slane %v962_v27, 5  ;;  %7819 = vmatpush.bf16.msra.mxu2 %v8817_v51  ;;  %v7630_v9 = vld [vmem:[#allocation9 + $0x48] sm:$0xff]  ;;  %v969_v54 = vrot.slane %v967_v39, 4  ;;  %v972_v14 = vrot.slane %v970_v63, 5  ;;  %v7621_v30 = vld [vmem:[#allocation9] sm:$0xff]  ;;  %v7611_v38 = vld [vmem:[#allocation2] sm:$0xff] }
  0xf7   : > { %1288 = vmatpush.bf16.msra.mxu0 %v7634_v17  ;;  %v950_v56 = vrot.slane %v949_v47, 4  ;;  %v960_v60 = vrot.slane %v959_v20, 4  ;;  %v7622_v10 = vld [vmem:[#allocation9 + $0x8] sm:$0xff]  ;;  %v978_v58 = vrot.slane %v976_v8, 5  ;;  %v982_v24 = vrot.slane %v980_v34, 4  ;;  %v7661_v47 = vld [vmem:[#allocation9 + $0xf0] sm:$0xff] }
  0xf8   : > { %1455 = vmatpush.bf16.msra.mxu1 %v7626_v31  ;;  %7812 = vmatpush.bf16.msra.mxu3 %v7626_v31  ;;  %v8835_v17 = vld [vmem:[#allocation2 + $0x14] sm:$0x1]  ;;  %v7629_v31 = vld [vmem:[#allocation9 + $0x40] sm:$0xff]  ;;  %v973_v62 = vor.u32 %v972_v14, %v969_v54  ;;  %v897_v20 = vld [vmem:[#allocation2 + $0x18] sm:$0xf] }
  0xf9   : > { %v955_v40 = vsel %vm8819_vm11, %v950_v56, %v954_v22  ;;  %v965_v48 = vsel %vm8819_vm11, %v960_v60, %v964_v11  ;;  %v983_v33 = vor.u32 %v982_v24, %v978_v58  ;;  %v986_v32 = vshll.u32 %v8835_v17, 16  ;;  %v7618_v22 = vld [vmem:[#allocation2 + $0x54] sm:$0xff]  ;;  %v8845_v46 = vld [vmem:[#allocation2 + $0x1c] sm:$0xf]  ;;  %v8852_v56 = vld [vmem:[#allocation2 + $0x2c] sm:$0x1] }
  0xfa   : > { %7820 = vmatpush.bf16.msra.mxu2 %v8824_v18  ;;  %v1198_v16 = vunpack.c.l.b16 %v955_v40  ;;  %v1199_v36 = vunpack.c.l.b16 %v965_v48  ;;  %v974_v13 = vrot.slane %v973_v62, 4  ;;  %v8843_v27 = vld [vmem:[#allocation9 + $0x90] sm:$0xff]  ;;  %v991_v11 = vshrl.u32 %v897_v20, 16  ;;  %v8857_v39 = vld [vmem:[#allocation9 + $0x88] sm:$0xff]  ;;  %v1515_v63 = vld [vmem:[#allocation2 + $0x24] sm:$0xe] }
  0xfb   : > { %1289 = vmatpush.bf16.msra.mxu0 %v7633_v53  ;;  %v7662_v53 = vld [vmem:[#allocation9 + $0xf8] sm:$0xff]  ;;  %v1571_v34 = vrot.slane %v8852_v56, 5  ;;  %v1004_v40 = vshrl.u32 %v8845_v46, 16  ;;  %v6860_v48 = vrot.slane %v1515_v63, 9 }
  0xfc   : > { %1456 = vmatpush.bf16.msra.mxu1 %v7625_v23  ;;  %7813 = vmatpush.bf16.msra.mxu3 %v7625_v23  ;;  %v8839_v23 = vld [vmem:[#allocation9 + $0x98] sm:$0xff]  ;;  %v1218_v25 = vpack.c.b16 %v1199_v36, %v1198_v16  ;;  %v7659_v16 = vld [vmem:[#allocation9 + $0xe0] sm:$0xff]  ;;  %v993_v36 = vrot.slane %v991_v11, 4 }
  0xfd   : > { %v899_v63 = vld [vmem:[#allocation2 + $0x24] sm:$0xf]  ;;  %v2993_v59 = vld [vmem:[#allocation2 + $0x20] sm:$0x1] }
  0xfe   : > { %7821 = vmatpush.bf16.msra.mxu2 %v8833_v29  ;;  %v3041_v37 = vshll.u32 %v2993_v59, 16  ;;  %v2028_v3 = vld [vmem:[#allocation2 + $0x24] sm:$0xf] }
  0xff   : > { %1290 = vmatpush.bf16.msra.mxu0 %v7632_v44  ;;  %v984_v44 = vrot.slane %v983_v33, 4 }
 0x100   : > { %1457 = vmatpush.bf16.msra.mxu1 %v7624_v45  ;;  %7814 = vmatpush.bf16.msra.mxu3 %v7624_v45  ;;  %v988_v45 = vrot.slane %v986_v32, 5 }
 0x102   : > { %7822 = vmatpush.bf16.msra.mxu2 %v8839_v23  ;;  %v989_v60 = vsel %vm8819_vm11, %v984_v44, %v988_v45  ;;  %v7612_v44 = vld [vmem:[#allocation2 + $0xc] sm:$0xff] }
 0x103   : > { %1291 = vmatpush.bf16.msra.mxu0 %v7631_v52  ;;  %v7660_v52 = vld [vmem:[#allocation9 + $0xe8] sm:$0xff]  ;;  %v1201_v24 = vunpack.c.l.b16 %v989_v60 }
 0x104   : > { %1458 = vmatpush.bf16.msra.mxu1 %v7623_v55  ;;  %7815 = vmatpush.bf16.msra.mxu3 %v7623_v55  ;;  %v8850_v55 = vld [vmem:[#allocation2 + $0x28] sm:$0xf] }
 0x106   : > { %7823 = vmatpush.bf16.msra.mxu2 %v8843_v27 }
 0x107   : > { %1292 = vmatpush.bf16.msra.mxu0 %v7630_v9  ;;  %v994_v9 = vshll.u32 %v897_v20, 16 }
 0x108   : > { %1459 = vmatpush.bf16.msra.mxu1 %v7622_v10  ;;  %7816 = vmatpush.bf16.msra.mxu3 %v7622_v10  ;;  %v1000_v10 = vshll.u32 %v8845_v46, 16 }
 0x109   : > { %v996_v33 = vrot.slane %v994_v9, 5  ;;  %v1516_v9 = vld [vmem:[#allocation2 + $0x30] sm:$0xe] }
 0x10a   : > { %7824 = vmatpush.bf16.msra.mxu2 %v8857_v39  ;;  %v1002_v32 = vrot.slane %v1000_v10, 5  ;;  %v1024_v10 = vshll.u32 %v8850_v55, 16 }
 0x10b   : > { %1293 = vmatpush.bf16.msra.mxu0 %v7629_v31  ;;  %v7637_v31 = vld [vmem:[#allocation9 + $0x80] sm:$0xff]  ;;  %v997_v45 = vor.u32 %v996_v33, %v993_v36 }
 0x10c   : > { %1460 = vmatpush.bf16.msra.mxu1 %v7621_v30  ;;  %7817 = vmatpush.bf16.msra.mxu3 %v7621_v30  ;;  %v1026_v33 = vrot.slane %v1024_v10, 5  ;;  %v904_v10 = vld [vmem:[#allocation2 + $0x40] sm:$0xf] }
 0x10d   : > { %v998_v60 = vrot.slane %v997_v45, 4 }
 0x10e   : > { %1294 = vmatmul.bf16.vlgmr.msra.gmra.mxu0 %v1218_v25  ;;  %7825 = vmatpush.bf16.msra.mxu2 %v7637_v31 }
 0x10f   : > { %1719 = vmatpush.bf16.msrb.mxu0 %v8809_v35  ;;  %1461 = vmatmul.bf16.vlgmr.msra.gmra.mxu1 %v7611_v38  ;;  %v979_v35 = vsel %vm8819_vm11, %v974_v13, %v978_v58  ;;  %v8873_v38 = vld [vmem:[#allocation2 + $0x20] sm:$0x1] }
 0x110   : > { %1943 = vmatpush.bf16.msrb.mxu3 %v7662_v53  ;;  %v1200_v14 = vunpack.c.l.b16 %v979_v35  ;;  %v1006_v53 = vrot.slane %v1004_v40, 4  ;;  %v1010_v20 = vshll.u32 %v8873_v38, 16  ;;  %v7619_v35 = vld [vmem:[#allocation2 + $0x60] sm:$0xff]  ;;  %v6861_v40 = vrot.slane %v1516_v9, 9  ;;  %v901_v9 = vld [vmem:[#allocation2 + $0x30] sm:$0xf] }
 0x111   : > { %1496 = vmatmul.bf16.vlgmr.msra.gmra.mxu3 %v7618_v22  ;;  %v7658_v22 = vld [vmem:[#allocation9 + $0xd8] sm:$0xff] }
 0x112   : > { %v1219_v13 = vpack.c.b16 %v1201_v24, %v1200_v14  ;;  %v1015_v14 = vshrl.u32 %v899_v63, 16  ;;  %v1028_v24 = vshrl.u32 %v8850_v55, 16 }
 0x113   : > { %1720 = vmatpush.bf16.msrb.mxu0 %v8817_v51  ;;  %v1568_v51 = vrot.slane %v8850_v55, 5 }
 0x114   : > { %1944 = vmatpush.bf16.msrb.mxu3 %v7661_v47  ;;  %v1007_v47 = vor.u32 %v1006_v53, %v1002_v32  ;;  %v1017_v55 = vrot.slane %v1015_v14, 4 }
 0x115   : > { %v1570_v54 = vrot.slane %v1568_v51, 4  ;;  %v1569_v58 = vsel %vm8859_vm14, %v6860_v48, %v1568_v51  ;;  %v8878_v51 = vld [vmem:[#allocation2 + $0x34] sm:$0xf] }
 0x116   : > { %v1637_v62 = vunpack.c.l.b16 %v1569_v58  ;;  %v1008_v11 = vrot.slane %v1007_v47, 4  ;;  %v1575_v48 = vrot.slane %v8878_v51, 5  ;;  %v1018_v58 = vshll.u32 %v899_v63, 16 }
 0x117   : > { %1721 = vmatpush.bf16.msrb.mxu0 %v8824_v18  ;;  %v1572_v30 = vsel %vm8859_vm14, %v1570_v54, %v1571_v34  ;;  %v8880_v34 = vld [vmem:[#allocation2 + $0x38] sm:$0x1]  ;;  %v7656_v54 = vld [vmem:[#allocation9 + $0xc8] sm:$0xff] }
 0x118   : > { %1945 = vmatpush.bf16.msrb.mxu3 %v7660_v52  ;;  %v1638_v25 = vunpack.c.l.b16 %v1572_v30  ;;  %v7657_v52 = vld [vmem:[#allocation9 + $0xd0] sm:$0xff]  ;;  %v1577_v36 = vrot.slane %v1575_v48, 4  ;;  %v1003_v30 = vsel %vm8819_vm11, %v998_v60, %v1002_v32 }
 0x119   : > { %v7613_v60 = vld [vmem:[#allocation2 + $0x18] sm:$0xff] }
 0x11a   : > { %v1654_v18 = vpack.c.b16 %v1638_v25, %v1637_v62  ;;  %v7655_v25 = vld [vmem:[#allocation9 + $0xc0] sm:$0xff] }
 0x11b   : > { %1722 = vmatpush.bf16.msrb.mxu0 %v8833_v29  ;;  %v1012_v29 = vrot.slane %v1010_v20, 5 }
 0x11c   : > { %1946 = vmatpush.bf16.msrb.mxu3 %v7659_v16  ;;  %1742 = vmatmul.bf16.vlgmr.msra.gmra.mxu2 %v1654_v18  ;;  %v1576_v16 = vsel %vm8859_vm14, %v6861_v40, %v1575_v48  ;;  %v1020_v18 = vrot.slane %v1018_v58, 5  ;;  %v8897_v40 = vld [vmem:[#allocation2 + $0x44] sm:$0x1]  ;;  %v1039_v58 = vshrl.u32 %v901_v9, 16 }
 0x11d   : > { %v1013_v62 = vsel %vm8819_vm11, %v1008_v11, %v1012_v29  ;;  %v1639_v53 = vunpack.c.l.b16 %v1576_v16  ;;  %v7620_v11 = vld [vmem:[#allocation2 + $0x6c] sm:$0xff]  ;;  %v1042_v16 = vshll.u32 %v901_v9, 16 }
 0x11e   : > { %1299 = vmatmul.bf16.gmra.mxu0 %v1219_v13  ;;  %v1203_v45 = vunpack.c.l.b16 %v1013_v62  ;;  %v1021_v32 = vor.u32 %v1020_v18, %v1017_v55  ;;  %v1041_v18 = vrot.slane %v1039_v58, 4  ;;  %v8911_v9 = vld [vmem:[#allocation2 + $0x50] sm:$0x1]  ;;  %v1076_v58 = vshrl.u32 %v904_v10, 16 }
 0x11f   : > { %1723 = vmatpush.bf16.msrb.mxu0 %v8839_v23  ;;  %1466 = vmatmul.bf16.gmra.mxu1 %v7612_v44  ;;  %v1578_v23 = vrot.slane %v8880_v34, 5  ;;  %v1202_v44 = vunpack.c.l.b16 %v1003_v30 }
 0x120   : > { %1947 = vmatpush.bf16.msrb.mxu3 %v7658_v22  ;;  %v1030_v22 = vrot.slane %v1028_v24, 4  ;;  %v1048_v24 = vshll.u32 %v8878_v51, 16 }
 0x121   : > { %1501 = vmatmul.bf16.gmra.mxu3 %v7619_v35  ;;  %v1034_v35 = vshll.u32 %v8852_v56, 16 }
 0x122   : > { %v1031_v20 = vor.u32 %v1030_v22, %v1026_v33  ;;  %v1044_v22 = vrot.slane %v1042_v16, 5 }
 0x123   : > { %1724 = vmatpush.bf16.msrb.mxu0 %v8843_v27  ;;  %v1579_v27 = vsel %vm8859_vm14, %v1577_v36, %v1578_v23  ;;  %v1036_v63 = vrot.slane %v1034_v35, 5  ;;  %v1582_v23 = vrot.slane %v904_v10, 5  ;;  %v1052_v36 = vshrl.u32 %v8878_v51, 16 }
 0x124   : > { %1948 = vmatpush.bf16.msrb.mxu3 %v7657_v52  ;;  %v1640_v13 = vunpack.c.l.b16 %v1579_v27  ;;  %v1220_v52 = vpack.c.b16 %v1203_v45, %v1202_v44  ;;  %v1032_v29 = vrot.slane %v1031_v20, 4  ;;  %v1045_v20 = vor.u32 %v1044_v22, %v1041_v18 }
 0x125   : > { %v1584_v62 = vrot.slane %v1582_v23, 4  ;;  %v1054_v44 = vrot.slane %v1052_v36, 4  ;;  %v1058_v35 = vshll.u32 %v8880_v34, 16 }
 0x126   : > { %v1655_v47 = vpack.c.b16 %v1640_v13, %v1639_v53  ;;  %v1037_v14 = vsel %vm8819_vm11, %v1032_v29, %v1036_v63  ;;  %v1050_v13 = vrot.slane %v1048_v24, 5  ;;  %v903_v29 = vld [vmem:[#allocation2 + $0x3c] sm:$0xf]  ;;  %v906_v63 = vld [vmem:[#allocation2 + $0x4c] sm:$0xf] }
 0x127   : > { %1725 = vmatpush.bf16.msrb.mxu0 %v8857_v39  ;;  %v1022_v39 = vrot.slane %v1021_v32, 4  ;;  %v1205_v55 = vunpack.c.l.b16 %v1037_v14  ;;  %v7614_v32 = vld [vmem:[#allocation2 + $0x24] sm:$0xff]  ;;  %v1063_v14 = vshrl.u32 %v903_v29, 16  ;;  %v1066_v34 = vshll.u32 %v903_v29, 16  ;;  %v8923_v29 = vld [vmem:[#allocation2 + $0x5c] sm:$0x1] }
 0x128   : > { %1949 = vmatpush.bf16.msrb.mxu3 %v7656_v54  ;;  %v1585_v54 = vrot.slane %v8897_v40, 5  ;;  %v1055_v51 = vor.u32 %v1054_v44, %v1050_v13 }
 0x129   : > { %v1027_v56 = vsel %vm8819_vm11, %v1022_v39, %v1026_v33  ;;  %v1060_v39 = vrot.slane %v1058_v35, 5 }
 0x12a   : > { %v1586_v27 = vsel %vm8859_vm14, %v1584_v62, %v1585_v54  ;;  %v1589_v54 = vrot.slane %v906_v63, 5 }
 0x12b   : > { %1726 = vmatpush.bf16.msrb.mxu0 %v7637_v31  ;;  %v1517_v31 = vld [vmem:[#allocation2 + $0x3c] sm:$0xe]  ;;  %v1642_v33 = vunpack.c.l.b16 %v1586_v27 }
 0x12c   : > { %1950 = vmatpush.bf16.msrb.mxu3 %v7655_v25  ;;  %1747 = vmatmul.bf16.gmra.mxu2 %v1655_v47  ;;  %v6862_v48 = vrot.slane %v1517_v31, 9  ;;  %v1204_v25 = vunpack.c.l.b16 %v1027_v56  ;;  %v1518_v31 = vld [vmem:[#allocation2 + $0x48] sm:$0xe]  ;;  %v1592_v56 = vrot.slane %v8911_v9, 5  ;;  %v1591_v16 = vrot.slane %v1589_v54, 4 }
 0x12e   : > { %1304 = vmatmul.bf16.gmra.mxu0 %v1220_v52  ;;  %v1583_v30 = vsel %vm8859_vm14, %v6862_v48, %v1582_v23  ;;  %v1221_v47 = vpack.c.b16 %v1205_v55, %v1204_v25  ;;  %v7645_v52 = vld [vmem:[#allocation2 + $0xc] sm:$0xff]  ;;  %v1072_v48 = vshll.u32 %v904_v10, 16  ;;  %v6863_v23 = vrot.slane %v1518_v31, 9  ;;  %v1519_v31 = vld [vmem:[#allocation2 + $0x54] sm:$0xe] }
 0x12f   : > { %1471 = vmatmul.bf16.gmra.mxu1 %v7613_v60  ;;  %v1641_v53 = vunpack.c.l.b16 %v1583_v30  ;;  %v1046_v60 = vrot.slane %v1045_v20, 4  ;;  %v1593_v27 = vsel %vm8859_vm14, %v1591_v16, %v1592_v56  ;;  %v1065_v25 = vrot.slane %v1063_v14, 4  ;;  %v7615_v20 = vld [vmem:[#allocation2 + $0x30] sm:$0xff] }
 0x130   : > { %v1590_v24 = vsel %vm8859_vm14, %v6863_v23, %v1589_v54  ;;  %v1074_v62 = vrot.slane %v1072_v48, 5  ;;  %v1068_v55 = vrot.slane %v1066_v34, 5  ;;  %v1644_v18 = vunpack.c.l.b16 %v1593_v27 }
 0x131   : > { %1506 = vmatmul.bf16.gmra.mxu3 %v7620_v11  ;;  %v1656_v45 = vpack.c.b16 %v1642_v33, %v1641_v53  ;;  %v1056_v11 = vrot.slane %v1055_v51, 4  ;;  %v1051_v36 = vsel %vm8819_vm11, %v1046_v60, %v1050_v13  ;;  %v1643_v53 = vunpack.c.l.b16 %v1590_v24  ;;  %v7646_v51 = vld [vmem:[#allocation2 + $0x18] sm:$0xff] }
 0x132   : > { %v1078_v33 = vrot.slane %v1076_v58, 4  ;;  %v1206_v10 = vunpack.c.l.b16 %v1051_v36  ;;  %v6864_v48 = vrot.slane %v1519_v31, 9  ;;  %v1599_v54 = vrot.slane %v8923_v29, 5  ;;  %v1520_v31 = vld [vmem:[#allocation2 + $0x60] sm:$0xe] }
 0x133   : > { %v1061_v30 = vsel %vm8819_vm11, %v1056_v11, %v1060_v39  ;;  %v1657_v44 = vpack.c.b16 %v1644_v18, %v1643_v53  ;;  %v905_v11 = vld [vmem:[#allocation2 + $0x48] sm:$0xf]  ;;  %v908_v39 = vld [vmem:[#allocation2 + $0x58] sm:$0xf]  ;;  %v1096_v34 = vshll.u32 %v906_v63, 16  ;;  %v1100_v24 = vshrl.u32 %v906_v63, 16 }
 0x134   : > { %v1207_v22 = vunpack.c.l.b16 %v1061_v30  ;;  %v1596_v23 = vrot.slane %v908_v39, 5  ;;  %v1087_v14 = vshrl.u32 %v905_v11, 16  ;;  %v1090_v58 = vshll.u32 %v905_v11, 16  ;;  %v8935_v11 = vld [vmem:[#allocation2 + $0x68] sm:$0x1] }
 0x135   : > { %v1098_v18 = vrot.slane %v1096_v34, 5 }
 0x136   : > { %v1222_v13 = vpack.c.b16 %v1207_v22, %v1206_v10  ;;  %v1597_v16 = vsel %vm8859_vm14, %v6864_v48, %v1596_v23  ;;  %v1598_v36 = vrot.slane %v1596_v23, 4  ;;  %v1102_v10 = vrot.slane %v1100_v24, 4 }
 0x137   : > { %v1645_v27 = vunpack.c.l.b16 %v1597_v16  ;;  %v6865_v48 = vrot.slane %v1520_v31, 9 }
 0x138   : > { %v1600_v30 = vsel %vm8859_vm14, %v1598_v36, %v1599_v54  ;;  %v1103_v63 = vor.u32 %v1102_v10, %v1098_v18  ;;  %v1606_v54 = vrot.slane %v8935_v11, 5 }
 0x13c   : > { %1752 = vmatmul.bf16.gmra.mxu2 %v1656_v45  ;;  %v1069_v45 = vor.u32 %v1068_v55, %v1065_v25  ;;  %v1646_v55 = vunpack.c.l.b16 %v1600_v30 }
 0x13e   : > { %1309 = vmatmul.bf16.gmra.mxu0 %v1221_v47  ;;  %v1079_v47 = vor.u32 %v1078_v33, %v1074_v62  ;;  %v1070_v35 = vrot.slane %v1069_v45, 4  ;;  %v1089_v33 = vrot.slane %v1087_v14, 4  ;;  %v1658_v22 = vpack.c.b16 %v1646_v55, %v1645_v27  ;;  %v7616_v45 = vld [vmem:[#allocation2 + $0x3c] sm:$0xff] }
 0x13f   : > { %1476 = vmatmul.bf16.gmra.mxu1 %v7614_v32  ;;  %v1082_v32 = vshll.u32 %v8897_v40, 16  ;;  %v1124_v14 = vshrl.u32 %v908_v39, 16 }
 0x140   : > { %v1075_v40 = vsel %vm8819_vm11, %v1070_v35, %v1074_v62  ;;  %v1092_v62 = vrot.slane %v1090_v58, 5 }
 0x141   : > { %1951 = vmatmul.bf16.vlgmr.msrb.gmra.mxu3 %v7645_v52  ;;  %v1080_v52 = vrot.slane %v1079_v47, 4  ;;  %v1084_v60 = vrot.slane %v1082_v32, 5  ;;  %v1208_v53 = vunpack.c.l.b16 %v1075_v40  ;;  %v1106_v32 = vshll.u32 %v8911_v9, 16 }
 0x142   : > { %v1093_v47 = vor.u32 %v1092_v62, %v1089_v33  ;;  %v1120_v9 = vshll.u32 %v908_v39, 16  ;;  %v1126_v62 = vrot.slane %v1124_v14, 4 }
 0x143   : > { %v1085_v56 = vsel %vm8819_vm11, %v1080_v52, %v1084_v60  ;;  %v1108_v35 = vrot.slane %v1106_v32, 5  ;;  %v907_v52 = vld [vmem:[#allocation2 + $0x54] sm:$0xf]  ;;  %v910_v60 = vld [vmem:[#allocation2 + $0x64] sm:$0xf] }
 0x144   : > { %v1209_v25 = vunpack.c.l.b16 %v1085_v56  ;;  %v1603_v23 = vrot.slane %v910_v60, 5  ;;  %v1111_v40 = vshrl.u32 %v907_v52, 16  ;;  %v1114_v56 = vshll.u32 %v907_v52, 16 }
 0x145   : > { %v1122_v39 = vrot.slane %v1120_v9, 5  ;;  %v1521_v9 = vld [vmem:[#allocation2 + $0x6c] sm:$0xe] }
 0x146   : > { %v1604_v34 = vsel %vm8859_vm14, %v6865_v48, %v1603_v23  ;;  %v1605_v58 = vrot.slane %v1603_v23, 4  ;;  %v1113_v27 = vrot.slane %v1111_v40, 4  ;;  %v912_v48 = vld [vmem:[#allocation2 + $0x70] sm:$0xf]  ;;  %v6866_v14 = vrot.slane %v1521_v9, 9 }
 0x147   : > { %v1647_v30 = vunpack.c.l.b16 %v1604_v34  ;;  %v1610_v40 = vrot.slane %v912_v48, 5 }
 0x148   : > { %v1607_v36 = vsel %vm8859_vm14, %v1605_v58, %v1606_v54  ;;  %v1144_v54 = vshll.u32 %v910_v60, 16 }
 0x149   : > { %v1612_v34 = vrot.slane %v1610_v40, 4 }
 0x14c   : > { %1757 = vmatmul.bf16.gmra.mxu2 %v1657_v44  ;;  %v1223_v44 = vpack.c.b16 %v1209_v25, %v1208_v53  ;;  %v1116_v53 = vrot.slane %v1114_v56, 5  ;;  %v1648_v25 = vunpack.c.l.b16 %v1607_v36  ;;  %v938_v56 = vld [vmem:[#allocation2 + $0x74] sm:$0x1] }
 0x14d   : > { %v1613_v58 = vrot.slane %v938_v56, 5 }
 0x14e   : > { %1314 = vmatmul.bf16.gmra.mxu0 %v1222_v13  ;;  %v7647_v13 = vld [vmem:[#allocation2 + $0x24] sm:$0xff]  ;;  %v1659_v10 = vpack.c.b16 %v1648_v25, %v1647_v30  ;;  %v1611_v25 = vsel %vm8859_vm14, %v6866_v14, %v1610_v40 }
 0x14f   : > { %1481 = vmatmul.bf16.gmra.mxu1 %v7615_v20  ;;  %v1094_v20 = vrot.slane %v1093_v47, 4  ;;  %v1127_v47 = vor.u32 %v1126_v62, %v1122_v39 }
 0x151   : > { %1956 = vmatmul.bf16.gmra.mxu3 %v7646_v51  ;;  %v1104_v51 = vrot.slane %v1103_v63, 4  ;;  %v1099_v24 = vsel %vm8819_vm11, %v1094_v20, %v1098_v18  ;;  %v1130_v18 = vshll.u32 %v8923_v29, 16  ;;  %v7648_v63 = vld [vmem:[#allocation2 + $0x30] sm:$0xff]  ;;  %v1148_v29 = vshrl.u32 %v910_v60, 16 }
 0x152   : > { %v1210_v55 = vunpack.c.l.b16 %v1099_v24 }
 0x153   : > { %v1109_v16 = vsel %vm8819_vm11, %v1104_v51, %v1108_v35  ;;  %v1132_v20 = vrot.slane %v1130_v18, 5  ;;  %v909_v51 = vld [vmem:[#allocation2 + $0x60] sm:$0xf] }
 0x154   : > { %v1211_v33 = vunpack.c.l.b16 %v1109_v16  ;;  %v1135_v52 = vshrl.u32 %v909_v51, 16  ;;  %v1138_v31 = vshll.u32 %v909_v51, 16 }
 0x156   : > { %v1137_v36 = vrot.slane %v1135_v52, 4  ;;  %v1140_v30 = vrot.slane %v1138_v31, 5  ;;  %v1168_v52 = vshll.u32 %v912_v48, 16  ;;  %v1172_v31 = vshrl.u32 %v912_v48, 16 }
 0x158   : > { %v1170_v40 = vrot.slane %v1168_v52, 5  ;;  %v1174_v9 = vrot.slane %v1172_v31, 4  ;;  %v7696_v52 = vld [vmem:[#allocation9 + $0x1b8] sm:$0xff] }
 0x159   : > { %2912 = vmatpush.bf16.msrb.mxu2 %v7696_v52  ;;  %v7704_v31 = vld [vmem:[#allocation9 + $0x1f8] sm:$0xff]  ;;  %v7665_v52 = vld [vmem:[#allocation9 + $0x110] sm:$0xff] }
 0x15a   : > { %3365 = vmatpush.bf16.msra.mxu3 %v7704_v31  ;;  %v7675_v31 = vld [vmem:[#allocation9 + $0x160] sm:$0xff] }
 0x15c   : > { %1762 = vmatmul.bf16.gmra.mxu2 %v1658_v22  ;;  %v1117_v22 = vor.u32 %v1116_v53, %v1113_v27  ;;  %v1146_v27 = vrot.slane %v1144_v54, 5  ;;  %v1150_v53 = vrot.slane %v1148_v29, 4 }
 0x15e   : > { %1319 = vmatmul.bf16.gmra.mxu0 %v1223_v44  ;;  %v1224_v44 = vpack.c.b16 %v1211_v33, %v1210_v55  ;;  %v1118_v32 = vrot.slane %v1117_v22, 4  ;;  %v1614_v55 = vsel %vm8859_vm14, %v1612_v34, %v1613_v58  ;;  %v1649_v33 = vunpack.c.l.b16 %v1611_v25 }
 0x15f   : > { %1486 = vmatmul.bf16.gmra.mxu1 %v7616_v45  ;;  %v7617_v45 = vld [vmem:[#allocation2 + $0x48] sm:$0xff]  ;;  %v1650_v60 = vunpack.c.l.b16 %v1614_v55  ;;  %v1151_v22 = vor.u32 %v1150_v53, %v1146_v27  ;;  %v7670_v55 = vld [vmem:[#allocation9 + $0x138] sm:$0xff] }
 0x160   : > { %v1123_v35 = vsel %vm8819_vm11, %v1118_v32, %v1122_v39  ;;  %v911_v32 = vld [vmem:[#allocation2 + $0x6c] sm:$0xf]  ;;  %2396 = vmatpush.bf16.msra.mxu0 %v7670_v55  ;;  %v7702_v55 = vld [vmem:[#allocation9 + $0x1e8] sm:$0xff] }
 0x161   : > { %1961 = vmatmul.bf16.gmra.mxu3 %v7647_v13  ;;  %v1128_v13 = vrot.slane %v1127_v47, 4  ;;  %v1212_v24 = vunpack.c.l.b16 %v1123_v35  ;;  %v1660_v39 = vpack.c.b16 %v1650_v60, %v1649_v33  ;;  %v1152_v18 = vrot.slane %v1151_v22, 4 }
 0x162   : > { %v1159_v51 = vshrl.u32 %v911_v32, 16  ;;  %v1162_v35 = vshll.u32 %v911_v32, 16 }
 0x163   : > { %v1133_v23 = vsel %vm8819_vm11, %v1128_v13, %v1132_v20 }
 0x164   : > { %v1213_v16 = vunpack.c.l.b16 %v1133_v23  ;;  %v1161_v54 = vrot.slane %v1159_v51, 4  ;;  %v1164_v29 = vrot.slane %v1162_v35, 5  ;;  %v1512_v35 = vld [vmem:[#allocation2] sm:$0xe] }
 0x166   : > { %v1225_v62 = vpack.c.b16 %v1213_v16, %v1212_v24  ;;  %v7650_v24 = vld [vmem:[#allocation2 + $0x48] sm:$0xff]  ;;  %v1165_v16 = vor.u32 %v1164_v29, %v1161_v54  ;;  %v1550_v54 = vrot.slane %v8812_v41, 5 }
 0x167   : > { %v7667_v29 = vld [vmem:[#allocation9 + $0x120] sm:$0xff] }
 0x168   : > { %v1166_v53 = vrot.slane %v1165_v16, 4 }
 0x16c   : > { %1767 = vmatmul.bf16.gmra.mxu2 %v1659_v10  ;;  %v1141_v10 = vor.u32 %v1140_v30, %v1137_v36  ;;  %v1175_v36 = vor.u32 %v1174_v9, %v1170_v40  ;;  %v1178_v30 = vshll.u32 %v938_v56, 16  ;;  %v7678_v9 = vld [vmem:[#allocation9 + $0x178] sm:$0xff] }
 0x16d   : > { %2689 = vmatpush.bf16.msrb.mxu1 %v7678_v9  ;;  %v1557_v9 = vrot.slane %v8835_v17, 5 }
 0x16e   : > { %1324 = vmatmul.bf16.gmra.mxu0 %v1224_v44  ;;  %v1154_v44 = vshll.u32 %v8935_v11, 16  ;;  %v1142_v47 = vrot.slane %v1141_v10, 4  ;;  %v1176_v25 = vrot.slane %v1175_v36, 4  ;;  %v1180_v48 = vrot.slane %v1178_v30, 5  ;;  %v7669_v10 = vld [vmem:[#allocation9 + $0x130] sm:$0xff]  ;;  %v7694_v30 = vld [vmem:[#allocation9 + $0x1a8] sm:$0xff] }
 0x16f   : > { %1491 = vmatmul.bf16.gmra.mxu1 %v7617_v45  ;;  %v7649_v45 = vld [vmem:[#allocation2 + $0x3c] sm:$0xff]  ;;  %2397 = vmatpush.bf16.msra.mxu0 %v7669_v10 }
 0x170   : > { %v1147_v13 = vsel %vm8819_vm11, %v1142_v47, %v1146_v27  ;;  %v1181_v56 = vsel %vm8819_vm11, %v1176_v25, %v1180_v48  ;;  %v7677_v36 = vld [vmem:[#allocation9 + $0x170] sm:$0xff]  ;;  %v7666_v48 = vld [vmem:[#allocation9 + $0x118] sm:$0xff] }
 0x171   : > { %1966 = vmatmul.bf16.gmra.mxu3 %v7648_v63  ;;  %v1156_v63 = vrot.slane %v1154_v44, 5  ;;  %v1214_v23 = vunpack.c.l.b16 %v1147_v13  ;;  %v1217_v44 = vunpack.c.l.b16 %v1181_v56  ;;  %v7651_v13 = vld [vmem:[#allocation2 + $0x54] sm:$0xff]  ;;  %2690 = vmatpush.bf16.msrb.mxu1 %v7677_v36  ;;  %v7693_v56 = vld [vmem:[#allocation9 + $0x1a0] sm:$0xff] }
 0x173   : > { %v1157_v20 = vsel %vm8819_vm11, %v1152_v18, %v1156_v63  ;;  %v7668_v18 = vld [vmem:[#allocation9 + $0x128] sm:$0xff] }
 0x174   : > { %v1215_v11 = vunpack.c.l.b16 %v1157_v20  ;;  %v1547_v20 = vrot.slane %v8805_v28, 5  ;;  %2398 = vmatpush.bf16.msra.mxu0 %v7668_v18 }
 0x176   : > { %v1226_v14 = vpack.c.b16 %v1215_v11, %v1214_v23  ;;  %v6857_v23 = vrot.slane %v1512_v35, 9  ;;  %v1549_v11 = vrot.slane %v1547_v20, 4 }
 0x178   : > { %2399 = vmatpush.bf16.msra.mxu0 %v7667_v29  ;;  %v1548_v16 = vsel %vm8859_vm14, %v6857_v23, %v1547_v20  ;;  %v1551_v41 = vsel %vm8859_vm14, %v1549_v11, %v1550_v54  ;;  %v1554_v20 = vrot.slane %v8815_v50, 5  ;;  %v7692_v23 = vld [vmem:[#allocation9 + $0x198] sm:$0xff] }
 0x179   : > { %v1632_v25 = vunpack.c.l.b16 %v1551_v41  ;;  %v7700_v11 = vld [vmem:[#allocation9 + $0x1d8] sm:$0xff]  ;;  %v7699_v41 = vld [vmem:[#allocation9 + $0x1d0] sm:$0xff] }
 0x17a   : > { %v1556_v29 = vrot.slane %v1554_v20, 4 }
 0x17c   : > { %1772 = vmatmul.bf16.gmra.mxu2 %v1660_v39  ;;  %2400 = vmatpush.bf16.msra.mxu0 %v7666_v48  ;;  %v1558_v17 = vsel %vm8859_vm14, %v1556_v29, %v1557_v9  ;;  %v7673_v48 = vld [vmem:[#allocation9 + $0x150] sm:$0xff]  ;;  %v7697_v29 = vld [vmem:[#allocation9 + $0x1c0] sm:$0xff] }
 0x17e   : > { %1329 = vmatmul.bf16.gmra.mxu0 %v1225_v62  ;;  %v1171_v62 = vsel %vm8819_vm11, %v1166_v53, %v1170_v40  ;;  %v1631_v53 = vunpack.c.l.b16 %v1548_v16  ;;  %v7664_v16 = vld [vmem:[#allocation9 + $0x108] sm:$0xff] }
 0x17f   : > { %v1216_v22 = vunpack.c.l.b16 %v1171_v62  ;;  %v7676_v62 = vld [vmem:[#allocation9 + $0x168] sm:$0xff] }
 0x180   : > { %2691 = vmatpush.bf16.msrb.mxu1 %v7676_v62  ;;  %2401 = vmatpush.bf16.msra.mxu0 %v7665_v52 }
 0x181   : > { %1971 = vmatmul.bf16.gmra.mxu3 %v7649_v45  ;;  %v1227_v47 = vpack.c.b16 %v1217_v44, %v1216_v22  ;;  %v1651_v22 = vpack.c.b16 %v1632_v25, %v1631_v53 }
 0x184   : > { %2692 = vmatpush.bf16.msrb.mxu1 %v7675_v31  ;;  %2402 = vmatpush.bf16.msra.mxu0 %v7664_v16 }
 0x18b   : > { %v1295_v34 = vpop.f32.mrf.mxu0 }
 0x18c   : > { %v1462_v58 = vpop.f32.mrf.mxu1 }
 0x18d   : > { %v8960_v27 = vadd.f32 %v1462_v58, %v1295_v34  ;;  %v7703_v34 = vld [vmem:[#allocation9 + $0x1f0] sm:$0xff] }
 0x18e   : > { %1334 = vmatmul.bf16.gmra.mxu0 %v1226_v14  ;;  %v7695_v14 = vld [vmem:[#allocation9 + $0x1b0] sm:$0xff]  ;;  %3366 = vmatpush.bf16.msra.mxu3 %v7703_v34 }
 0x18f   : > { %2913 = vmatpush.bf16.msrb.mxu2 %v7695_v14  ;;  %v7674_v14 = vld [vmem:[#allocation9 + $0x158] sm:$0xff]  ;;  %v7691_v34 = vld [vmem:[#allocation9 + $0x190] sm:$0xff] }
 0x190   : > { %2693 = vmatpush.bf16.msrb.mxu1 %v7674_v14 }
 0x191   : > { %1976 = vmatmul.bf16.gmra.mxu3 %v7650_v24 }
 0x192   : > { %3367 = vmatpush.bf16.msra.mxu3 %v7702_v55  ;;  %v7690_v55 = vld [vmem:[#allocation9 + $0x188] sm:$0xff] }
 0x193   : > { %v8964_v60 = vpop.f32.mrf.mxu0  ;;  %2914 = vmatpush.bf16.msrb.mxu2 %v7694_v30 }
 0x194   : > { %v8962_v33 = vpop.f32.mrf.mxu3  ;;  %v8966_v39 = vpop.f32.mrf.mxu1  ;;  %2694 = vmatpush.bf16.msrb.mxu1 %v7673_v48 }
 0x197   : > { %2915 = vmatpush.bf16.msrb.mxu2 %v7693_v56  ;;  %v1634_v56 = vunpack.c.l.b16 %v1558_v17 }
 0x19b   : > { %v1300_v63 = vpop.f32.mrf.mxu0  ;;  %2916 = vmatpush.bf16.msrb.mxu2 %v7692_v23 }
 0x19c   : > { %v8972_v45 = vpop.f32.mrf.mxu3  ;;  %v1467_v32 = vpop.f32.mrf.mxu1 }
 0x19d   : > { %v8975_v51 = vadd.f32 %v1467_v32, %v1300_v63  ;;  %v7652_v32 = vld [vmem:[#allocation2 + $0x60] sm:$0xff] }
 0x19e   : > { %1339 = vmatmul.bf16.gmra.mxu0 %v1227_v47  ;;  %v7701_v47 = vld [vmem:[#allocation9 + $0x1e0] sm:$0xff] }
 0x19f   : > { %v8978_v40 = vpop.f32.mrf.mxu2  ;;  %3368 = vmatpush.bf16.msra.mxu3 %v7701_v47  ;;  %2917 = vmatpush.bf16.msrb.mxu2 %v7691_v34  ;;  %v7663_v47 = vld [vmem:[#allocation9 + $0x100] sm:$0xff] }
 0x1a0   : > { %2403 = vmatpush.bf16.msra.mxu0 %v7663_v47 }
 0x1a1   : > { %1981 = vmatmul.bf16.gmra.mxu3 %v7651_v13  ;;  %v1513_v13 = vld [vmem:[#allocation2 + $0xc] sm:$0xe] }
 0x1a2   : > { %v6858_v54 = vrot.slane %v1513_v13, 9  ;;  %v9010_v13 = vld [vmem:[#allocation2 + $0x14] sm:$0x1] }
 0x1a3   : > { %v8982_v58 = vpop.f32.mrf.mxu0  ;;  %3369 = vmatpush.bf16.msra.mxu3 %v7700_v11  ;;  %2918 = vmatpush.bf16.msrb.mxu2 %v7690_v55  ;;  %v1514_v11 = vld [vmem:[#allocation2 + $0x18] sm:$0xe]  ;;  %v2520_v14 = vrot.slane %v9010_v13, 5  ;;  %v7671_v55 = vld [vmem:[#allocation9 + $0x140] sm:$0xff] }
 0x1a4   : > { %v8980_v28 = vpop.f32.mrf.mxu3  ;;  %v8984_v24 = vpop.f32.mrf.mxu1  ;;  %v1555_v53 = vsel %vm8859_vm14, %v6858_v54, %v1554_v20  ;;  %v2475_v20 = vld [vmem:[#allocation2 + $0xc] sm:$0xe]  ;;  %v1561_v54 = vrot.slane %v8845_v46, 5 }
 0x1a5   : > { %v1633_v62 = vunpack.c.l.b16 %v1555_v53  ;;  %v7003_v9 = vrot.slane %v2475_v20, 9  ;;  %v7679_v53 = vld [vmem:[#allocation2 + $0x18] sm:$0xff]  ;;  %v1564_v20 = vrot.slane %v8873_v38, 5 }
 0x1a7   : > { %v8992_v44 = vpop.f32.mrf.mxu2  ;;  %3370 = vmatpush.bf16.msra.mxu3 %v7699_v41  ;;  %v1652_v23 = vpack.c.b16 %v1634_v56, %v1633_v62  ;;  %v7653_v41 = vld [vmem:[#allocation2 + $0x6c] sm:$0xff]  ;;  %v6859_v62 = vrot.slane %v1514_v11, 9  ;;  %v2991_v11 = vld [vmem:[#allocation2 + $0x18] sm:$0xf] }
 0x1ab   : > { %v1305_v18 = vpop.f32.mrf.mxu0 }
 0x1ac   : > { %v8990_v10 = vpop.f32.mrf.mxu3  ;;  %v1472_v63 = vpop.f32.mrf.mxu1 }
 0x1ad   : > { %v8995_v35 = vadd.f32 %v1472_v63, %v1305_v18  ;;  %v7672_v18 = vld [vmem:[#allocation9 + $0x148] sm:$0xff]  ;;  %v7689_v63 = vld [vmem:[#allocation9 + $0x180] sm:$0xff] }
 0x1ae   : > { %1727 = vmatmul.bf16.vlgmr.msrb.gmra.mxu0 %v1651_v22  ;;  %v7698_v22 = vld [vmem:[#allocation9 + $0x1c8] sm:$0xff]  ;;  %2695 = vmatpush.bf16.msrb.mxu1 %v7672_v18  ;;  %v1563_v18 = vrot.slane %v1561_v54, 4 }
 0x1af   : > { %v9008_v25 = vpop.f32.mrf.mxu2  ;;  %3371 = vmatpush.bf16.msra.mxu3 %v7698_v22  ;;  %2919 = vmatpush.bf16.msrb.mxu2 %v7689_v63  ;;  %v2022_v63 = vld [vmem:[#allocation2 + $0xc] sm:$0xf] }
 0x1b0   : > { %v1565_v38 = vsel %vm8859_vm14, %v1563_v18, %v1564_v20 }
 0x1b1   : > { %1986 = vmatmul.bf16.gmra.mxu3 %v7652_v32  ;;  %v2023_v32 = vld [vmem:[#allocation2 + $0x10] sm:$0xf] }
 0x1b2   : > { %v2517_v52 = vrot.slane %v2023_v32, 5  ;;  %2696 = vmatpush.bf16.msrb.mxu1 %v7671_v55  ;;  %2920 = vmatmul.bf16.vlgmr.msrb.gmra.mxu2 %v7679_v53  ;;  %v3022_v55 = vshrl.u32 %v2991_v11, 16 }
 0x1b3   : > { %v9000_v36 = vpop.f32.mrf.mxu0  ;;  %3372 = vmatpush.bf16.msra.mxu3 %v7697_v29  ;;  %v2992_v29 = vld [vmem:[#allocation2 + $0x1c] sm:$0xf] }
 0x1b4   : > { %v8998_v50 = vpop.f32.mrf.mxu3  ;;  %v9002_v30 = vpop.f32.mrf.mxu1  ;;  %v2519_v17 = vrot.slane %v2517_v52, 4  ;;  %v2518_v22 = vsel %vm8859_vm14, %v7003_v9, %v2517_v52  ;;  %v7712_v52 = vld [vmem:[#allocation9 + $0x238] sm:$0xff] }
 0x1b5   : > { %v2601_v56 = vunpack.c.l.b16 %v2518_v22  ;;  %3658 = vmatpush.bf16.msrb.mxu0 %v7712_v52  ;;  %v3025_v22 = vshll.u32 %v2991_v11, 16 }
 0x1b6   : > { %v2521_v46 = vsel %vm8859_vm14, %v2519_v17, %v2520_v14  ;;  %v2053_v14 = vshrl.u32 %v2022_v63, 16  ;;  %v2062_v17 = vshll.u32 %v2023_v32, 16 }
 0x1b7   : > { %v9024_v57 = vpop.f32.mrf.mxu2  ;;  %v3027_v18 = vrot.slane %v3025_v22, 5 }
 0x1b8   : > { %v2055_v52 = vrot.slane %v2053_v14, 4  ;;  %v9036_v5 = vrot.slane %v2062_v17, 5 }
 0x1bb   : > { %v1310_v34 = vpop.f32.mrf.mxu0 }
 0x1bc   : > { %v9012_v31 = vpop.f32.mrf.mxu3  ;;  %v1477_v16 = vpop.f32.mrf.mxu1 }
 0x1bd   : > { %v1478_v48 = vadd.f32 %v1477_v16, %v1310_v34  ;;  %v2602_v34 = vunpack.c.l.b16 %v2521_v46  ;;  %v2056_v16 = vshll.u32 %v2022_v63, 16  ;;  %v3031_v46 = vshll.u32 %v2992_v29, 16 }
 0x1be   : > { %1732 = vmatmul.bf16.gmra.mxu0 %v1652_v23  ;;  %v1562_v23 = vsel %vm8859_vm14, %v6859_v62, %v1561_v54  ;;  %v3024_v62 = vrot.slane %v3022_v55, 4 }
 0x1bf   : > { %v9021_v47 = vadd.f32 %v8978_v40, %v1478_v48  ;;  %v2621_v9 = vpack.c.b16 %v2602_v34, %v2601_v56  ;;  %v2066_v48 = vshrl.u32 %v2023_v32, 16  ;;  %v3035_v56 = vshrl.u32 %v2992_v29, 16  ;;  %v9040_v2 = vpop.f32.mrf.mxu2  ;;  %v2476_v29 = vld [vmem:[#allocation2 + $0x18] sm:$0xe] }
 0x1c0   : > { %v1635_v63 = vunpack.c.l.b16 %v1562_v23  ;;  %v1636_v34 = vunpack.c.l.b16 %v1565_v38  ;;  %v2058_v15 = vrot.slane %v2056_v16, 5  ;;  %v9038_v20 = vrot.slane %v3031_v46, 5  ;;  %v9046_v38 = vld [vmem:[#allocation2 + $0x20] sm:$0x1]  ;;  %v7654_v46 = vld [vmem:[#allocation2 + $0x78] sm:$0xff] }
 0x1c1   : > { %1991 = vmatmul.bf16.gmra.mxu3 %v7653_v41  ;;  %2697 = vmatmul.bf16.vlgmr.msrb.gmra.mxu1 %v2621_v9  ;;  %v2068_v54 = vrot.slane %v2066_v48, 4  ;;  %v3037_v32 = vrot.slane %v3035_v56, 4  ;;  %v2026_v9 = vld [vmem:[#allocation2 + $0x1c] sm:$0xf]  ;;  %v2072_v16 = vshll.u32 %v9010_v13, 16  ;;  %v7004_v17 = vrot.slane %v2476_v29, 9 }
 0x1c2   : > { %v2524_v49 = vrot.slane %v2026_v9, 5  ;;  %v1653_v11 = vpack.c.b16 %v1636_v34, %v1635_v63  ;;  %v2059_v43 = vor.u32 %v2058_v15, %v2055_v52  ;;  %v3028_v56 = vor.u32 %v3027_v18, %v3024_v62  ;;  %v7680_v63 = vld [vmem:[#allocation2 + $0x24] sm:$0xff]  ;;  %v2025_v13 = vld [vmem:[#allocation2 + $0x18] sm:$0xf] }
 0x1c3   : > { %v9032_v41 = vpop.f32.mrf.mxu0  ;;  %v2069_v14 = vor.u32 %v2068_v54, %v9036_v5  ;;  %v3038_v42 = vor.u32 %v3037_v32, %v9038_v20  ;;  %v2527_v15 = vrot.slane %v9046_v38, 5  ;;  %v2074_v18 = vrot.slane %v2072_v16, 5  ;;  %2925 = vmatmul.bf16.gmra.mxu2 %v7680_v63 }
 0x1c4   : > { %v9026_v40 = vpop.f32.mrf.mxu3  ;;  %v9034_v53 = vpop.f32.mrf.mxu1  ;;  %v2526_v48 = vrot.slane %v2524_v49, 4  ;;  %v2525_v52 = vsel %vm8859_vm14, %v7004_v17, %v2524_v49  ;;  %v2060_v54 = vrot.slane %v2059_v43, 4  ;;  %v3029_v32 = vrot.slane %v3028_v56, 4  ;;  %v2994_v43 = vld [vmem:[#allocation2 + $0x24] sm:$0xf] }
 0x1c5   : > { %v2603_v19 = vunpack.c.l.b16 %v2525_v52  ;;  %v2070_v62 = vrot.slane %v2069_v14, 4  ;;  %v3039_v7 = vrot.slane %v3038_v42, 4  ;;  %v2080_v49 = vshll.u32 %v2025_v13, 16 }
 0x1c6   : > { %v2528_v29 = vsel %vm8859_vm14, %v2526_v48, %v2527_v15  ;;  %v2086_v6 = vshll.u32 %v2026_v9, 16  ;;  %v2090_v4 = vshrl.u32 %v2026_v9, 16  ;;  %v2995_v48 = vld [vmem:[#allocation2 + $0x28] sm:$0xf]  ;;  %v3046_v16 = vshrl.u32 %v2994_v43, 16 }
 0x1c7   : > { %v2604_v59 = vunpack.c.l.b16 %v2528_v29  ;;  %v9064_v14 = vpop.f32.mrf.mxu2  ;;  %v2082_v63 = vrot.slane %v2080_v49, 5  ;;  %v3059_v52 = vshrl.u32 %v2995_v48, 16 }
 0x1c9   : > { %v2622_v17 = vpack.c.b16 %v2604_v59, %v2603_v19  ;;  %v3034_v19 = vsel %vm8819_vm11, %v3029_v32, %v9038_v20  ;;  %v9077_v32 = vld [vmem:[#allocation2 + $0x28] sm:$0xf] }
 0x1ca   : > { %v2531_v49 = vrot.slane %v9077_v32, 5 }
 0x1cb   : > { %v1315_v55 = vpop.f32.mrf.mxu0 }
 0x1cc   : > { %v9042_v23 = vpop.f32.mrf.mxu3  ;;  %v1482_v22 = vpop.f32.mrf.mxu1 }
 0x1cd   : > { %v1483_v34 = vadd.f32 %v1482_v22, %v1315_v55  ;;  %v3043_v55 = vrot.slane %v3041_v37, 5  ;;  %v2077_v22 = vshrl.u32 %v2025_v13, 16  ;;  %v2092_v13 = vrot.slane %v2090_v4, 4 }
 0x1ce   : > { %1737 = vmatmul.bf16.gmra.mxu0 %v1653_v11  ;;  %v2075_v11 = vsel %vm8819_vm11, %v2070_v62, %v2074_v18  ;;  %v3277_v18 = vunpack.c.l.b16 %v3034_v19  ;;  %v2096_v4 = vshll.u32 %v9046_v38, 16  ;;  %v9086_v19 = vld [vmem:[#allocation2 + $0x2c] sm:$0x1] }
 0x1cf   : > { %v9055_v12 = vadd.f32 %v9008_v25, %v1483_v34  ;;  %v2065_v25 = vsel %vm8819_vm11, %v2060_v54, %v9036_v5  ;;  %v3044_v9 = vsel %vm8819_vm11, %v3039_v7, %v3043_v55  ;;  %v7711_v5 = vld [vmem:[#allocation9 + $0x230] sm:$0xff]  ;;  %v2079_v56 = vrot.slane %v2077_v22, 4  ;;  %v2996_v55 = vld [vmem:[#allocation2 + $0x2c] sm:$0x1] }
 0x1d0   : > { %v3055_v34 = vshll.u32 %v2995_v48, 16  ;;  %v9075_v54 = vrot.slane %v2086_v6, 5  ;;  %3659 = vmatpush.bf16.msrb.mxu0 %v7711_v5  ;;  %v2308_v29 = vunpack.c.l.b16 %v2065_v25  ;;  %v2309_v62 = vunpack.c.l.b16 %v2075_v11  ;;  %v2477_v48 = vld [vmem:[#allocation2 + $0x24] sm:$0xe] }
 0x1d1   : > { %1996 = vmatmul.bf16.gmra.mxu3 %v7654_v46  ;;  %2702 = vmatmul.bf16.gmra.mxu1 %v2622_v17  ;;  %v3049_v46 = vshll.u32 %v2994_v43, 16  ;;  %v3278_v59 = vunpack.c.l.b16 %v3044_v9  ;;  %v3048_v17 = vrot.slane %v3046_v16, 4  ;;  %v2083_v7 = vor.u32 %v2082_v63, %v2079_v56 }
 0x1d2   : > { %v9079_v43 = vrot.slane %v3055_v34, 5  ;;  %v3061_v22 = vrot.slane %v3059_v52, 4  ;;  %v2093_v6 = vor.u32 %v2092_v13, %v9075_v54  ;;  %v2328_v11 = vpack.c.b16 %v2309_v62, %v2308_v29  ;;  %v7681_v52 = vld [vmem:[#allocation2 + $0x30] sm:$0xff]  ;;  %v9092_v29 = vpop.f32.mrf.mxu2 }
 0x1d3   : > { %v9066_v37 = vpop.f32.mrf.mxu0  ;;  %v3051_v20 = vrot.slane %v3049_v46, 5  ;;  %v7005_v9 = vrot.slane %v2477_v48, 9  ;;  %v2533_v16 = vrot.slane %v2531_v49, 4  ;;  %v3297_v56 = vpack.c.b16 %v3278_v59, %v3277_v18  ;;  %2930 = vmatmul.bf16.gmra.mxu2 %v7681_v52 }
 0x1d4   : > { %v9057_v15 = vpop.f32.mrf.mxu3  ;;  %v9068_v42 = vpop.f32.mrf.mxu1  ;;  %v3065_v34 = vshll.u32 %v2996_v55, 16  ;;  %v2534_v1 = vrot.slane %v9086_v19, 5  ;;  %v2084_v13 = vrot.slane %v2083_v7, 4  ;;  %v3062_v38 = vor.u32 %v3061_v22, %v9079_v43  ;;  %v2997_v22 = vld [vmem:[#allocation2 + $0x30] sm:$0xf] }
 0x1d5   : > { %10263 = vst [vmem:[#allocation47_spill] sm:$0xff] %v9057_v15  ;;  %v3052_v63 = vor.u32 %v3051_v20, %v3048_v17  ;;  %v2532_v21 = vsel %vm8859_vm14, %v7005_v9, %v2531_v49  ;;  %v2094_v62 = vrot.slane %v2093_v6, 4  ;;  %v2098_v48 = vrot.slane %v2096_v4, 5  ;;  %v2998_v49 = vld [vmem:[#allocation2 + $0x34] sm:$0xf] }
 0x1d6   : > { %v2535_v18 = vsel %vm8859_vm14, %v2533_v16, %v2534_v1  ;;  %v2605_v59 = vunpack.c.l.b16 %v2532_v21  ;;  %v3067_v55 = vrot.slane %v3065_v34, 5  ;;  %v3063_v9 = vrot.slane %v3062_v38, 4 }
 0x1d7   : > { %v2606_v20 = vunpack.c.l.b16 %v2535_v18  ;;  %v3053_v7 = vrot.slane %v3052_v63, 4  ;;  %v2104_v6 = vshll.u32 %v2028_v3, 16  ;;  %v2089_v1 = vsel %vm8819_vm11, %v2084_v13, %v9075_v54 }
 0x1d8   : > { %v2110_v21 = vshll.u32 %v9077_v32, 16  ;;  %v3070_v16 = vshrl.u32 %v2997_v22, 16  ;;  %v3083_v63 = vshrl.u32 %v2998_v49, 16  ;;  %v3068_v13 = vsel %vm8819_vm11, %v3063_v9, %v3067_v55 }
 0x1d9   : > { %v2623_v4 = vpack.c.b16 %v2606_v20, %v2605_v59  ;;  %v3058_v54 = vsel %vm8819_vm11, %v3053_v7, %v9079_v43  ;;  %v2999_v20 = vld [vmem:[#allocation2 + $0x38] sm:$0x1]  ;;  %v3280_v7 = vunpack.c.l.b16 %v3068_v13  ;;  %v2120_v9 = vshll.u32 %v9086_v19, 16 }
 0x1da   : > { %v9115_v18 = vrot.slane %v2110_v21, 5  ;;  %v3085_v26 = vrot.slane %v3083_v63, 4  ;;  %v3279_v43 = vunpack.c.l.b16 %v3058_v54  ;;  %v2478_v21 = vld [vmem:[#allocation2 + $0x30] sm:$0xe] }
 0x1db   : > { %v1320_v46 = vpop.f32.mrf.mxu0  ;;  %v7006_v63 = vrot.slane %v2478_v21, 9 }
 0x1dc   : > { %v9084_v25 = vpop.f32.mrf.mxu3  ;;  %v1487_v5 = vpop.f32.mrf.mxu1  ;;  %v3298_v19 = vpack.c.b16 %v3280_v7, %v3279_v43 }
 0x1dd   : > { %10264 = vst [vmem:[#allocation48_spill] sm:$0xff] %v9084_v25  ;;  %v1488_v0 = vadd.f32 %v1487_v5, %v1320_v46  ;;  %v2101_v46 = vshrl.u32 %v2028_v3, 16  ;;  %v3073_v5 = vshll.u32 %v2997_v22, 16  ;;  %v3072_v22 = vrot.slane %v3070_v16, 4 }
 0x1de   : > { %2404 = vmatmul.bf16.vlgmr.msra.gmra.mxu0 %v2328_v11 }
 0x1df   : > { %v9097_v17 = vadd.f32 %v9040_v2, %v1488_v0  ;;  %v2099_v0 = vsel %vm8819_vm11, %v2094_v62, %v2098_v48  ;;  %v2114_v2 = vshrl.u32 %v9077_v32, 16  ;;  %v2103_v38 = vrot.slane %v2101_v46, 4 }
 0x1e0   : > { %v2106_v32 = vrot.slane %v2104_v6, 5  ;;  %v2310_v62 = vunpack.c.l.b16 %v2089_v1  ;;  %v2311_v48 = vunpack.c.l.b16 %v2099_v0  ;;  %v3089_v0 = vshll.u32 %v2999_v20, 16 }
 0x1e1   : > { %3373 = vmatmul.bf16.vlgmr.msra.gmra.mxu3 %v3297_v56  ;;  %v3079_v56 = vshll.u32 %v2998_v49, 16  ;;  %2707 = vmatmul.bf16.gmra.mxu1 %v2623_v4  ;;  %v2116_v59 = vrot.slane %v2114_v2, 4  ;;  %v3075_v49 = vrot.slane %v3073_v5, 5 }
 0x1e2   : > { %v2107_v55 = vor.u32 %v2106_v32, %v2103_v38  ;;  %v2329_v6 = vpack.c.b16 %v2311_v48, %v2310_v62 }
 0x1e3   : > { %v1322_v3 = vpop.f32.mrf.mxu0  ;;  %v9117_v4 = vrot.slane %v3079_v56, 5  ;;  %v2117_v1 = vor.u32 %v2116_v59, %v9115_v18  ;;  %v3076_v16 = vor.u32 %v3075_v49, %v3072_v22  ;;  %v9129_v56 = vld [vmem:[#allocation2 + $0x38] sm:$0x1]  ;;  %v2122_v59 = vrot.slane %v2120_v9, 5  ;;  %v3000_v9 = vld [vmem:[#allocation2 + $0x3c] sm:$0xf] }
 0x1e4   : > { %v9106_v11 = vpop.f32.mrf.mxu3  ;;  %v1489_v34 = vpop.f32.mrf.mxu1  ;;  %v2541_v32 = vrot.slane %v9129_v56, 5  ;;  %v2108_v48 = vrot.slane %v2107_v55, 4  ;;  %v3091_v22 = vrot.slane %v3089_v0, 5  ;;  %v2031_v55 = vld [vmem:[#allocation2 + $0x30] sm:$0xf] }
 0x1e5   : > { %10265 = vst [vmem:[#allocation49_spill] sm:$0xff] %v9106_v11  ;;  %v9111_v52 = vadd.f32 %v1489_v34, %v1322_v3  ;;  %v7710_v11 = vld [vmem:[#allocation9 + $0x228] sm:$0xff]  ;;  %v9119_v3 = vpop.f32.mrf.mxu2  ;;  %v3086_v5 = vor.u32 %v3085_v26, %v9117_v4  ;;  %v3077_v43 = vrot.slane %v3076_v16, 4  ;;  %v3001_v0 = vld [vmem:[#allocation2 + $0x40] sm:$0xf] }
 0x1e6   : > { %v9121_v34 = vld [vmem:[#allocation2 + $0x34] sm:$0xf]  ;;  %3660 = vmatpush.bf16.msrb.mxu0 %v7710_v11  ;;  %v7682_v11 = vld [vmem:[#allocation2 + $0x3c] sm:$0xff] }
 0x1e7   : > { %v2538_v46 = vrot.slane %v9121_v34, 5  ;;  %v3087_v7 = vrot.slane %v3086_v5, 4  ;;  %2935 = vmatmul.bf16.gmra.mxu2 %v7682_v11  ;;  %v2125_v5 = vshrl.u32 %v2031_v55, 16  ;;  %v3097_v11 = vshll.u32 %v3000_v9, 16 }
 0x1e9   : > { %v2540_v54 = vrot.slane %v2538_v46, 4  ;;  %v2539_v20 = vsel %vm8859_vm14, %v7006_v63, %v2538_v46  ;;  %v2113_v46 = vsel %vm8819_vm11, %v2108_v48, %v9115_v18  ;;  %v3092_v16 = vsel %vm8819_vm11, %v3087_v7, %v3091_v22 }
 0x1ea   : > { %v2607_v49 = vunpack.c.l.b16 %v2539_v20  ;;  %v2128_v63 = vshll.u32 %v2031_v55, 16  ;;  %v2134_v18 = vshll.u32 %v9121_v34, 16  ;;  %v2312_v48 = vunpack.c.l.b16 %v2113_v46  ;;  %v9160_v55 = vld [vmem:[#allocation2 + $0x40] sm:$0xf]  ;;  %v2479_v46 = vld [vmem:[#allocation2 + $0x3c] sm:$0xe] }
 0x1eb   : > { %v1325_v13 = vpop.f32.mrf.mxu0  ;;  %v2542_v26 = vsel %vm8859_vm14, %v2540_v54, %v2541_v32  ;;  %v3103_v32 = vshll.u32 %v3001_v0, 16  ;;  %v3282_v22 = vunpack.c.l.b16 %v3092_v16 }
 0x1ec   : > { %v9126_v2 = vpop.f32.mrf.mxu3  ;;  %v1492_v38 = vpop.f32.mrf.mxu1  ;;  %v2608_v25 = vunpack.c.l.b16 %v2542_v26  ;;  %v2127_v26 = vrot.slane %v2125_v5, 4  ;;  %v2144_v5 = vshll.u32 %v9129_v56, 16 }
 0x1ed   : > { %10266 = vst [vmem:[#allocation50_spill] sm:$0xff] %v9126_v2  ;;  %v1493_v62 = vadd.f32 %v1492_v38, %v1325_v13  ;;  %v2118_v2 = vrot.slane %v2117_v1, 4  ;;  %v1763_v38 = vpop.f32.mrf.mxu2 }
 0x1ee   : > { %2409 = vmatmul.bf16.gmra.mxu0 %v2329_v6  ;;  %v2624_v13 = vpack.c.b16 %v2608_v25, %v2607_v49  ;;  %v3082_v6 = vsel %vm8819_vm11, %v3077_v43, %v9117_v4  ;;  %v1480_v4 = vadd.f32 %v9034_v53, %v9032_v41  ;;  %v9158_v49 = vrot.slane %v2134_v18, 5 }
 0x1ef   : > { %v9137_v21 = vadd.f32 %v9092_v29, %v1493_v62  ;;  %v2123_v1 = vsel %vm8819_vm11, %v2118_v2, %v2122_v59  ;;  %v2138_v2 = vshrl.u32 %v9121_v34, 16  ;;  %v3107_v62 = vshrl.u32 %v3001_v0, 16  ;;  %v3002_v34 = vld [vmem:[#allocation2 + $0x44] sm:$0x1] }
 0x1f0   : > { %v2313_v59 = vunpack.c.l.b16 %v2123_v1  ;;  %v3281_v20 = vunpack.c.l.b16 %v3082_v6  ;;  %v1785_v41 = vadd.f32 %v8992_v44, %v1480_v4 }
 0x1f1   : > { %3378 = vmatmul.bf16.gmra.mxu3 %v3298_v19  ;;  %2712 = vmatmul.bf16.gmra.mxu1 %v2624_v13  ;;  %v3094_v19 = vshrl.u32 %v3000_v9, 16  ;;  %v2140_v43 = vrot.slane %v2138_v2, 4  ;;  %v3099_v13 = vrot.slane %v3097_v11, 5  ;;  %v9162_v9 = vrot.slane %v3103_v32, 5 }
 0x1f2   : > { %v3109_v0 = vrot.slane %v3107_v62, 4  ;;  %v2330_v53 = vpack.c.b16 %v2313_v59, %v2312_v48  ;;  %v3299_v6 = vpack.c.b16 %v3282_v22, %v3281_v20  ;;  %v3113_v32 = vshll.u32 %v3002_v34, 16  ;;  %v7709_v62 = vld [vmem:[#allocation9 + $0x220] sm:$0xff]  ;;  %v9174_v59 = vld [vmem:[#allocation2 + $0x44] sm:$0x1] }
 0x1f3   : > { %v9152_v54 = vpop.f32.mrf.mxu0  ;;  %v3096_v7 = vrot.slane %v3094_v19, 4  ;;  %v2141_v11 = vor.u32 %v2140_v43, %v9158_v49  ;;  %3661 = vmatpush.bf16.msrb.mxu0 %v7709_v62  ;;  %v2548_v20 = vrot.slane %v9174_v59, 5 }
 0x1f4   : > { %v1967_v29 = vpop.f32.mrf.mxu3  ;;  %v3110_v48 = vor.u32 %v3109_v0, %v9162_v9 }
 0x1f5   : > { %v9150_v25 = vadd.f32 %v1967_v29, %v9021_v47  ;;  %v2130_v47 = vrot.slane %v2128_v63, 5  ;;  %v2545_v29 = vrot.slane %v9160_v55, 5  ;;  %v7007_v63 = vrot.slane %v2479_v46, 9  ;;  %v9169_v19 = vpop.f32.mrf.mxu2 }
 0x1f6   : > { %v3100_v4 = vor.u32 %v3099_v13, %v3096_v7  ;;  %v2142_v34 = vrot.slane %v2141_v11, 4  ;;  %v3111_v0 = vrot.slane %v3110_v48, 4 }
 0x1f7   : > { %10267 = vst [vmem:[#allocation51_spill] sm:$0xff] %v9150_v25  ;;  %v2131_v16 = vor.u32 %v2130_v47, %v2127_v26  ;;  %v7683_v25 = vld [vmem:[#allocation2 + $0x48] sm:$0xff]  ;;  %v2547_v15 = vrot.slane %v2545_v29, 4  ;;  %v2546_v56 = vsel %vm8859_vm14, %v7007_v63, %v2545_v29  ;;  %v2034_v47 = vld [vmem:[#allocation2 + $0x3c] sm:$0xf] }
 0x1f8   : > { %v2609_v43 = vunpack.c.l.b16 %v2546_v56  ;;  %2940 = vmatmul.bf16.gmra.mxu2 %v7683_v25  ;;  %v3101_v13 = vrot.slane %v3100_v4, 4  ;;  %v3003_v29 = vld [vmem:[#allocation2 + $0x48] sm:$0xf]  ;;  %v2152_v63 = vshll.u32 %v2034_v47, 16  ;;  %v2162_v25 = vshrl.u32 %v9160_v55, 16 }
 0x1f9   : > { %v2132_v26 = vrot.slane %v2131_v16, 4  ;;  %v2549_v7 = vsel %vm8859_vm14, %v2547_v15, %v2548_v20  ;;  %v2158_v16 = vshll.u32 %v9160_v55, 16  ;;  %v3121_v62 = vshll.u32 %v3003_v29, 16 }
 0x1fa   : > { %v2610_v46 = vunpack.c.l.b16 %v2549_v7  ;;  %v2154_v20 = vrot.slane %v2152_v63, 5  ;;  %v2480_v63 = vld [vmem:[#allocation2 + $0x48] sm:$0xe] }
 0x1fb   : > { %v1330_v2 = vpop.f32.mrf.mxu0 }
 0x1fc   : > { %v1969_v1 = vpop.f32.mrf.mxu3  ;;  %v1498_v44 = vadd.f32 %v8962_v33, %v1330_v2  ;;  %v2146_v33 = vrot.slane %v2144_v5, 5  ;;  %v2625_v5 = vpack.c.b16 %v2610_v46, %v2609_v43  ;;  %v9206_v43 = vrot.slane %v2158_v16, 5 }
 0x1fd   : > { %v9167_v18 = vadd.f32 %v1969_v1, %v1785_v41  ;;  %v3115_v41 = vrot.slane %v3113_v32, 5  ;;  %v2149_v1 = vshrl.u32 %v2034_v47, 16  ;;  %v3118_v32 = vshrl.u32 %v3003_v29, 16  ;;  %v1768_v48 = vpop.f32.mrf.mxu2 }
 0x1fe   : > { %v9179_v22 = vadd.f32 %v1763_v38, %v1498_v44  ;;  %2414 = vmatmul.bf16.gmra.mxu0 %v2330_v53  ;;  %v9183_v38 = vld [vmem:[#allocation2 + $0x4c] sm:$0xf]  ;;  %v2147_v11 = vsel %vm8819_vm11, %v2142_v34, %v2146_v33  ;;  %v3106_v44 = vsel %vm8819_vm11, %v3101_v13, %v9162_v9  ;;  %v2164_v34 = vrot.slane %v2162_v25, 4 }
 0x1ff   : > { %v3127_v55 = vshll.u32 %v9183_v38, 16  ;;  %v3131_v4 = vshrl.u32 %v9183_v38, 16  ;;  %v2151_v56 = vrot.slane %v2149_v1, 4  ;;  %v2315_v47 = vunpack.c.l.b16 %v2147_v11  ;;  %v9214_v1 = vld [vmem:[#allocation2 + $0x50] sm:$0x1] }
 0x200   : > { %v3283_v9 = vunpack.c.l.b16 %v3106_v44  ;;  %v3120_v7 = vrot.slane %v3118_v32, 4  ;;  %v3123_v13 = vrot.slane %v3121_v62, 5  ;;  %v2165_v16 = vor.u32 %v2164_v34, %v9206_v43 }
 0x201   : > { %3383 = vmatmul.bf16.gmra.mxu3 %v3299_v6  ;;  %v2137_v6 = vsel %vm8819_vm11, %v2132_v26, %v9158_v49  ;;  %v3116_v49 = vsel %vm8819_vm11, %v3111_v0, %v3115_v41  ;;  %2717 = vmatmul.bf16.gmra.mxu1 %v2625_v5  ;;  %v9208_v0 = vld [vmem:[#allocation2 + $0x4c] sm:$0xf]  ;;  %v9210_v41 = vrot.slane %v3127_v55, 5  ;;  %v3133_v29 = vrot.slane %v3131_v4, 4 }
 0x202   : > { %v2314_v26 = vunpack.c.l.b16 %v2137_v6  ;;  %v3284_v33 = vunpack.c.l.b16 %v3116_v49  ;;  %v2552_v46 = vrot.slane %v9208_v0, 5  ;;  %v2168_v25 = vshll.u32 %v9174_v59, 16  ;;  %v7684_v49 = vld [vmem:[#allocation2 + $0x54] sm:$0xff] }
 0x203   : > { %v9193_v2 = vpop.f32.mrf.mxu0  ;;  %v7008_v5 = vrot.slane %v2480_v63, 9  ;;  %v3124_v44 = vor.u32 %v3123_v13, %v3120_v7  ;;  %v3134_v4 = vor.u32 %v3133_v29, %v9210_v41  ;;  %v2166_v34 = vrot.slane %v2165_v16, 4  ;;  %v7708_v29 = vld [vmem:[#allocation9 + $0x218] sm:$0xff] }
 0x204   : > { %v1972_v53 = vpop.f32.mrf.mxu3  ;;  %v2331_v6 = vpack.c.b16 %v2315_v47, %v2314_v26  ;;  %v3300_v62 = vpack.c.b16 %v3284_v33, %v3283_v9  ;;  %v2554_v55 = vrot.slane %v2552_v46, 4  ;;  %v2170_v9 = vrot.slane %v2168_v25, 5  ;;  %v2037_v33 = vld [vmem:[#allocation2 + $0x48] sm:$0xf]  ;;  %v9235_v25 = vld [vmem:[#allocation2 + $0x58] sm:$0xf]  ;;  %3662 = vmatpush.bf16.msrb.mxu0 %v7708_v29 }
 0x205   : > { %v9191_v15 = vadd.f32 %v1972_v53, %v9055_v12  ;;  %v1485_v12 = vadd.f32 %v9068_v42, %v9066_v37  ;;  %v2155_v42 = vor.u32 %v2154_v20, %v2151_v56  ;;  %v9223_v56 = vld [vmem:[#allocation2 + $0x50] sm:$0x1]  ;;  %v2553_v20 = vsel %vm8859_vm14, %v7008_v5, %v2552_v46  ;;  %10268 = vst [vmem:[#allocation52_spill] sm:$0xff] %v9235_v25 }
 0x206   : > { %v2555_v26 = vrot.slane %v9223_v56, 5  ;;  %v2611_v7 = vunpack.c.l.b16 %v2553_v20  ;;  %v3125_v13 = vrot.slane %v3124_v44, 4  ;;  %v3135_v63 = vrot.slane %v3134_v4, 4 }
 0x207   : > { %v1787_v37 = vadd.f32 %v9024_v57, %v1485_v12  ;;  %v3137_v12 = vshll.u32 %v9214_v1, 16  ;;  %v2156_v59 = vrot.slane %v2155_v42, 4  ;;  %v3006_v42 = vld [vmem:[#allocation2 + $0x54] sm:$0xf]  ;;  %v2176_v16 = vshll.u32 %v2037_v33, 16 }
 0x208   : > { %2945 = vmatmul.bf16.gmra.mxu2 %v7684_v49  ;;  %v2186_v44 = vshrl.u32 %v9208_v0, 16  ;;  %v3142_v4 = vshrl.u32 %v3006_v42, 16 }
 0x209   : > { %v3139_v46 = vrot.slane %v3137_v12, 5  ;;  %v3145_v12 = vshll.u32 %v3006_v42, 16 }
 0x20a   : > { %v3144_v42 = vrot.slane %v3142_v4, 4 }
 0x20b   : > { %v1335_v32 = vpop.f32.mrf.mxu0 }
 0x20c   : > { %v1974_v53 = vpop.f32.mrf.mxu3  ;;  %v1503_v57 = vadd.f32 %v8980_v28, %v1335_v32  ;;  %v1770_v28 = vpop.f32.mrf.mxu2  ;;  %v2171_v32 = vsel %vm8819_vm11, %v2166_v34, %v2170_v9  ;;  %v2178_v9 = vrot.slane %v2176_v16, 5 }
 0x20d   : > { %v9218_v11 = vadd.f32 %v1974_v53, %v1787_v37  ;;  %v2556_v37 = vsel %vm8859_vm14, %v2554_v55, %v2555_v26  ;;  %v3151_v26 = vshll.u32 %v9235_v25, 16 }
 0x20e   : > { %v9228_v47 = vadd.f32 %v1768_v48, %v1503_v57  ;;  %2419 = vmatmul.bf16.gmra.mxu0 %v2331_v6  ;;  %v2612_v53 = vunpack.c.l.b16 %v2556_v37  ;;  %v2161_v48 = vsel %vm8819_vm11, %v2156_v59, %v9206_v43  ;;  %v2173_v6 = vshrl.u32 %v2037_v33, 16 }
 0x20f   : > { %v3130_v43 = vsel %vm8819_vm11, %v3125_v13, %v9210_v41  ;;  %v3140_v59 = vsel %vm8819_vm11, %v3135_v63, %v3139_v46  ;;  %v2316_v34 = vunpack.c.l.b16 %v2161_v48  ;;  %v2188_v41 = vrot.slane %v2186_v44, 4  ;;  %v9258_v46 = vld [vmem:[#allocation2 + $0x58] sm:$0xf] }
 0x210   : > { %v2626_v49 = vpack.c.b16 %v2612_v53, %v2611_v7  ;;  %v2317_v7 = vunpack.c.l.b16 %v2171_v32  ;;  %v3285_v13 = vunpack.c.l.b16 %v3130_v43  ;;  %v3286_v37 = vunpack.c.l.b16 %v3140_v59 }
 0x211   : > { %3388 = vmatmul.bf16.gmra.mxu3 %v3300_v62  ;;  %v2182_v62 = vshll.u32 %v9208_v0, 16  ;;  %v3155_v0 = vshrl.u32 %v9235_v25, 16  ;;  %v3147_v63 = vrot.slane %v3145_v12, 5  ;;  %v9260_v53 = vrot.slane %v3151_v26, 5 }
 0x212   : > { %2722 = vmatmul.bf16.gmra.mxu1 %v2626_v49  ;;  %v2559_v48 = vrot.slane %v9258_v46, 5  ;;  %v2192_v32 = vshll.u32 %v9223_v56, 16  ;;  %v2332_v49 = vpack.c.b16 %v2317_v7, %v2316_v34  ;;  %v3301_v59 = vpack.c.b16 %v3286_v37, %v3285_v13  ;;  %v2040_v56 = vld [vmem:[#allocation2 + $0x54] sm:$0xf] }
 0x213   : > { %v1337_v57 = vpop.f32.mrf.mxu0  ;;  %v9254_v29 = vrot.slane %v2182_v62, 5  ;;  %v2481_v62 = vld [vmem:[#allocation2 + $0x54] sm:$0xe]  ;;  %v3148_v26 = vor.u32 %v3147_v63, %v3144_v42  ;;  %v3009_v42 = vld [vmem:[#allocation2 + $0x60] sm:$0xf] }
 0x214   : > { %v1977_v5 = vpop.f32.mrf.mxu3  ;;  %v1505_v20 = vadd.f32 %v8990_v10, %v1337_v57  ;;  %v9256_v10 = vld [vmem:[#allocation2 + $0x5c] sm:$0x1]  ;;  %v7009_v4 = vrot.slane %v2481_v62, 9  ;;  %v2561_v25 = vrot.slane %v2559_v48, 4  ;;  %v2194_v7 = vrot.slane %v2192_v32, 5 }
 0x215   : > { %v9242_v55 = vadd.f32 %v1977_v5, %v9097_v17  ;;  %v2175_v17 = vrot.slane %v2173_v6, 4  ;;  %v3157_v5 = vrot.slane %v3155_v0, 4  ;;  %v1773_v6 = vpop.f32.mrf.mxu2  ;;  %v2189_v57 = vor.u32 %v2188_v41, %v9254_v29  ;;  %v7685_v0 = vld [vmem:[#allocation2 + $0x60] sm:$0xff] }
 0x216   : > { %v9252_v33 = vadd.f32 %v1770_v28, %v1505_v20  ;;  %v1789_v28 = vadd.f32 %v9064_v14, %v9111_v52  ;;  %v3161_v43 = vshll.u32 %v9256_v10, 16  ;;  %v2560_v34 = vsel %vm8859_vm14, %v7009_v4, %v2559_v48  ;;  %v9279_v63 = vld [vmem:[#allocation2 + $0x64] sm:$0xf] }
 0x217   : > { %v2179_v16 = vor.u32 %v2178_v9, %v2175_v17  ;;  %v3158_v52 = vor.u32 %v3157_v5, %v9260_v53  ;;  %v9272_v17 = vld [vmem:[#allocation2 + $0x5c] sm:$0x1]  ;;  %v2190_v13 = vrot.slane %v2189_v57, 4  ;;  %v1494_v5 = vpop.f32.mrf.mxu1  ;;  %v3149_v62 = vrot.slane %v3148_v26, 4 }
 0x218   : > { %v2562_v41 = vrot.slane %v9272_v17, 5  ;;  %v3163_v37 = vrot.slane %v3161_v43, 5  ;;  %2950 = vmatmul.bf16.gmra.mxu2 %v7685_v0  ;;  %v2210_v32 = vshrl.u32 %v9258_v46, 16  ;;  %v3166_v57 = vshrl.u32 %v3009_v42, 16 }
 0x219   : > { %v2180_v9 = vrot.slane %v2179_v16, 4  ;;  %v3159_v16 = vrot.slane %v3158_v52, 4  ;;  %v3169_v43 = vshll.u32 %v3009_v42, 16  ;;  %v3175_v4 = vshll.u32 %v9279_v63, 16 }
 0x21a   : > { %v2563_v48 = vsel %vm8859_vm14, %v2561_v25, %v2562_v41  ;;  %v2195_v25 = vsel %vm8819_vm11, %v2190_v13, %v2194_v7  ;;  %v3154_v41 = vsel %vm8819_vm11, %v3149_v62, %v9260_v53  ;;  %v2212_v7 = vrot.slane %v2210_v32, 4 }
 0x21b   : > { %v1340_v20 = vpop.f32.mrf.mxu0  ;;  %v2185_v0 = vsel %vm8819_vm11, %v2180_v9, %v9254_v29  ;;  %v3164_v29 = vsel %vm8819_vm11, %v3159_v16, %v3163_v37  ;;  %v3171_v13 = vrot.slane %v3169_v43, 5  ;;  %v2319_v62 = vunpack.c.l.b16 %v2195_v25  ;;  %v9310_v37 = vld [vmem:[#allocation2 + $0x64] sm:$0xf] }
 0x21c   : > { %v1979_v44 = vpop.f32.mrf.mxu3  ;;  %v1508_v14 = vadd.f32 %v8998_v50, %v1340_v20  ;;  %v2613_v50 = vunpack.c.l.b16 %v2560_v34  ;;  %v2200_v20 = vshll.u32 %v2040_v56, 16  ;;  %v2318_v53 = vunpack.c.l.b16 %v2185_v0  ;;  %v2482_v0 = vld [vmem:[#allocation2 + $0x60] sm:$0xe] }
 0x21d   : > { %v9268_v12 = vadd.f32 %v1979_v44, %v1789_v28  ;;  %v2197_v44 = vshrl.u32 %v2040_v56, 16  ;;  %v1775_v34 = vpop.f32.mrf.mxu2  ;;  %v2566_v32 = vrot.slane %v9310_v37, 5 }
 0x21e   : > { %v9277_v28 = vadd.f32 %v1773_v6, %v1508_v14  ;;  %2424 = vmatmul.bf16.gmra.mxu0 %v2332_v49  ;;  %v2206_v6 = vshll.u32 %v9258_v46, 16  ;;  %v2614_v49 = vunpack.c.l.b16 %v2563_v48  ;;  %v3179_v14 = vshrl.u32 %v9279_v63, 16 }
 0x21f   : > { %v2199_v42 = vrot.slane %v2197_v44, 4  ;;  %v9308_v44 = vld [vmem:[#allocation2 + $0x68] sm:$0x1] }
 0x220   : > { %v2627_v52 = vpack.c.b16 %v2614_v49, %v2613_v50  ;;  %v9302_v9 = vrot.slane %v2206_v6, 5  ;;  %v9304_v50 = vrot.slane %v3175_v4, 5  ;;  %v3181_v49 = vrot.slane %v3179_v14, 4 }
 0x221   : > { %3393 = vmatmul.bf16.gmra.mxu3 %v3301_v59  ;;  %v1495_v59 = vadd.f32 %v1494_v5, %v9152_v54  ;;  %v2202_v54 = vrot.slane %v2200_v20, 5  ;;  %v7707_v5 = vld [vmem:[#allocation9 + $0x210] sm:$0xff]  ;;  %v3288_v20 = vunpack.c.l.b16 %v3164_v29  ;;  %v2216_v6 = vshll.u32 %v9272_v17, 16 }
 0x222   : > { %2727 = vmatmul.bf16.gmra.mxu1 %v2627_v52  ;;  %3663 = vmatpush.bf16.msrb.mxu0 %v7707_v5  ;;  %v2213_v16 = vor.u32 %v2212_v7, %v9302_v9  ;;  %v3182_v4 = vor.u32 %v3181_v49, %v9304_v50  ;;  %v3185_v14 = vshll.u32 %v9308_v44, 16  ;;  %v2333_v52 = vpack.c.b16 %v2319_v62, %v2318_v53  ;;  %v9323_v7 = vld [vmem:[#allocation2 + $0x68] sm:$0x1] }
 0x223   : > { %v1342_v56 = vpop.f32.mrf.mxu0  ;;  %v2568_v17 = vrot.slane %v2566_v32, 4  ;;  %v2569_v62 = vrot.slane %v9323_v7, 5 }
 0x224   : > { %v1982_v26 = vpop.f32.mrf.mxu3  ;;  %v1510_v48 = vadd.f32 %v9012_v31, %v1342_v56  ;;  %v3287_v31 = vunpack.c.l.b16 %v3154_v41  ;;  %v2203_v56 = vor.u32 %v2202_v54, %v2199_v42  ;;  %v3183_v49 = vrot.slane %v3182_v4, 4 }
 0x225   : > { %v9294_v46 = vadd.f32 %v1982_v26, %v9137_v21  ;;  %v3168_v21 = vrot.slane %v3166_v57, 4  ;;  %v1791_v57 = vadd.f32 %v9119_v3, %v1495_v59  ;;  %v2214_v3 = vrot.slane %v2213_v16, 4 }
 0x226   : > { %v9306_v26 = vadd.f32 %v1775_v34, %v1510_v48  ;;  %v7010_v34 = vrot.slane %v2482_v0, 9  ;;  %v3302_v54 = vpack.c.b16 %v3288_v20, %v3287_v31  ;;  %v2204_v5 = vrot.slane %v2203_v56, 4  ;;  %v7686_v48 = vld [vmem:[#allocation2 + $0x6c] sm:$0xff]  ;;  %v2043_v31 = vld [vmem:[#allocation2 + $0x60] sm:$0xf] }
 0x227   : > { %v3172_v43 = vor.u32 %v3171_v13, %v3168_v21  ;;  %v2218_v59 = vrot.slane %v2216_v6, 5  ;;  %v3187_v53 = vrot.slane %v3185_v14, 5  ;;  %v1465_v56 = vadd.f32 %v8966_v39, %v8964_v60  ;;  %v3012_v6 = vld [vmem:[#allocation2 + $0x6c] sm:$0xf]  ;;  %v9342_v0 = vld [vmem:[#allocation2 + $0x70] sm:$0xf] }
 0x228   : > { %v2567_v21 = vsel %vm8859_vm14, %v7010_v34, %v2566_v32  ;;  %2955 = vmatmul.bf16.gmra.mxu2 %v7686_v48  ;;  %v2209_v16 = vsel %vm8819_vm11, %v2204_v5, %v9302_v9  ;;  %v2221_v14 = vshrl.u32 %v2043_v31, 16  ;;  %v2224_v39 = vshll.u32 %v2043_v31, 16 }
 0x229   : > { %v3173_v13 = vrot.slane %v3172_v43, 4  ;;  %v2615_v20 = vunpack.c.l.b16 %v2567_v21  ;;  %v3188_v4 = vsel %vm8819_vm11, %v3183_v49, %v3187_v53  ;;  %v2234_v9 = vshrl.u32 %v9310_v37, 16 }
 0x22a   : > { %v3193_v5 = vshll.u32 %v3012_v6, 16  ;;  %v2320_v21 = vunpack.c.l.b16 %v2209_v16  ;;  %v3290_v49 = vunpack.c.l.b16 %v3188_v4  ;;  %v2226_v53 = vrot.slane %v2224_v39, 5 }
 0x22b   : > { %v1728_v42 = vpop.f32.mrf.mxu0  ;;  %v3178_v43 = vsel %vm8819_vm11, %v3173_v13, %v9304_v50  ;;  %v1500_v50 = vadd.f32 %v8972_v45, %v9193_v2  ;;  %v2236_v31 = vrot.slane %v2234_v9, 4  ;;  %v9357_v2 = vld [vmem:[#allocation2 + $0x74] sm:$0x1] }
 0x22c   : > { %v1984_v25 = vpop.f32.mrf.mxu3  ;;  %v9321_v29 = vadd.f32 %v1728_v42, %v8960_v27  ;;  %v2570_v27 = vsel %vm8859_vm14, %v2568_v17, %v2569_v62  ;;  %v3199_v17 = vshll.u32 %v9342_v0, 16  ;;  %v3289_v13 = vunpack.c.l.b16 %v3178_v43  ;;  %v2483_v43 = vld [vmem:[#allocation2 + $0x6c] sm:$0xe]  ;;  %v9364_v9 = vld [vmem:[#allocation2 + $0x74] sm:$0x1] }
 0x22d   : > { %v9318_v41 = vadd.f32 %v1984_v25, %v1791_v57  ;;  %v2616_v32 = vunpack.c.l.b16 %v2570_v27  ;;  %v2219_v57 = vsel %vm8819_vm11, %v2214_v3, %v2218_v59  ;;  %v2230_v25 = vshll.u32 %v9310_v37, 16  ;;  %v7706_v59 = vld [vmem:[#allocation9 + $0x208] sm:$0xff] }
 0x22e   : > { %2429 = vmatmul.bf16.gmra.mxu0 %v2333_v52  ;;  %v3203_v3 = vshrl.u32 %v9342_v0, 16  ;;  %v2321_v37 = vunpack.c.l.b16 %v2219_v57  ;;  %v3195_v45 = vrot.slane %v3193_v5, 5  ;;  %v9359_v27 = vrot.slane %v3199_v17, 5 }
 0x22f   : > { %v2628_v52 = vpack.c.b16 %v2616_v32, %v2615_v20  ;;  %v9355_v62 = vrot.slane %v2230_v25, 5  ;;  %3664 = vmatpush.bf16.msrb.mxu0 %v7706_v59  ;;  %v1793_v32 = vadd.f32 %v9169_v19, %v1500_v50  ;;  %v3303_v57 = vpack.c.b16 %v3290_v49, %v3289_v13  ;;  %v7687_v19 = vld [vmem:[#allocation2 + $0x78] sm:$0xff] }
 0x230   : > { %v2334_v16 = vpack.c.b16 %v2321_v37, %v2320_v21  ;;  %v2240_v25 = vshll.u32 %v9323_v7, 16  ;;  %v3209_v17 = vshll.u32 %v9357_v2, 16  ;;  %v2576_v50 = vrot.slane %v9364_v9, 5  ;;  %v2046_v21 = vld [vmem:[#allocation2 + $0x6c] sm:$0xf] }
 0x231   : > { %3398 = vmatmul.bf16.gmra.mxu3 %v3302_v54  ;;  %v3190_v54 = vshrl.u32 %v3012_v6, 16  ;;  %v2047_v6 = vld [vmem:[#allocation2 + $0x70] sm:$0xf]  ;;  %v2237_v39 = vor.u32 %v2236_v31, %v9355_v62 }
 0x232   : > { %2732 = vmatmul.bf16.gmra.mxu1 %v2628_v52  ;;  %v2573_v4 = vrot.slane %v2047_v6, 5  ;;  %v7011_v52 = vrot.slane %v2483_v43, 9  ;;  %v2242_v49 = vrot.slane %v2240_v25, 5  ;;  %v2245_v43 = vshrl.u32 %v2046_v21, 16 }
 0x233   : > { %v1730_v42 = vpop.f32.mrf.mxu0  ;;  %v3192_v20 = vrot.slane %v3190_v54, 4  ;;  %v2238_v31 = vrot.slane %v2237_v39, 4 }
 0x234   : > { %v1987_v60 = vpop.f32.mrf.mxu3  ;;  %v9351_v48 = vadd.f32 %v1730_v42, %v1465_v56  ;;  %v3205_v56 = vrot.slane %v3203_v3, 4  ;;  %v2574_v7 = vsel %vm8859_vm14, %v7011_v52, %v2573_v4  ;;  %v2575_v37 = vrot.slane %v2573_v4, 4 }
 0x235   : > { %v9347_v34 = vadd.f32 %v1987_v60, %v9179_v22  ;;  %v2223_v22 = vrot.slane %v2221_v14, 4  ;;  %v3196_v5 = vor.u32 %v3195_v45, %v3192_v20  ;;  %v3211_v45 = vrot.slane %v3209_v17, 5 }
 0x236   : > { %v3206_v59 = vor.u32 %v3205_v56, %v9359_v27  ;;  %v2254_v4 = vshll.u32 %v2047_v6, 16 }
 0x237   : > { %v2227_v60 = vor.u32 %v2226_v53, %v2223_v22  ;;  %v3015_v22 = vld [vmem:[#allocation2 + $0x78] sm:$0xf]  ;;  %v2617_v53 = vunpack.c.l.b16 %v2574_v7  ;;  %v3197_v20 = vrot.slane %v3196_v5, 4 }
 0x238   : > { %2960 = vmatmul.bf16.gmra.mxu2 %v7687_v19  ;;  %v3207_v56 = vrot.slane %v3206_v59, 4  ;;  %v3217_v25 = vshll.u32 %v3015_v22, 16 }
 0x239   : > { %v2228_v13 = vrot.slane %v2227_v60, 4  ;;  %v3214_v60 = vshrl.u32 %v3015_v22, 16 }
 0x23a   : > { %v3212_v7 = vsel %vm8819_vm11, %v3207_v56, %v3211_v45 }
 0x23b   : > { %v1733_v54 = vpop.f32.mrf.mxu0  ;;  %v2233_v59 = vsel %vm8819_vm11, %v2228_v13, %v9355_v62  ;;  %v3219_v62 = vrot.slane %v3217_v25, 5 }
 0x23c   : > { %v1989_v14 = vpop.f32.mrf.mxu3  ;;  %v9371_v3 = vadd.f32 %v1733_v54, %v8975_v51  ;;  %v2577_v51 = vsel %vm8859_vm14, %v2575_v37, %v2576_v50  ;;  %v9399_v37 = vrot.slane %v2254_v4, 5  ;;  %v2322_v13 = vunpack.c.l.b16 %v2233_v59 }
 0x23d   : > { %v9366_v42 = vadd.f32 %v1989_v14, %v1793_v32  ;;  %v9376_v32 = vld [vmem:[#allocation2 + $0x7c] sm:$0xf]  ;;  %v2248_v14 = vshll.u32 %v2046_v21, 16  ;;  %v2618_v52 = vunpack.c.l.b16 %v2577_v51  ;;  %v2247_v21 = vrot.slane %v2245_v43, 4 }
 0x23e   : > { %2434 = vmatmul.bf16.gmra.mxu0 %v2334_v16  ;;  %v2258_v16 = vshrl.u32 %v2047_v6, 16  ;;  %v3223_v54 = vshll.u32 %v9376_v32, 16  ;;  %v3227_v5 = vshrl.u32 %v9376_v32, 16  ;;  %v2243_v6 = vsel %vm8819_vm11, %v2238_v31, %v2242_v49 }
 0x23f   : > { %v2629_v17 = vpack.c.b16 %v2618_v52, %v2617_v53  ;;  %v3216_v53 = vrot.slane %v3214_v60, 4  ;;  %v2323_v51 = vunpack.c.l.b16 %v2243_v6  ;;  %v7705_v6 = vld [vmem:[#allocation9 + $0x200] sm:$0xff] }
 0x240   : > { %v2260_v22 = vrot.slane %v2258_v16, 4  ;;  %v9401_v49 = vrot.slane %v3223_v54, 5  ;;  %v3229_v31 = vrot.slane %v3227_v5, 4  ;;  %v2484_v16 = vld [vmem:[#allocation2 + $0x78] sm:$0xe]  ;;  %3665 = vmatpush.bf16.msrb.mxu0 %v7705_v6 }
 0x241   : > { %3403 = vmatmul.bf16.gmra.mxu3 %v3303_v57  ;;  %v1470_v57 = vadd.f32 %v8984_v24, %v8982_v58  ;;  %v3202_v58 = vsel %vm8819_vm11, %v3197_v20, %v9359_v27  ;;  %v3292_v27 = vunpack.c.l.b16 %v3212_v7  ;;  %v9403_v20 = vld [vmem:[#allocation2 + $0x80] sm:$0x1]  ;;  %v3220_v4 = vor.u32 %v3219_v62, %v3216_v53 }
 0x242   : > { %2737 = vmatmul.bf16.gmra.mxu1 %v2629_v17  ;;  %v3291_v52 = vunpack.c.l.b16 %v3202_v58  ;;  %v2261_v43 = vor.u32 %v2260_v22, %v9399_v37  ;;  %v2335_v25 = vpack.c.b16 %v2323_v51, %v2322_v13  ;;  %v3233_v54 = vshll.u32 %v9403_v20, 16  ;;  %v7688_v58 = vld [vmem:[#allocation2 + $0x84] sm:$0xff] }
 0x243   : > { %v1735_v50 = vpop.f32.mrf.mxu0  ;;  %v7012_v5 = vrot.slane %v2484_v16, 9  ;;  %v3221_v13 = vrot.slane %v3220_v4, 4 }
 0x244   : > { %v1992_v39 = vpop.f32.mrf.mxu3  ;;  %v9395_v24 = vadd.f32 %v1735_v50, %v1470_v57  ;;  %v9405_v57 = vld [vmem:[#allocation2 + $0x7c] sm:$0xf]  ;;  %v3304_v59 = vpack.c.b16 %v3292_v27, %v3291_v52  ;;  %v2262_v53 = vrot.slane %v2261_v43, 4 }
 0x245   : > { %v9385_v19 = vadd.f32 %v1992_v39, %v9228_v47  ;;  %v2250_v47 = vrot.slane %v2248_v14, 5  ;;  %v2580_v56 = vrot.slane %v9405_v57, 5  ;;  %v2264_v14 = vshll.u32 %v9364_v9, 16 }
 0x246   : > { %v3230_v39 = vor.u32 %v3229_v31, %v9401_v49  ;;  %v3235_v31 = vrot.slane %v3233_v54, 5  ;;  %v3226_v4 = vsel %vm8819_vm11, %v3221_v13, %v9401_v49 }
 0x247   : > { %v2251_v45 = vor.u32 %v2250_v47, %v2247_v21  ;;  %v2582_v7 = vrot.slane %v2580_v56, 4  ;;  %v9418_v47 = vld [vmem:[#allocation2 + $0x80] sm:$0x1]  ;;  %v2581_v22 = vsel %vm8859_vm14, %v7012_v5, %v2580_v56  ;;  %v2266_v62 = vrot.slane %v2264_v14, 5 }
 0x248   : > { %v3231_v51 = vrot.slane %v3230_v39, 4  ;;  %v2619_v52 = vunpack.c.l.b16 %v2581_v22  ;;  %2965 = vmatmul.bf16.gmra.mxu2 %v7688_v58  ;;  %v1475_v56 = vadd.f32 %v9002_v30, %v9000_v36 }
 0x249   : > { %v2252_v9 = vrot.slane %v2251_v45, 4  ;;  %v3018_v45 = vld [vmem:[#allocation2 + $0x84] sm:$0xf]  ;;  %v2267_v14 = vsel %vm8819_vm11, %v2262_v53, %v2266_v62  ;;  %v3293_v62 = vunpack.c.l.b16 %v3226_v4 }
 0x24a   : > { %v3236_v39 = vsel %vm8819_vm11, %v3231_v51, %v3235_v31  ;;  %v3238_v6 = vshrl.u32 %v3018_v45, 16  ;;  %v3241_v49 = vshll.u32 %v3018_v45, 16  ;;  %v2325_v53 = vunpack.c.l.b16 %v2267_v14 }
 0x24b   : > { %v1738_v50 = vpop.f32.mrf.mxu0  ;;  %v2257_v43 = vsel %vm8819_vm11, %v2252_v9, %v9399_v37  ;;  %v3294_v13 = vunpack.c.l.b16 %v3236_v39 }
 0x24c   : > { %v1994_v60 = vpop.f32.mrf.mxu3  ;;  %v9416_v21 = vadd.f32 %v1738_v50, %v8995_v35  ;;  %v2049_v35 = vld [vmem:[#allocation2 + $0x78] sm:$0xf]  ;;  %v2278_v50 = vshll.u32 %v9405_v57, 16  ;;  %v2324_v22 = vunpack.c.l.b16 %v2257_v43 }
 0x24d   : > { %v9413_v17 = vadd.f32 %v1994_v60, %v9252_v33  ;;  %v2583_v33 = vrot.slane %v9418_v47, 5  ;;  %v9435_v60 = vld [vmem:[#allocation2 + $0x88] sm:$0xf]  ;;  %v2269_v54 = vshrl.u32 %v2049_v35, 16  ;;  %v2272_v5 = vshll.u32 %v2049_v35, 16 }
 0x24e   : > { %2439 = vmatmul.bf16.gmra.mxu0 %v2335_v25  ;;  %v3251_v9 = vshrl.u32 %v9435_v60, 16  ;;  %v2280_v51 = vrot.slane %v2278_v50, 5  ;;  %v3243_v35 = vrot.slane %v3241_v49, 5 }
 0x24f   : > { %v2584_v27 = vsel %vm8859_vm14, %v2582_v7, %v2583_v33  ;;  %v3247_v7 = vshll.u32 %v9435_v60, 16  ;;  %v2274_v33 = vrot.slane %v2272_v5, 5 }
 0x250   : > { %v2620_v16 = vunpack.c.l.b16 %v2584_v27  ;;  %v3253_v27 = vrot.slane %v3251_v9, 4  ;;  %v2003_v9 = vadd.f32 %v9042_v23, %v9351_v48  ;;  %v10269_v23 = vld [vmem:[#allocation47_spill] sm:$0xff] }
 0x251   : > { %3408 = vmatmul.bf16.gmra.mxu3 %v3304_v59  ;;  %v2282_v59 = vshrl.u32 %v9405_v57, 16  ;;  %v3249_v57 = vrot.slane %v3247_v7, 5  ;;  %v2004_v48 = vadd.f32 %v10269_v23, %v9371_v3 }
 0x252   : > { %v2630_v36 = vpack.c.b16 %v2620_v16, %v2619_v52  ;;  %v3240_v52 = vrot.slane %v3238_v6, 4  ;;  %v9448_v16 = vld [vmem:[#allocation2 + $0x8c] sm:$0x1] }
 0x253   : > { %v1740_v37 = vpop.f32.mrf.mxu0  ;;  %v2284_v31 = vrot.slane %v2282_v59, 4  ;;  %v3254_v50 = vor.u32 %v3253_v27, %v3249_v57  ;;  %v3257_v59 = vshll.u32 %v9448_v16, 16 }
 0x254   : > { %v1997_v25 = vpop.f32.mrf.mxu3  ;;  %v9444_v58 = vadd.f32 %v1740_v37, %v1475_v56  ;;  %2742 = vmatmul.bf16.gmra.mxu1 %v2630_v36  ;;  %v2002_v56 = vadd.f32 %v9026_v40, %v9321_v29  ;;  %v3305_v36 = vpack.c.b16 %v3294_v13, %v3293_v62  ;;  %v3244_v37 = vor.u32 %v3243_v35, %v3240_v52 }
 0x255   : > { %v9440_v30 = vadd.f32 %v1997_v25, %v9277_v28  ;;  %v2271_v28 = vrot.slane %v2269_v54, 4  ;;  %v2336_v25 = vpack.c.b16 %v2325_v53, %v2324_v22  ;;  %v2285_v39 = vor.u32 %v2284_v31, %v2280_v51 }
 0x256   : > { %v2288_v54 = vshll.u32 %v9418_v47, 16  ;;  %v3245_v49 = vrot.slane %v3244_v37, 4  ;;  %v3255_v7 = vrot.slane %v3254_v50, 4  ;;  %v10270_v37 = vld [vmem:[#allocation48_spill] sm:$0xff] }
 0x257   : > { %v2275_v4 = vor.u32 %v2274_v33, %v2271_v28  ;;  %v2286_v40 = vrot.slane %v2285_v39, 4  ;;  %v7939_v39 = vld [vmem:[#allocation2 + $0x20] sm:$0x1]  ;;  %v2005_v50 = vadd.f32 %v10270_v37, %v9395_v24  ;;  %v3445_v24 = vld [vmem:[#allocation2 + $0x24] sm:$0xe] }
 0x258   : > { %v2290_v29 = vrot.slane %v2288_v54, 5  ;;  %v3250_v13 = vsel %vm8819_vm11, %v3245_v49, %v3249_v57  ;;  %v3489_v54 = vrot.slane %v7939_v39, 5  ;;  %v10273_v39 = vld [vmem:[#allocation51_spill] sm:$0xff]  ;;  %v3446_v37 = vld [vmem:[#allocation2 + $0x30] sm:$0xe] }
 0x259   : > { %v2276_v6 = vrot.slane %v2275_v4, 4  ;;  %v3295_v52 = vunpack.c.l.b16 %v3250_v13 }
 0x25a   : > { %v2291_v53 = vsel %vm8819_vm11, %v2286_v40, %v2290_v29 }
 0x25b   : > { %v2405_v14 = vpop.f32.mrf.mxu0  ;;  %v2281_v47 = vsel %vm8819_vm11, %v2276_v6, %v2280_v51  ;;  %v2327_v31 = vunpack.c.l.b16 %v2291_v53 }
 0x25c   : > { %v1999_v45 = vpop.f32.mrf.mxu3  ;;  %v9456_v5 = vadd.f32 %v2405_v14, %v2002_v56  ;;  %v2326_v33 = vunpack.c.l.b16 %v2281_v47  ;;  %v7938_v56 = vld [vmem:[#allocation2 + $0x1c] sm:$0xf]  ;;  %v3444_v14 = vld [vmem:[#allocation2 + $0x18] sm:$0xe]  ;;  %v7940_v47 = vld [vmem:[#allocation2 + $0x28] sm:$0xf] }
 0x25d   : > { %v9453_v43 = vadd.f32 %v1999_v45, %v9306_v26  ;;  %v3259_v26 = vrot.slane %v3257_v59, 5  ;;  %v7149_v57 = vrot.slane %v3444_v14, 9  ;;  %v3493_v53 = vrot.slane %v7940_v47, 5 }
 0x25e   : > { %2444 = vmatmul.bf16.gmra.mxu0 %v2336_v25  ;;  %v2337_v27 = vpack.c.b16 %v2327_v31, %v2326_v33  ;;  %v3486_v25 = vrot.slane %v7938_v56, 5  ;;  %v7941_v31 = vld [vmem:[#allocation2 + $0x2c] sm:$0x1] }
 0x25f   : > { %v3260_v28 = vsel %vm8819_vm11, %v3255_v7, %v3259_v26  ;;  %v10271_v7 = vld [vmem:[#allocation49_spill] sm:$0xff]  ;;  %v3495_v33 = vrot.slane %v3493_v53, 4 }
 0x260   : > { %v3296_v35 = vunpack.c.l.b16 %v3260_v28  ;;  %v3488_v4 = vrot.slane %v3486_v25, 4  ;;  %v3487_v3 = vsel %vm8859_vm14, %v7149_v57, %v3486_v25  ;;  %v2006_v26 = vadd.f32 %v10271_v7, %v9416_v21  ;;  %v7942_v57 = vld [vmem:[#allocation2 + $0x34] sm:$0xf] }
 0x261   : > { %3413 = vmatmul.bf16.gmra.mxu3 %v3305_v36  ;;  %v3570_v29 = vunpack.c.l.b16 %v3487_v3  ;;  %v7150_v28 = vrot.slane %v3445_v24, 9 }
 0x262   : > { %v3306_v45 = vpack.c.b16 %v3296_v35, %v3295_v52  ;;  %v3490_v6 = vsel %vm8859_vm14, %v3488_v4, %v3489_v54  ;;  %v3496_v52 = vrot.slane %v7941_v31, 5  ;;  %v10272_v35 = vld [vmem:[#allocation50_spill] sm:$0xff]  ;;  %v3500_v4 = vrot.slane %v7942_v57, 5 }
 0x263   : > { %v2407_v22 = vpop.f32.mrf.mxu0  ;;  %v3571_v49 = vunpack.c.l.b16 %v3490_v6  ;;  %v2007_v23 = vadd.f32 %v10272_v35, %v9444_v58  ;;  %v7151_v58 = vrot.slane %v3446_v37, 9  ;;  %v7945_v35 = vld [vmem:[#allocation2 + $0x44] sm:$0x1] }
 0x264   : > { %v9465_v62 = vadd.f32 %v2407_v22, %v2003_v9  ;;  %v3497_v21 = vsel %vm8859_vm14, %v3495_v33, %v3496_v52  ;;  %v3447_v33 = vld [vmem:[#allocation2 + $0x3c] sm:$0xe] }
 0x265   : > { %v3590_v9 = vpack.c.b16 %v3571_v49, %v3570_v29  ;;  %v3573_v56 = vunpack.c.l.b16 %v3497_v21  ;;  %v3501_v29 = vsel %vm8859_vm14, %v7151_v58, %v3500_v4  ;;  %v7152_v31 = vrot.slane %v3447_v33, 9 }
 0x266   : > { %v3517_v58 = vrot.slane %v9214_v1, 5  ;;  %v3449_v1 = vld [vmem:[#allocation2 + $0x54] sm:$0xe] }
 0x26b   : > { %v2410_v51 = vpop.f32.mrf.mxu0 }
 0x26c   : > { %v9473_v36 = vadd.f32 %v2410_v51, %v2004_v48 }
 0x26e   : > { %2449 = vmatmul.bf16.gmra.mxu0 %v2337_v27  ;;  %v3494_v27 = vsel %vm8859_vm14, %v7150_v28, %v3493_v53  ;;  %v7944_v53 = vld [vmem:[#allocation2 + $0x40] sm:$0xf] }
 0x26f   : > { %v3507_v24 = vrot.slane %v7944_v53, 5  ;;  %v3524_v53 = vrot.slane %v9256_v10, 5  ;;  %v3450_v10 = vld [vmem:[#allocation2 + $0x60] sm:$0xe] }
 0x271   : > { %3418 = vmatmul.bf16.gmra.mxu3 %v3306_v45  ;;  %v3572_v45 = vunpack.c.l.b16 %v3494_v27  ;;  %v3509_v52 = vrot.slane %v3507_v24, 4 }
 0x273   : > { %v2412_v59 = vpop.f32.mrf.mxu0  ;;  %v3591_v25 = vpack.c.b16 %v3573_v56, %v3572_v45 }
 0x274   : > { %v9481_v40 = vadd.f32 %v2412_v59, %v2005_v50  ;;  %v3502_v50 = vrot.slane %v3500_v4, 4  ;;  %v7943_v59 = vld [vmem:[#allocation2 + $0x38] sm:$0x1]  ;;  %v3448_v4 = vld [vmem:[#allocation2 + $0x48] sm:$0xe] }
 0x275   : > { %v3503_v3 = vrot.slane %v7943_v59, 5 }
 0x277   : > { %v3504_v49 = vsel %vm8859_vm14, %v3502_v50, %v3503_v3 }
 0x27b   : > { %v2415_v22 = vpop.f32.mrf.mxu0 }
 0x27c   : > { %v9485_v13 = vadd.f32 %v2415_v22, %v2006_v26  ;;  %v3574_v26 = vunpack.c.l.b16 %v3501_v29 }
 0x27e   : > { %3666 = vmatmul.bf16.vlgmr.msrb.gmra.mxu0 %v3590_v9  ;;  %v3575_v9 = vunpack.c.l.b16 %v3504_v49  ;;  %v10274_v49 = vld [vmem:[#allocation52_spill] sm:$0xff] }
 0x280   : > { %v3592_v22 = vpack.c.b16 %v3575_v9, %v3574_v26  ;;  %v3521_v26 = vrot.slane %v10274_v49, 5 }
 0x283   : > { %v2417_v48 = vpop.f32.mrf.mxu0 }
 0x284   : > { %v9493_v51 = vadd.f32 %v2417_v48, %v2007_v23  ;;  %v3510_v23 = vrot.slane %v7945_v35, 5 }
 0x286   : > { %v3511_v27 = vsel %vm8859_vm14, %v3509_v52, %v3510_v23 }
 0x287   : > { %v3577_v56 = vunpack.c.l.b16 %v3511_v27 }
 0x28b   : > { %v2420_v14 = vpop.f32.mrf.mxu0 }
 0x28c   : > { %v9496_v54 = vadd.f32 %v2420_v14, %v10273_v39  ;;  %v3514_v14 = vrot.slane %v9183_v38, 5  ;;  %v7153_v39 = vrot.slane %v3448_v4, 9 }
 0x28e   : > { %3671 = vmatmul.bf16.gmra.mxu0 %v3591_v25  ;;  %v3516_v37 = vrot.slane %v3514_v14, 4 }
 0x290   : > { %v3518_v59 = vsel %vm8859_vm14, %v3516_v37, %v3517_v58 }
 0x293   : > { %v2422_v6 = vpop.f32.mrf.mxu0 }
 0x294   : > { %v9503_v7 = vadd.f32 %v2422_v6, %v9167_v18  ;;  %v3508_v18 = vsel %vm8859_vm14, %v7152_v31, %v3507_v24  ;;  %v3579_v6 = vunpack.c.l.b16 %v3518_v59 }
 0x295   : > { %v3576_v45 = vunpack.c.l.b16 %v3508_v18  ;;  %v3528_v18 = vrot.slane %v9279_v63, 5 }
 0x29b   : > { %v2425_v47 = vpop.f32.mrf.mxu0 }
 0x29c   : > { %v9506_v28 = vadd.f32 %v2425_v47, %v9191_v15  ;;  %v3593_v15 = vpack.c.b16 %v3577_v56, %v3576_v45  ;;  %v3523_v47 = vrot.slane %v3521_v26, 4  ;;  %v2921_v45 = vpop.f32.mrf.mxu2  ;;  %v7155_v56 = vrot.slane %v3450_v10, 9 }
 0x29e   : > { %3676 = vmatmul.bf16.gmra.mxu0 %v3592_v22  ;;  %v7154_v22 = vrot.slane %v3449_v1, 9  ;;  %v3525_v33 = vsel %vm8859_vm14, %v3523_v47, %v3524_v53  ;;  %v3538_v1 = vrot.slane %v9357_v2, 5 }
 0x29f   : > { %v3581_v35 = vunpack.c.l.b16 %v3525_v33 }
 0x2a3   : > { %v2427_v48 = vpop.f32.mrf.mxu0 }
 0x2a4   : > { %v9513_v21 = vadd.f32 %v2427_v48, %v9218_v11  ;;  %v3515_v11 = vsel %vm8859_vm14, %v7153_v39, %v3514_v14  ;;  %v3374_v14 = vpop.f32.mrf.mxu3  ;;  %v3529_v39 = vsel %vm8859_vm14, %v7155_v56, %v3528_v18 }
 0x2a5   : > { %v3578_v38 = vunpack.c.l.b16 %v3515_v11 }
 0x2ab   : > { %v2430_v25 = vpop.f32.mrf.mxu0 }
 0x2ac   : > { %v9517_v57 = vadd.f32 %v2430_v25, %v9242_v55  ;;  %v3594_v55 = vpack.c.b16 %v3579_v6, %v3578_v38  ;;  %v3531_v25 = vrot.slane %v9308_v44, 5  ;;  %v3376_v59 = vpop.f32.mrf.mxu3  ;;  %v3535_v44 = vrot.slane %v9342_v0, 5 }
 0x2ae   : > { %3681 = vmatmul.bf16.gmra.mxu0 %v3593_v15  ;;  %v3530_v15 = vrot.slane %v3528_v18, 4  ;;  %v3452_v18 = vld [vmem:[#allocation2 + $0x78] sm:$0xe] }
 0x2b0   : > { %v3532_v37 = vsel %vm8859_vm14, %v3530_v15, %v3531_v25  ;;  %v3545_v15 = vrot.slane %v9403_v20, 5 }
 0x2b1   : > { %v3583_v58 = vunpack.c.l.b16 %v3532_v37 }
 0x2b3   : > { %v2432_v50 = vpop.f32.mrf.mxu0 }
 0x2b4   : > { %v9525_v3 = vadd.f32 %v2432_v50, %v9268_v12  ;;  %v3522_v12 = vsel %vm8859_vm14, %v7154_v22, %v3521_v26  ;;  %v2923_v50 = vpop.f32.mrf.mxu2  ;;  %v3537_v26 = vrot.slane %v3535_v44, 4 }
 0x2b5   : > { %v3580_v52 = vunpack.c.l.b16 %v3522_v12 }
 0x2b6   : > { %v3539_v53 = vsel %vm8859_vm14, %v3537_v26, %v3538_v1  ;;  %v3549_v26 = vrot.slane %v9435_v60, 5 }
 0x2b7   : > { %v3595_v23 = vpack.c.b16 %v3581_v35, %v3580_v52  ;;  %v3585_v12 = vunpack.c.l.b16 %v3539_v53  ;;  %v3552_v53 = vrot.slane %v9448_v16, 5 }
 0x2bb   : > { %v2435_v29 = vpop.f32.mrf.mxu0 }
 0x2bc   : > { %v9529_v9 = vadd.f32 %v2435_v29, %v9294_v46  ;;  %v2698_v46 = vpop.f32.mrf.mxu1 }
 0x2be   : > { %3686 = vmatmul.bf16.gmra.mxu0 %v3594_v55  ;;  %v3451_v55 = vld [vmem:[#allocation2 + $0x6c] sm:$0xe] }
 0x2bf   : > { %v7156_v49 = vrot.slane %v3451_v55, 9 }
 0x2c1   : > { %v3536_v47 = vsel %vm8859_vm14, %v7156_v49, %v3535_v44 }
 0x2c3   : > { %v2437_v24 = vpop.f32.mrf.mxu0 }
 0x2c4   : > { %v9537_v31 = vadd.f32 %v2437_v24, %v9318_v41  ;;  %v2700_v41 = vpop.f32.mrf.mxu1  ;;  %v3584_v24 = vunpack.c.l.b16 %v3536_v47 }
 0x2c6   : > { %v3597_v52 = vpack.c.b16 %v3585_v12, %v3584_v24 }
 0x2cb   : > { %v2440_v48 = vpop.f32.mrf.mxu0 }
 0x2cc   : > { %v9541_v27 = vadd.f32 %v2440_v48, %v9347_v34  ;;  %v3582_v34 = vunpack.c.l.b16 %v3529_v39  ;;  %v2703_v29 = vpop.f32.mrf.mxu1 }
 0x2ce   : > { %3691 = vmatmul.bf16.gmra.mxu0 %v3595_v23  ;;  %v3596_v11 = vpack.c.b16 %v3583_v58, %v3582_v34  ;;  %v3542_v23 = vrot.slane %v9376_v32, 5 }
 0x2d0   : > { %v3544_v56 = vrot.slane %v3542_v23, 4 }
 0x2d2   : > { %v3546_v32 = vsel %vm8859_vm14, %v3544_v56, %v3545_v15 }
 0x2d3   : > { %v2442_v4 = vpop.f32.mrf.mxu0 }
 0x2d4   : > { %v9549_v63 = vadd.f32 %v2442_v4, %v9366_v42  ;;  %v2926_v42 = vpop.f32.mrf.mxu2  ;;  %v9565_v33 = vpop.f32.mrf.mxu1  ;;  %v2748_v4 = vadd.f32 %v2698_v46, %v9456_v5  ;;  %v2749_v5 = vadd.f32 %v2700_v41, %v9465_v62  ;;  %v9594_v46 = vld [vmem:[%s10275_s9] ss:$0 sm:$0xff]  ;;  %v3551_v41 = vrot.slane %v3549_v26, 4 }
 0x2d6   : > { %v2971_v58 = vadd.f32 %v2921_v45, %v2748_v4  ;;  %v3453_v45 = vld [vmem:[#allocation2 + $0x84] sm:$0xe] }
 0x2d7   : > { %v7158_v62 = vrot.slane %v3453_v45, 9 }
 0x2d8   : > { %v3424_v44 = vadd.f32 %v3374_v14, %v2971_v58 }
 0x2db   : > { %v2445_v38 = vpop.f32.mrf.mxu0 }
 0x2dc   : > { %v9553_v6 = vadd.f32 %v2445_v38, %v9385_v19  ;;  %v9563_v19 = vpop.f32.mrf.mxu3  ;;  %v9567_v35 = vpop.f32.mrf.mxu2  ;;  %v3587_v38 = vunpack.c.l.b16 %v3546_v32  ;;  %v4041_v32 = vld [vmem:[#allocation3] sm:$0xf] }
 0x2dd   : > { %v9576_v25 = vpop.f32.mrf.mxu1 }
 0x2de   : > { %3696 = vmatmul.bf16.gmra.mxu0 %v3596_v11 }
 0x2e3   : > { %v2447_v22 = vpop.f32.mrf.mxu0 }
 0x2e4   : > { %v9561_v0 = vadd.f32 %v2447_v22, %v9413_v17  ;;  %v9573_v10 = vpop.f32.mrf.mxu3  ;;  %v7157_v17 = vrot.slane %v3452_v18, 9  ;;  %v9586_v34 = vpop.f32.mrf.mxu2  ;;  %v2972_v22 = vadd.f32 %v2923_v50, %v2749_v5  ;;  %v3550_v50 = vsel %vm8859_vm14, %v7158_v62, %v3549_v26 }
 0x2e5   : > { %v9596_v49 = vpop.f32.mrf.mxu1  ;;  %v2751_v5 = vadd.f32 %v9565_v33, %v9481_v40 }
 0x2e6   : > { %v3543_v37 = vsel %vm8859_vm14, %v7157_v17, %v3542_v23  ;;  %v3425_v12 = vadd.f32 %v3376_v59, %v2972_v22  ;;  %v3553_v17 = vsel %vm8859_vm14, %v3551_v41, %v3552_v53 }
 0x2e7   : > { %v3586_v11 = vunpack.c.l.b16 %v3543_v37  ;;  %v2974_v41 = vadd.f32 %v9567_v35, %v2751_v5 }
 0x2e9   : > { %v3598_v55 = vpack.c.b16 %v3587_v38, %v3586_v11 }
 0x2eb   : > { %v2450_v2 = vpop.f32.mrf.mxu0 }
 0x2ec   : > { %v9571_v48 = vadd.f32 %v2450_v2, %v9440_v30  ;;  %v9588_v20 = vpop.f32.mrf.mxu3  ;;  %v9600_v14 = vpop.f32.mrf.mxu2 }
 0x2ed   : > { %v9610_v15 = vpop.f32.mrf.mxu1 }
 0x2ee   : > { %3701 = vmatmul.bf16.gmra.mxu0 %v3597_v52  ;;  %v2750_v52 = vadd.f32 %v2703_v29, %v9473_v36  ;;  %v3589_v36 = vunpack.c.l.b16 %v3553_v17 }
 0x2f0   : > { %v2973_v4 = vadd.f32 %v2926_v42, %v2750_v52 }
 0x2f3   : > { %v2452_v39 = vpop.f32.mrf.mxu0 }
 0x2f4   : > { %v9584_v30 = vadd.f32 %v2452_v39, %v9453_v43  ;;  %v9604_v23 = vpop.f32.mrf.mxu3  ;;  %v3588_v39 = vunpack.c.l.b16 %v3550_v50  ;;  %v9613_v11 = vpop.f32.mrf.mxu2  ;;  %v2752_v50 = vadd.f32 %v9576_v25, %v9485_v13 }
 0x2fb   : > { %v3667_v43 = vpop.f32.mrf.mxu0 }
 0x2fc   : > { %v3717_v1 = vadd.f32 %v3667_v43, %v3424_v44  ;;  %v3426_v44 = vadd.f32 %v9563_v19, %v2973_v4  ;;  %v3599_v43 = vpack.c.b16 %v3589_v36, %v3588_v39  ;;  %v9624_v19 = vpop.f32.mrf.mxu1  ;;  %v9629_v35 = vpop.f32.mrf.mxu2 }
 0x2fe   : > { %v3741_v47 = vadd.f32 %v9594_v46, %v3717_v1  ;;  %3706 = vmatmul.bf16.gmra.mxu0 %v3598_v55 }
 0x300   : > { %vm3761_vm15 = vcmp.gt.f32.partialorder %v3741_v47, 0.0  ;;  %v3781_v24 = vmul.f32 0.01, %v3741_v47 }
 0x302   : > { %v3801_v2 = vsel %vm3761_vm15, %v3741_v47, %v3781_v24  ;;  %v9620_v47 = vpop.f32.mrf.mxu3  ;;  %v4045_v24 = vld [vmem:[#allocation3 + $0x8] sm:$0x1] }
 0x303   : > { %v3821_v60 = vpack.c.bf16 %v3801_v2, %v3801_v2  ;;  %v3669_v18 = vpop.f32.mrf.mxu0 }
 0x304   : > { %v3718_v56 = vadd.f32 %v3669_v18, %v3425_v12  ;;  %v3427_v18 = vadd.f32 %v9573_v10, %v2974_v41  ;;  %v2975_v10 = vadd.f32 %v9586_v34, %v2752_v50  ;;  %v9639_v5 = vpop.f32.mrf.mxu1  ;;  %v9646_v41 = vpop.f32.mrf.mxu2  ;;  %v2754_v50 = vadd.f32 %v9610_v15, %v9496_v54 }
 0x305   : > { %v3842_v16 = vshrl.u32 %v3821_v60, 16  ;;  %v3845_v37 = vshll.u32 %v3821_v60, 16 }
 0x306   : > { %v3742_v59 = vadd.f32 %v9594_v46, %v3718_v56 }
 0x307   : > { %v3844_v29 = vrot.slane %v3842_v16, 7 }
 0x308   : > { %vm3762_vm0 = vcmp.gt.f32.partialorder %v3742_v59, 0.0  ;;  %v3782_v58 = vmul.f32 0.01, %v3742_v59 }
 0x309   : > { %v3847_v38 = vor.u32 %v3845_v37, %v3844_v29  ;;  %v3848_v52 = vrot.slane %v3844_v29, 4 }
 0x30a   : > { %v3802_v55 = vsel %vm3762_vm0, %v3742_v59, %v3782_v58  ;;  %v9637_v13 = vpop.f32.mrf.mxu3 }
 0x30b   : > { %v4042_v26 = vsel %vm8440_vm5, %v3847_v38, %v4041_v32  ;;  %v3822_v1 = vpack.c.bf16 %v3802_v55, %v3802_v55  ;;  %v3672_v45 = vpop.f32.mrf.mxu0  ;;  %v4048_v38 = vld [vmem:[#allocation3 + $0xc] sm:$0xf] }
 0x30c   : > { %4043 = vst [vmem:[#allocation3] sm:$0xf] %v4042_v26  ;;  %v3719_v22 = vadd.f32 %v3672_v45, %v3426_v44  ;;  %v2753_v26 = vadd.f32 %v9596_v49, %v9493_v51 }
 0x30d   : > { %v3850_v62 = vshrl.u32 %v3822_v1, 16  ;;  %v3853_v33 = vshll.u32 %v3822_v1, 16 }
 0x30e   : > { %v3743_v53 = vadd.f32 %v9594_v46, %v3719_v22  ;;  %3711 = vmatmul.bf16.gmra.mxu0 %v3599_v43  ;;  %v3428_v43 = vadd.f32 %v9588_v20, %v2975_v10  ;;  %v2977_v10 = vadd.f32 %v9613_v11, %v2754_v50 }
 0x30f   : > { %v3852_v40 = vrot.slane %v3850_v62, 7 }
 0x310   : > { %vm3763_vm1 = vcmp.gt.f32.partialorder %v3743_v53, 0.0  ;;  %v3783_v12 = vmul.f32 0.01, %v3743_v53 }
 0x311   : > { %v3855_v2 = vor.u32 %v3853_v33, %v3852_v40  ;;  %v3857_v60 = vrot.slane %v3852_v40, 4  ;;  %v2976_v40 = vadd.f32 %v9600_v14, %v2753_v26 }
 0x312   : > { %v3803_v17 = vsel %vm3763_vm1, %v3743_v53, %v3783_v12  ;;  %v4052_v12 = vld [vmem:[#allocation3 + $0x14] sm:$0x1]  ;;  %v9650_v49 = vpop.f32.mrf.mxu3 }
 0x313   : > { %v3856_v16 = vsel %vm8629_vm7, %v3848_v52, %v3855_v2  ;;  %v4046_v59 = vsel %vm8428_vm4, %v3857_v60, %v4045_v24  ;;  %v3823_v39 = vpack.c.bf16 %v3803_v17, %v3803_v17  ;;  %v3674_v36 = vpop.f32.mrf.mxu0 }
 0x314   : > { %4044 = vst [vmem:[#allocation3 + $0x4] sm:$0xf] %v3856_v16  ;;  %v3720_v29 = vadd.f32 %v3674_v36, %v3427_v18  ;;  %v3429_v18 = vadd.f32 %v9604_v23, %v2976_v40  ;;  %v2720_v16 = vpop.f32.mrf.mxu1 }
 0x315   : > { %4047 = vst [vmem:[#allocation3 + $0x8] sm:$0x1] %v4046_v59  ;;  %v3859_v37 = vshrl.u32 %v3823_v39, 16  ;;  %v3862_v58 = vshll.u32 %v3823_v39, 16 }
 0x316   : > { %v3744_v32 = vadd.f32 %v9594_v46, %v3720_v29 }
 0x317   : > { %v3861_v25 = vrot.slane %v3859_v37, 7 }
 0x318   : > { %vm3764_vm2 = vcmp.gt.f32.partialorder %v3744_v32, 0.0  ;;  %v3784_v44 = vmul.f32 0.01, %v3744_v32 }
 0x319   : > { %v3864_v55 = vor.u32 %v3862_v58, %v3861_v25  ;;  %v3865_v52 = vrot.slane %v3861_v25, 4  ;;  %v4055_v25 = vld [vmem:[#allocation3 + $0x18] sm:$0xf] }
 0x31a   : > { %v3804_v1 = vsel %vm3764_vm2, %v3744_v32, %v3784_v44  ;;  %v2943_v32 = vpop.f32.mrf.mxu2  ;;  %v3430_v44 = vadd.f32 %v9620_v47, %v2977_v10  ;;  %v3396_v26 = vpop.f32.mrf.mxu3 }
 0x31b   : > { %v4049_v34 = vsel %vm8440_vm5, %v3864_v55, %v4048_v38  ;;  %v3824_v45 = vpack.c.bf16 %v3804_v1, %v3804_v1  ;;  %v3677_v22 = vpop.f32.mrf.mxu0  ;;  %v2755_v55 = vadd.f32 %v9624_v19, %v9503_v7 }
 0x31c   : > { %4050 = vst [vmem:[#allocation3 + $0xc] sm:$0xf] %v4049_v34  ;;  %v3721_v62 = vadd.f32 %v3677_v22, %v3428_v43  ;;  %v2723_v22 = vpop.f32.mrf.mxu1 }
 0x31d   : > { %v3867_v53 = vshrl.u32 %v3824_v45, 16  ;;  %v3870_v20 = vshll.u32 %v3824_v45, 16 }
 0x31e   : > { %v3745_v33 = vadd.f32 %v9594_v46, %v3721_v62 }
 0x31f   : > { %v3869_v24 = vrot.slane %v3867_v53, 7  ;;  %v2978_v53 = vadd.f32 %v9629_v35, %v2755_v55 }
 0x320   : > { %vm3765_vm3 = vcmp.gt.f32.partialorder %v3745_v33, 0.0  ;;  %v3785_v51 = vmul.f32 0.01, %v3745_v33 }
 0x321   : > { %v3872_v2 = vor.u32 %v3870_v20, %v3869_v24  ;;  %v3874_v60 = vrot.slane %v3869_v24, 4  ;;  %v4059_v24 = vld [vmem:[#allocation3 + $0x20] sm:$0x1] }
 0x322   : > { %v3805_v17 = vsel %vm3765_vm3, %v3745_v33, %v3785_v51  ;;  %v2946_v19 = vpop.f32.mrf.mxu2 }
 0x323   : > { %v3873_v14 = vsel %vm8629_vm7, %v3865_v52, %v3872_v2  ;;  %v4053_v59 = vsel %vm8428_vm4, %v3874_v60, %v4052_v12  ;;  %v3825_v39 = vpack.c.bf16 %v3805_v17, %v3805_v17  ;;  %v3679_v36 = vpop.f32.mrf.mxu0  ;;  %v3431_v52 = vadd.f32 %v9637_v13, %v2978_v53  ;;  %v4066_v53 = vld [vmem:[#allocation3 + $0x2c] sm:$0x1] }
 0x324   : > { %4051 = vst [vmem:[#allocation3 + $0x10] sm:$0xf] %v3873_v14  ;;  %v3722_v29 = vadd.f32 %v3679_v36, %v3429_v18  ;;  %v2756_v2 = vadd.f32 %v9639_v5, %v9506_v28 }
 0x325   : > { %4054 = vst [vmem:[#allocation3 + $0x14] sm:$0x1] %v4053_v59  ;;  %v3876_v37 = vshrl.u32 %v3825_v39, 16  ;;  %v3879_v15 = vshll.u32 %v3825_v39, 16  ;;  %v3399_v59 = vpop.f32.mrf.mxu3 }
 0x326   : > { %v3746_v23 = vadd.f32 %v9594_v46, %v3722_v29  ;;  %v2979_v36 = vadd.f32 %v9646_v41, %v2756_v2  ;;  %v2725_v29 = vpop.f32.mrf.mxu1 }
 0x327   : > { %v3878_v54 = vrot.slane %v3876_v37, 7  ;;  %v4062_v37 = vld [vmem:[#allocation3 + $0x24] sm:$0xf] }
 0x328   : > { %vm3766_vm6 = vcmp.gt.f32.partialorder %v3746_v23, 0.0  ;;  %v3786_v58 = vmul.f32 0.01, %v3746_v23 }
 0x329   : > { %v3881_v38 = vor.u32 %v3879_v15, %v3878_v54  ;;  %v3882_v20 = vrot.slane %v3878_v54, 4  ;;  %v3432_v54 = vadd.f32 %v9650_v49, %v2979_v36  ;;  %v2757_v15 = vadd.f32 %v2720_v16, %v9513_v21 }
 0x32a   : > { %v3806_v43 = vsel %vm3766_vm6, %v3746_v23, %v3786_v58  ;;  %v2948_v58 = vpop.f32.mrf.mxu2  ;;  %v2759_v36 = vadd.f32 %v2725_v29, %v9525_v3 }
 0x32b   : > { %v4056_v1 = vsel %vm8440_vm5, %v3881_v38, %v4055_v25  ;;  %v3826_v11 = vpack.c.bf16 %v3806_v43, %v3806_v43  ;;  %v3682_v34 = vpop.f32.mrf.mxu0 }
 0x32c   : > { %4057 = vst [vmem:[#allocation3 + $0x18] sm:$0xf] %v4056_v1  ;;  %v3723_v45 = vadd.f32 %v3682_v34, %v3430_v44  ;;  %v2980_v1 = vadd.f32 %v2943_v32, %v2757_v15 }
 0x32d   : > { %v3884_v62 = vshrl.u32 %v3826_v11, 16  ;;  %v3887_v47 = vshll.u32 %v3826_v11, 16  ;;  %v3401_v34 = vpop.f32.mrf.mxu3 }
 0x32e   : > { %v3747_v40 = vadd.f32 %v9594_v46, %v3723_v45  ;;  %v2728_v21 = vpop.f32.mrf.mxu1 }
 0x32f   : > { %v3886_v33 = vrot.slane %v3884_v62, 7 }
 0x330   : > { %vm3767_vm8 = vcmp.gt.f32.partialorder %v3747_v40, 0.0  ;;  %v3787_v7 = vmul.f32 0.01, %v3747_v40 }
 0x331   : > { %v3889_v12 = vor.u32 %v3887_v47, %v3886_v33  ;;  %v3891_v51 = vrot.slane %v3886_v33, 4  ;;  %v3433_v47 = vadd.f32 %v3396_v26, %v2980_v1  ;;  %v2760_v1 = vadd.f32 %v2728_v21, %v9529_v9  ;;  %v4076_v21 = vld [vmem:[#allocation3 + $0x3c] sm:$0xf] }
 0x332   : > { %v3807_v60 = vsel %vm3767_vm8, %v3747_v40, %v3787_v7  ;;  %v2951_v2 = vpop.f32.mrf.mxu2 }
 0x333   : > { %v3890_v35 = vsel %vm8629_vm7, %v3882_v20, %v3889_v12  ;;  %v4060_v18 = vsel %vm8428_vm4, %v3891_v51, %v4059_v24  ;;  %v3827_v50 = vpack.c.bf16 %v3807_v60, %v3807_v60  ;;  %v3684_v17 = vpop.f32.mrf.mxu0  ;;  %v2758_v24 = vadd.f32 %v2723_v22, %v9517_v57  ;;  %v4069_v57 = vld [vmem:[#allocation3 + $0x30] sm:$0xf] }
 0x334   : > { %4058 = vst [vmem:[#allocation3 + $0x1c] sm:$0xf] %v3890_v35  ;;  %v3724_v14 = vadd.f32 %v3684_v17, %v3431_v52 }
 0x335   : > { %4061 = vst [vmem:[#allocation3 + $0x20] sm:$0x1] %v4060_v18  ;;  %v3893_v39 = vshrl.u32 %v3827_v50, 16  ;;  %v3896_v5 = vshll.u32 %v3827_v50, 16  ;;  %v2981_v35 = vadd.f32 %v2946_v19, %v2758_v24  ;;  %v3404_v17 = vpop.f32.mrf.mxu3 }
 0x336   : > { %v3748_v13 = vadd.f32 %v9594_v46, %v3724_v14 }
 0x337   : > { %v3895_v28 = vrot.slane %v3893_v39, 7  ;;  %v3434_v39 = vadd.f32 %v3399_v59, %v2981_v35 }
 0x338   : > { %vm3768_vm9 = vcmp.gt.f32.partialorder %v3748_v13, 0.0  ;;  %v3788_v10 = vmul.f32 0.01, %v3748_v13 }
 0x339   : > { %v3898_v23 = vor.u32 %v3896_v5, %v3895_v28  ;;  %v3899_v16 = vrot.slane %v3895_v28, 4  ;;  %v2730_v28 = vpop.f32.mrf.mxu1 }
 0x33a   : > { %v3808_v25 = vsel %vm3768_vm9, %v3748_v13, %v3788_v10 }
 0x33b   : > { %v4063_v38 = vsel %vm8440_vm5, %v3898_v23, %v4062_v37  ;;  %v3828_v44 = vpack.c.bf16 %v3808_v25, %v3808_v25  ;;  %v3687_v41 = vpop.f32.mrf.mxu0  ;;  %v2953_v25 = vpop.f32.mrf.mxu2 }
 0x33c   : > { %4064 = vst [vmem:[#allocation3 + $0x24] sm:$0xf] %v4063_v38  ;;  %v3725_v55 = vadd.f32 %v3687_v41, %v3432_v54  ;;  %v2982_v54 = vadd.f32 %v2948_v58, %v2759_v36  ;;  %v4073_v41 = vld [vmem:[#allocation3 + $0x38] sm:$0x1] }
 0x33d   : > { %v3901_v43 = vshrl.u32 %v3828_v44, 16  ;;  %v3904_v62 = vshll.u32 %v3828_v44, 16 }
 0x33e   : > { %v3749_v11 = vadd.f32 %v9594_v46, %v3725_v55 }
 0x33f   : > { %v3903_v45 = vrot.slane %v3901_v43, 7  ;;  %v3435_v43 = vadd.f32 %v3401_v34, %v2982_v54 }
 0x340   : > { %vm3769_vm10 = vcmp.gt.f32.partialorder %v3749_v11, 0.0  ;;  %v3789_v49 = vmul.f32 0.01, %v3749_v11 }
 0x341   : > { %v3906_v40 = vor.u32 %v3904_v62, %v3903_v45  ;;  %v3908_v33 = vrot.slane %v3903_v45, 4  ;;  %v3406_v45 = vpop.f32.mrf.mxu3 }
 0x342   : > { %v3809_v7 = vsel %vm3769_vm10, %v3749_v11, %v3789_v49 }
 0x343   : > { %v3907_v20 = vsel %vm8629_vm7, %v3899_v16, %v3906_v40  ;;  %v4067_v32 = vsel %vm8428_vm4, %v3908_v33, %v4066_v53  ;;  %v3829_v12 = vpack.c.bf16 %v3809_v7, %v3809_v7  ;;  %v3689_v51 = vpop.f32.mrf.mxu0  ;;  %v2733_v40 = vpop.f32.mrf.mxu1 }
 0x344   : > { %4065 = vst [vmem:[#allocation3 + $0x28] sm:$0xf] %v3907_v20  ;;  %v3726_v52 = vadd.f32 %v3689_v51, %v3433_v47  ;;  %v2983_v47 = vadd.f32 %v2951_v2, %v2760_v1  ;;  %v2956_v20 = vpop.f32.mrf.mxu2  ;;  %v2761_v51 = vadd.f32 %v2730_v28, %v9537_v31 }
 0x345   : > { %4068 = vst [vmem:[#allocation3 + $0x2c] sm:$0x1] %v4067_v32  ;;  %v3910_v60 = vshrl.u32 %v3829_v12, 16  ;;  %v3913_v50 = vshll.u32 %v3829_v12, 16 }
 0x346   : > { %v3750_v18 = vadd.f32 %v9594_v46, %v3726_v52  ;;  %v3436_v12 = vadd.f32 %v3404_v17, %v2983_v47 }
 0x347   : > { %v3912_v26 = vrot.slane %v3910_v60, 7 }
 0x348   : > { %vm3770_vm12 = vcmp.gt.f32.partialorder %v3750_v18, 0.0  ;;  %v3790_v22 = vmul.f32 0.01, %v3750_v18 }
 0x349   : > { %v3915_v14 = vor.u32 %v3913_v50, %v3912_v26  ;;  %v3916_v3 = vrot.slane %v3912_v26, 4  ;;  %v3409_v26 = vpop.f32.mrf.mxu3 }
 0x34a   : > { %v3810_v13 = vsel %vm3770_vm12, %v3750_v18, %v3790_v22 }
 0x34b   : > { %v4070_v5 = vsel %vm8440_vm5, %v3915_v14, %v4069_v57  ;;  %v3830_v37 = vpack.c.bf16 %v3810_v13, %v3810_v13  ;;  %v3692_v10 = vpop.f32.mrf.mxu0  ;;  %v2984_v57 = vadd.f32 %v2953_v25, %v2761_v51  ;;  %v2735_v14 = vpop.f32.mrf.mxu1  ;;  %v4080_v13 = vld [vmem:[#allocation3 + $0x44] sm:$0x1] }
 0x34c   : > { %4071 = vst [vmem:[#allocation3 + $0x30] sm:$0xf] %v4070_v5  ;;  %v3727_v19 = vadd.f32 %v3692_v10, %v3434_v39  ;;  %v2762_v10 = vadd.f32 %v2733_v40, %v9541_v27 }
 0x34d   : > { %v3918_v23 = vshrl.u32 %v3830_v37, 16  ;;  %v3921_v44 = vshll.u32 %v3830_v37, 16  ;;  %v3437_v37 = vadd.f32 %v3406_v45, %v2984_v57 }
 0x34e   : > { %v3751_v15 = vadd.f32 %v9594_v46, %v3727_v19 }
 0x34f   : > { %v3920_v38 = vrot.slane %v3918_v23, 7  ;;  %v2958_v23 = vpop.f32.mrf.mxu2 }
 0x350   : > { %vm3771_vm13 = vcmp.gt.f32.partialorder %v3751_v15, 0.0  ;;  %v3791_v59 = vmul.f32 0.01, %v3751_v15 }
 0x351   : > { %v3923_v29 = vor.u32 %v3921_v44, %v3920_v38  ;;  %v3925_v55 = vrot.slane %v3920_v38, 4 }
 0x352   : > { %v3811_v11 = vsel %vm3771_vm13, %v3751_v15, %v3791_v59  ;;  %v2985_v59 = vadd.f32 %v2956_v20, %v2762_v10  ;;  %v4087_v20 = vld [vmem:[#allocation3 + $0x50] sm:$0x1] }
 0x353   : > { %v3924_v62 = vsel %vm8629_vm7, %v3916_v3, %v3923_v29  ;;  %v4074_v58 = vsel %vm8428_vm4, %v3925_v55, %v4073_v41  ;;  %v3831_v53 = vpack.c.bf16 %v3811_v11, %v3811_v11  ;;  %v3694_v49 = vpop.f32.mrf.mxu0  ;;  %v3411_v29 = vpop.f32.mrf.mxu3 }
 0x354   : > { %4072 = vst [vmem:[#allocation3 + $0x34] sm:$0xf] %v3924_v62  ;;  %v3728_v16 = vadd.f32 %v3694_v49, %v3435_v43  ;;  %v4083_v43 = vld [vmem:[#allocation3 + $0x48] sm:$0xf]  ;;  %v2738_v11 = vpop.f32.mrf.mxu1  ;;  %v3438_v62 = vadd.f32 %v3409_v26, %v2985_v59 }
 0x355   : > { %4075 = vst [vmem:[#allocation3 + $0x38] sm:$0x1] %v4074_v58  ;;  %v3927_v33 = vshrl.u32 %v3831_v53, 16  ;;  %v3930_v9 = vshll.u32 %v3831_v53, 16  ;;  %v2763_v58 = vadd.f32 %v2735_v14, %v9549_v63 }
 0x356   : > { %v3752_v34 = vadd.f32 %v9594_v46, %v3728_v16 }
 0x357   : > { %v3929_v24 = vrot.slane %v3927_v33, 7  ;;  %v2961_v47 = vpop.f32.mrf.mxu2 }
 0x358   : > { %vm3772_vm15 = vcmp.gt.f32.partialorder %v3752_v34, 0.0  ;;  %v3792_v7 = vmul.f32 0.01, %v3752_v34 }
 0x359   : > { %v3932_v32 = vor.u32 %v3930_v9, %v3929_v24  ;;  %v3933_v31 = vrot.slane %v3929_v24, 4  ;;  %v2986_v24 = vadd.f32 %v2958_v23, %v2763_v58 }
 0x35a   : > { %v3812_v52 = vsel %vm3772_vm15, %v3752_v34, %v3792_v7 }
 0x35b   : > { %v4077_v60 = vsel %vm8440_vm5, %v3932_v32, %v4076_v21  ;;  %v3832_v35 = vpack.c.bf16 %v3812_v52, %v3812_v52  ;;  %v3697_v18 = vpop.f32.mrf.mxu0 }
 0x35c   : > { %4078 = vst [vmem:[#allocation3 + $0x3c] sm:$0xf] %v4077_v60  ;;  %v3729_v2 = vadd.f32 %v3697_v18, %v3436_v12  ;;  %v3414_v12 = vpop.f32.mrf.mxu3  ;;  %v3439_v60 = vadd.f32 %v3411_v29, %v2986_v24 }
 0x35d   : > { %v3935_v50 = vshrl.u32 %v3832_v35, 16  ;;  %v3938_v36 = vshll.u32 %v3832_v35, 16  ;;  %v2764_v35 = vadd.f32 %v2738_v11, %v9553_v6 }
 0x35e   : > { %v3753_v22 = vadd.f32 %v9594_v46, %v3729_v2  ;;  %v2740_v2 = vpop.f32.mrf.mxu1 }
 0x35f   : > { %v3937_v39 = vrot.slane %v3935_v50, 7 }
 0x360   : > { %vm3773_vm0 = vcmp.gt.f32.partialorder %v3753_v22, 0.0  ;;  %v3793_v17 = vmul.f32 0.01, %v3753_v22 }
 0x361   : > { %v3940_v28 = vor.u32 %v3938_v36, %v3937_v39  ;;  %v3942_v5 = vrot.slane %v3937_v39, 4  ;;  %v2987_v36 = vadd.f32 %v2961_v47, %v2764_v35 }
 0x362   : > { %v3813_v19 = vsel %vm3773_vm0, %v3753_v22, %v3793_v17  ;;  %v2963_v17 = vpop.f32.mrf.mxu2 }
 0x363   : > { %v3941_v54 = vsel %vm8629_vm7, %v3933_v31, %v3940_v28  ;;  %v4081_v15 = vsel %vm8428_vm4, %v3942_v5, %v4080_v13  ;;  %v3833_v25 = vpack.c.bf16 %v3813_v19, %v3813_v19  ;;  %v3699_v38 = vpop.f32.mrf.mxu0  ;;  %v4090_v28 = vld [vmem:[#allocation3 + $0x54] sm:$0xf]  ;;  %v3440_v10 = vadd.f32 %v3414_v12, %v2987_v36  ;;  %v4097_v12 = vld [vmem:[#allocation3 + $0x60] sm:$0xf] }
 0x364   : > { %4079 = vst [vmem:[#allocation3 + $0x40] sm:$0xf] %v3941_v54  ;;  %v3730_v44 = vadd.f32 %v3699_v38, %v3437_v37  ;;  %v2765_v19 = vadd.f32 %v2740_v2, %v9561_v0  ;;  %v3416_v54 = vpop.f32.mrf.mxu3 }
 0x365   : > { %4082 = vst [vmem:[#allocation3 + $0x44] sm:$0x1] %v4081_v15  ;;  %v3944_v41 = vshrl.u32 %v3833_v25, 16  ;;  %v3947_v27 = vshll.u32 %v3833_v25, 16 }
 0x366   : > { %v3754_v3 = vadd.f32 %v9594_v46, %v3730_v44 }
 0x367   : > { %v3946_v55 = vrot.slane %v3944_v41, 7  ;;  %v2743_v41 = vpop.f32.mrf.mxu1 }
 0x368   : > { %vm3774_vm1 = vcmp.gt.f32.partialorder %v3754_v3, 0.0  ;;  %v3794_v1 = vmul.f32 0.01, %v3754_v3 }
 0x369   : > { %v3949_v45 = vor.u32 %v3947_v27, %v3946_v55  ;;  %v3950_v63 = vrot.slane %v3946_v55, 4 }
 0x36a   : > { %v3814_v53 = vsel %vm3774_vm1, %v3754_v3, %v3794_v1  ;;  %v2988_v3 = vadd.f32 %v2963_v17, %v2765_v19  ;;  %v2966_v0 = vpop.f32.mrf.mxu2 }
 0x36b   : > { %v4084_v49 = vsel %vm8440_vm5, %v3949_v45, %v4083_v43  ;;  %v3834_v16 = vpack.c.bf16 %v3814_v53, %v3814_v53  ;;  %v3702_v40 = vpop.f32.mrf.mxu0  ;;  %v4094_v43 = vld [vmem:[#allocation3 + $0x5c] sm:$0x1]  ;;  %v2766_v53 = vadd.f32 %v2743_v41, %v9571_v48 }
 0x36c   : > { %4085 = vst [vmem:[#allocation3 + $0x48] sm:$0xf] %v4084_v49  ;;  %v3731_v33 = vadd.f32 %v3702_v40, %v3438_v62  ;;  %v3441_v58 = vadd.f32 %v3416_v54, %v2988_v3  ;;  %v3419_v24 = vpop.f32.mrf.mxu3  ;;  %v4104_v3 = vld [vmem:[#allocation3 + $0x6c] sm:$0xf] }
 0x36d   : > { %v3952_v34 = vshrl.u32 %v3834_v16, 16  ;;  %v3955_v7 = vshll.u32 %v3834_v16, 16 }
 0x36e   : > { %v3755_v9 = vadd.f32 %v9594_v46, %v3731_v33 }
 0x36f   : > { %v3954_v21 = vrot.slane %v3952_v34, 7 }
 0x370   : > { %vm3775_vm2 = vcmp.gt.f32.partialorder %v3755_v9, 0.0  ;;  %v3795_v32 = vmul.f32 0.01, %v3755_v9 }
 0x371   : > { %v3957_v51 = vor.u32 %v3955_v7, %v3954_v21  ;;  %v3959_v52 = vrot.slane %v3954_v21, 4  ;;  %v2989_v21 = vadd.f32 %v2966_v0, %v2766_v53 }
 0x372   : > { %v3815_v18 = vsel %vm3775_vm2, %v3755_v9, %v3795_v32 }
 0x373   : > { %v3958_v26 = vsel %vm8629_vm7, %v3950_v63, %v3957_v51  ;;  %v4088_v50 = vsel %vm8428_vm4, %v3959_v52, %v4087_v20  ;;  %v3835_v57 = vpack.c.bf16 %v3815_v18, %v3815_v18  ;;  %v3704_v22 = vpop.f32.mrf.mxu0  ;;  %v2745_v20 = vpop.f32.mrf.mxu1  ;;  %v3442_v52 = vadd.f32 %v3419_v24, %v2989_v21 }
 0x374   : > { %4086 = vst [vmem:[#allocation3 + $0x4c] sm:$0xf] %v3958_v26  ;;  %v3732_v14 = vadd.f32 %v3704_v22, %v3439_v60  ;;  %v2767_v60 = vadd.f32 %v2745_v20, %v9584_v30  ;;  %v2968_v18 = vpop.f32.mrf.mxu2  ;;  %v3421_v36 = vpop.f32.mrf.mxu3 }
 0x375   : > { %4089 = vst [vmem:[#allocation3 + $0x50] sm:$0x1] %v4088_v50  ;;  %v3961_v39 = vshrl.u32 %v3835_v57, 16  ;;  %v3964_v6 = vshll.u32 %v3835_v57, 16 }
 0x376   : > { %v3756_v13 = vadd.f32 %v9594_v46, %v3732_v14  ;;  %v2990_v14 = vadd.f32 %v2968_v18, %v2767_v60 }
 0x377   : > { %v3963_v31 = vrot.slane %v3961_v39, 7 }
 0x378   : > { %vm3776_vm3 = vcmp.gt.f32.partialorder %v3756_v13, 0.0  ;;  %v3796_v5 = vmul.f32 0.01, %v3756_v13 }
 0x379   : > { %v3966_v37 = vor.u32 %v3964_v6, %v3963_v31  ;;  %v3967_v11 = vrot.slane %v3963_v31, 4  ;;  %v4101_v31 = vld [vmem:[#allocation3 + $0x68] sm:$0x1] }
 0x37a   : > { %v3816_v23 = vsel %vm3776_vm3, %v3756_v13, %v3796_v5 }
 0x37b   : > { %v4091_v15 = vsel %vm8440_vm5, %v3966_v37, %v4090_v28  ;;  %v3836_v25 = vpack.c.bf16 %v3816_v23, %v3816_v23  ;;  %v3707_v38 = vpop.f32.mrf.mxu0  ;;  %v3443_v37 = vadd.f32 %v3421_v36, %v2990_v14 }
 0x37c   : > { %4092 = vst [vmem:[#allocation3 + $0x54] sm:$0xf] %v4091_v15  ;;  %v3733_v44 = vadd.f32 %v3707_v38, %v3440_v10 }
 0x37d   : > { %v3969_v59 = vshrl.u32 %v3836_v25, 16  ;;  %v3972_v27 = vshll.u32 %v3836_v25, 16 }
 0x37e   : > { %v3757_v29 = vadd.f32 %v9594_v46, %v3733_v44 }
 0x37f   : > { %v3971_v55 = vrot.slane %v3969_v59, 7 }
 0x380   : > { %vm3777_vm6 = vcmp.gt.f32.partialorder %v3757_v29, 0.0  ;;  %v3797_v1 = vmul.f32 0.01, %v3757_v29 }
 0x381   : > { %v3974_v45 = vor.u32 %v3972_v27, %v3971_v55  ;;  %v3976_v62 = vrot.slane %v3971_v55, 4 }
 0x382   : > { %v3817_v49 = vsel %vm3777_vm6, %v3757_v29, %v3797_v1 }
 0x383   : > { %v3975_v16 = vsel %vm8629_vm7, %v3967_v11, %v3974_v45  ;;  %v4095_v40 = vsel %vm8428_vm4, %v3976_v62, %v4094_v43  ;;  %v3837_v33 = vpack.c.bf16 %v3817_v49, %v3817_v49  ;;  %v3709_v47 = vpop.f32.mrf.mxu0  ;;  %v4108_v62 = vld [vmem:[#allocation3 + $0x74] sm:$0x1] }
 0x384   : > { %4093 = vst [vmem:[#allocation3 + $0x58] sm:$0xf] %v3975_v16  ;;  %v3734_v34 = vadd.f32 %v3709_v47, %v3441_v58 }
 0x385   : > { %4096 = vst [vmem:[#allocation3 + $0x5c] sm:$0x1] %v4095_v40  ;;  %v3978_v9 = vshrl.u32 %v3837_v33, 16  ;;  %v3981_v48 = vshll.u32 %v3837_v33, 16 }
 0x386   : > { %v3758_v7 = vadd.f32 %v9594_v46, %v3734_v34 }
 0x387   : > { %v3980_v32 = vrot.slane %v3978_v9, 7 }
 0x388   : > { %vm3778_vm8 = vcmp.gt.f32.partialorder %v3758_v7, 0.0  ;;  %v3798_v63 = vmul.f32 0.01, %v3758_v7 }
 0x389   : > { %v3983_v51 = vor.u32 %v3981_v48, %v3980_v32  ;;  %v3984_v30 = vrot.slane %v3980_v32, 4 }
 0x38a   : > { %v3818_v35 = vsel %vm3778_vm8, %v3758_v7, %v3798_v63 }
 0x38b   : > { %v4098_v2 = vsel %vm8440_vm5, %v3983_v51, %v4097_v12  ;;  %v3838_v26 = vpack.c.bf16 %v3818_v35, %v3818_v35  ;;  %v3712_v50 = vpop.f32.mrf.mxu0 }
 0x38c   : > { %4099 = vst [vmem:[#allocation3 + $0x60] sm:$0xf] %v4098_v2  ;;  %v3735_v57 = vadd.f32 %v3712_v50, %v3442_v52 }
 0x38d   : > { %v3986_v22 = vshrl.u32 %v3838_v26, 16  ;;  %v3989_v17 = vshll.u32 %v3838_v26, 16 }
 0x38e   : > { %v3759_v39 = vadd.f32 %v9594_v46, %v3735_v57 }
 0x38f   : > { %v3988_v13 = vrot.slane %v3986_v22, 7 }
 0x390   : > { %vm3779_vm9 = vcmp.gt.f32.partialorder %v3759_v39, 0.0  ;;  %v3799_v6 = vmul.f32 0.01, %v3759_v39 }
 0x391   : > { %v3991_v28 = vor.u32 %v3989_v17, %v3988_v13  ;;  %v3993_v5 = vrot.slane %v3988_v13, 4 }
 0x392   : > { %v3819_v10 = vsel %vm3779_vm9, %v3759_v39, %v3799_v6 }
 0x393   : > { %v3992_v19 = vsel %vm8629_vm7, %v3984_v30, %v3991_v28  ;;  %v4102_v23 = vsel %vm8428_vm4, %v3993_v5, %v4101_v31  ;;  %v3839_v54 = vpack.c.bf16 %v3819_v10, %v3819_v10  ;;  %v3714_v15 = vpop.f32.mrf.mxu0 }
 0x394   : > { %4100 = vst [vmem:[#allocation3 + $0x64] sm:$0xf] %v3992_v19  ;;  %v3736_v25 = vadd.f32 %v3714_v15, %v3443_v37 }
 0x395   : > { %4103 = vst [vmem:[#allocation3 + $0x68] sm:$0x1] %v4102_v23  ;;  %v3995_v38 = vshrl.u32 %v3839_v54, 16  ;;  %v3998_v59 = vshll.u32 %v3839_v54, 16 }
 0x396   : > { %v3760_v44 = vadd.f32 %v9594_v46, %v3736_v25 }
 0x397   : > { %v3997_v41 = vrot.slane %v3995_v38, 7 }
 0x398   : > { %vm3780_vm10 = vcmp.gt.f32.partialorder %v3760_v44, 0.0  ;;  %v3800_v29 = vmul.f32 0.01, %v3760_v44 }
 0x399   : > { %v4000_v55 = vor.u32 %v3998_v59, %v3997_v41  ;;  %v4001_v58 = vrot.slane %v3997_v41, 4 }
 0x39a   : > { %v3820_v27 = vsel %vm3780_vm10, %v3760_v44, %v3800_v29 }
 0x39b   : > { %v4105_v43 = vsel %vm8440_vm5, %v4000_v55, %v4104_v3  ;;  %v3840_v1 = vpack.c.bf16 %v3820_v27, %v3820_v27 }
 0x39c   : > { %4106 = vst [vmem:[#allocation3 + $0x6c] sm:$0xf] %v4105_v43 }
 0x39d   : > { %v4003_v0 = vshrl.u32 %v3840_v1, 16  ;;  %v4006_v45 = vshll.u32 %v3840_v1, 16 }
 0x39f   : > { %v4005_v11 = vrot.slane %v4003_v0, 7 }
 0x3a1   : > { %v4008_v53 = vor.u32 %v4006_v45, %v4005_v11  ;;  %v4010_v49 = vrot.slane %v4005_v11, 4  ;;  %4113 = sbr.rel (%p6750_p1) target bundleno = 938 (0x3aa), region = 80 }
 0x3a3   : > { %v4009_v46 = vsel %vm8629_vm7, %v4001_v58, %v4008_v53  ;;  %v4109_v16 = vsel %vm8428_vm4, %v4010_v49, %v4108_v62 }
 0x3a4   : > { %4107 = vst [vmem:[#allocation3 + $0x70] sm:$0xf] %v4009_v46 }
 0x3a5   : > { %4110 = vst [vmem:[#allocation3 + $0x74] sm:$0x1] %v4109_v16 }
 0x3a6   : > { %v8203_v42 = vmov 0  }
 0x3a7   : > { %4114 = vst [vmem:[#allocation3] sm:$0xf] %v8203_v42 }
 0x3a8   : > { %4115 = vst [vmem:[#allocation3 + $0x4] sm:$0xf] %v8203_v42 }
 0x3a9   : > { %4116 = vst [vmem:[#allocation3 + $0x8] sm:$0x1] %v8203_v42 }
 0x3aa PF: > { %4119 = sbr.rel (%p6752_p10) target bundleno = 947 (0x3b3), region = 84 }
 0x3af   : > { %v8204_v40 = vmov 0  }
 0x3b0   : > { %4121 = vst [vmem:[#allocation3 + $0x6c] sm:$0xf] %v8204_v40 }
 0x3b1   : > { %4122 = vst [vmem:[#allocation3 + $0x70] sm:$0xf] %v8204_v40 }
 0x3b2   : > { %4123 = vst [vmem:[#allocation3 + $0x74] sm:$0x1] %v8204_v40 }
 0x3b3 PF: > { %v7736_v56 = vld [vmem:[#allocation11 + $0x78] sm:$0xff]  ;;  %v7735_v47 = vld [vmem:[#allocation11 + $0x70] sm:$0xff]  ;;  %v7734_v9 = vld [vmem:[#allocation11 + $0x68] sm:$0xff]  ;;  %s10279_s18 = sld [smem:[#allocation56_spill]]  ;;  %s7809_s19 = sshll.u32 %s8179_s25, 4 }
 0x3b4   : > { %v7728_v4 = vld [vmem:[#allocation11 + $0x38] sm:$0xff]  ;;  %4452 = vmatpush.bf16.msra.mxu1 %v7736_v56  ;;  %v7727_v34 = vld [vmem:[#allocation11 + $0x30] sm:$0xff]  ;;  %v7726_v21 = vld [vmem:[#allocation11 + $0x28] sm:$0xff]  ;;  %s7604_s16 = sshll.u32 %s8175_s24, 5  ;;  %s10295_s20 = sld [smem:[#allocation57_spill]] }
 0x3b5   : > { %v7744_v33 = vld [vmem:[#allocation11 + $0xb8] sm:$0xff]  ;;  %4597 = vmatpush.bf16.msra.mxu2 %v7728_v4  ;;  %v7743_v24 = vld [vmem:[#allocation11 + $0xb0] sm:$0xff]  ;;  %v7742_v7 = vld [vmem:[#allocation11 + $0xa8] sm:$0xff]  ;;  %s6592_s21 = sadd.s32 %s7809_s19, %s7604_s16  ;;  %s6595_s13 = sshll.u32 %s8771_s8, 4  ;;  %s6596_s13 = int_to_ptr.vmem [resolvable:$true] %s6595_s13 }
 0x3b6   : > { %4822 = vmatpush.bf16.msrb.mxu3 %v7744_v33  ;;  %v4124_v20 = vld [vmem:[#allocation3] sm:$0xf]  ;;  %v4125_v32 = vld [vmem:[#allocation3 + $0x4] sm:$0xf]  ;;  %v7733_v52 = vld [vmem:[#allocation11 + $0x60] sm:$0xff]  ;;  %s7605_s12 = sshll.u32 %s6592_s21, 3 }
 0x3b7   : > { %v4165_v48 = vshrl.u32 %v4124_v20, 16  ;;  %v4168_v12 = vshll.u32 %v4124_v20, 16  ;;  %v4174_v63 = vshll.u32 %v4125_v32, 16  ;;  %v4178_v51 = vshrl.u32 %v4125_v32, 16  ;;  %v7725_v60 = vld [vmem:[#allocation11 + $0x20] sm:$0xff]  ;;  %v7732_v22 = vld [vmem:[#allocation11 + $0x58] sm:$0xff] }
 0x3b8   : > { %4453 = vmatpush.bf16.msra.mxu1 %v7735_v47  ;;  %v7741_v35 = vld [vmem:[#allocation11 + $0xa0] sm:$0xff]  ;;  %v4156_v18 = vld [vmem:[#allocation3 + $0x8] sm:$0x1]  ;;  %v7724_v14 = vld [vmem:[#allocation11 + $0x18] sm:$0xff]  ;;  %v4672_v6 = vrot.slane %v4125_v32, 5  ;;  %s6580_s30 = scalar_lea.sflag [#allocation8], %s8362_s2 }
 0x3b9   : > { %4598 = vmatpush.bf16.msra.mxu2 %v7727_v34  ;;  %v4167_v2 = vrot.slane %v4165_v48, 4  ;;  %v4170_v26 = vrot.slane %v4168_v12, 5  ;;  %v4176_v50 = vrot.slane %v4174_v63, 5  ;;  %v4180_v57 = vrot.slane %v4178_v51, 4  ;;  %v7740_v17 = vld [vmem:[#allocation11 + $0x98] sm:$0xff]  ;;  %v7731_v30 = vld [vmem:[#allocation11 + $0x50] sm:$0xff] }
 0x3ba   : > { %4823 = vmatpush.bf16.msrb.mxu3 %v7743_v24  ;;  %v4184_v13 = vshll.u32 %v4156_v18, 16  ;;  %v4646_v31 = vld [vmem:[#allocation3] sm:$0xe]  ;;  %v7723_v28 = vld [vmem:[#allocation11 + $0x10] sm:$0xff]  ;;  %v9747_v54 = vld [vmem:[#allocation3 + $0x10] sm:$0xf]  ;;  %s6594_s7 = scalar_lea.hbm %s10295_s20, %s7605_s12 }
 0x3bb   : > { %v4171_v39 = vor.u32 %v4170_v26, %v4167_v2  ;;  %v4181_v36 = vor.u32 %v4180_v57, %v4176_v50  ;;  %v4126_v5 = vld [vmem:[#allocation3 + $0xc] sm:$0xf]  ;;  %v7289_v23 = vrot.slane %v4646_v31, 9  ;;  %v4674_v25 = vrot.slane %v4672_v6, 4  ;;  %v7730_v3 = vld [vmem:[#allocation11 + $0x48] sm:$0xff]  ;;  %v7729_v49 = vld [vmem:[#allocation11 + $0x40] sm:$0xff] }
 0x3bc   : > { %4454 = vmatpush.bf16.msra.mxu1 %v7734_v9  ;;  %v4186_v19 = vrot.slane %v4184_v13, 5  ;;  %v7739_v15 = vld [vmem:[#allocation11 + $0x90] sm:$0xff]  ;;  %v4675_v38 = vrot.slane %v4156_v18, 5  ;;  %v4189_v44 = vshrl.u32 %v4126_v5, 16  ;;  %v4192_v41 = vshll.u32 %v4126_v5, 16  ;;  %v7722_v29 = vld [vmem:[#allocation11 + $0x8] sm:$0xff] }
 0x3bd   : > { %4599 = vmatpush.bf16.msra.mxu2 %v7726_v21  ;;  %v4172_v37 = vrot.slane %v4171_v39, 4  ;;  %v4182_v10 = vrot.slane %v4181_v36, 4  ;;  %v4198_v59 = vshll.u32 %v9747_v54, 16  ;;  %v4673_v43 = vsel %vm8859_vm14, %v7289_v23, %v4672_v6  ;;  %v7738_v0 = vld [vmem:[#allocation11 + $0x88] sm:$0xff]  ;;  %v7721_v46 = vld [vmem:[#allocation11] sm:$0xff]  ;;  %v7768_v33 = vld [vmem:[#allocation11 + $0x138] sm:$0xff] }
 0x3be   : > { %4824 = vmatpush.bf16.msrb.mxu3 %v7742_v7  ;;  %v4202_v1 = vshrl.u32 %v9747_v54, 16  ;;  %v4676_v11 = vsel %vm8859_vm14, %v4674_v25, %v4675_v38  ;;  %v4742_v58 = vunpack.c.l.b16 %v4673_v43  ;;  %v4191_v53 = vrot.slane %v4189_v44, 4  ;;  %v7737_v4 = vld [vmem:[#allocation11 + $0x80] sm:$0xff]  ;;  %v4157_v47 = vld [vmem:[#allocation3 + $0x14] sm:$0x1]  ;;  %v7713_v9 = vld [vmem:[#allocation3] sm:$0xff] }
 0x3bf   : > { %v4177_v55 = vsel %vm8819_vm11, %v4172_v37, %v4176_v50  ;;  %v4187_v27 = vsel %vm8819_vm11, %v4182_v10, %v4186_v19  ;;  %v4743_v16 = vunpack.c.l.b16 %v4676_v11  ;;  %v4194_v42 = vrot.slane %v4192_v41, 5  ;;  %v7760_v34 = vld [vmem:[#allocation11 + $0xf8] sm:$0xff]  ;;  %v7767_v48 = vld [vmem:[#allocation11 + $0x130] sm:$0xff]  ;;  %v4129_v2 = vld [vmem:[#allocation3 + $0x1c] sm:$0xf]  ;;  %s6597_s29 = sshll.u32 %s6594_s7, 4  ;;  %s6598_s29 = int_to_ptr.hbm [resolvable:$true] %s6597_s29 }
 0x3c0   : > { %4455 = vmatpush.bf16.msra.mxu1 %v7733_v52  ;;  %v4372_v45 = vunpack.c.l.b16 %v4177_v55  ;;  %v4373_v62 = vunpack.c.l.b16 %v4187_v27  ;;  %v4200_v40 = vrot.slane %v4198_v59, 5  ;;  %v4204_v56 = vrot.slane %v4202_v1, 4  ;;  %v4647_v63 = vld [vmem:[#allocation3 + $0xc] sm:$0xe]  ;;  %v4128_v52 = vld [vmem:[#allocation3 + $0x18] sm:$0xf] }
 0x3c1   : > { %4600 = vmatpush.bf16.msra.mxu2 %v7725_v60  ;;  %v4758_v21 = vpack.c.b16 %v4743_v16, %v4742_v58  ;;  %v4195_v7 = vor.u32 %v4194_v42, %v4191_v53  ;;  %v4208_v32 = vshll.u32 %v4157_v47, 16  ;;  %v4679_v12 = vrot.slane %v9747_v54, 5  ;;  %v7759_v51 = vld [vmem:[#allocation11 + $0xf0] sm:$0xff]  ;;  %v7758_v36 = vld [vmem:[#allocation11 + $0xe8] sm:$0xff]  ;;  %v4648_v43 = vld [vmem:[#allocation3 + $0x18] sm:$0xe] }
 0x3c2   : > { %4825 = vmatpush.bf16.msrb.mxu3 %v7741_v35  ;;  %v4388_v24 = vpack.c.b16 %v4373_v62, %v4372_v45  ;;  %v4205_v20 = vor.u32 %v4204_v56, %v4200_v40  ;;  %v7290_v26 = vrot.slane %v4647_v63, 9  ;;  %v4682_v57 = vrot.slane %v4157_v47, 5  ;;  %v4158_v23 = vld [vmem:[#allocation3 + $0x20] sm:$0x1]  ;;  %v7765_v53 = vld [vmem:[#allocation11 + $0x120] sm:$0xff]  ;;  %s8099_s6 = sshra.s32 %s6598_s29, 4  ;;  %s8100_s6 = int_to_ptr.hbm [resolvable:$true] %s8099_s6 }
 0x3c3   : > { %v4196_v60 = vrot.slane %v4195_v7, 4  ;;  %v4210_v18 = vrot.slane %v4208_v32, 5  ;;  %v4681_v50 = vrot.slane %v4679_v12, 4  ;;  %v4216_v39 = vshll.u32 %v4128_v52, 16  ;;  %v4131_v16 = vld [vmem:[#allocation3 + $0x28] sm:$0xf]  ;;  %p8106_p0 = scmp.lt.s32.totalorder %s8100_s6, %s10295_s20 }
 0x3c4   : > { %4456 = vmatpush.bf16.msra.mxu1 %v7732_v22  ;;  %v4206_v35 = vrot.slane %v4205_v20, 4  ;;  %v7766_v22 = vld [vmem:[#allocation11 + $0x128] sm:$0xff]  ;;  %v4222_v13 = vshll.u32 %v4129_v2, 16  ;;  %v4232_v41 = vshll.u32 %v4158_v23, 16  ;;  %v4686_v55 = vrot.slane %v4129_v2, 5  ;;  %s8101_s3 = scalar_lea.hbm %s8100_s6, 128 }
 0x3c5   : > { %4601 = vmatpush.bf16.msra.mxu2 %v7724_v14  ;;  %v4213_v14 = vshrl.u32 %v4128_v52, 16  ;;  %v4201_v31 = vsel %vm8819_vm11, %v4196_v60, %v4200_v40  ;;  %v4218_v37 = vrot.slane %v4216_v39, 5  ;;  %v7291_v45 = vrot.slane %v4648_v43, 9  ;;  %v7715_v60 = vld [vmem:[#allocation3 + $0x18] sm:$0xff]  ;;  %p8102_p11 = scmp.ne.s32.totalorder %s8100_s6, %s8101_s3  ;;  %s8105_s9 = scalar_lea.hbm %s10295_s20, 512 }
 0x3c6   : > { %4826 = vmatpush.bf16.msrb.mxu3 %v7740_v17  ;;  %v4226_v17 = vshrl.u32 %v4129_v2, 16  ;;  %v4211_v6 = vsel %vm8819_vm11, %v4206_v35, %v4210_v18  ;;  %v4374_v10 = vunpack.c.l.b16 %v4201_v31  ;;  %v4224_v54 = vrot.slane %v4222_v13, 5  ;;  %v7756_v31 = vld [vmem:[#allocation11 + $0xd8] sm:$0xff]  ;;  %p8107_p3 = scmp.lt.s32.totalorder %s8105_s9, %s8101_s3 }
 0x3c7   : > { %v4215_v5 = vrot.slane %v4213_v14, 4  ;;  %v4375_v19 = vunpack.c.l.b16 %v4211_v6  ;;  %v4688_v62 = vrot.slane %v4686_v55, 4  ;;  %v4689_v58 = vrot.slane %v4158_v23, 5  ;;  %v7764_v14 = vld [vmem:[#allocation11 + $0x118] sm:$0xff]  ;;  %p8103_p12 = pnand %p8102_p11, %p8337_p5 }
 0x3c8   : > { %4457 = vmatpush.bf16.msra.mxu1 %v7731_v30  ;;  %v4680_v30 = vsel %vm8859_vm14, %v7290_v26, %v4679_v12  ;;  %v4687_v56 = vsel %vm8859_vm14, %v7291_v45, %v4686_v55  ;;  %v7716_v45 = vld [vmem:[#allocation3 + $0x24] sm:$0xff]  ;;  %p8108_p7 = por %p8107_p3, %p8106_p0 }
 0x3c9   : > { %4602 = vmatpush.bf16.msra.mxu2 %v7723_v28  ;;  %v4683_v28 = vsel %vm8859_vm14, %v4681_v50, %v4682_v57  ;;  %v4744_v25 = vunpack.c.l.b16 %v4680_v30  ;;  %v4219_v44 = vor.u32 %v4218_v37, %v4215_v5  ;;  %v4389_v59 = vpack.c.b16 %v4375_v19, %v4374_v10  ;;  %v4649_v57 = vld [vmem:[#allocation3 + $0x24] sm:$0xe]  ;;  %p8104_p13 = pneg %p8103_p12 }
 0x3ca   : > { %4827 = vmatpush.bf16.msrb.mxu3 %v7739_v15  ;;  %v4228_v15 = vrot.slane %v4226_v17, 4  ;;  %v4745_v38 = vunpack.c.l.b16 %v4683_v28  ;;  %v4746_v7 = vunpack.c.l.b16 %v4687_v56  ;;  %v4693_v50 = vrot.slane %v4131_v16, 5  ;;  %v4133_v17 = vld [vmem:[#allocation3 + $0x34] sm:$0xf] }
 0x3cb   : > { %v4220_v1 = vrot.slane %v4219_v44, 4  ;;  %v7292_v6 = vrot.slane %v4649_v57, 9  ;;  %v4270_v10 = vshll.u32 %v4133_v17, 16  ;;  %v4274_v19 = vshrl.u32 %v4133_v17, 16  ;;  %p8109_p9 = pnand %p8108_p7, %p8104_p13 }
 0x3cc   : > { %4458 = vmatpush.bf16.msra.mxu1 %v7730_v3  ;;  %v7714_v3 = vld [vmem:[#allocation3 + $0xc] sm:$0xff]  ;;  %v4759_v27 = vpack.c.b16 %v4745_v38, %v4744_v25  ;;  %v4695_v30 = vrot.slane %v4693_v50, 4 }
 0x3cd   : > { %4603 = vmatpush.bf16.msra.mxu2 %v7722_v29  ;;  %v4229_v29 = vor.u32 %v4228_v15, %v4224_v54  ;;  %v4225_v42 = vsel %vm8819_vm11, %v4220_v1, %v4224_v54  ;;  %v4694_v15 = vsel %vm8859_vm14, %v7292_v6, %v4693_v50  ;;  %v4276_v55 = vrot.slane %v4274_v19, 4  ;;  %v4651_v6 = vld [vmem:[#allocation3 + $0x3c] sm:$0xe]  ;;  %v9792_v19 = vld [vmem:[#allocation3 + $0x4c] sm:$0xf] }
 0x3ce   : > { %4828 = vmatpush.bf16.msrb.mxu3 %v7738_v0  ;;  %v4234_v0 = vrot.slane %v4232_v41, 5 }
 0x3cf   : > { %v4230_v11 = vrot.slane %v4229_v29, 4  ;;  %v4272_v29 = vrot.slane %v4270_v10, 5 }
 0x3d0   : > { %4459 = vmatpush.bf16.msra.mxu1 %v7729_v49  ;;  %v7757_v49 = vld [vmem:[#allocation11 + $0xe0] sm:$0xff] }
 0x3d1   : > { %4604 = vmatpush.bf16.msra.mxu2 %v7721_v46  ;;  %v4130_v46 = vld [vmem:[#allocation3 + $0x24] sm:$0xf]  ;;  %v4235_v40 = vsel %vm8819_vm11, %v4230_v11, %v4234_v0 }
 0x3d2   : > { %4829 = vmatpush.bf16.msrb.mxu3 %v7737_v4  ;;  %v4690_v4 = vsel %vm8859_vm14, %v4688_v62, %v4689_v58  ;;  %v4240_v47 = vshll.u32 %v4130_v46, 16  ;;  %v4277_v62 = vor.u32 %v4276_v55, %v4272_v29  ;;  %v4700_v58 = vrot.slane %v4133_v17, 5 }
 0x3d3   : > { %4460 = vmatmul.bf16.vlgmr.msra.gmra.mxu1 %v4388_v24  ;;  %v4250_v24 = vshrl.u32 %v4131_v16, 16  ;;  %v4747_v20 = vunpack.c.l.b16 %v4690_v4  ;;  %v4322_v55 = vshrl.u32 %v9792_v19, 16 }
 0x3d4   : > { %5016 = vmatpush.bf16.msrb.mxu1 %v7760_v34  ;;  %4605 = vmatmul.bf16.vlgmr.msra.gmra.mxu2 %v7713_v9  ;;  %v4246_v34 = vshll.u32 %v4131_v16, 16  ;;  %v4376_v9 = vunpack.c.l.b16 %v4225_v42  ;;  %v4278_v42 = vrot.slane %v4277_v62, 4  ;;  %v4702_v56 = vrot.slane %v4700_v58, 4 }
 0x3d5   : > { %5393 = vmatpush.bf16.msrb.mxu2 %v7768_v33  ;;  %4830 = vmatmul.bf16.vlgmr.msrb.gmra.mxu3 %v4758_v21  ;;  %v4237_v33 = vshrl.u32 %v4130_v46, 16  ;;  %v4377_v21 = vunpack.c.l.b16 %v4235_v40  ;;  %v4252_v63 = vrot.slane %v4250_v24, 4  ;;  %v4760_v35 = vpack.c.b16 %v4747_v20, %v4746_v7  ;;  %v4135_v24 = vld [vmem:[#allocation3 + $0x40] sm:$0xf] }
 0x3d6   : > { %v4248_v12 = vrot.slane %v4246_v34, 5  ;;  %v4134_v34 = vld [vmem:[#allocation3 + $0x3c] sm:$0xf] }
 0x3d7   : > { %v4239_v32 = vrot.slane %v4237_v33, 4  ;;  %v4390_v52 = vpack.c.b16 %v4377_v21, %v4376_v9  ;;  %v7763_v33 = vld [vmem:[#allocation11 + $0x110] sm:$0xff] }
 0x3d8   : > { %5017 = vmatpush.bf16.msrb.mxu1 %v7759_v51  ;;  %v4159_v51 = vld [vmem:[#allocation3 + $0x2c] sm:$0x1]  ;;  %v4253_v2 = vor.u32 %v4252_v63, %v4248_v12  ;;  %v4298_v63 = vshrl.u32 %v4135_v24, 16 }
 0x3d9   : > { %5394 = vmatpush.bf16.msrb.mxu2 %v7767_v48  ;;  %v4242_v48 = vrot.slane %v4240_v47, 5  ;;  %v4256_v26 = vshll.u32 %v4159_v51, 16  ;;  %v4696_v28 = vrot.slane %v4159_v51, 5  ;;  %v7755_v47 = vld [vmem:[#allocation11 + $0xd0] sm:$0xff] }
 0x3da   : > { %v4300_v57 = vrot.slane %v4298_v63, 4 }
 0x3db   : > { %v4243_v18 = vor.u32 %v4242_v48, %v4239_v32  ;;  %v4258_v13 = vrot.slane %v4256_v26, 5  ;;  %v4697_v25 = vsel %vm8859_vm14, %v4695_v30, %v4696_v28  ;;  %v4285_v32 = vshrl.u32 %v4134_v34, 16  ;;  %v4136_v28 = vld [vmem:[#allocation3 + $0x48] sm:$0xf] }
 0x3dc   : > { %5018 = vmatpush.bf16.msrb.mxu1 %v7758_v36  ;;  %v4254_v36 = vrot.slane %v4253_v2, 4  ;;  %v4749_v43 = vunpack.c.l.b16 %v4697_v25  ;;  %v4288_v48 = vshll.u32 %v4134_v34, 16 }
 0x3dd   : > { %5395 = vmatpush.bf16.msrb.mxu2 %v7766_v22  ;;  %v4132_v22 = vld [vmem:[#allocation3 + $0x30] sm:$0xf]  ;;  %v4244_v39 = vrot.slane %v4243_v18, 4  ;;  %v4161_v18 = vld [vmem:[#allocation3 + $0x44] sm:$0x1]  ;;  %v4287_v2 = vrot.slane %v4285_v32, 4 }
 0x3de   : > { %v4261_v5 = vshrl.u32 %v4132_v22, 16  ;;  %v4264_v37 = vshll.u32 %v4132_v22, 16  ;;  %v4259_v54 = vsel %vm8819_vm11, %v4254_v36, %v4258_v13  ;;  %v4290_v26 = vrot.slane %v4288_v48, 5 }
 0x3df   : > { %v4249_v23 = vsel %vm8819_vm11, %v4244_v39, %v4248_v12  ;;  %v4294_v12 = vshll.u32 %v4135_v24, 16  ;;  %v4304_v39 = vshll.u32 %v4161_v18, 16 }
 0x3e0   : > { %5019 = vmatpush.bf16.msrb.mxu1 %v7757_v49  ;;  %v4263_v38 = vrot.slane %v4261_v5, 4  ;;  %v4266_v44 = vrot.slane %v4264_v37, 5  ;;  %v4378_v41 = vunpack.c.l.b16 %v4249_v23  ;;  %v4650_v49 = vld [vmem:[#allocation3 + $0x30] sm:$0xe]  ;;  %v4291_v13 = vor.u32 %v4290_v26, %v4287_v2  ;;  %v7762_v5 = vld [vmem:[#allocation11 + $0x108] sm:$0xff]  ;;  %v7753_v2 = vld [vmem:[#allocation11 + $0xc0] sm:$0xff] }
 0x3e1   : > { %5396 = vmatpush.bf16.msrb.mxu2 %v7765_v53  ;;  %v7293_v40 = vrot.slane %v4650_v49, 9  ;;  %v4296_v50 = vrot.slane %v4294_v12, 5  ;;  %v4306_v30 = vrot.slane %v4304_v39, 5  ;;  %v7776_v23 = vld [vmem:[#allocation11 + $0x178] sm:$0xff] }
 0x3e2   : > { %v4267_v1 = vor.u32 %v4266_v44, %v4263_v38  ;;  %v4292_v37 = vrot.slane %v4291_v13, 4  ;;  %v4710_v38 = vrot.slane %v4161_v18, 5  ;;  %v7792_v44 = vld [vmem:[#allocation11 + $0x1b8] sm:$0xff]  ;;  %5642 = vmatpush.bf16.msra.mxu3 %v7776_v23  ;;  %v7790_v18 = vld [vmem:[#allocation11 + $0x1a8] sm:$0xff] }
 0x3e3   : > { %4465 = vmatmul.bf16.gmra.mxu1 %v4389_v59  ;;  %v4379_v59 = vunpack.c.l.b16 %v4259_v54  ;;  %v4701_v7 = vsel %vm8859_vm14, %v7293_v40, %v4700_v58  ;;  %v4301_v17 = vor.u32 %v4300_v57, %v4296_v50  ;;  %v7754_v54 = vld [vmem:[#allocation11 + $0xc8] sm:$0xff]  ;;  %5836 = vmatpush.bf16.msra.mxu0 %v7792_v44  ;;  %v4138_v26 = vld [vmem:[#allocation3 + $0x54] sm:$0xf]  ;;  %v7771_v57 = vld [vmem:[#allocation11 + $0x150] sm:$0xff] }
 0x3e4   : > { %4610 = vmatmul.bf16.gmra.mxu2 %v7714_v3  ;;  %5020 = vmatpush.bf16.msrb.mxu1 %v7756_v31  ;;  %v4160_v3 = vld [vmem:[#allocation3 + $0x38] sm:$0x1]  ;;  %v4268_v46 = vrot.slane %v4267_v1, 4  ;;  %v4707_v31 = vrot.slane %v4135_v24, 5  ;;  %v7774_v58 = vld [vmem:[#allocation11 + $0x168] sm:$0xff] }
 0x3e5   : > { %4835 = vmatmul.bf16.gmra.mxu3 %v4759_v27  ;;  %5397 = vmatpush.bf16.msrb.mxu2 %v7764_v14  ;;  %v4748_v27 = vunpack.c.l.b16 %v4694_v15  ;;  %v4280_v0 = vshll.u32 %v4160_v3, 16  ;;  %v4391_v11 = vpack.c.b16 %v4379_v59, %v4378_v41  ;;  %v4703_v4 = vrot.slane %v4160_v3, 5  ;;  %v7717_v14 = vld [vmem:[#allocation3 + $0x30] sm:$0xff]  ;;  %v7775_v3 = vld [vmem:[#allocation11 + $0x170] sm:$0xff]  ;;  %v7718_v24 = vld [vmem:[#allocation3 + $0x3c] sm:$0xff] }
 0x3e6   : > { %v4273_v9 = vsel %vm8819_vm11, %v4268_v46, %v4272_v29  ;;  %v4302_v10 = vrot.slane %v4301_v17, 4  ;;  %v7294_v15 = vrot.slane %v4651_v6, 9  ;;  %v4709_v25 = vrot.slane %v4707_v31, 4  ;;  %5643 = vmatpush.bf16.msra.mxu3 %v7775_v3  ;;  %v4162_v46 = vld [vmem:[#allocation3 + $0x50] sm:$0x1] }
 0x3e7   : > { %v4761_v53 = vpack.c.b16 %v4749_v43, %v4748_v27  ;;  %v4282_v16 = vrot.slane %v4280_v0, 5  ;;  %v4704_v20 = vsel %vm8859_vm14, %v4702_v56, %v4703_v4  ;;  %v4380_v51 = vunpack.c.l.b16 %v4273_v9  ;;  %v7791_v27 = vld [vmem:[#allocation11 + $0x1b0] sm:$0xff]  ;;  %v4163_v44 = vld [vmem:[#allocation3 + $0x5c] sm:$0x1] }
 0x3e8   : > { %5021 = vmatpush.bf16.msrb.mxu1 %v7755_v47  ;;  %v4309_v41 = vshrl.u32 %v4136_v28, 16  ;;  %v4312_v59 = vshll.u32 %v4136_v28, 16  ;;  %v4318_v29 = vshll.u32 %v9792_v19, 16  ;;  %v4297_v43 = vsel %vm8819_vm11, %v4292_v37, %v4296_v50  ;;  %5837 = vmatpush.bf16.msra.mxu0 %v7791_v27  ;;  %v7773_v47 = vld [vmem:[#allocation11 + $0x160] sm:$0xff]  ;;  %v7770_v28 = vld [vmem:[#allocation11 + $0x148] sm:$0xff] }
 0x3e9   : > { %5398 = vmatpush.bf16.msrb.mxu2 %v7763_v33  ;;  %v4283_v21 = vsel %vm8819_vm11, %v4278_v42, %v4282_v16  ;;  %v4307_v1 = vsel %vm8819_vm11, %v4302_v10, %v4306_v30  ;;  %v4708_v0 = vsel %vm8859_vm14, %v7294_v15, %v4707_v31  ;;  %v4324_v42 = vrot.slane %v4322_v55, 4  ;;  %v9805_v50 = vld [vmem:[#allocation3 + $0x58] sm:$0xf] }
 0x3ea   : > { %v4314_v62 = vrot.slane %v4312_v59, 5  ;;  %v4383_v49 = vunpack.c.l.b16 %v4307_v1  ;;  %v4320_v16 = vrot.slane %v4318_v29, 5  ;;  %v4752_v40 = vunpack.c.l.b16 %v4708_v0  ;;  %5644 = vmatpush.bf16.msra.mxu3 %v7774_v58  ;;  %v7719_v59 = vld [vmem:[#allocation3 + $0x48] sm:$0xff] }
 0x3eb   : > { %v4328_v33 = vshll.u32 %v4162_v46, 16  ;;  %v4333_v17 = vshrl.u32 %v4138_v26, 16  ;;  %v4336_v31 = vshll.u32 %v4138_v26, 16  ;;  %v4342_v6 = vshll.u32 %v9805_v50, 16  ;;  %v7787_v1 = vld [vmem:[#allocation11 + $0x190] sm:$0xff] }
 0x3ec   : > { %5022 = vmatpush.bf16.msrb.mxu1 %v7754_v54  ;;  %v4325_v9 = vor.u32 %v4324_v42, %v4320_v16  ;;  %5838 = vmatpush.bf16.msra.mxu0 %v7790_v18  ;;  %v4346_v30 = vshrl.u32 %v9805_v50, 16  ;;  %v4352_v27 = vshll.u32 %v4163_v44, 16  ;;  %v4721_v0 = vrot.slane %v9805_v50, 5 }
 0x3ed   : > { %5399 = vmatpush.bf16.msrb.mxu2 %v7762_v5  ;;  %v4330_v48 = vrot.slane %v4328_v33, 5  ;;  %v7788_v5 = vld [vmem:[#allocation11 + $0x198] sm:$0xff]  ;;  %v4335_v54 = vrot.slane %v4333_v17, 4  ;;  %v4338_v15 = vrot.slane %v4336_v31, 5  ;;  %v5458_v17 = vld [vmem:[#allocation3 + $0xc] sm:$0xe] }
 0x3ee   : > { %5645 = vmatpush.bf16.msra.mxu3 %v7773_v47  ;;  %v4326_v12 = vrot.slane %v4325_v9, 4 }
 0x3ef   : > { %v4339_v29 = vor.u32 %v4338_v15, %v4335_v54 }
 0x3f0   : > { %v4331_v39 = vsel %vm8819_vm11, %v4326_v12, %v4330_v48  ;;  %5023 = vmatpush.bf16.msrb.mxu1 %v7753_v2  ;;  %v7777_v48 = vld [vmem:[#allocation3 + $0x18] sm:$0xff] }
 0x3f1   : > { %v4385_v10 = vunpack.c.l.b16 %v4331_v39  ;;  %v4340_v58 = vrot.slane %v4339_v29, 4 }
 0x3f3   : > { %4470 = vmatmul.bf16.gmra.mxu1 %v4390_v52  ;;  %v4381_v52 = vunpack.c.l.b16 %v4283_v21  ;;  %v4714_v21 = vrot.slane %v9792_v19, 5 }
 0x3f4   : > { %4615 = vmatmul.bf16.gmra.mxu2 %v7715_v60  ;;  %v4750_v60 = vunpack.c.l.b16 %v4701_v7 }
 0x3f5   : > { %4840 = vmatmul.bf16.gmra.mxu3 %v4760_v35  ;;  %v4751_v35 = vunpack.c.l.b16 %v4704_v20  ;;  %v4392_v22 = vpack.c.b16 %v4381_v52, %v4380_v51  ;;  %v4652_v20 = vld [vmem:[#allocation3 + $0x48] sm:$0xe]  ;;  %v4716_v51 = vrot.slane %v4714_v21, 4  ;;  %v4717_v52 = vrot.slane %v4162_v46, 5  ;;  %v5082_v46 = vld [vmem:[#allocation3 + $0x10] sm:$0xf] }
 0x3f6   : > { %v7295_v63 = vrot.slane %v4652_v20, 9  ;;  %v5115_v47 = vshll.u32 %v5082_v46, 16 }
 0x3f7   : > { %v4762_v36 = vpack.c.b16 %v4751_v35, %v4750_v60  ;;  %v7761_v60 = vld [vmem:[#allocation11 + $0x100] sm:$0xff]  ;;  %v7772_v35 = vld [vmem:[#allocation11 + $0x158] sm:$0xff]  ;;  %v4718_v13 = vsel %vm8859_vm14, %v4716_v51, %v4717_v52 }
 0x3f8   : > { %5400 = vmatpush.bf16.msrb.mxu2 %v7761_v60  ;;  %5646 = vmatpush.bf16.msra.mxu3 %v7772_v35  ;;  %v4755_v23 = vunpack.c.l.b16 %v4718_v13  ;;  %v5083_v60 = vld [vmem:[#allocation3 + $0x14] sm:$0x1]  ;;  %v5117_v35 = vrot.slane %v5115_v47, 5  ;;  %v5459_v47 = vld [vmem:[#allocation3 + $0x18] sm:$0xe] }
 0x3fc   : > { %5647 = vmatpush.bf16.msra.mxu3 %v7771_v57  ;;  %v5125_v57 = vshll.u32 %v5083_v60, 16 }
 0x400   : > { %5648 = vmatpush.bf16.msra.mxu3 %v7770_v28  ;;  %v7425_v28 = vrot.slane %v5458_v17, 9 }
 0x403   : > { %4475 = vmatmul.bf16.gmra.mxu1 %v4391_v11  ;;  %v4711_v11 = vsel %vm8859_vm14, %v4709_v25, %v4710_v38  ;;  %v4344_v25 = vrot.slane %v4342_v6, 5  ;;  %v4348_v38 = vrot.slane %v4346_v30, 4  ;;  %v5127_v6 = vrot.slane %v5125_v57, 5 }
 0x404   : > { %4620 = vmatmul.bf16.gmra.mxu2 %v7716_v45  ;;  %v4311_v45 = vrot.slane %v4309_v41, 4  ;;  %v4753_v56 = vunpack.c.l.b16 %v4711_v11  ;;  %v4653_v11 = vld [vmem:[#allocation3 + $0x54] sm:$0xe] }
 0x405   : > { %4845 = vmatmul.bf16.gmra.mxu3 %v4761_v53  ;;  %v4382_v53 = vunpack.c.l.b16 %v4297_v43  ;;  %v4349_v55 = vor.u32 %v4348_v38, %v4344_v25  ;;  %v7769_v43 = vld [vmem:[#allocation11 + $0x140] sm:$0xff]  ;;  %v7296_v42 = vrot.slane %v4653_v11, 9  ;;  %v4345_v9 = vsel %vm8819_vm11, %v4340_v58, %v4344_v25 }
 0x406   : > { %v4315_v4 = vor.u32 %v4314_v62, %v4311_v45  ;;  %v4763_v7 = vpack.c.b16 %v4753_v56, %v4752_v40  ;;  %5649 = vmatpush.bf16.msra.mxu3 %v7769_v43  ;;  %v5081_v45 = vld [vmem:[#allocation3 + $0xc] sm:$0xf]  ;;  %v7808_v62 = vld [vmem:[#allocation11 + $0x238] sm:$0xff]  ;;  %v4723_v40 = vrot.slane %v4721_v0, 4  ;;  %v4724_v56 = vrot.slane %v4163_v44, 5 }
 0x407   : > { %v4393_v34 = vpack.c.b16 %v4383_v49, %v4382_v53  ;;  %v4350_v53 = vrot.slane %v4349_v55, 4  ;;  %v4354_v49 = vrot.slane %v4352_v27, 5  ;;  %6462 = vmatpush.bf16.msra.mxu2 %v7808_v62  ;;  %v5109_v33 = vshll.u32 %v5081_v45, 16  ;;  %v7799_v44 = vld [vmem:[#allocation11 + $0x1f0] sm:$0xff] }
 0x408   : > { %v4316_v32 = vrot.slane %v4315_v4, 4  ;;  %v5106_v4 = vshrl.u32 %v5081_v45, 16  ;;  %v4722_v20 = vsel %vm8859_vm14, %v7296_v42, %v4721_v0  ;;  %v4386_v51 = vunpack.c.l.b16 %v4345_v9  ;;  %v7778_v55 = vld [vmem:[#allocation3 + $0x24] sm:$0xff] }
 0x409   : > { %v4756_v2 = vunpack.c.l.b16 %v4722_v20  ;;  %v7806_v9 = vld [vmem:[#allocation11 + $0x228] sm:$0xff] }
 0x40a   : > { %v5108_v12 = vrot.slane %v5106_v4, 4 }
 0x413   : > { %4480 = vmatmul.bf16.gmra.mxu1 %v4392_v22  ;;  %v7789_v22 = vld [vmem:[#allocation11 + $0x1a0] sm:$0xff] }
 0x414   : > { %4625 = vmatmul.bf16.gmra.mxu2 %v7717_v14  ;;  %v4321_v14 = vsel %vm8819_vm11, %v4316_v32, %v4320_v16  ;;  %5839 = vmatpush.bf16.msra.mxu0 %v7789_v22  ;;  %v7786_v16 = vld [vmem:[#allocation11 + $0x188] sm:$0xff]  ;;  %v4725_v32 = vsel %vm8859_vm14, %v4723_v40, %v4724_v56 }
 0x415   : > { %4850 = vmatmul.bf16.gmra.mxu3 %v4762_v36  ;;  %v4715_v36 = vsel %vm8859_vm14, %v7295_v63, %v4714_v21  ;;  %v4384_v37 = vunpack.c.l.b16 %v4321_v14  ;;  %v4355_v21 = vsel %vm8819_vm11, %v4350_v53, %v4354_v49  ;;  %v5111_v63 = vrot.slane %v5109_v33, 5  ;;  %v7720_v14 = vld [vmem:[#allocation3 + $0x54] sm:$0xff]  ;;  %v5086_v53 = vld [vmem:[#allocation3 + $0x20] sm:$0x1]  ;;  %v7745_v49 = vld [vmem:[#allocation3 + $0xc] sm:$0xff] }
 0x416   : > { %v4754_v19 = vunpack.c.l.b16 %v4715_v36  ;;  %v4387_v52 = vunpack.c.l.b16 %v4355_v21  ;;  %v4757_v26 = vunpack.c.l.b16 %v4725_v32  ;;  %v5492_v36 = vrot.slane %v5082_v46, 5 }
 0x417   : > { %v4394_v41 = vpack.c.b16 %v4385_v10, %v4384_v37  ;;  %v5112_v50 = vor.u32 %v5111_v63, %v5108_v12  ;;  %v5495_v37 = vrot.slane %v5083_v60, 5  ;;  %v7807_v10 = vld [vmem:[#allocation11 + $0x230] sm:$0xff]  ;;  %v5149_v4 = vshll.u32 %v5086_v53, 16 }
 0x418   : > { %5840 = vmatpush.bf16.msra.mxu0 %v7788_v5  ;;  %v4764_v3 = vpack.c.b16 %v4755_v23, %v4754_v19  ;;  %v4395_v22 = vpack.c.b16 %v4387_v52, %v4386_v51  ;;  %v4765_v13 = vpack.c.b16 %v4757_v26, %v4756_v2  ;;  %v5494_v5 = vrot.slane %v5492_v36, 4  ;;  %v5084_v19 = vld [vmem:[#allocation3 + $0x18] sm:$0xf]  ;;  %v5085_v23 = vld [vmem:[#allocation3 + $0x1c] sm:$0xf]  ;;  %6463 = vmatpush.bf16.msra.mxu2 %v7807_v10  ;;  %v7798_v26 = vld [vmem:[#allocation11 + $0x1e8] sm:$0xff] }
 0x419   : > { %v5113_v31 = vrot.slane %v5112_v50, 4  ;;  %v5493_v25 = vsel %vm8859_vm14, %v7425_v28, %v5492_v36  ;;  %v5143_v29 = vshrl.u32 %v5085_v23, 16  ;;  %v5499_v33 = vrot.slane %v5085_v23, 5 }
 0x41a   : > { %v5496_v38 = vsel %vm8859_vm14, %v5494_v5, %v5495_v37  ;;  %v5151_v20 = vrot.slane %v5149_v4, 5  ;;  %v7426_v32 = vrot.slane %v5459_v47, 9  ;;  %v5502_v12 = vrot.slane %v5086_v53, 5  ;;  %v7805_v53 = vld [vmem:[#allocation11 + $0x220] sm:$0xff] }
 0x41b   : > { %v5118_v54 = vsel %vm8819_vm11, %v5113_v31, %v5117_v35  ;;  %v5563_v0 = vunpack.c.l.b16 %v5496_v38  ;;  %v5145_v58 = vrot.slane %v5143_v29, 4 }
 0x41c   : > { %5841 = vmatpush.bf16.msra.mxu0 %v7787_v1  ;;  %v5313_v27 = vunpack.c.l.b16 %v5118_v54  ;;  %v5562_v1 = vunpack.c.l.b16 %v5493_v25  ;;  %6464 = vmatpush.bf16.msra.mxu2 %v7806_v9 }
 0x41e   : > { %v5578_v42 = vpack.c.b16 %v5563_v0, %v5562_v1 }
 0x420   : > { %5842 = vmatpush.bf16.msra.mxu0 %v7786_v16  ;;  %6465 = vmatpush.bf16.msra.mxu2 %v7805_v53 }
 0x423   : > { %4485 = vmatmul.bf16.gmra.mxu1 %v4393_v34  ;;  %v5119_v34 = vshrl.u32 %v5082_v46, 16 }
 0x424   : > { %4630 = vmatmul.bf16.gmra.mxu2 %v7718_v24  ;;  %v7800_v24 = vld [vmem:[#allocation11 + $0x1f8] sm:$0xff] }
 0x425   : > { %4855 = vmatmul.bf16.gmra.mxu3 %v4763_v7  ;;  %v7785_v7 = vld [vmem:[#allocation11 + $0x180] sm:$0xff]  ;;  %6213 = vmatpush.bf16.msra.mxu1 %v7800_v24  ;;  %v5121_v18 = vrot.slane %v5119_v34, 4  ;;  %v5087_v34 = vld [vmem:[#allocation3 + $0x24] sm:$0xf]  ;;  %v9834_v24 = vld [vmem:[#allocation3 + $0x28] sm:$0xf] }
 0x426   : > { %5843 = vmatpush.bf16.msra.mxu0 %v7785_v7  ;;  %v5154_v51 = vshrl.u32 %v5087_v34, 16  ;;  %v5157_v52 = vshll.u32 %v5087_v34, 16  ;;  %v5163_v60 = vshll.u32 %v9834_v24, 16  ;;  %v7797_v34 = vld [vmem:[#allocation11 + $0x1e0] sm:$0xff] }
 0x427   : > { %v5122_v39 = vor.u32 %v5121_v18, %v5117_v35  ;;  %v5167_v35 = vshrl.u32 %v9834_v24, 16 }
 0x428   : > { %v5156_v17 = vrot.slane %v5154_v51, 4  ;;  %v5159_v31 = vrot.slane %v5157_v52, 5 }
 0x429   : > { %5844 = vmatmul.bf16.vlgmr.msra.gmra.mxu0 %v7777_v48  ;;  %v5123_v30 = vrot.slane %v5122_v39, 4  ;;  %6214 = vmatpush.bf16.msra.mxu1 %v7799_v44  ;;  %v5501_v48 = vrot.slane %v5499_v33, 4  ;;  %v5500_v39 = vsel %vm8859_vm14, %v7426_v32, %v5499_v33  ;;  %v7746_v44 = vld [vmem:[#allocation3 + $0x18] sm:$0xff] }
 0x42a   : > { %v5564_v37 = vunpack.c.l.b16 %v5500_v39  ;;  %v5160_v54 = vor.u32 %v5159_v31, %v5156_v17  ;;  %v7747_v39 = vld [vmem:[#allocation3 + $0x24] sm:$0xff] }
 0x42b   : > { %v5128_v15 = vsel %vm8819_vm11, %v5123_v30, %v5127_v6  ;;  %v5503_v36 = vsel %vm8859_vm14, %v5501_v48, %v5502_v12  ;;  %v5165_v6 = vrot.slane %v5163_v60, 5  ;;  %v5169_v30 = vrot.slane %v5167_v35, 4  ;;  %v7780_v48 = vld [vmem:[#allocation3 + $0x3c] sm:$0xff] }
 0x42c   : > { %v5314_v43 = vunpack.c.l.b16 %v5128_v15  ;;  %v5565_v10 = vunpack.c.l.b16 %v5503_v36  ;;  %v5161_v1 = vrot.slane %v5160_v54, 4 }
 0x42d   : > { %6215 = vmatpush.bf16.msra.mxu1 %v7798_v26  ;;  %v5170_v15 = vor.u32 %v5169_v30, %v5165_v6  ;;  %v5092_v26 = vld [vmem:[#allocation3 + $0x38] sm:$0x1] }
 0x42e   : > { %v5329_v46 = vpack.c.b16 %v5314_v43, %v5313_v27  ;;  %v5460_v27 = vld [vmem:[#allocation3 + $0x24] sm:$0xe]  ;;  %v5197_v30 = vshll.u32 %v5092_v26, 16 }
 0x42f   : > { %v5171_v0 = vrot.slane %v5170_v15, 4 }
 0x431   : > { %6216 = vmatpush.bf16.msra.mxu1 %v7797_v34 }
 0x433   : > { %4490 = vmatmul.bf16.gmra.mxu1 %v4394_v41  ;;  %v5130_v41 = vshrl.u32 %v5084_v19, 16 }
 0x434   : > { %4635 = vmatmul.bf16.gmra.mxu2 %v7719_v59  ;;  %v5133_v59 = vshll.u32 %v5084_v19, 16  ;;  %v5089_v19 = vld [vmem:[#allocation3 + $0x2c] sm:$0x1] }
 0x435   : > { %4860 = vmatmul.bf16.gmra.mxu3 %v4764_v3  ;;  %v5139_v3 = vshll.u32 %v5085_v23, 16  ;;  %v5132_v11 = vrot.slane %v5130_v41, 4 }
 0x436   : > { %v5135_v45 = vrot.slane %v5133_v59, 5  ;;  %v5173_v59 = vshll.u32 %v5089_v19, 16 }
 0x437   : > { %v5141_v62 = vrot.slane %v5139_v3, 5  ;;  %v5506_v3 = vrot.slane %v9834_v24, 5 }
 0x438   : > { %v5136_v40 = vor.u32 %v5135_v45, %v5132_v11  ;;  %v5175_v11 = vrot.slane %v5173_v59, 5  ;;  %v7427_v45 = vrot.slane %v5460_v27, 9 }
 0x439   : > { %5849 = vmatmul.bf16.gmra.mxu0 %v7778_v55  ;;  %v5146_v56 = vor.u32 %v5145_v58, %v5141_v62  ;;  %v5579_v55 = vpack.c.b16 %v5565_v10, %v5564_v37  ;;  %v5509_v58 = vrot.slane %v5089_v19, 5  ;;  %v5461_v37 = vld [vmem:[#allocation3 + $0x30] sm:$0xe]  ;;  %v5093_v10 = vld [vmem:[#allocation3 + $0x3c] sm:$0xf] }
 0x43a   : > { %v5137_v21 = vrot.slane %v5136_v40, 4  ;;  %v5176_v4 = vsel %vm8819_vm11, %v5171_v0, %v5175_v11  ;;  %v5507_v33 = vsel %vm8859_vm14, %v7427_v45, %v5506_v3  ;;  %v9868_v19 = vld [vmem:[#allocation3 + $0x40] sm:$0xf]  ;;  %v7796_v11 = vld [vmem:[#allocation11 + $0x1d8] sm:$0xff] }
 0x43b   : > { %v5147_v7 = vrot.slane %v5146_v56, 4  ;;  %v5566_v51 = vunpack.c.l.b16 %v5507_v33  ;;  %v5215_v27 = vshrl.u32 %v9868_v19, 16  ;;  %6217 = vmatpush.bf16.msra.mxu1 %v7796_v11 }
 0x43c   : > { %v5142_v57 = vsel %vm8819_vm11, %v5137_v21, %v5141_v62  ;;  %v5508_v62 = vrot.slane %v5506_v3, 4  ;;  %v5202_v3 = vshrl.u32 %v5093_v10, 16 }
 0x43d   : > { %v5315_v28 = vunpack.c.l.b16 %v5142_v57 }
 0x43e   : > { %v5510_v47 = vsel %vm8859_vm14, %v5508_v62, %v5509_v58 }
 0x43f   : > { %v5567_v52 = vunpack.c.l.b16 %v5510_v47 }
 0x441   : > { %v5580_v17 = vpack.c.b16 %v5567_v52, %v5566_v51 }
 0x443   : > { %4495 = vmatmul.bf16.gmra.mxu1 %v4395_v22  ;;  %v5152_v22 = vsel %vm8819_vm11, %v5147_v7, %v5151_v20 }
 0x444   : > { %4640 = vmatmul.bf16.gmra.mxu2 %v7720_v14  ;;  %v5316_v5 = vunpack.c.l.b16 %v5152_v22 }
 0x445   : > { %4865 = vmatmul.bf16.gmra.mxu3 %v4765_v13  ;;  %v7779_v13 = vld [vmem:[#allocation3 + $0x30] sm:$0xff] }
 0x446   : > { %v5330_v41 = vpack.c.b16 %v5316_v5, %v5315_v28 }
 0x449   : > { %5854 = vmatmul.bf16.gmra.mxu0 %v7779_v13 }
 0x450   : > { %v4461_v16 = vpop.f32.mrf.mxu1 }
 0x453   : > { %5024 = vmatmul.bf16.vlgmr.msrb.gmra.mxu1 %v7745_v49  ;;  %v5090_v49 = vld [vmem:[#allocation3 + $0x30] sm:$0xf] }
 0x454   : > { %5401 = vmatmul.bf16.vlgmr.msrb.gmra.mxu2 %v5329_v46  ;;  %v9851_v46 = vld [vmem:[#allocation3 + $0x34] sm:$0xf]  ;;  %v5178_v9 = vshrl.u32 %v5090_v49, 16  ;;  %v5181_v21 = vshll.u32 %v5090_v49, 16 }
 0x455   : > { %5650 = vmatmul.bf16.vlgmr.msra.gmra.mxu3 %v5578_v42  ;;  %v5166_v42 = vsel %vm8819_vm11, %v5161_v1, %v5165_v6  ;;  %v5187_v7 = vshll.u32 %v9851_v46, 16  ;;  %v5191_v20 = vshrl.u32 %v9851_v46, 16  ;;  %v5513_v5 = vrot.slane %v9851_v46, 5 }
 0x456   : > { %v5317_v12 = vunpack.c.l.b16 %v5166_v42  ;;  %v5180_v60 = vrot.slane %v5178_v9, 4  ;;  %v5183_v35 = vrot.slane %v5181_v21, 5  ;;  %v5204_v42 = vrot.slane %v5202_v3, 4  ;;  %v5095_v9 = vld [vmem:[#allocation3 + $0x44] sm:$0x1] }
 0x457   : > { %v4606_v63 = vpop.f32.mrf.mxu2  ;;  %v5221_v52 = vshll.u32 %v5095_v9, 16 }
 0x458   : > { %v4607_v18 = vadd.f32 %v4606_v63, %v4461_v16  ;;  %v4831_v2 = vpop.f32.mrf.mxu3  ;;  %v4463_v50 = vpop.f32.mrf.mxu1  ;;  %v5318_v63 = vunpack.c.l.b16 %v5176_v4  ;;  %v5184_v31 = vor.u32 %v5183_v35, %v5180_v60  ;;  %v5217_v4 = vrot.slane %v5215_v27, 4 }
 0x459   : > { %5859 = vmatmul.bf16.gmra.mxu0 %v7780_v48  ;;  %v5520_v60 = vrot.slane %v9868_v19, 5 }
 0x45a   : > { %v9842_v14 = vadd.f32 %v4831_v2, %v4607_v18  ;;  %v5189_v18 = vrot.slane %v5187_v7, 5  ;;  %v5193_v2 = vrot.slane %v5191_v20, 4  ;;  %v5331_v36 = vpack.c.b16 %v5318_v63, %v5317_v12  ;;  %v7748_v63 = vld [vmem:[#allocation3 + $0x30] sm:$0xff] }
 0x45b   : > { %v5185_v54 = vrot.slane %v5184_v31, 4  ;;  %v5096_v31 = vld [vmem:[#allocation3 + $0x48] sm:$0xf] }
 0x45c   : > { %v5194_v6 = vor.u32 %v5193_v2, %v5189_v18  ;;  %v5462_v2 = vld [vmem:[#allocation3 + $0x3c] sm:$0xe] }
 0x45d   : > { %v5190_v62 = vsel %vm8819_vm11, %v5185_v54, %v5189_v18 }
 0x45e   : > { %v5195_v15 = vrot.slane %v5194_v6, 4  ;;  %v5319_v33 = vunpack.c.l.b16 %v5190_v62  ;;  %v9885_v6 = vld [vmem:[#allocation3 + $0x4c] sm:$0xf] }
 0x45f   : > { %v4608_v23 = vpop.f32.mrf.mxu2 }
 0x460   : > { %v4609_v25 = vadd.f32 %v4608_v23, %v4463_v50  ;;  %v4833_v38 = vpop.f32.mrf.mxu3  ;;  %v4466_v29 = vpop.f32.mrf.mxu1  ;;  %v7804_v23 = vld [vmem:[#allocation11 + $0x218] sm:$0xff] }
 0x461   : > { %6466 = vmatpush.bf16.msra.mxu2 %v7804_v23 }
 0x462   : > { %v9849_v43 = vadd.f32 %v4833_v38, %v4609_v25  ;;  %v5199_v25 = vrot.slane %v5197_v30, 5  ;;  %v7428_v38 = vrot.slane %v5461_v37, 9 }
 0x463   : > { %5029 = vmatmul.bf16.gmra.mxu1 %v7746_v44  ;;  %v5515_v44 = vrot.slane %v5513_v5, 4 }
 0x464   : > { %5406 = vmatmul.bf16.gmra.mxu2 %v5330_v41  ;;  %v5516_v41 = vrot.slane %v5092_v26, 5  ;;  %v5200_v58 = vsel %vm8819_vm11, %v5195_v15, %v5199_v25  ;;  %v5514_v49 = vsel %vm8859_vm14, %v7428_v38, %v5513_v5  ;;  %v7795_v15 = vld [vmem:[#allocation11 + $0x1d0] sm:$0xff]  ;;  %v5226_v38 = vshrl.u32 %v5096_v31, 16 }
 0x465   : > { %5655 = vmatmul.bf16.gmra.mxu3 %v5579_v55  ;;  %v5211_v55 = vshll.u32 %v9868_v19, 16  ;;  %v5320_v47 = vunpack.c.l.b16 %v5200_v58  ;;  %v5568_v34 = vunpack.c.l.b16 %v5514_v49  ;;  %6218 = vmatpush.bf16.msra.mxu1 %v7795_v15  ;;  %v5098_v49 = vld [vmem:[#allocation3 + $0x50] sm:$0x1] }
 0x466   : > { %v5517_v46 = vsel %vm8859_vm14, %v5515_v44, %v5516_v41  ;;  %v5229_v44 = vshll.u32 %v5096_v31, 16  ;;  %v5235_v41 = vshll.u32 %v9885_v6, 16  ;;  %v5228_v11 = vrot.slane %v5226_v38, 4 }
 0x467   : > { %v4611_v16 = vpop.f32.mrf.mxu2  ;;  %v5332_v51 = vpack.c.b16 %v5320_v47, %v5319_v33 }
 0x468   : > { %v4612_v40 = vadd.f32 %v4611_v16, %v4466_v29  ;;  %v4836_v56 = vpop.f32.mrf.mxu3  ;;  %v4468_v24 = vpop.f32.mrf.mxu1  ;;  %v5205_v29 = vshll.u32 %v5093_v10, 16  ;;  %v7781_v16 = vld [vmem:[#allocation3 + $0x48] sm:$0xff]  ;;  %v5237_v62 = vrot.slane %v5235_v41, 5  ;;  %v5101_v41 = vld [vmem:[#allocation3 + $0x5c] sm:$0x1] }
 0x469   : > { %5864 = vmatmul.bf16.gmra.mxu0 %v7781_v16 }
 0x46a   : > { %v9863_v32 = vadd.f32 %v4836_v56, %v4612_v40  ;;  %v5207_v40 = vrot.slane %v5205_v29, 5  ;;  %v5213_v56 = vrot.slane %v5211_v55, 5  ;;  %v7782_v29 = vld [vmem:[#allocation3 + $0x54] sm:$0xff] }
 0x46c   : > { %v5208_v7 = vor.u32 %v5207_v40, %v5204_v42  ;;  %v5218_v20 = vor.u32 %v5217_v4, %v5213_v56  ;;  %v7749_v40 = vld [vmem:[#allocation3 + $0x3c] sm:$0xff] }
 0x46f   : > { %v4613_v50 = vpop.f32.mrf.mxu2 }
 0x470   : > { %v4614_v57 = vadd.f32 %v4613_v50, %v4468_v24  ;;  %v4838_v22 = vpop.f32.mrf.mxu3  ;;  %v4471_v13 = vpop.f32.mrf.mxu1  ;;  %v5569_v24 = vunpack.c.l.b16 %v5517_v46  ;;  %v5209_v50 = vrot.slane %v5208_v7, 4  ;;  %v5463_v7 = vld [vmem:[#allocation3 + $0x48] sm:$0xe] }
 0x472   : > { %v9865_v28 = vadd.f32 %v4838_v22, %v4614_v57  ;;  %v5581_v18 = vpack.c.b16 %v5569_v24, %v5568_v34  ;;  %v5219_v57 = vrot.slane %v5218_v20, 4  ;;  %v5223_v22 = vrot.slane %v5221_v52, 5  ;;  %v5099_v20 = vld [vmem:[#allocation3 + $0x54] sm:$0xf] }
 0x473   : > { %5034 = vmatmul.bf16.gmra.mxu1 %v7747_v39  ;;  %v7429_v39 = vrot.slane %v5462_v2, 9  ;;  %v5214_v5 = vsel %vm8819_vm11, %v5209_v50, %v5213_v56  ;;  %v5245_v24 = vshll.u32 %v5098_v49, 16  ;;  %v5250_v50 = vshrl.u32 %v5099_v20, 16 }
 0x474   : > { %5411 = vmatmul.bf16.gmra.mxu2 %v5331_v36  ;;  %v5522_v36 = vrot.slane %v5520_v60, 4  ;;  %v5224_v19 = vsel %vm8819_vm11, %v5219_v57, %v5223_v22  ;;  %v5321_v55 = vunpack.c.l.b16 %v5214_v5  ;;  %v5253_v57 = vshll.u32 %v5099_v20, 16 }
 0x475   : > { %5660 = vmatmul.bf16.gmra.mxu3 %v5580_v17  ;;  %v7803_v17 = vld [vmem:[#allocation11 + $0x210] sm:$0xff]  ;;  %v5521_v23 = vsel %vm8859_vm14, %v7429_v39, %v5520_v60  ;;  %v5322_v27 = vunpack.c.l.b16 %v5224_v19  ;;  %v5247_v52 = vrot.slane %v5245_v24, 5  ;;  %v7430_v60 = vrot.slane %v5463_v7, 9  ;;  %v7783_v19 = vld [vmem:[#allocation3 + $0x60] sm:$0xff] }
 0x476   : > { %6467 = vmatpush.bf16.msra.mxu2 %v7803_v17  ;;  %v7794_v17 = vld [vmem:[#allocation11 + $0x1c8] sm:$0xff]  ;;  %v5537_v20 = vrot.slane %v5101_v41, 5 }
 0x477   : > { %v4616_v59 = vpop.f32.mrf.mxu2  ;;  %v5333_v56 = vpack.c.b16 %v5322_v27, %v5321_v55  ;;  %6219 = vmatpush.bf16.msra.mxu1 %v7794_v17  ;;  %v9919_v24 = vld [vmem:[#allocation3 + $0x64] sm:$0xf] }
 0x478   : > { %v4617_v1 = vadd.f32 %v4616_v59, %v4471_v13  ;;  %v4841_v0 = vpop.f32.mrf.mxu3  ;;  %v4473_v45 = vpop.f32.mrf.mxu1  ;;  %v5523_v13 = vrot.slane %v5095_v9, 5  ;;  %v5239_v59 = vshrl.u32 %v9885_v6, 16 }
 0x479   : > { %5869 = vmatmul.bf16.gmra.mxu0 %v7782_v29 }
 0x47a   : > { %v9876_v53 = vadd.f32 %v4841_v0, %v4617_v1  ;;  %v5524_v54 = vsel %vm8859_vm14, %v5522_v36, %v5523_v13  ;;  %v5570_v1 = vunpack.c.l.b16 %v5521_v23  ;;  %v5241_v58 = vrot.slane %v5239_v59, 4 }
 0x47b   : > { %v5571_v0 = vunpack.c.l.b16 %v5524_v54  ;;  %v5252_v23 = vrot.slane %v5250_v50, 4  ;;  %v5255_v54 = vrot.slane %v5253_v57, 5  ;;  %v7793_v50 = vld [vmem:[#allocation11 + $0x1c0] sm:$0xff] }
 0x47c   : > { %v5242_v34 = vor.u32 %v5241_v58, %v5237_v62  ;;  %6220 = vmatpush.bf16.msra.mxu1 %v7793_v50 }
 0x47d   : > { %v5582_v33 = vpack.c.b16 %v5571_v0, %v5570_v1  ;;  %v5256_v27 = vor.u32 %v5255_v54, %v5252_v23  ;;  %v5269_v0 = vshll.u32 %v5101_v41, 16  ;;  %v5104_v54 = vld [vmem:[#allocation3 + $0x68] sm:$0x1]  ;;  %v7751_v41 = vld [vmem:[#allocation3 + $0x54] sm:$0xff] }
 0x47f   : > { %v4618_v21 = vpop.f32.mrf.mxu2 }
 0x480   : > { %v4619_v48 = vadd.f32 %v4618_v21, %v4473_v45  ;;  %v4843_v12 = vpop.f32.mrf.mxu3  ;;  %v4476_v35 = vpop.f32.mrf.mxu1  ;;  %v5231_v45 = vrot.slane %v5229_v44, 5  ;;  %v5527_v21 = vrot.slane %v9885_v6, 5 }
 0x482   : > { %v9883_v26 = vadd.f32 %v4843_v12, %v4619_v48  ;;  %v5232_v47 = vor.u32 %v5231_v45, %v5228_v11  ;;  %v9902_v48 = vld [vmem:[#allocation3 + $0x58] sm:$0xf]  ;;  %v7802_v12 = vld [vmem:[#allocation11 + $0x208] sm:$0xff] }
 0x483   : > { %5039 = vmatmul.bf16.gmra.mxu1 %v7748_v63  ;;  %6468 = vmatpush.bf16.msra.mxu2 %v7802_v12  ;;  %v5259_v22 = vshll.u32 %v9902_v48, 16  ;;  %v5263_v39 = vshrl.u32 %v9902_v48, 16 }
 0x484   : > { %5416 = vmatmul.bf16.gmra.mxu2 %v5332_v51  ;;  %v5233_v63 = vrot.slane %v5232_v47, 4  ;;  %v5243_v51 = vrot.slane %v5242_v34, 4  ;;  %v5102_v47 = vld [vmem:[#allocation3 + $0x60] sm:$0xf]  ;;  %v7801_v34 = vld [vmem:[#allocation11 + $0x200] sm:$0xff] }
 0x485   : > { %5665 = vmatmul.bf16.gmra.mxu3 %v5581_v18  ;;  %v5530_v18 = vrot.slane %v5098_v49, 5  ;;  %v5261_v15 = vrot.slane %v5259_v22, 5 }
 0x486   : > { %v5238_v6 = vsel %vm8819_vm11, %v5233_v63, %v5237_v62  ;;  %v7750_v62 = vld [vmem:[#allocation3 + $0x48] sm:$0xff] }
 0x487   : > { %v4621_v30 = vpop.f32.mrf.mxu2  ;;  %v5323_v38 = vunpack.c.l.b16 %v5238_v6  ;;  %6469 = vmatpush.bf16.msra.mxu2 %v7801_v34 }
 0x488   : > { %v4622_v37 = vadd.f32 %v4621_v30, %v4476_v35  ;;  %v4846_v10 = vpop.f32.mrf.mxu3  ;;  %v4478_v25 = vpop.f32.mrf.mxu1  ;;  %v5529_v35 = vrot.slane %v5527_v21, 4  ;;  %v5248_v30 = vsel %vm8819_vm11, %v5243_v51, %v5247_v52  ;;  %v5274_v51 = vshrl.u32 %v5102_v47, 16 }
 0x489   : > { %v5324_v44 = vunpack.c.l.b16 %v5248_v30  ;;  %5874 = vmatmul.bf16.gmra.mxu0 %v7783_v19 }
 0x48a   : > { %v9897_v3 = vadd.f32 %v4846_v10, %v4622_v37  ;;  %v5528_v37 = vsel %vm8859_vm14, %v7430_v60, %v5527_v21  ;;  %v5531_v10 = vsel %vm8859_vm14, %v5529_v35, %v5530_v18  ;;  %v5277_v35 = vshll.u32 %v5102_v47, 16 }
 0x48b   : > { %v5572_v59 = vunpack.c.l.b16 %v5528_v37  ;;  %v5573_v29 = vunpack.c.l.b16 %v5531_v10  ;;  %v5334_v58 = vpack.c.b16 %v5324_v44, %v5323_v38  ;;  %v5283_v18 = vshll.u32 %v9919_v24, 16 }
 0x48c   : > { %v5276_v6 = vrot.slane %v5274_v51, 4  ;;  %v5279_v30 = vrot.slane %v5277_v35, 5 }
 0x48d   : > { %v5285_v37 = vrot.slane %v5283_v18, 5 }
 0x48f   : > { %v4623_v46 = vpop.f32.mrf.mxu2 }
 0x490   : > { %v4624_v16 = vadd.f32 %v4623_v46, %v4478_v25  ;;  %v4848_v42 = vpop.f32.mrf.mxu3  ;;  %v4481_v4 = vpop.f32.mrf.mxu1  ;;  %v5265_v25 = vrot.slane %v5263_v39, 4  ;;  %v5583_v46 = vpack.c.b16 %v5573_v29, %v5572_v59  ;;  %v5280_v59 = vor.u32 %v5279_v30, %v5276_v6 }
 0x492   : > { %v9899_v9 = vadd.f32 %v4848_v42, %v4624_v16  ;;  %v5266_v1 = vor.u32 %v5265_v25, %v5261_v15  ;;  %v5534_v42 = vrot.slane %v9902_v48, 5 }
 0x493   : > { %5044 = vmatmul.bf16.gmra.mxu1 %v7749_v40  ;;  %v5257_v40 = vrot.slane %v5256_v27, 4 }
 0x494   : > { %5421 = vmatmul.bf16.gmra.mxu2 %v5333_v56  ;;  %v5267_v56 = vrot.slane %v5266_v1, 4  ;;  %v5536_v7 = vrot.slane %v5534_v42, 4 }
 0x495   : > { %5670 = vmatmul.bf16.gmra.mxu3 %v5582_v33  ;;  %v5464_v33 = vld [vmem:[#allocation3 + $0x54] sm:$0xe]  ;;  %v5262_v63 = vsel %vm8819_vm11, %v5257_v40, %v5261_v15 }
 0x496   : > { %v7431_v21 = vrot.slane %v5464_v33, 9  ;;  %v5325_v17 = vunpack.c.l.b16 %v5262_v63 }
 0x497   : > { %v4626_v2 = vpop.f32.mrf.mxu2 }
 0x498   : > { %v4627_v36 = vadd.f32 %v4626_v2, %v4481_v4  ;;  %v4851_v13 = vpop.f32.mrf.mxu3  ;;  %v4483_v31 = vpop.f32.mrf.mxu1  ;;  %v5271_v4 = vrot.slane %v5269_v0, 5  ;;  %v5287_v2 = vshrl.u32 %v9919_v24, 16  ;;  %v5535_v39 = vsel %vm8859_vm14, %v7431_v21, %v5534_v42 }
 0x499   : > { %v5574_v19 = vunpack.c.l.b16 %v5535_v39  ;;  %v5541_v0 = vrot.slane %v9919_v24, 5 }
 0x49a   : > { %v9910_v5 = vadd.f32 %v4851_v13, %v4627_v36  ;;  %v5272_v48 = vsel %vm8819_vm11, %v5267_v56, %v5271_v4  ;;  %v5538_v36 = vsel %vm8859_vm14, %v5536_v7, %v5537_v20  ;;  %v7784_v13 = vld [vmem:[#allocation3 + $0x6c] sm:$0xff]  ;;  %v5289_v10 = vrot.slane %v5287_v2, 4 }
 0x49b   : > { %v5575_v23 = vunpack.c.l.b16 %v5538_v36  ;;  %5879 = vmatmul.bf16.gmra.mxu0 %v7784_v13  ;;  %v5543_v56 = vrot.slane %v5541_v0, 4  ;;  %v5544_v4 = vrot.slane %v5104_v54, 5  ;;  %v5903_v36 = vld [vmem:[#allocation3 + $0x20] sm:$0x1] }
 0x49c   : > { %v5290_v29 = vor.u32 %v5289_v10, %v5285_v37 }
 0x49d   : > { %v5584_v1 = vpack.c.b16 %v5575_v23, %v5574_v19 }
 0x49f   : > { %v4628_v55 = vpop.f32.mrf.mxu2 }
 0x4a0   : > { %v4629_v11 = vadd.f32 %v4628_v55, %v4483_v31  ;;  %v4853_v45 = vpop.f32.mrf.mxu3  ;;  %v4486_v49 = vpop.f32.mrf.mxu1  ;;  %v5326_v31 = vunpack.c.l.b16 %v5272_v48  ;;  %v5293_v55 = vshll.u32 %v5104_v54, 16  ;;  %v7752_v54 = vld [vmem:[#allocation3 + $0x60] sm:$0xff] }
 0x4a2   : > { %v9916_v16 = vadd.f32 %v4853_v45, %v4629_v11  ;;  %v5335_v25 = vpack.c.b16 %v5326_v31, %v5325_v17  ;;  %v5465_v45 = vld [vmem:[#allocation3 + $0x60] sm:$0xe]  ;;  %v5295_v42 = vrot.slane %v5293_v55, 5 }
 0x4a3   : > { %5049 = vmatmul.bf16.gmra.mxu1 %v7750_v62  ;;  %v5901_v62 = vld [vmem:[#allocation3 + $0x18] sm:$0xf]  ;;  %v7432_v40 = vrot.slane %v5465_v45, 9  ;;  %v5904_v45 = vld [vmem:[#allocation3 + $0x24] sm:$0xf] }
 0x4a4   : > { %5426 = vmatmul.bf16.gmra.mxu2 %v5334_v58  ;;  %v5902_v58 = vld [vmem:[#allocation3 + $0x1c] sm:$0xf]  ;;  %v5926_v33 = vshrl.u32 %v5901_v62, 16  ;;  %v5929_v47 = vshll.u32 %v5901_v62, 16  ;;  %v5905_v62 = vld [vmem:[#allocation3 + $0x28] sm:$0xf] }
 0x4a5   : > { %5675 = vmatmul.bf16.gmra.mxu3 %v5583_v46  ;;  %v5291_v46 = vrot.slane %v5290_v29, 4  ;;  %v5935_v34 = vshll.u32 %v5902_v58, 16  ;;  %v5939_v21 = vshrl.u32 %v5902_v58, 16  ;;  %v5542_v51 = vsel %vm8859_vm14, %v7432_v40, %v5541_v0 }
 0x4a6   : > { %v5931_v18 = vrot.slane %v5929_v47, 5  ;;  %v5576_v13 = vunpack.c.l.b16 %v5542_v51  ;;  %v6312_v10 = vrot.slane %v5902_v58, 5  ;;  %v6315_v0 = vrot.slane %v5903_v36, 5 }
 0x4a7   : > { %v4631_v12 = vpop.f32.mrf.mxu2  ;;  %v5296_v48 = vsel %vm8819_vm11, %v5291_v46, %v5295_v42  ;;  %v5937_v2 = vrot.slane %v5935_v34, 5  ;;  %v5941_v50 = vrot.slane %v5939_v21, 4  ;;  %v5953_v47 = vshll.u32 %v5904_v45, 16 }
 0x4a8   : > { %v4632_v52 = vadd.f32 %v4631_v12, %v4486_v49  ;;  %v4856_v60 = vpop.f32.mrf.mxu3  ;;  %v4488_v57 = vpop.f32.mrf.mxu1  ;;  %v5281_v49 = vrot.slane %v5280_v59, 4  ;;  %v5328_v39 = vunpack.c.l.b16 %v5296_v48  ;;  %v5959_v34 = vshll.u32 %v5905_v62, 16 }
 0x4a9   : > { %v5942_v6 = vor.u32 %v5941_v50, %v5937_v2  ;;  %v5963_v21 = vshrl.u32 %v5905_v62, 16 }
 0x4aa   : > { %v9927_v22 = vadd.f32 %v4856_v60, %v4632_v52  ;;  %v5286_v12 = vsel %vm8819_vm11, %v5281_v49, %v5285_v37  ;;  %v5545_v52 = vsel %vm8859_vm14, %v5543_v56, %v5544_v4  ;;  %v5928_v60 = vrot.slane %v5926_v33, 4 }
 0x4ab   : > { %v5577_v17 = vunpack.c.l.b16 %v5545_v52  ;;  %v5945_v37 = vshll.u32 %v5903_v36, 16  ;;  %v5943_v29 = vrot.slane %v5942_v6, 4  ;;  %v5950_v56 = vshrl.u32 %v5904_v45, 16 }
 0x4ac   : > { %v5932_v31 = vor.u32 %v5931_v18, %v5928_v60  ;;  %v5955_v52 = vrot.slane %v5953_v47, 5  ;;  %v5961_v60 = vrot.slane %v5959_v34, 5  ;;  %v5965_v18 = vrot.slane %v5963_v21, 4 }
 0x4ad   : > { %v5947_v55 = vrot.slane %v5945_v37, 5  ;;  %v5952_v51 = vrot.slane %v5950_v56, 4  ;;  %v6319_v37 = vrot.slane %v5905_v62, 5 }
 0x4ae   : > { %v5933_v59 = vrot.slane %v5932_v31, 4  ;;  %v5966_v31 = vor.u32 %v5965_v18, %v5961_v60 }
 0x4af   : > { %v4633_v15 = vpop.f32.mrf.mxu2  ;;  %v5948_v46 = vsel %vm8819_vm11, %v5943_v29, %v5947_v55  ;;  %v6321_v29 = vrot.slane %v6319_v37, 4 }
 0x4b0   : > { %v4634_v38 = vadd.f32 %v4633_v15, %v4488_v57  ;;  %v4858_v44 = vpop.f32.mrf.mxu3  ;;  %v4491_v27 = vpop.f32.mrf.mxu1  ;;  %v5327_v57 = vunpack.c.l.b16 %v5286_v12  ;;  %v5938_v58 = vsel %vm8819_vm11, %v5933_v59, %v5937_v2  ;;  %v6134_v12 = vunpack.c.l.b16 %v5948_v46  ;;  %v5906_v2 = vld [vmem:[#allocation3 + $0x2c] sm:$0x1] }
 0x4b1   : > { %v5969_v6 = vshll.u32 %v5906_v2, 16  ;;  %v6322_v55 = vrot.slane %v5906_v2, 5 }
 0x4b2   : > { %v9934_v11 = vadd.f32 %v4858_v44, %v4634_v38  ;;  %v5336_v15 = vpack.c.b16 %v5328_v39, %v5327_v57  ;;  %v5585_v44 = vpack.c.b16 %v5577_v17, %v5576_v13  ;;  %v5956_v17 = vor.u32 %v5955_v52, %v5952_v51 }
 0x4b3   : > { %5054 = vmatmul.bf16.gmra.mxu1 %v7751_v41 }
 0x4b4   : > { %5431 = vmatmul.bf16.gmra.mxu2 %v5335_v25  ;;  %v6278_v25 = vld [vmem:[#allocation3 + $0x18] sm:$0xe] }
 0x4b5   : > { %5680 = vmatmul.bf16.gmra.mxu3 %v5584_v1  ;;  %v6314_v1 = vrot.slane %v6312_v10, 4 }
 0x4b7   : > { %v4636_v7 = vpop.f32.mrf.mxu2  ;;  %v6316_v40 = vsel %vm8859_vm14, %v6314_v1, %v6315_v0 }
 0x4b8   : > { %v4637_v24 = vadd.f32 %v4636_v7, %v4491_v27  ;;  %v4861_v20 = vpop.f32.mrf.mxu3  ;;  %v4493_v63 = vpop.f32.mrf.mxu1  ;;  %v7561_v27 = vrot.slane %v6278_v25, 9  ;;  %v6383_v48 = vunpack.c.l.b16 %v6316_v40  ;;  %v5957_v25 = vrot.slane %v5956_v17, 4 }
 0x4b9   : > { %v6323_v40 = vsel %vm8859_vm14, %v6321_v29, %v6322_v55 }
 0x4ba   : > { %v9944_v35 = vadd.f32 %v4861_v20, %v4637_v24  ;;  %v6313_v42 = vsel %vm8859_vm14, %v7561_v27, %v6312_v10  ;;  %v6133_v20 = vunpack.c.l.b16 %v5938_v58 }
 0x4bc   : > { %v6149_v57 = vpack.c.b16 %v6134_v12, %v6133_v20  ;;  %v6385_v12 = vunpack.c.l.b16 %v6323_v40 }
 0x4bf   : > { %v4638_v30 = vpop.f32.mrf.mxu2 }
 0x4c0   : > { %v4639_v19 = vadd.f32 %v4638_v30, %v4493_v63  ;;  %v4863_v23 = vpop.f32.mrf.mxu3  ;;  %v4496_v38 = vpop.f32.mrf.mxu1  ;;  %v6382_v63 = vunpack.c.l.b16 %v6313_v42 }
 0x4c2   : > { %v9946_v41 = vadd.f32 %v4863_v23, %v4639_v19  ;;  %v6398_v39 = vpack.c.b16 %v6383_v48, %v6382_v63  ;;  %v6279_v23 = vld [vmem:[#allocation3 + $0x24] sm:$0xe]  ;;  %v5909_v63 = vld [vmem:[#allocation3 + $0x38] sm:$0x1] }
 0x4c3   : > { %5059 = vmatmul.bf16.gmra.mxu1 %v7752_v54  ;;  %v5907_v54 = vld [vmem:[#allocation3 + $0x30] sm:$0xf]  ;;  %v7562_v59 = vrot.slane %v6279_v23, 9  ;;  %v5911_v23 = vld [vmem:[#allocation3 + $0x40] sm:$0xf] }
 0x4c4   : > { %5436 = vmatmul.bf16.gmra.mxu2 %v5336_v15  ;;  %v5908_v15 = vld [vmem:[#allocation3 + $0x34] sm:$0xf]  ;;  %v5974_v27 = vshrl.u32 %v5907_v54, 16  ;;  %v5977_v1 = vshll.u32 %v5907_v54, 16  ;;  %v6007_v55 = vshll.u32 %v5911_v23, 16 }
 0x4c5   : > { %5685 = vmatmul.bf16.gmra.mxu3 %v5585_v44  ;;  %v5971_v44 = vrot.slane %v5969_v6, 5  ;;  %v5983_v0 = vshll.u32 %v5908_v15, 16  ;;  %v5987_v45 = vshrl.u32 %v5908_v15, 16  ;;  %v6320_v42 = vsel %vm8859_vm14, %v7562_v59, %v6319_v37 }
 0x4c6   : > { %v5976_v56 = vrot.slane %v5974_v27, 4  ;;  %v6384_v20 = vunpack.c.l.b16 %v6320_v42  ;;  %v6326_v18 = vrot.slane %v5908_v15, 5  ;;  %v6329_v37 = vrot.slane %v5909_v63, 5 }
 0x4c7   : > { %v4641_v49 = vpop.f32.mrf.mxu2  ;;  %v5985_v47 = vrot.slane %v5983_v0, 5  ;;  %v5989_v34 = vrot.slane %v5987_v45, 4  ;;  %v6011_v27 = vshrl.u32 %v5911_v23, 16  ;;  %v6009_v40 = vrot.slane %v6007_v55, 5 }
 0x4c8   : > { %v4642_v4 = vadd.f32 %v4641_v49, %v4496_v38  ;;  %v4866_v33 = vpop.f32.mrf.mxu3  ;;  %v4498_v7 = vpop.f32.mrf.mxu1  ;;  %v5967_v38 = vrot.slane %v5966_v31, 4 }
 0x4c9   : > { %v5990_v51 = vor.u32 %v5989_v34, %v5985_v47 }
 0x4ca   : > { %v9956_v24 = vadd.f32 %v4866_v33, %v4642_v4  ;;  %v5972_v46 = vsel %vm8819_vm11, %v5967_v38, %v5971_v44  ;;  %v5979_v33 = vrot.slane %v5977_v1, 5 }
 0x4cb   : > { %v5991_v17 = vrot.slane %v5990_v51, 4  ;;  %v6281_v51 = vld [vmem:[#allocation3 + $0x3c] sm:$0xe] }
 0x4cc   : > { %v5980_v48 = vor.u32 %v5979_v33, %v5976_v56  ;;  %v6013_v56 = vrot.slane %v6011_v27, 4 }
 0x4cf   : > { %v4643_v50 = vpop.f32.mrf.mxu2 }
 0x4d0   : > { %v4644_v36 = vadd.f32 %v4643_v50, %v4498_v7  ;;  %v4868_v13 = vpop.f32.mrf.mxu3  ;;  %v5025_v30 = vpop.f32.mrf.mxu1  ;;  %v6136_v7 = vunpack.c.l.b16 %v5972_v46 }
 0x4d1   : > { %v5065_v19 = vadd.f32 %v5025_v30, %v9842_v14  ;;  %v5962_v14 = vsel %vm8819_vm11, %v5957_v25, %v5961_v60  ;;  %v5993_v60 = vshll.u32 %v5909_v63, 16  ;;  %v6328_v30 = vrot.slane %v6326_v18, 4 }
 0x4d2   : > { %v9958_v10 = vadd.f32 %v4868_v13, %v4644_v36  ;;  %v6135_v21 = vunpack.c.l.b16 %v5962_v14  ;;  %v5981_v13 = vrot.slane %v5980_v48, 4  ;;  %v6333_v48 = vrot.slane %v5911_v23, 5 }
 0x4d3   : > { %6221 = vmatmul.bf16.vlgmr.msra.gmra.mxu1 %v6149_v57  ;;  %v6399_v57 = vpack.c.b16 %v6385_v12, %v6384_v20  ;;  %v5995_v31 = vrot.slane %v5993_v60, 5  ;;  %v6330_v38 = vsel %vm8859_vm14, %v6328_v30, %v6329_v37  ;;  %v6014_v20 = vor.u32 %v6013_v56, %v6009_v40  ;;  %v5914_v60 = vld [vmem:[#allocation3 + $0x4c] sm:$0xf] }
 0x4d4   : > { %6470 = vmatmul.bf16.vlgmr.msra.gmra.mxu2 %v6398_v39  ;;  %v6150_v50 = vpack.c.b16 %v6136_v7, %v6135_v21  ;;  %v6280_v39 = vld [vmem:[#allocation3 + $0x30] sm:$0xe]  ;;  %v5986_v54 = vsel %vm8819_vm11, %v5981_v13, %v5985_v47 }
 0x4d5   : > { %v7563_v6 = vrot.slane %v6280_v39, 9  ;;  %v5996_v25 = vsel %vm8819_vm11, %v5991_v17, %v5995_v31  ;;  %v6137_v45 = vunpack.c.l.b16 %v5986_v54  ;;  %v7564_v39 = vrot.slane %v6281_v51, 9  ;;  %v5917_v51 = vld [vmem:[#allocation3 + $0x58] sm:$0xf] }
 0x4d6   : > { %v6031_v31 = vshll.u32 %v5914_v60, 16 }
 0x4d7   : > { %v5402_v62 = vpop.f32.mrf.mxu2  ;;  %v6334_v54 = vsel %vm8859_vm14, %v7564_v39, %v6333_v48 }
 0x4d8   : > { %v9961_v58 = vadd.f32 %v5402_v62, %v5065_v19  ;;  %v5027_v49 = vpop.f32.mrf.mxu1  ;;  %v5910_v19 = vld [vmem:[#allocation3 + $0x3c] sm:$0xf]  ;;  %v6138_v62 = vunpack.c.l.b16 %v5996_v25 }
 0x4d9   : > { %v5066_v4 = vadd.f32 %v5027_v49, %v9849_v43  ;;  %v5998_v44 = vshrl.u32 %v5910_v19, 16  ;;  %v6001_v29 = vshll.u32 %v5910_v19, 16  ;;  %v6387_v49 = vunpack.c.l.b16 %v6330_v38 }
 0x4da   : > { %v6151_v47 = vpack.c.b16 %v6138_v62, %v6137_v45  ;;  %v5915_v45 = vld [vmem:[#allocation3 + $0x50] sm:$0x1] }
 0x4db   : > { %v6000_v46 = vrot.slane %v5998_v44, 4  ;;  %v6003_v42 = vrot.slane %v6001_v29, 5  ;;  %v6033_v44 = vrot.slane %v6031_v31, 5 }
 0x4dd   : > { %v6004_v7 = vor.u32 %v6003_v42, %v6000_v46  ;;  %v6041_v46 = vshll.u32 %v5915_v45, 16  ;;  %v6340_v42 = vrot.slane %v5914_v60, 5 }
 0x4df   : > { %v5404_v52 = vpop.f32.mrf.mxu2 }
 0x4e0   : > { %v9972_v2 = vadd.f32 %v5404_v52, %v5066_v4  ;;  %v5030_v36 = vpop.f32.mrf.mxu1  ;;  %v5912_v4 = vld [vmem:[#allocation3 + $0x44] sm:$0x1]  ;;  %v5913_v52 = vld [vmem:[#allocation3 + $0x48] sm:$0xf] }
 0x4e1   : > { %v5067_v43 = vadd.f32 %v5030_v36, %v9863_v32  ;;  %v6327_v32 = vsel %vm8859_vm14, %v7563_v6, %v6326_v18  ;;  %v6017_v12 = vshll.u32 %v5912_v4, 16  ;;  %v6005_v18 = vrot.slane %v6004_v7, 4 }
 0x4e2   : > { %v6386_v14 = vunpack.c.l.b16 %v6327_v32  ;;  %v6335_v36 = vrot.slane %v6333_v48, 4  ;;  %v6022_v13 = vshrl.u32 %v5913_v52, 16  ;;  %v6025_v17 = vshll.u32 %v5913_v52, 16 }
 0x4e3   : > { %6226 = vmatmul.bf16.gmra.mxu1 %v6150_v50  ;;  %v6015_v50 = vrot.slane %v6014_v20, 4  ;;  %v6035_v6 = vshrl.u32 %v5914_v60, 16  ;;  %v6043_v20 = vrot.slane %v6041_v46, 5  ;;  %v6343_v48 = vrot.slane %v5915_v45, 5  ;;  %v5920_v46 = vld [vmem:[#allocation3 + $0x64] sm:$0xf] }
 0x4e4   : > { %6475 = vmatmul.bf16.gmra.mxu2 %v6399_v57  ;;  %v6400_v34 = vpack.c.b16 %v6387_v49, %v6386_v14  ;;  %v6019_v57 = vrot.slane %v6017_v12, 5  ;;  %v6024_v25 = vrot.slane %v6022_v13, 4  ;;  %v6027_v38 = vrot.slane %v6025_v17, 5 }
 0x4e5   : > { %v6037_v29 = vrot.slane %v6035_v6, 4  ;;  %v6059_v13 = vshrl.u32 %v5917_v51, 16 }
 0x4e6   : > { %v6020_v23 = vsel %vm8819_vm11, %v6015_v50, %v6019_v57  ;;  %v6028_v62 = vor.u32 %v6027_v38, %v6024_v25 }
 0x4e7   : > { %v5407_v15 = vpop.f32.mrf.mxu2  ;;  %v6140_v27 = vunpack.c.l.b16 %v6020_v23  ;;  %v6038_v14 = vor.u32 %v6037_v29, %v6033_v44  ;;  %v6061_v25 = vrot.slane %v6059_v13, 4 }
 0x4e8   : > { %v9983_v59 = vadd.f32 %v5407_v15, %v5067_v43  ;;  %v5032_v1 = vpop.f32.mrf.mxu1  ;;  %v6336_v43 = vrot.slane %v5912_v4, 5 }
 0x4e9   : > { %v5068_v0 = vadd.f32 %v5032_v1, %v9865_v28  ;;  %v6388_v1 = vunpack.c.l.b16 %v6334_v54  ;;  %v6039_v7 = vrot.slane %v6038_v14, 4  ;;  %v6283_v14 = vld [vmem:[#allocation3 + $0x54] sm:$0xe] }
 0x4ea   : > { %v6337_v15 = vsel %vm8859_vm14, %v6335_v36, %v6336_v43  ;;  %v6055_v43 = vshll.u32 %v5917_v51, 16 }
 0x4ef   : > { %v5409_v33 = vpop.f32.mrf.mxu2 }
 0x4f0   : > { %v9986_v21 = vadd.f32 %v5409_v33, %v5068_v0  ;;  %v5035_v63 = vpop.f32.mrf.mxu1  ;;  %v6389_v0 = vunpack.c.l.b16 %v6337_v15  ;;  %v6282_v33 = vld [vmem:[#allocation3 + $0x48] sm:$0xe]  ;;  %v6057_v15 = vrot.slane %v6055_v43, 5 }
 0x4f1   : > { %v5069_v28 = vadd.f32 %v5035_v63, %v9876_v53  ;;  %v6010_v53 = vsel %vm8819_vm11, %v6005_v18, %v6009_v40  ;;  %v7565_v12 = vrot.slane %v6282_v33, 9  ;;  %v6342_v63 = vrot.slane %v6340_v42, 4 }
 0x4f2   : > { %v6139_v55 = vunpack.c.l.b16 %v6010_v53  ;;  %v6401_v4 = vpack.c.b16 %v6389_v0, %v6388_v1  ;;  %v6044_v18 = vsel %vm8819_vm11, %v6039_v7, %v6043_v20  ;;  %v6062_v1 = vor.u32 %v6061_v25, %v6057_v15 }
 0x4f3   : > { %6231 = vmatmul.bf16.gmra.mxu1 %v6151_v47  ;;  %v6344_v50 = vsel %vm8859_vm14, %v6342_v63, %v6343_v48  ;;  %v7566_v33 = vrot.slane %v6283_v14, 9  ;;  %v6079_v20 = vshll.u32 %v5920_v46, 16  ;;  %v5923_v14 = vld [vmem:[#allocation3 + $0x70] sm:$0xf] }
 0x4f4   : > { %6480 = vmatmul.bf16.gmra.mxu2 %v6400_v34  ;;  %v6152_v56 = vpack.c.b16 %v6140_v27, %v6139_v55  ;;  %v6029_v34 = vrot.slane %v6028_v62, 4  ;;  %v6347_v62 = vrot.slane %v5917_v51, 5 }
 0x4f6   : > { %v6034_v52 = vsel %vm8819_vm11, %v6029_v34, %v6033_v44 }
 0x4f7   : > { %v5412_v30 = vpop.f32.mrf.mxu2  ;;  %v6141_v6 = vunpack.c.l.b16 %v6034_v52  ;;  %v6348_v52 = vsel %vm8859_vm14, %v7566_v33, %v6347_v62 }
 0x4f8   : > { %v9989_v37 = vadd.f32 %v5412_v30, %v5069_v28  ;;  %v5037_v19 = vpop.f32.mrf.mxu1  ;;  %v5916_v28 = vld [vmem:[#allocation3 + $0x54] sm:$0xf]  ;;  %v6142_v30 = vunpack.c.l.b16 %v6044_v18 }
 0x4f9   : > { %v5070_v32 = vadd.f32 %v5037_v19, %v9883_v26  ;;  %v6046_v57 = vshrl.u32 %v5916_v28, 16  ;;  %v6049_v36 = vshll.u32 %v5916_v28, 16  ;;  %v6391_v19 = vunpack.c.l.b16 %v6344_v50 }
 0x4fa   : > { %v6153_v44 = vpack.c.b16 %v6142_v30, %v6141_v6  ;;  %v5921_v6 = vld [vmem:[#allocation3 + $0x68] sm:$0x1] }
 0x4fb   : > { %v6048_v23 = vrot.slane %v6046_v57, 4  ;;  %v6051_v54 = vrot.slane %v6049_v36, 5  ;;  %v6081_v57 = vrot.slane %v6079_v20, 5 }
 0x4fd   : > { %v6052_v27 = vor.u32 %v6051_v54, %v6048_v23  ;;  %v6089_v23 = vshll.u32 %v5921_v6, 16  ;;  %v6354_v54 = vrot.slane %v5920_v46, 5 }
 0x4ff   : > { %v5414_v49 = vpop.f32.mrf.mxu2 }
 0x500   : > { %v10000_v40 = vadd.f32 %v5414_v49, %v5070_v32  ;;  %v5040_v47 = vpop.f32.mrf.mxu1  ;;  %v5918_v32 = vld [vmem:[#allocation3 + $0x5c] sm:$0x1]  ;;  %v5919_v49 = vld [vmem:[#allocation3 + $0x60] sm:$0xf] }
 0x501   : > { %v5071_v26 = vadd.f32 %v5040_v47, %v9897_v3  ;;  %v6341_v3 = vsel %vm8859_vm14, %v7565_v12, %v6340_v42  ;;  %v6065_v0 = vshll.u32 %v5918_v32, 16  ;;  %v6053_v42 = vrot.slane %v6052_v27, 4 }
 0x502   : > { %v6390_v53 = vunpack.c.l.b16 %v6341_v3  ;;  %v6349_v47 = vrot.slane %v6347_v62, 4  ;;  %v6070_v34 = vshrl.u32 %v5919_v49, 16  ;;  %v6073_v7 = vshll.u32 %v5919_v49, 16 }
 0x503   : > { %6236 = vmatmul.bf16.gmra.mxu1 %v6152_v56  ;;  %v6063_v56 = vrot.slane %v6062_v1, 4  ;;  %v6083_v12 = vshrl.u32 %v5920_v46, 16  ;;  %v6091_v1 = vrot.slane %v6089_v23, 5  ;;  %v6357_v62 = vrot.slane %v5921_v6, 5  ;;  %v5845_v23 = vpop.f32.mrf.mxu0 }
 0x504   : > { %6485 = vmatmul.bf16.gmra.mxu2 %v6401_v4  ;;  %v6402_v29 = vpack.c.b16 %v6391_v19, %v6390_v53  ;;  %v6067_v4 = vrot.slane %v6065_v0, 5  ;;  %v6072_v18 = vrot.slane %v6070_v34, 4  ;;  %v6075_v50 = vrot.slane %v6073_v7, 5 }
 0x505   : > { %v6085_v36 = vrot.slane %v6083_v12, 4  ;;  %v6107_v34 = vshrl.u32 %v5923_v14, 16 }
 0x506   : > { %v6068_v51 = vsel %vm8819_vm11, %v6063_v56, %v6067_v4  ;;  %v6076_v30 = vor.u32 %v6075_v50, %v6072_v18  ;;  %v5651_v50 = vpop.f32.mrf.mxu3 }
 0x507   : > { %v5417_v60 = vpop.f32.mrf.mxu2  ;;  %v6144_v13 = vunpack.c.l.b16 %v6068_v51  ;;  %v6086_v53 = vor.u32 %v6085_v36, %v6081_v57  ;;  %v6109_v18 = vrot.slane %v6107_v34, 4 }
 0x508   : > { %v10011_v39 = vadd.f32 %v5417_v60, %v5071_v26  ;;  %v5042_v17 = vpop.f32.mrf.mxu1  ;;  %v6350_v26 = vrot.slane %v5918_v32, 5 }
 0x509   : > { %v5072_v31 = vadd.f32 %v5042_v17, %v9899_v9  ;;  %v6392_v17 = vunpack.c.l.b16 %v6348_v52  ;;  %v6087_v27 = vrot.slane %v6086_v53, 4 }
 0x50a   : > { %v6351_v60 = vsel %vm8859_vm14, %v6349_v47, %v6350_v26  ;;  %v6103_v26 = vshll.u32 %v5923_v14, 16 }
 0x50f   : > { %v5419_v38 = vpop.f32.mrf.mxu2 }
 0x510   : > { %v10014_v55 = vadd.f32 %v5419_v38, %v5072_v31  ;;  %v5045_v45 = vpop.f32.mrf.mxu1  ;;  %v6393_v31 = vunpack.c.l.b16 %v6351_v60  ;;  %v6284_v38 = vld [vmem:[#allocation3 + $0x60] sm:$0xe]  ;;  %v6105_v60 = vrot.slane %v6103_v26, 5 }
 0x511   : > { %v5073_v9 = vadd.f32 %v5045_v45, %v9910_v5  ;;  %v6058_v5 = vsel %vm8819_vm11, %v6053_v42, %v6057_v15  ;;  %v7567_v0 = vrot.slane %v6284_v38, 9  ;;  %v6356_v45 = vrot.slane %v6354_v54, 4 }
 0x512   : > { %v6143_v43 = vunpack.c.l.b16 %v6058_v5  ;;  %v6403_v32 = vpack.c.b16 %v6393_v31, %v6392_v17  ;;  %v6092_v42 = vsel %vm8819_vm11, %v6087_v27, %v6091_v1  ;;  %v6110_v31 = vor.u32 %v6109_v18, %v6105_v60  ;;  %v5653_v1 = vpop.f32.mrf.mxu3 }
 0x513   : > { %6241 = vmatmul.bf16.gmra.mxu1 %v6153_v44  ;;  %v6358_v56 = vsel %vm8859_vm14, %v6356_v45, %v6357_v62 }
 0x514   : > { %6490 = vmatmul.bf16.gmra.mxu2 %v6402_v29  ;;  %v6154_v25 = vpack.c.b16 %v6144_v13, %v6143_v43  ;;  %v6077_v29 = vrot.slane %v6076_v30, 4 }
 0x516   : > { %v6082_v49 = vsel %vm8819_vm11, %v6077_v29, %v6081_v57 }
 0x517   : > { %v5422_v63 = vpop.f32.mrf.mxu2  ;;  %v6145_v12 = vunpack.c.l.b16 %v6082_v49 }
 0x518   : > { %v10017_v48 = vadd.f32 %v5422_v63, %v5073_v9  ;;  %v5047_v28 = vpop.f32.mrf.mxu1  ;;  %v5922_v9 = vld [vmem:[#allocation3 + $0x6c] sm:$0xf]  ;;  %v6146_v63 = vunpack.c.l.b16 %v6092_v42 }
 0x519   : > { %v5074_v3 = vadd.f32 %v5047_v28, %v9916_v16  ;;  %v6094_v4 = vshrl.u32 %v5922_v9, 16  ;;  %v6097_v47 = vshll.u32 %v5922_v9, 16  ;;  %v6395_v28 = vunpack.c.l.b16 %v6358_v56  ;;  %v5847_v56 = vpop.f32.mrf.mxu0 }
 0x51a   : > { %v6155_v36 = vpack.c.b16 %v6146_v63, %v6145_v12 }
 0x51b   : > { %v6096_v51 = vrot.slane %v6094_v4, 4  ;;  %v6099_v52 = vrot.slane %v6097_v47, 5 }
 0x51d   : > { %v6100_v17 = vor.u32 %v6099_v52, %v6096_v51  ;;  %v5691_v52 = vadd.f32 %v5651_v50, %v9961_v58 }
 0x51f   : > { %v5424_v19 = vpop.f32.mrf.mxu2 }
 0x520   : > { %v10028_v15 = vadd.f32 %v5424_v19, %v5074_v3  ;;  %v5050_v44 = vpop.f32.mrf.mxu1  ;;  %v5924_v3 = vld [vmem:[#allocation3 + $0x74] sm:$0x1]  ;;  %v6285_v19 = vld [vmem:[#allocation3 + $0x6c] sm:$0xe] }
 0x521   : > { %v5075_v16 = vadd.f32 %v5050_v44, %v9927_v22  ;;  %v6355_v22 = vsel %vm8859_vm14, %v7567_v0, %v6354_v54  ;;  %v6113_v30 = vshll.u32 %v5924_v3, 16  ;;  %v6101_v54 = vrot.slane %v6100_v17, 4  ;;  %v5850_v8 = vpop.f32.mrf.mxu0 }
 0x522   : > { %v6394_v5 = vunpack.c.l.b16 %v6355_v22  ;;  %v7568_v38 = vrot.slane %v6285_v19, 9 }
 0x523   : > { %6246 = vmatmul.bf16.gmra.mxu1 %v6154_v25  ;;  %v6111_v25 = vrot.slane %v6110_v31, 4  ;;  %v6106_v45 = vsel %vm8819_vm11, %v6101_v54, %v6105_v60 }
 0x524   : > { %6495 = vmatmul.bf16.gmra.mxu2 %v6403_v32  ;;  %v6404_v13 = vpack.c.b16 %v6395_v28, %v6394_v5  ;;  %v6115_v32 = vrot.slane %v6113_v30, 5  ;;  %v6147_v49 = vunpack.c.l.b16 %v6106_v45 }
 0x527   : > { %v5427_v46 = vpop.f32.mrf.mxu2 }
 0x528   : > { %v10039_v33 = vadd.f32 %v5427_v46, %v5075_v16  ;;  %v5052_v7 = vpop.f32.mrf.mxu1  ;;  %v6364_v16 = vrot.slane %v5924_v3, 5 }
 0x529   : > { %v5076_v20 = vadd.f32 %v5052_v7, %v9934_v11  ;;  %v6361_v11 = vrot.slane %v5923_v14, 5  ;;  %v5852_v18 = vpop.f32.mrf.mxu0 }
 0x52b   : > { %v6363_v44 = vrot.slane %v6361_v11, 4  ;;  %v6362_v62 = vsel %vm8859_vm14, %v7568_v38, %v6361_v11  ;;  %v10280_v11 = vld [vmem:[#allocation28_spill] sm:$0xff] }
 0x52c   : > { %v6396_v42 = vunpack.c.l.b16 %v6362_v62 }
 0x52d   : > { %v6365_v9 = vsel %vm8859_vm14, %v6363_v44, %v6364_v16  ;;  %v10281_v16 = vld [vmem:[#allocation29_spill] sm:$0xff] }
 0x52e   : > { %v6397_v22 = vunpack.c.l.b16 %v6365_v9 }
 0x52f   : > { %v5429_v57 = vpop.f32.mrf.mxu2 }
 0x530   : > { %v10042_v43 = vadd.f32 %v5429_v57, %v5076_v20  ;;  %v5055_v6 = vpop.f32.mrf.mxu1  ;;  %v6405_v34 = vpack.c.b16 %v6397_v22, %v6396_v42  ;;  %v5656_v20 = vpop.f32.mrf.mxu3 }
 0x531   : > { %v5077_v53 = vadd.f32 %v5055_v6, %v9944_v35  ;;  %v6116_v35 = vsel %vm8819_vm11, %v6111_v25, %v6115_v32  ;;  %v5855_v50 = vpop.f32.mrf.mxu0  ;;  %v5693_v54 = vadd.f32 %v5656_v20, %v9983_v59  ;;  %v10283_v20 = vld [vmem:[#allocation31_spill] sm:$0xff] }
 0x532   : > { %v6148_v46 = vunpack.c.l.b16 %v6116_v35 }
 0x533   : > { %6251 = vmatmul.bf16.gmra.mxu1 %v6155_v36  ;;  %v10068_v36 = vld [vmem:[%s10279_s18] ss:$0 sm:$0xff]  ;;  %v5887_v44 = vadd.f32 %v5850_v8, %v5693_v54 }
 0x534   : > { %6500 = vmatmul.bf16.gmra.mxu2 %v6404_v13  ;;  %v6156_v26 = vpack.c.b16 %v6148_v46, %v6147_v49  ;;  %v10282_v46 = vld [vmem:[#allocation30_spill] sm:$0xff] }
 0x537   : > { %v5432_v29 = vpop.f32.mrf.mxu2 }
 0x538   : > { %v10045_v27 = vadd.f32 %v5432_v29, %v5077_v53  ;;  %v5057_v0 = vpop.f32.mrf.mxu1  ;;  %v5658_v28 = vpop.f32.mrf.mxu3 }
 0x539   : > { %v5078_v14 = vadd.f32 %v5057_v0, %v9946_v41  ;;  %v5694_v35 = vadd.f32 %v5658_v28, %v9986_v21 }
 0x53b   : > { %v5888_v49 = vadd.f32 %v5852_v18, %v5694_v35 }
 0x53f   : > { %v5434_v4 = vpop.f32.mrf.mxu2 }
 0x540   : > { %v10056_v47 = vadd.f32 %v5434_v4, %v5078_v14  ;;  %v5060_v61 = vpop.f32.mrf.mxu1  ;;  %v5661_v13 = vpop.f32.mrf.mxu3 }
 0x541   : > { %v5079_v7 = vadd.f32 %v5060_v61, %v9956_v24  ;;  %v5885_v24 = vadd.f32 %v5845_v23, %v5691_v52 }
 0x543   : > { %6256 = vmatmul.bf16.gmra.mxu1 %v6156_v26  ;;  %v5695_v26 = vadd.f32 %v5661_v13, %v9989_v37 }
 0x544   : > { %6505 = vmatmul.bf16.gmra.mxu2 %v6405_v34 }
 0x547   : > { %v5437_v12 = vpop.f32.mrf.mxu2 }
 0x548   : > { %v10059_v63 = vadd.f32 %v5437_v12, %v5079_v7  ;;  %v5062_v41 = vpop.f32.mrf.mxu1  ;;  %v5663_v32 = vpop.f32.mrf.mxu3  ;;  %v5889_v7 = vadd.f32 %v5855_v50, %v5695_v26 }
 0x549   : > { %v5080_v5 = vadd.f32 %v5062_v41, %v9958_v10  ;;  %v5692_v10 = vadd.f32 %v5653_v1, %v9972_v2  ;;  %v5857_v1 = vpop.f32.mrf.mxu0  ;;  %v5696_v28 = vadd.f32 %v5663_v32, %v10000_v40 }
 0x54b   : > { %v5886_v30 = vadd.f32 %v5847_v56, %v5692_v10 }
 0x54f   : > { %v5439_v51 = vpop.f32.mrf.mxu2 }
 0x550   : > { %v10063_v60 = vadd.f32 %v5439_v51, %v5080_v5  ;;  %v6222_v3 = vpop.f32.mrf.mxu1  ;;  %v5666_v14 = vpop.f32.mrf.mxu3 }
 0x551   : > { %v6262_v57 = vadd.f32 %v6222_v3, %v5885_v24  ;;  %v5860_v56 = vpop.f32.mrf.mxu0  ;;  %v5890_v3 = vadd.f32 %v5857_v1, %v5696_v28  ;;  %v10284_v24 = vld [vmem:[#allocation32_spill] sm:$0xff] }
 0x557   : > { %v6471_v17 = vpop.f32.mrf.mxu2 }
 0x558   : > { %v6511_v31 = vadd.f32 %v6471_v17, %v6262_v57  ;;  %v6224_v6 = vpop.f32.mrf.mxu1  ;;  %v5668_v12 = vpop.f32.mrf.mxu3 }
 0x559   : > { %v6263_v19 = vadd.f32 %v6224_v6, %v5886_v30  ;;  %v5862_v52 = vpop.f32.mrf.mxu0  ;;  %v5698_v54 = vadd.f32 %v5668_v12, %v10014_v55 }
 0x55a   : > { %v6531_v58 = vadd.f32 %v10068_v36, %v6511_v31  ;;  %v5697_v31 = vadd.f32 %v5666_v14, %v10011_v39  ;;  %v10287_v14 = vld [vmem:[#allocation37_spill] sm:$0xff] }
 0x55c   : > { %v6547_v53 = vadd.f32 %v6531_v58, %v10280_v11  ;;  %v5891_v30 = vadd.f32 %v5860_v56, %v5697_v31  ;;  %v10285_v11 = vld [vmem:[#allocation33_spill] sm:$0xff] }
 0x55e   : > { %6563 = vst [vmem:[%s8771_s8] sm:$0xff] %v6547_v53 }
 0x55f   : > { %v6473_v23 = vpop.f32.mrf.mxu2 }
 0x560   : > { %v6512_v25 = vadd.f32 %v6473_v23, %v6263_v19  ;;  %v6227_v38 = vpop.f32.mrf.mxu1  ;;  %v5671_v17 = vpop.f32.mrf.mxu3 }
 0x561   : > { %v6264_v0 = vadd.f32 %v6227_v38, %v5887_v44  ;;  %v5865_v50 = vpop.f32.mrf.mxu0  ;;  %v10286_v44 = vld [vmem:[#allocation34_spill] sm:$0xff] }
 0x562   : > { %v6532_v2 = vadd.f32 %v10068_v36, %v6512_v25 }
 0x564   : > { %v6548_v29 = vadd.f32 %v6532_v2, %v10281_v16  ;;  %v5892_v2 = vadd.f32 %v5862_v52, %v5698_v54  ;;  %v10289_v52 = vld [vmem:[#allocation39_spill] sm:$0xff]  ;;  %v10291_v54 = vld [vmem:[#allocation41_spill] sm:$0xff] }
 0x566   : > { %6564 = vst [vmem:[%s8771_s8 + $0x8] sm:$0xff] %v6548_v29 }
 0x567   : > { %v6476_v45 = vpop.f32.mrf.mxu2 }
 0x568   : > { %v6513_v62 = vadd.f32 %v6476_v45, %v6264_v0  ;;  %v6229_v9 = vpop.f32.mrf.mxu1  ;;  %v5673_v32 = vpop.f32.mrf.mxu3  ;;  %v5699_v45 = vadd.f32 %v5671_v17, %v10017_v48 }
 0x569   : > { %v6265_v22 = vadd.f32 %v6229_v9, %v5888_v49  ;;  %v5867_v29 = vpop.f32.mrf.mxu0  ;;  %v5700_v56 = vadd.f32 %v5673_v32, %v10028_v15 }
 0x56a   : > { %v6533_v59 = vadd.f32 %v10068_v36, %v6513_v62 }
 0x56c   : > { %v6549_v42 = vadd.f32 %v6533_v59, %v10282_v46  ;;  %v5893_v59 = vadd.f32 %v5865_v50, %v5699_v45 }
 0x56e   : > { %6565 = vst [vmem:[%s8771_s8 + $0x10] sm:$0xff] %v6549_v42 }
 0x56f   : > { %v6478_v4 = vpop.f32.mrf.mxu2 }
 0x570   : > { %v6514_v34 = vadd.f32 %v6478_v4, %v6265_v22  ;;  %v6232_v61 = vpop.f32.mrf.mxu1  ;;  %v5676_v9 = vpop.f32.mrf.mxu3 }
 0x571   : > { %v6266_v41 = vadd.f32 %v6232_v61, %v5889_v7  ;;  %v5870_v42 = vpop.f32.mrf.mxu0  ;;  %v10288_v61 = vld [vmem:[#allocation38_spill] sm:$0xff]  ;;  %v5701_v12 = vadd.f32 %v5676_v9, %v10039_v33 }
 0x572   : > { %v6534_v21 = vadd.f32 %v10068_v36, %v6514_v34  ;;  %v5894_v34 = vadd.f32 %v5867_v29, %v5700_v56 }
 0x574   : > { %v6550_v8 = vadd.f32 %v6534_v21, %v10283_v20 }
 0x576   : > { %6566 = vst [vmem:[%s8771_s8 + $0x18] sm:$0xff] %v6550_v8 }
 0x577   : > { %v6481_v5 = vpop.f32.mrf.mxu2 }
 0x578   : > { %v6515_v51 = vadd.f32 %v6481_v5, %v6266_v41  ;;  %v6234_v18 = vpop.f32.mrf.mxu1  ;;  %v5678_v7 = vpop.f32.mrf.mxu3 }
 0x579   : > { %v6267_v13 = vadd.f32 %v6234_v18, %v5890_v3  ;;  %v5872_v5 = vpop.f32.mrf.mxu0 }
 0x57a   : > { %v6535_v37 = vadd.f32 %v10068_v36, %v6515_v51  ;;  %v5895_v51 = vadd.f32 %v5870_v42, %v5701_v12 }
 0x57c   : > { %v6551_v57 = vadd.f32 %v6535_v37, %v10284_v24 }
 0x57e   : > { %6567 = vst [vmem:[%s8771_s8 + $0x20] sm:$0xff] %v6551_v57  ;;  %v5702_v57 = vadd.f32 %v5678_v7, %v10042_v43  ;;  %v10294_v7 = vld [vmem:[#allocation44_spill] sm:$0xff] }
 0x57f   : > { %v6483_v10 = vpop.f32.mrf.mxu2 }
 0x580   : > { %v6516_v6 = vadd.f32 %v6483_v10, %v6267_v13  ;;  %v6237_v58 = vpop.f32.mrf.mxu1  ;;  %v5681_v3 = vpop.f32.mrf.mxu3  ;;  %v5896_v31 = vadd.f32 %v5872_v5, %v5702_v57  ;;  %v10297_v5 = vld [vmem:[#allocation45_spill] sm:$0xff] }
 0x581   : > { %v6268_v19 = vadd.f32 %v6237_v58, %v5891_v30  ;;  %v5875_v10 = vpop.f32.mrf.mxu0  ;;  %v5703_v30 = vadd.f32 %v5681_v3, %v10045_v27 }
 0x582   : > { %v6536_v40 = vadd.f32 %v10068_v36, %v6516_v6  ;;  %v10290_v6 = vld [vmem:[#allocation40_spill] sm:$0xff] }
 0x584   : > { %v6552_v53 = vadd.f32 %v6536_v40, %v10285_v11 }
 0x586   : > { %6568 = vst [vmem:[%s8771_s8 + $0x28] sm:$0xff] %v6552_v53 }
 0x587   : > { %v6486_v23 = vpop.f32.mrf.mxu2 }
 0x588   : > { %v6517_v25 = vadd.f32 %v6486_v23, %v6268_v19  ;;  %v6239_v38 = vpop.f32.mrf.mxu1  ;;  %v5683_v53 = vpop.f32.mrf.mxu3  ;;  %v5897_v23 = vadd.f32 %v5875_v10, %v5703_v30 }
 0x589   : > { %v6269_v1 = vadd.f32 %v6239_v38, %v5892_v2  ;;  %v5877_v32 = vpop.f32.mrf.mxu0  ;;  %v5704_v2 = vadd.f32 %v5683_v53, %v10056_v47 }
 0x58a   : > { %v6537_v39 = vadd.f32 %v10068_v36, %v6517_v25 }
 0x58c   : > { %v6553_v16 = vadd.f32 %v6537_v39, %v10286_v44 }
 0x58e   : > { %6569 = vst [vmem:[%s8771_s8 + $0x30] sm:$0xff] %v6553_v16 }
 0x58f   : > { %v6488_v0 = vpop.f32.mrf.mxu2 }
 0x590   : > { %v6518_v35 = vadd.f32 %v6488_v0, %v6269_v1  ;;  %v6242_v62 = vpop.f32.mrf.mxu1  ;;  %v5686_v29 = vpop.f32.mrf.mxu3  ;;  %v5898_v1 = vadd.f32 %v5877_v32, %v5704_v2  ;;  %v10292_v0 = vld [vmem:[#allocation42_spill] sm:$0xff] }
 0x591   : > { %v6270_v46 = vadd.f32 %v6242_v62, %v5893_v59  ;;  %v5880_v62 = vpop.f32.mrf.mxu0  ;;  %v5705_v9 = vadd.f32 %v5686_v29, %v10059_v63 }
 0x592   : > { %v6538_v55 = vadd.f32 %v10068_v36, %v6518_v35 }
 0x594   : > { %v6554_v49 = vadd.f32 %v6538_v55, %v10287_v14 }
 0x596   : > { %6570 = vst [vmem:[%s8771_s8 + $0x38] sm:$0xff] %v6554_v49  ;;  %v5899_v49 = vadd.f32 %v5880_v62, %v5705_v9 }
 0x597   : > { %v6491_v22 = vpop.f32.mrf.mxu2 }
 0x598   : > { %v6519_v4 = vadd.f32 %v6491_v22, %v6270_v46  ;;  %v6244_v26 = vpop.f32.mrf.mxu1  ;;  %v10293_v46 = vld [vmem:[#allocation43_spill] sm:$0xff]  ;;  %v5688_v22 = vpop.f32.mrf.mxu3 }
 0x599   : > { %v6271_v20 = vadd.f32 %v6244_v26, %v5894_v34  ;;  %v5706_v26 = vadd.f32 %v5688_v22, %v10063_v60  ;;  %v5882_v63 = vpop.f32.mrf.mxu0 }
 0x59a   : > { %v6539_v48 = vadd.f32 %v10068_v36, %v6519_v4 }
 0x59c   : > { %v6555_v21 = vadd.f32 %v6539_v48, %v10288_v61 }
 0x59e   : > { %6571 = vst [vmem:[%s8771_s8 + $0x40] sm:$0xff] %v6555_v21  ;;  %v5900_v21 = vadd.f32 %v5882_v63, %v5706_v26 }
 0x59f   : > { %v6493_v8 = vpop.f32.mrf.mxu2 }
 0x5a0   : > { %v6520_v41 = vadd.f32 %v6493_v8, %v6271_v20  ;;  %v6247_v28 = vpop.f32.mrf.mxu1 }
 0x5a1   : > { %v6272_v37 = vadd.f32 %v6247_v28, %v5895_v51 }
 0x5a2   : > { %v6540_v15 = vadd.f32 %v10068_v36, %v6520_v41 }
 0x5a4   : > { %v6556_v18 = vadd.f32 %v6540_v15, %v10289_v52 }
 0x5a6   : > { %6572 = vst [vmem:[%s8771_s8 + $0x48] sm:$0xff] %v6556_v18 }
 0x5a7   : > { %v6496_v24 = vpop.f32.mrf.mxu2 }
 0x5a8   : > { %v6521_v13 = vadd.f32 %v6496_v24, %v6272_v37  ;;  %v6249_v17 = vpop.f32.mrf.mxu1 }
 0x5a9   : > { %v6273_v40 = vadd.f32 %v6249_v17, %v5896_v31 }
 0x5aa   : > { %v6541_v33 = vadd.f32 %v10068_v36, %v6521_v13 }
 0x5ac   : > { %v6557_v58 = vadd.f32 %v6541_v33, %v10290_v6 }
 0x5ae   : > { %6573 = vst [vmem:[%s8771_s8 + $0x50] sm:$0xff] %v6557_v58 }
 0x5af   : > { %v6498_v50 = vpop.f32.mrf.mxu2 }
 0x5b0   : > { %v6522_v11 = vadd.f32 %v6498_v50, %v6273_v40  ;;  %v6252_v19 = vpop.f32.mrf.mxu1 }
 0x5b1   : > { %v6274_v38 = vadd.f32 %v6252_v19, %v5897_v23 }
 0x5b2   : > { %v6542_v43 = vadd.f32 %v10068_v36, %v6522_v11 }
 0x5b4   : > { %v6558_v25 = vadd.f32 %v6542_v43, %v10291_v54 }
 0x5b6   : > { %6574 = vst [vmem:[%s8771_s8 + $0x58] sm:$0xff] %v6558_v25 }
 0x5b7   : > { %v6501_v39 = vpop.f32.mrf.mxu2 }
 0x5b8   : > { %v6523_v44 = vadd.f32 %v6501_v39, %v6274_v38  ;;  %v6254_v16 = vpop.f32.mrf.mxu1 }
 0x5b9   : > { %v6275_v35 = vadd.f32 %v6254_v16, %v5898_v1 }
 0x5ba   : > { %v6543_v27 = vadd.f32 %v10068_v36, %v6523_v44 }
 0x5bc   : > { %v6559_v45 = vadd.f32 %v6543_v27, %v10292_v0 }
 0x5be   : > { %6575 = vst [vmem:[%s8771_s8 + $0x60] sm:$0xff] %v6559_v45 }
 0x5bf   : > { %v6503_v55 = vpop.f32.mrf.mxu2 }
 0x5c0   : > { %v6524_v59 = vadd.f32 %v6503_v55, %v6275_v35  ;;  %v6257_v14 = vpop.f32.mrf.mxu1 }
 0x5c1   : > { %v6276_v56 = vadd.f32 %v6257_v14, %v5899_v49 }
 0x5c2   : > { %v6544_v47 = vadd.f32 %v10068_v36, %v6524_v59 }
 0x5c4   : > { %v6560_v42 = vadd.f32 %v6544_v47, %v10293_v46 }
 0x5c6   : > { %6576 = vst [vmem:[%s8771_s8 + $0x68] sm:$0xff] %v6560_v42 }
 0x5c7   : > { %v6506_v4 = vpop.f32.mrf.mxu2 }
 0x5c8   : > { %v6525_v48 = vadd.f32 %v6506_v4, %v6276_v56  ;;  %v6259_v61 = vpop.f32.mrf.mxu1 }
 0x5c9   : > { %v6277_v8 = vadd.f32 %v6259_v61, %v5900_v21 }
 0x5ca   : > { %v6545_v34 = vadd.f32 %v10068_v36, %v6525_v48 }
 0x5cc   : > { %v6561_v20 = vadd.f32 %v6545_v34, %v10294_v7 }
 0x5ce   : > { %6577 = vst [vmem:[%s8771_s8 + $0x70] sm:$0xff] %v6561_v20 }
 0x5cf   : > { %v6508_v12 = vpop.f32.mrf.mxu2 }
 0x5d0   : > { %v6526_v60 = vadd.f32 %v6508_v12, %v6277_v8 }
 0x5d2   : > { %v6546_v41 = vadd.f32 %v10068_v36, %v6526_v60 }
 0x5d4   : > { %v6562_v28 = vadd.f32 %v6546_v41, %v10297_v5 }
 0x5d6   : > { %6578 = vst [vmem:[%s8771_s8 + $0x78] sm:$0xff] %v6562_v28 }
 0x5d7   : > { %8112 = shalt.err (!%p8109_p9)
}
 0x5d8   : > { %s8205_s2 = smov 128   ;;  %s8206_s8 = smov 8  }
 0x5d9   : > { %7836 = dma.vmem_to_hbm [thread:$0]  (%p8337_p5), %s6596_s13, 2048, %s6598_s29, %s6580_s30, %s8205_s2, %s8205_s2, %s8206_s8  }
 0x5da PF: > { %s10298_s18 = sld [smem:[#allocation24_spill]]  ;;  %p7858_p2 = scmp.ge.s32.totalorder %s8191_s28, 2 }
 0x5dc   : > { %p7850_p8 = pnand %p7858_p2, %p8301_p6 }
 0x5de   : > { %p7851_p1 = pneg %p7850_p8 }
 0x5e0   : > { %s6612_s16 = sand.u32 1, %s10298_s18  }
 0x5e1   : > { %s6613_s21 = scalar_lea.sflag [#allocation8], %s6612_s16 }
 0x5e2   : > { %8158 = dma.done.wait (%p7851_p1), %s6613_s21, 2048  }
 0x5e3   : > { %8160 = vsyncadd (%p7851_p1), %s6613_s21, 4294965248  ;;  %s23_s28 = sadd.s32 1, %s8191_s28   ;;  %s10300_s12 = sld [smem:[#allocation26_spill]] }
 0x5e4   : > { %p20_p4 = scmp.ge.s32.totalorder %s23_s28, 6   ;;  %s10301_s21 = smov %s8167_s22 }
 0x5e5   : > { %s10302_s22 = smov %s8171_s23  ;;  %s10303_s23 = smov %s8350_s10 }
 0x5e6   : > { %s10304_s24 = smov %s8183_s26  ;;  %s10305_s25 = smov %s8187_s27 }
 0x5e7   : > { %s10307_s27 = smov %s10313_s15  ;;  %22 = sbr.rel (!%p20_p4) target bundleno = 14 (0xe), region = 137 }
 0x5e9   : > { %s10306_s26 = smov %s10300_s12 }
 0x5ec   :  { %6619 = vsyncpa [#allocation7], 1 }
 0x5ed   :  { %6621 = vsyncpa [#allocation7 + $0x1], 1 }
 0x5ee   :  { %6622 = vsyncpa [#allocation10], 1 }
 0x5ef   :  { %6623 = vsyncpa [#allocation8], 1 }
 0x5f0   :  { %6625 = vsyncpa [#allocation8 + $0x1], 1 }
 0x5f1   :  { %6626 = vsyncmov [#allocation5] }
 0x5f4   :  { %s6627_s7 = vpop.sfrf %6626 }
 0x5f5   :  { %p7608_p6 = scmp.ne.s32.totalorder %s6627_s7, 0 }
 0x5f7   :  { %6631 = shalt.err (%p7608_p6)  }
 0x5f8   :  { %6633 = vsyncmov [#allocation5 + $0x1] }
 0x5fb   :  { %s6634_s10 = vpop.sfrf %6633 }
 0x5fc   :  { %p7609_p5 = scmp.ne.s32.totalorder %s6634_s10, 0 }
 0x5fe   :  { %6638 = shalt.err (%p7609_p5)  }

</bundles_post_ra>
